<compile_context>
chip_gen: v6e
topology: v6e:2x2x1
jax: 0.10.0
libtpu: 0.0.40
codegen_flags: <defaults>
</compile_context>

<pallas_src>
import jax
import jax.numpy as jnp
import numpy as np
from jax.experimental import pallas as pl
from jax.experimental.pallas import tpu as pltpu


# ----------------------------- Pallas kernels -----------------------------

def _upsample_kernel(x_ref, w_ref, b_ref, o_ref):
    """ConvTranspose2d(k=2, s=2) for one batch image (NHWC).

    x_ref: (H, W, Cin)      rows n*H..(n+1)*H of the batch-flattened input
    w_ref: (Cin, 4*C2)      columns ordered (ki, kj, co)
    b_ref: (1, 4*C2)
    o_ref: (H, 2, W, 2*C2)  row-major identical to the (2H, 2W, C2) NHWC result,
                            so the wrapper reshape is a free bitcast (no XLA
                            transpose / scatter pass over HBM).
    """
    H, W, Cin = x_ref.shape
    c2x2 = o_ref.shape[3]                      # = 2 * C2  (kj, co) columns
    x = x_ref[...].reshape(H * W, Cin)
    y = jnp.dot(x, w_ref[...], preferred_element_type=jnp.float32) + b_ref[...]
    # ki = 0 -> even output rows, ki = 1 -> odd output rows.
    o_ref[:, 0:1, :, :] = y[:, :c2x2].reshape(H, 1, W, c2x2)
    o_ref[:, 1:2, :, :] = y[:, c2x2:].reshape(H, 1, W, c2x2)


def _conv_bn_relu_kernel(x2_ref, x1_ref, w2_ref, w1_ref, cb_ref, g_ref, bt_ref,
                         o_ref, x2p_ref, x1p_ref, sum_ref, sq_ref):
    """Fused 3x3 conv (split weights, no concat) + bias + BN(train) + ReLU.

    Grid: (N,), "arbitrary".  The output block is the FULL (N, H, W, Cout) array
    (same block every step), so it stays resident in VMEM: per-step conv results
    are written into their batch slice, per-channel sum / sum-of-squares
    accumulate in scratch, and the last step normalizes the resident output in
    place -> a single HBM write-back, no second pallas_call.

    x2_ref, x1_ref : (1, H, W, C2)   the two channel halves of the (never built) concat
    w2_ref, w1_ref : (9, C2, Cout)   3x3 taps, (ki, kj) row-major
    cb_ref, g_ref, bt_ref : (1, Cout) conv bias, BN gamma, BN beta
    o_ref          : (N, H, W, Cout)
    x2p_ref/x1p_ref: (H+2, W+2, C2)  zero-padded slabs built in VMEM (no jnp.pad in HBM)
    sum_ref/sq_ref : (1, Cout)       BN statistic accumulators
    """
    n = pl.program_id(0)
    last = pl.num_programs(0) - 1
    H, W, C2 = x2_ref.shape[1], x2_ref.shape[2], x2_ref.shape[3]
    Cout = o_ref.shape[3]

    @pl.when(n == 0)
    def _init():
        x2p_ref[...] = jnp.zeros_like(x2p_ref)
        x1p_ref[...] = jnp.zeros_like(x1p_ref)
        sum_ref[...] = jnp.zeros_like(sum_ref)
        sq_ref[...] = jnp.zeros_like(sq_ref)

    # Fill the interiors of the padded slabs (borders stay zero from step 0).
    x2p_ref[1:H + 1, 1:W + 1, :] = x2_ref[0]
    x1p_ref[1:H + 1, 1:W + 1, :] = x1_ref[0]
    xp2 = x2p_ref[...]
    xp1 = x1p_ref[...]

    acc = jnp.zeros((H * W, Cout), jnp.float32)
    # TODO(synk): the 9 slice+reshape taps each imply a small in-VMEM relayout;
    # an im2col / pltpu.roll formulation would raise the MXU K-dim, but this
    # straightforward form is kept for lowering robustness at these sizes.
    for k in range(9):
        ki, kj = divmod(k, 3)
        p2 = xp2[ki:ki + H, kj:kj + W, :].reshape(H * W, C2)
        p1 = xp1[ki:ki + H, kj:kj + W, :].reshape(H * W, C2)
        acc = acc + jnp.dot(p2, w2_ref[k], preferred_element_type=jnp.float32)
        acc = acc + jnp.dot(p1, w1_ref[k], preferred_element_type=jnp.float32)
    acc = acc + cb_ref[...]

    # Single-pass BN statistics.
    sum_ref[...] += jnp.sum(acc, axis=0, keepdims=True)
    sq_ref[...] += jnp.sum(acc * acc, axis=0, keepdims=True)

    o_ref[pl.ds(n, 1)] = acc.reshape(1, H, W, Cout)

    @pl.when(n == last)
    def _finalize():
        cnt = float(o_ref.shape[0] * H * W)
        mean = sum_ref[...] / cnt
        var = sq_ref[...] / cnt - mean * mean            # biased variance
        inv = jax.lax.rsqrt(var + 1e-5)
        scale = (g_ref[...] * inv).reshape(1, 1, 1, Cout)
        shift = (bt_ref[...] - mean * g_ref[...] * inv).reshape(1, 1, 1, Cout)
        o_ref[...] = jnp.maximum(o_ref[...] * scale + shift, 0.0)


# ----------------------------- wrappers (glue) -----------------------------

def up_forward(x1, x2, params):
    """Up.forward(x1, x2). x1: (N, Cin, H, W), x2: (N, Cin//2, H2, W2) NCHW."""
    N, Cin, H, W = x1.shape
    C2 = Cin // 2
    H2, W2 = x2.shape[2], x2.shape[3]

    # NCHW -> NHWC only at the module boundary.
    x1_nhwc = jnp.transpose(x1, (0, 2, 3, 1))
    x2_nhwc = jnp.transpose(x2, (0, 2, 3, 1))

    # ---- upsample (ConvTranspose2d k=2 s=2), scatter folded into out layout ----
    w_up = jnp.transpose(params["up_w"], (0, 2, 3, 1)).reshape(Cin, 4 * C2)
    b_up = jnp.tile(params["up_b"], 4).reshape(1, 4 * C2)
    x1_rows = x1_nhwc.reshape(N * H, W, Cin)
    y = pl.pallas_call(
        _upsample_kernel,
        out_shape=jax.ShapeDtypeStruct((N * H, 2, W, 2 * C2), jnp.float32),
        grid=(N,),
        in_specs=[pl.BlockSpec((H, W, Cin), lambda n: (n, 0, 0)),
                  pl.BlockSpec((Cin, 4 * C2), lambda n: (0, 0)),
                  pl.BlockSpec((1, 4 * C2), lambda n: (0, 0))],
        out_specs=pl.BlockSpec((H, 2, W, 2 * C2), lambda n: (n, 0, 0, 0)),
        compiler_params=pltpu.CompilerParams(
            dimension_semantics=("parallel",), vmem_limit_bytes=32 << 20),
    )(x1_rows, w_up, b_up)
    x1u = y.reshape(N, 2 * H, 2 * W, C2)        # pure row-major view (bitcast)

    # Pad to x2's spatial size if needed (zero in this configuration).
    dY, dX = H2 - 2 * H, W2 - 2 * W
    if dY or dX:
        x1u = jnp.pad(x1u, ((0, 0), (dY // 2, dY - dY // 2),
                            (dX // 2, dX - dX // 2), (0, 0)))

    # ---- fused conv3x3(split weights) + bias + BN(train stats) + ReLU ----
    Cout = params["conv_w"].shape[0]
    w_x2 = jnp.transpose(params["conv_w"][:, :C2], (2, 3, 1, 0)).reshape(9, C2, Cout)
    w_x1 = jnp.transpose(params["conv_w"][:, C2:], (2, 3, 1, 0)).reshape(9, C2, Cout)
    out = pl.pallas_call(
        _conv_bn_relu_kernel,
        out_shape=jax.ShapeDtypeStruct((N, H2, W2, Cout), jnp.float32),
        grid=(N,),
        in_specs=[pl.BlockSpec((1, H2, W2, C2), lambda n: (n, 0, 0, 0)),
                  pl.BlockSpec((1, H2, W2, C2), lambda n: (n, 0, 0, 0)),
                  pl.BlockSpec((9, C2, Cout), lambda n: (0, 0, 0)),
                  pl.BlockSpec((9, C2, Cout), lambda n: (0, 0, 0)),
                  pl.BlockSpec((1, Cout), lambda n: (0, 0)),
                  pl.BlockSpec((1, Cout), lambda n: (0, 0)),
                  pl.BlockSpec((1, Cout), lambda n: (0, 0))],
        out_specs=pl.BlockSpec((N, H2, W2, Cout), lambda n: (0, 0, 0, 0)),
        scratch_shapes=[pltpu.VMEM((H2 + 2, W2 + 2, C2), jnp.float32),
                        pltpu.VMEM((H2 + 2, W2 + 2, C2), jnp.float32),
                        pltpu.VMEM((1, Cout), jnp.float32),
                        pltpu.VMEM((1, Cout), jnp.float32)],
        compiler_params=pltpu.CompilerParams(
            dimension_semantics=("arbitrary",), vmem_limit_bytes=32 << 20),
    )(x2_nhwc, x1u, w_x2, w_x1,
      params["conv_b"].reshape(1, Cout),
      params["gamma"].reshape(1, Cout),
      params["beta"].reshape(1, Cout))

    return jnp.transpose(out, (0, 3, 1, 2))     # back to NCHW at the boundary


# ----------------------------- pure-JAX reference -----------------------------

def up_reference(x1, x2, params):
    y = jnp.einsum('ncij,cokl->noikjl', x1, params["up_w"])
    N, Co, H, _, W, _ = y.shape
    y = y.reshape(N, Co, 2 * H, 2 * W) + params["up_b"][None, :, None, None]
    diffY = x2.shape[2] - y.shape[2]
    diffX = x2.shape[3] - y.shape[3]
    y = jnp.pad(y, ((0, 0), (0, 0),
                    (diffY // 2, diffY - diffY // 2),
                    (diffX // 2, diffX - diffX // 2)))
    x = jnp.concatenate([x2, y], axis=1)
    c = jax.lax.conv_general_dilated(x, params["conv_w"], (1, 1),
                                     ((1, 1), (1, 1)),
                                     dimension_numbers=('NCHW', 'OIHW', 'NCHW'))
    c = c + params["conv_b"][None, :, None, None]
    mean = jnp.mean(c, axis=(0, 2, 3), keepdims=True)
    var = jnp.mean((c - mean) ** 2, axis=(0, 2, 3), keepdims=True)
    c = (c - mean) * jax.lax.rsqrt(var + 1e-5)
    c = c * params["gamma"][None, :, None, None] + params["beta"][None, :, None, None]
    return jnp.maximum(c, 0.0)


# ----------------------------- main -----------------------------

if __name__ == "__main__":
    in_ch, out_ch = 8, 4
    N, H, W = 2, 8, 8

    key = jax.random.PRNGKey(0)
    ks = jax.random.split(key, 8)
    x1 = jax.random.normal(ks[0], (N, in_ch, H, W), jnp.float32)
    x2 = jax.random.normal(ks[1], (N, in_ch // 2, 2 * H, 2 * W), jnp.float32)

    params = {
        # ConvTranspose2d(in_ch, in_ch//2, k=2, s=2): weight (Cin, Cout, 2, 2)
        "up_w": 0.1 * jax.random.normal(ks[2], (in_ch, in_ch // 2, 2, 2), jnp.float32),
        "up_b": 0.1 * jax.random.normal(ks[3], (in_ch // 2,), jnp.float32),
        # Conv2d(in_ch, out_ch, k=3, p=1): weight (Cout, Cin, 3, 3)
        "conv_w": 0.1 * jax.random.normal(ks[4], (out_ch, in_ch, 3, 3), jnp.float32),
        "conv_b": 0.1 * jax.random.normal(ks[5], (out_ch,), jnp.float32),
        # BatchNorm2d(out_ch) affine params
        "gamma": 1.0 + 0.1 * jax.random.normal(ks[6], (out_ch,), jnp.float32),
        "beta": 0.1 * jax.random.normal(ks[7], (out_ch,), jnp.float32),
    }

    out = jax.jit(up_forward)(x1, x2, params)
    out = jax.block_until_ready(out)

    ref = up_reference(x1, x2, params)
    if not np.allclose(np.asarray(out), np.asarray(ref), atol=1e-4, rtol=1e-4):
        raise AssertionError("Pallas output does not match JAX reference")

    print("KERNEL_OK")
</pallas_src>

<mosaic_0001>
module attributes {stable_mosaic.version = 11 : i64} {
  func.func @_upsample_kernel(%arg0: i32, %arg1: memref<8x8x8xf32, #tpu.memory_space<vmem>>, %arg2: memref<8x16xf32, #tpu.memory_space<vmem>>, %arg3: memref<1x16xf32, #tpu.memory_space<vmem>>, %arg4: memref<8x2x8x8xf32, #tpu.memory_space<vmem>>) attributes {dimension_semantics = [#tpu.dimension_semantics<parallel>], iteration_bounds = array<i64: 2>, scalar_prefetch = 0 : i64, scratch_operands = 0 : i64, tpu.core_type = #tpu.core_type<tc>, window_params = [{transform_indices = @transform_0, window_bounds = array<i64: 8, 8, 8>}, {pipeline_mode = #tpu.pipeline_mode<synchronous>, transform_indices = @transform_1, window_bounds = array<i64: 8, 16>}, {pipeline_mode = #tpu.pipeline_mode<synchronous>, transform_indices = @transform_2, window_bounds = array<i64: 1, 16>}, {transform_indices = @transform_3, window_bounds = array<i64: 8, 2, 8, 8>}]} {
    %c0 = arith.constant 0 : index
    %c0_0 = arith.constant 0 : index
    %c0_1 = arith.constant 0 : index
    %0 = vector.load %arg1[%c0, %c0_0, %c0_1] : memref<8x8x8xf32, #tpu.memory_space<vmem>>, vector<8x8x8xf32>
    %1 = vector.shape_cast %0 : vector<8x8x8xf32> to vector<64x8xf32>
    %c0_2 = arith.constant 0 : index
    %c0_3 = arith.constant 0 : index
    %2 = vector.load %arg2[%c0_2, %c0_3] : memref<8x16xf32, #tpu.memory_space<vmem>>, vector<8x16xf32>
    %cst = arith.constant dense<0.000000e+00> : vector<64x16xf32>
    %3 = tpu.matmul %1, %2, %cst {dimension_numbers = #tpu.dot_dimension_numbers<[1], [0], [0], [1], [0, 0, 1, 1], [], []>} : vector<64x8xf32>, vector<8x16xf32>, vector<64x16xf32> -> vector<64x16xf32>
    %c0_4 = arith.constant 0 : index
    %c0_5 = arith.constant 0 : index
    %4 = vector.load %arg3[%c0_4, %c0_5] : memref<1x16xf32, #tpu.memory_space<vmem>>, vector<1x16xf32>
    %5 = vector.broadcast %4 : vector<1x16xf32> to vector<64x16xf32>
    %6 = arith.addf %3, %5 : vector<64x16xf32>
    %7 = vector.extract_strided_slice %6 {offsets = [0, 0], sizes = [64, 8], strides = [1, 1]} : vector<64x16xf32> to vector<64x8xf32>
    %8 = vector.shape_cast %7 : vector<64x8xf32> to vector<8x1x8x8xf32>
    %c0_6 = arith.constant 0 : index
    %c0_7 = arith.constant 0 : index
    %c0_8 = arith.constant 0 : index
    %c0_9 = arith.constant 0 : index
    %9 = vector.load %arg4[%c0_6, %c0_7, %c0_8, %c0_9] : memref<8x2x8x8xf32, #tpu.memory_space<vmem>>, vector<8x1x8x8xf32>
    tpu.vector_store %arg4[%c0_6, %c0_7, %c0_8, %c0_9], %8 {strides = array<i32>} : memref<8x2x8x8xf32, #tpu.memory_space<vmem>>, vector<8x1x8x8xf32>,
    %10 = vector.extract_strided_slice %6 {offsets = [0, 8], sizes = [64, 8], strides = [1, 1]} : vector<64x16xf32> to vector<64x8xf32>
    %11 = vector.shape_cast %10 : vector<64x8xf32> to vector<8x1x8x8xf32>
    %c0_10 = arith.constant 0 : index
    %c1 = arith.constant 1 : index
    %c0_11 = arith.constant 0 : index
    %c0_12 = arith.constant 0 : index
    %12 = vector.load %arg4[%c0_10, %c1, %c0_11, %c0_12] : memref<8x2x8x8xf32, #tpu.memory_space<vmem>>, vector<8x1x8x8xf32>
    tpu.vector_store %arg4[%c0_10, %c1, %c0_11, %c0_12], %11 {strides = array<i32>} : memref<8x2x8x8xf32, #tpu.memory_space<vmem>>, vector<8x1x8x8xf32>,
    return
  }
  func.func @transform_0(%arg0: i32) -> (i32, i32, i32) {
    %c0_i32 = arith.constant 0 : i32
    %c0_i32_0 = arith.constant 0 : i32
    %c0_i32_1 = arith.constant 0 : i32
    return %arg0, %c0_i32, %c0_i32_0 : i32, i32, i32
  }
  func.func @transform_1(%arg0: i32) -> (i32, i32) {
    %c0_i32 = arith.constant 0 : i32
    %c0_i32_0 = arith.constant 0 : i32
    %c0_i32_1 = arith.constant 0 : i32
    return %c0_i32, %c0_i32_0 : i32, i32
  }
  func.func @transform_2(%arg0: i32) -> (i32, i32) {
    %c0_i32 = arith.constant 0 : i32
    %c0_i32_0 = arith.constant 0 : i32
    %c0_i32_1 = arith.constant 0 : i32
    return %c0_i32, %c0_i32_0 : i32, i32
  }
  func.func @transform_3(%arg0: i32) -> (i32, i32, i32, i32) {
    %c0_i32 = arith.constant 0 : i32
    %c0_i32_0 = arith.constant 0 : i32
    %c0_i32_1 = arith.constant 0 : i32
    %c0_i32_2 = arith.constant 0 : i32
    return %arg0, %c0_i32, %c0_i32_0, %c0_i32_1 : i32, i32, i32, i32
  }
}

module attributes {stable_mosaic.version = 11 : i64} {
  func.func @_conv_bn_relu_kernel(%arg0: i32, %arg1: memref<1x16x16x4xf32, #tpu.memory_space<vmem>>, %arg2: memref<1x16x16x4xf32, #tpu.memory_space<vmem>>, %arg3: memref<9x4x4xf32, #tpu.memory_space<vmem>>, %arg4: memref<9x4x4xf32, #tpu.memory_space<vmem>>, %arg5: memref<1x4xf32, #tpu.memory_space<vmem>>, %arg6: memref<1x4xf32, #tpu.memory_space<vmem>>, %arg7: memref<1x4xf32, #tpu.memory_space<vmem>>, %arg8: memref<2x16x16x4xf32, #tpu.memory_space<vmem>>, %arg9: memref<18x18x4xf32, #tpu.memory_space<vmem>>, %arg10: memref<18x18x4xf32, #tpu.memory_space<vmem>>, %arg11: memref<1x4xf32, #tpu.memory_space<vmem>>, %arg12: memref<1x4xf32, #tpu.memory_space<vmem>>) attributes {dimension_semantics = [#tpu.dimension_semantics<arbitrary>], iteration_bounds = array<i64: 2>, scalar_prefetch = 0 : i64, scratch_operands = 4 : i64, tpu.core_type = #tpu.core_type<tc>, window_params = [{transform_indices = @transform_0, window_bounds = array<i64: 1, 16, 16, 4>}, {transform_indices = @transform_1, window_bounds = array<i64: 1, 16, 16, 4>}, {pipeline_mode = #tpu.pipeline_mode<synchronous>, transform_indices = @transform_2, window_bounds = array<i64: 9, 4, 4>}, {pipeline_mode = #tpu.pipeline_mode<synchronous>, transform_indices = @transform_3, window_bounds = array<i64: 9, 4, 4>}, {pipeline_mode = #tpu.pipeline_mode<synchronous>, transform_indices = @transform_4, window_bounds = array<i64: 1, 4>}, {pipeline_mode = #tpu.pipeline_mode<synchronous>, transform_indices = @transform_5, window_bounds = array<i64: 1, 4>}, {pipeline_mode = #tpu.pipeline_mode<synchronous>, transform_indices = @transform_6, window_bounds = array<i64: 1, 4>}, {pipeline_mode = #tpu.pipeline_mode<synchronous>, transform_indices = @transform_7, window_bounds = array<i64: 2, 16, 16, 4>}]} {
    %c0_i32 = arith.constant 0 : i32
    %0 = arith.cmpi eq, %arg0, %c0_i32 : i32
    %1 = arith.extui %0 : i1 to i32
    %c0_i32_0 = arith.constant 0 : i32
    %2 = arith.cmpi ne, %1, %c0_i32_0 : i32
    scf.if %2 {
      %cst_100 = arith.constant 0.000000e+00 : f32
      %140 = vector.broadcast %cst_100 : f32 to vector<18x18x4xf32>
      %c0_101 = arith.constant 0 : index
      %c0_102 = arith.constant 0 : index
      %c0_103 = arith.constant 0 : index
      %141 = vector.load %arg9[%c0_101, %c0_102, %c0_103] : memref<18x18x4xf32, #tpu.memory_space<vmem>>, vector<18x18x4xf32>
      tpu.vector_store %arg9[%c0_101, %c0_102, %c0_103], %140 {strides = array<i32>} : memref<18x18x4xf32, #tpu.memory_space<vmem>>, vector<18x18x4xf32>,
      %cst_104 = arith.constant 0.000000e+00 : f32
      %142 = vector.broadcast %cst_104 : f32 to vector<18x18x4xf32>
      %c0_105 = arith.constant 0 : index
      %c0_106 = arith.constant 0 : index
      %c0_107 = arith.constant 0 : index
      %143 = vector.load %arg10[%c0_105, %c0_106, %c0_107] : memref<18x18x4xf32, #tpu.memory_space<vmem>>, vector<18x18x4xf32>
      tpu.vector_store %arg10[%c0_105, %c0_106, %c0_107], %142 {strides = array<i32>} : memref<18x18x4xf32, #tpu.memory_space<vmem>>, vector<18x18x4xf32>,
      %cst_108 = arith.constant 0.000000e+00 : f32
      %144 = vector.broadcast %cst_108 : f32 to vector<1x4xf32>
      %c0_109 = arith.constant 0 : index
      %c0_110 = arith.constant 0 : index
      %145 = vector.load %arg11[%c0_109, %c0_110] : memref<1x4xf32, #tpu.memory_space<vmem>>, vector<1x4xf32>
      tpu.vector_store %arg11[%c0_109, %c0_110], %144 {strides = array<i32>} : memref<1x4xf32, #tpu.memory_space<vmem>>, vector<1x4xf32>,
      %cst_111 = arith.constant 0.000000e+00 : f32
      %146 = vector.broadcast %cst_111 : f32 to vector<1x4xf32>
      %c0_112 = arith.constant 0 : index
      %c0_113 = arith.constant 0 : index
      %147 = vector.load %arg12[%c0_112, %c0_113] : memref<1x4xf32, #tpu.memory_space<vmem>>, vector<1x4xf32>
      tpu.vector_store %arg12[%c0_112, %c0_113], %146 {strides = array<i32>} : memref<1x4xf32, #tpu.memory_space<vmem>>, vector<1x4xf32>,
    } else {
    }
    %c0 = arith.constant 0 : index
    %c0_1 = arith.constant 0 : index
    %c0_2 = arith.constant 0 : index
    %c0_3 = arith.constant 0 : index
    %3 = vector.load %arg1[%c0, %c0_1, %c0_2, %c0_3] : memref<1x16x16x4xf32, #tpu.memory_space<vmem>>, vector<1x16x16x4xf32>
    %4 = vector.shape_cast %3 : vector<1x16x16x4xf32> to vector<16x16x4xf32>
    %c1 = arith.constant 1 : index
    %c1_4 = arith.constant 1 : index
    %c0_5 = arith.constant 0 : index
    %5 = vector.load %arg9[%c1, %c1_4, %c0_5] : memref<18x18x4xf32, #tpu.memory_space<vmem>>, vector<16x16x4xf32>
    tpu.vector_store %arg9[%c1, %c1_4, %c0_5], %4 {strides = array<i32>} : memref<18x18x4xf32, #tpu.memory_space<vmem>>, vector<16x16x4xf32>,
    %c0_6 = arith.constant 0 : index
    %c0_7 = arith.constant 0 : index
    %c0_8 = arith.constant 0 : index
    %c0_9 = arith.constant 0 : index
    %6 = vector.load %arg2[%c0_6, %c0_7, %c0_8, %c0_9] : memref<1x16x16x4xf32, #tpu.memory_space<vmem>>, vector<1x16x16x4xf32>
    %7 = vector.shape_cast %6 : vector<1x16x16x4xf32> to vector<16x16x4xf32>
    %c1_10 = arith.constant 1 : index
    %c1_11 = arith.constant 1 : index
    %c0_12 = arith.constant 0 : index
    %8 = vector.load %arg10[%c1_10, %c1_11, %c0_12] : memref<18x18x4xf32, #tpu.memory_space<vmem>>, vector<16x16x4xf32>
    tpu.vector_store %arg10[%c1_10, %c1_11, %c0_12], %7 {strides = array<i32>} : memref<18x18x4xf32, #tpu.memory_space<vmem>>, vector<16x16x4xf32>,
    %c0_13 = arith.constant 0 : index
    %c0_14 = arith.constant 0 : index
    %c0_15 = arith.constant 0 : index
    %9 = vector.load %arg9[%c0_13, %c0_14, %c0_15] : memref<18x18x4xf32, #tpu.memory_space<vmem>>, vector<18x18x4xf32>
    %c0_16 = arith.constant 0 : index
    %c0_17 = arith.constant 0 : index
    %c0_18 = arith.constant 0 : index
    %10 = vector.load %arg10[%c0_16, %c0_17, %c0_18] : memref<18x18x4xf32, #tpu.memory_space<vmem>>, vector<18x18x4xf32>
    %cst = arith.constant 0.000000e+00 : f32
    %11 = vector.broadcast %cst : f32 to vector<256x4xf32>
    %12 = vector.extract_strided_slice %9 {offsets = [0, 0, 0], sizes = [16, 16, 4], strides = [1, 1, 1]} : vector<18x18x4xf32> to vector<16x16x4xf32>
    %13 = vector.shape_cast %12 : vector<16x16x4xf32> to vector<256x4xf32>
    %14 = vector.extract_strided_slice %10 {offsets = [0, 0, 0], sizes = [16, 16, 4], strides = [1, 1, 1]} : vector<18x18x4xf32> to vector<16x16x4xf32>
    %15 = vector.shape_cast %14 : vector<16x16x4xf32> to vector<256x4xf32>
    %c0_19 = arith.constant 0 : index
    %c0_20 = arith.constant 0 : index
    %c0_21 = arith.constant 0 : index
    %16 = vector.load %arg3[%c0_19, %c0_20, %c0_21] : memref<9x4x4xf32, #tpu.memory_space<vmem>>, vector<1x4x4xf32>
    %17 = vector.shape_cast %16 : vector<1x4x4xf32> to vector<4x4xf32>
    %cst_22 = arith.constant dense<0.000000e+00> : vector<256x4xf32>
    %18 = tpu.matmul %13, %17, %cst_22 {dimension_numbers = #tpu.dot_dimension_numbers<[1], [0], [0], [1], [0, 0, 1, 1], [], []>} : vector<256x4xf32>, vector<4x4xf32>, vector<256x4xf32> -> vector<256x4xf32>
    %19 = arith.addf %11, %18 : vector<256x4xf32>
    %c0_23 = arith.constant 0 : index
    %c0_24 = arith.constant 0 : index
    %c0_25 = arith.constant 0 : index
    %20 = vector.load %arg4[%c0_23, %c0_24, %c0_25] : memref<9x4x4xf32, #tpu.memory_space<vmem>>, vector<1x4x4xf32>
    %21 = vector.shape_cast %20 : vector<1x4x4xf32> to vector<4x4xf32>
    %cst_26 = arith.constant dense<0.000000e+00> : vector<256x4xf32>
    %22 = tpu.matmul %15, %21, %cst_26 {dimension_numbers = #tpu.dot_dimension_numbers<[1], [0], [0], [1], [0, 0, 1, 1], [], []>} : vector<256x4xf32>, vector<4x4xf32>, vector<256x4xf32> -> vector<256x4xf32>
    %23 = arith.addf %19, %22 : vector<256x4xf32>
    %24 = vector.extract_strided_slice %9 {offsets = [0, 1, 0], sizes = [16, 16, 4], strides = [1, 1, 1]} : vector<18x18x4xf32> to vector<16x16x4xf32>
    %25 = vector.shape_cast %24 : vector<16x16x4xf32> to vector<256x4xf32>
    %26 = vector.extract_strided_slice %10 {offsets = [0, 1, 0], sizes = [16, 16, 4], strides = [1, 1, 1]} : vector<18x18x4xf32> to vector<16x16x4xf32>
    %27 = vector.shape_cast %26 : vector<16x16x4xf32> to vector<256x4xf32>
    %c1_27 = arith.constant 1 : index
    %c0_28 = arith.constant 0 : index
    %c0_29 = arith.constant 0 : index
    %28 = vector.load %arg3[%c1_27, %c0_28, %c0_29] : memref<9x4x4xf32, #tpu.memory_space<vmem>>, vector<1x4x4xf32>
    %29 = vector.shape_cast %28 : vector<1x4x4xf32> to vector<4x4xf32>
    %cst_30 = arith.constant dense<0.000000e+00> : vector<256x4xf32>
    %30 = tpu.matmul %25, %29, %cst_30 {dimension_numbers = #tpu.dot_dimension_numbers<[1], [0], [0], [1], [0, 0, 1, 1], [], []>} : vector<256x4xf32>, vector<4x4xf32>, vector<256x4xf32> -> vector<256x4xf32>
    %31 = arith.addf %23, %30 : vector<256x4xf32>
    %c1_31 = arith.constant 1 : index
    %c0_32 = arith.constant 0 : index
    %c0_33 = arith.constant 0 : index
    %32 = vector.load %arg4[%c1_31, %c0_32, %c0_33] : memref<9x4x4xf32, #tpu.memory_space<vmem>>, vector<1x4x4xf32>
    %33 = vector.shape_cast %32 : vector<1x4x4xf32> to vector<4x4xf32>
    %cst_34 = arith.constant dense<0.000000e+00> : vector<256x4xf32>
    %34 = tpu.matmul %27, %33, %cst_34 {dimension_numbers = #tpu.dot_dimension_numbers<[1], [0], [0], [1], [0, 0, 1, 1], [], []>} : vector<256x4xf32>, vector<4x4xf32>, vector<256x4xf32> -> vector<256x4xf32>
    %35 = arith.addf %31, %34 : vector<256x4xf32>
    %36 = vector.extract_strided_slice %9 {offsets = [0, 2, 0], sizes = [16, 16, 4], strides = [1, 1, 1]} : vector<18x18x4xf32> to vector<16x16x4xf32>
    %37 = vector.shape_cast %36 : vector<16x16x4xf32> to vector<256x4xf32>
    %38 = vector.extract_strided_slice %10 {offsets = [0, 2, 0], sizes = [16, 16, 4], strides = [1, 1, 1]} : vector<18x18x4xf32> to vector<16x16x4xf32>
    %39 = vector.shape_cast %38 : vector<16x16x4xf32> to vector<256x4xf32>
    %c2 = arith.constant 2 : index
    %c0_35 = arith.constant 0 : index
    %c0_36 = arith.constant 0 : index
    %40 = vector.load %arg3[%c2, %c0_35, %c0_36] : memref<9x4x4xf32, #tpu.memory_space<vmem>>, vector<1x4x4xf32>
    %41 = vector.shape_cast %40 : vector<1x4x4xf32> to vector<4x4xf32>
    %cst_37 = arith.constant dense<0.000000e+00> : vector<256x4xf32>
    %42 = tpu.matmul %37, %41, %cst_37 {dimension_numbers = #tpu.dot_dimension_numbers<[1], [0], [0], [1], [0, 0, 1, 1], [], []>} : vector<256x4xf32>, vector<4x4xf32>, vector<256x4xf32> -> vector<256x4xf32>
    %43 = arith.addf %35, %42 : vector<256x4xf32>
    %c2_38 = arith.constant 2 : index
    %c0_39 = arith.constant 0 : index
    %c0_40 = arith.constant 0 : index
    %44 = vector.load %arg4[%c2_38, %c0_39, %c0_40] : memref<9x4x4xf32, #tpu.memory_space<vmem>>, vector<1x4x4xf32>
    %45 = vector.shape_cast %44 : vector<1x4x4xf32> to vector<4x4xf32>
    %cst_41 = arith.constant dense<0.000000e+00> : vector<256x4xf32>
    %46 = tpu.matmul %39, %45, %cst_41 {dimension_numbers = #tpu.dot_dimension_numbers<[1], [0], [0], [1], [0, 0, 1, 1], [], []>} : vector<256x4xf32>, vector<4x4xf32>, vector<256x4xf32> -> vector<256x4xf32>
    %47 = arith.addf %43, %46 : vector<256x4xf32>
    %48 = vector.extract_strided_slice %9 {offsets = [1, 0, 0], sizes = [16, 16, 4], strides = [1, 1, 1]} : vector<18x18x4xf32> to vector<16x16x4xf32>
    %49 = vector.shape_cast %48 : vector<16x16x4xf32> to vector<256x4xf32>
    %50 = vector.extract_strided_slice %10 {offsets = [1, 0, 0], sizes = [16, 16, 4], strides = [1, 1, 1]} : vector<18x18x4xf32> to vector<16x16x4xf32>
    %51 = vector.shape_cast %50 : vector<16x16x4xf32> to vector<256x4xf32>
    %c3 = arith.constant 3 : index
    %c0_42 = arith.constant 0 : index
    %c0_43 = arith.constant 0 : index
    %52 = vector.load %arg3[%c3, %c0_42, %c0_43] : memref<9x4x4xf32, #tpu.memory_space<vmem>>, vector<1x4x4xf32>
    %53 = vector.shape_cast %52 : vector<1x4x4xf32> to vector<4x4xf32>
    %cst_44 = arith.constant dense<0.000000e+00> : vector<256x4xf32>
    %54 = tpu.matmul %49, %53, %cst_44 {dimension_numbers = #tpu.dot_dimension_numbers<[1], [0], [0], [1], [0, 0, 1, 1], [], []>} : vector<256x4xf32>, vector<4x4xf32>, vector<256x4xf32> -> vector<256x4xf32>
    %55 = arith.addf %47, %54 : vector<256x4xf32>
    %c3_45 = arith.constant 3 : index
    %c0_46 = arith.constant 0 : index
    %c0_47 = arith.constant 0 : index
    %56 = vector.load %arg4[%c3_45, %c0_46, %c0_47] : memref<9x4x4xf32, #tpu.memory_space<vmem>>, vector<1x4x4xf32>
    %57 = vector.shape_cast %56 : vector<1x4x4xf32> to vector<4x4xf32>
    %cst_48 = arith.constant dense<0.000000e+00> : vector<256x4xf32>
    %58 = tpu.matmul %51, %57, %cst_48 {dimension_numbers = #tpu.dot_dimension_numbers<[1], [0], [0], [1], [0, 0, 1, 1], [], []>} : vector<256x4xf32>, vector<4x4xf32>, vector<256x4xf32> -> vector<256x4xf32>
    %59 = arith.addf %55, %58 : vector<256x4xf32>
    %60 = vector.extract_strided_slice %9 {offsets = [1, 1, 0], sizes = [16, 16, 4], strides = [1, 1, 1]} : vector<18x18x4xf32> to vector<16x16x4xf32>
    %61 = vector.shape_cast %60 : vector<16x16x4xf32> to vector<256x4xf32>
    %62 = vector.extract_strided_slice %10 {offsets = [1, 1, 0], sizes = [16, 16, 4], strides = [1, 1, 1]} : vector<18x18x4xf32> to vector<16x16x4xf32>
    %63 = vector.shape_cast %62 : vector<16x16x4xf32> to vector<256x4xf32>
    %c4 = arith.constant 4 : index
    %c0_49 = arith.constant 0 : index
    %c0_50 = arith.constant 0 : index
    %64 = vector.load %arg3[%c4, %c0_49, %c0_50] : memref<9x4x4xf32, #tpu.memory_space<vmem>>, vector<1x4x4xf32>
    %65 = vector.shape_cast %64 : vector<1x4x4xf32> to vector<4x4xf32>
    %cst_51 = arith.constant dense<0.000000e+00> : vector<256x4xf32>
    %66 = tpu.matmul %61, %65, %cst_51 {dimension_numbers = #tpu.dot_dimension_numbers<[1], [0], [0], [1], [0, 0, 1, 1], [], []>} : vector<256x4xf32>, vector<4x4xf32>, vector<256x4xf32> -> vector<256x4xf32>
    %67 = arith.addf %59, %66 : vector<256x4xf32>
    %c4_52 = arith.constant 4 : index
    %c0_53 = arith.constant 0 : index
    %c0_54 = arith.constant 0 : index
    %68 = vector.load %arg4[%c4_52, %c0_53, %c0_54] : memref<9x4x4xf32, #tpu.memory_space<vmem>>, vector<1x4x4xf32>
    %69 = vector.shape_cast %68 : vector<1x4x4xf32> to vector<4x4xf32>
    %cst_55 = arith.constant dense<0.000000e+00> : vector<256x4xf32>
    %70 = tpu.matmul %63, %69, %cst_55 {dimension_numbers = #tpu.dot_dimension_numbers<[1], [0], [0], [1], [0, 0, 1, 1], [], []>} : vector<256x4xf32>, vector<4x4xf32>, vector<256x4xf32> -> vector<256x4xf32>
    %71 = arith.addf %67, %70 : vector<256x4xf32>
    %72 = vector.extract_strided_slice %9 {offsets = [1, 2, 0], sizes = [16, 16, 4], strides = [1, 1, 1]} : vector<18x18x4xf32> to vector<16x16x4xf32>
    %73 = vector.shape_cast %72 : vector<16x16x4xf32> to vector<256x4xf32>
    %74 = vector.extract_strided_slice %10 {offsets = [1, 2, 0], sizes = [16, 16, 4], strides = [1, 1, 1]} : vector<18x18x4xf32> to vector<16x16x4xf32>
    %75 = vector.shape_cast %74 : vector<16x16x4xf32> to vector<256x4xf32>
    %c5 = arith.constant 5 : index
    %c0_56 = arith.constant 0 : index
    %c0_57 = arith.constant 0 : index
    %76 = vector.load %arg3[%c5, %c0_56, %c0_57] : memref<9x4x4xf32, #tpu.memory_space<vmem>>, vector<1x4x4xf32>
    %77 = vector.shape_cast %76 : vector<1x4x4xf32> to vector<4x4xf32>
    %cst_58 = arith.constant dense<0.000000e+00> : vector<256x4xf32>
    %78 = tpu.matmul %73, %77, %cst_58 {dimension_numbers = #tpu.dot_dimension_numbers<[1], [0], [0], [1], [0, 0, 1, 1], [], []>} : vector<256x4xf32>, vector<4x4xf32>, vector<256x4xf32> -> vector<256x4xf32>
    %79 = arith.addf %71, %78 : vector<256x4xf32>
    %c5_59 = arith.constant 5 : index
    %c0_60 = arith.constant 0 : index
    %c0_61 = arith.constant 0 : index
    %80 = vector.load %arg4[%c5_59, %c0_60, %c0_61] : memref<9x4x4xf32, #tpu.memory_space<vmem>>, vector<1x4x4xf32>
    %81 = vector.shape_cast %80 : vector<1x4x4xf32> to vector<4x4xf32>
    %cst_62 = arith.constant dense<0.000000e+00> : vector<256x4xf32>
    %82 = tpu.matmul %75, %81, %cst_62 {dimension_numbers = #tpu.dot_dimension_numbers<[1], [0], [0], [1], [0, 0, 1, 1], [], []>} : vector<256x4xf32>, vector<4x4xf32>, vector<256x4xf32> -> vector<256x4xf32>
    %83 = arith.addf %79, %82 : vector<256x4xf32>
    %84 = vector.extract_strided_slice %9 {offsets = [2, 0, 0], sizes = [16, 16, 4], strides = [1, 1, 1]} : vector<18x18x4xf32> to vector<16x16x4xf32>
    %85 = vector.shape_cast %84 : vector<16x16x4xf32> to vector<256x4xf32>
    %86 = vector.extract_strided_slice %10 {offsets = [2, 0, 0], sizes = [16, 16, 4], strides = [1, 1, 1]} : vector<18x18x4xf32> to vector<16x16x4xf32>
    %87 = vector.shape_cast %86 : vector<16x16x4xf32> to vector<256x4xf32>
    %c6 = arith.constant 6 : index
    %c0_63 = arith.constant 0 : index
    %c0_64 = arith.constant 0 : index
    %88 = vector.load %arg3[%c6, %c0_63, %c0_64] : memref<9x4x4xf32, #tpu.memory_space<vmem>>, vector<1x4x4xf32>
    %89 = vector.shape_cast %88 : vector<1x4x4xf32> to vector<4x4xf32>
    %cst_65 = arith.constant dense<0.000000e+00> : vector<256x4xf32>
    %90 = tpu.matmul %85, %89, %cst_65 {dimension_numbers = #tpu.dot_dimension_numbers<[1], [0], [0], [1], [0, 0, 1, 1], [], []>} : vector<256x4xf32>, vector<4x4xf32>, vector<256x4xf32> -> vector<256x4xf32>
    %91 = arith.addf %83, %90 : vector<256x4xf32>
    %c6_66 = arith.constant 6 : index
    %c0_67 = arith.constant 0 : index
    %c0_68 = arith.constant 0 : index
    %92 = vector.load %arg4[%c6_66, %c0_67, %c0_68] : memref<9x4x4xf32, #tpu.memory_space<vmem>>, vector<1x4x4xf32>
    %93 = vector.shape_cast %92 : vector<1x4x4xf32> to vector<4x4xf32>
    %cst_69 = arith.constant dense<0.000000e+00> : vector<256x4xf32>
    %94 = tpu.matmul %87, %93, %cst_69 {dimension_numbers = #tpu.dot_dimension_numbers<[1], [0], [0], [1], [0, 0, 1, 1], [], []>} : vector<256x4xf32>, vector<4x4xf32>, vector<256x4xf32> -> vector<256x4xf32>
    %95 = arith.addf %91, %94 : vector<256x4xf32>
    %96 = vector.extract_strided_slice %9 {offsets = [2, 1, 0], sizes = [16, 16, 4], strides = [1, 1, 1]} : vector<18x18x4xf32> to vector<16x16x4xf32>
    %97 = vector.shape_cast %96 : vector<16x16x4xf32> to vector<256x4xf32>
    %98 = vector.extract_strided_slice %10 {offsets = [2, 1, 0], sizes = [16, 16, 4], strides = [1, 1, 1]} : vector<18x18x4xf32> to vector<16x16x4xf32>
    %99 = vector.shape_cast %98 : vector<16x16x4xf32> to vector<256x4xf32>
    %c7 = arith.constant 7 : index
    %c0_70 = arith.constant 0 : index
    %c0_71 = arith.constant 0 : index
    %100 = vector.load %arg3[%c7, %c0_70, %c0_71] : memref<9x4x4xf32, #tpu.memory_space<vmem>>, vector<1x4x4xf32>
    %101 = vector.shape_cast %100 : vector<1x4x4xf32> to vector<4x4xf32>
    %cst_72 = arith.constant dense<0.000000e+00> : vector<256x4xf32>
    %102 = tpu.matmul %97, %101, %cst_72 {dimension_numbers = #tpu.dot_dimension_numbers<[1], [0], [0], [1], [0, 0, 1, 1], [], []>} : vector<256x4xf32>, vector<4x4xf32>, vector<256x4xf32> -> vector<256x4xf32>
    %103 = arith.addf %95, %102 : vector<256x4xf32>
    %c7_73 = arith.constant 7 : index
    %c0_74 = arith.constant 0 : index
    %c0_75 = arith.constant 0 : index
    %104 = vector.load %arg4[%c7_73, %c0_74, %c0_75] : memref<9x4x4xf32, #tpu.memory_space<vmem>>, vector<1x4x4xf32>
    %105 = vector.shape_cast %104 : vector<1x4x4xf32> to vector<4x4xf32>
    %cst_76 = arith.constant dense<0.000000e+00> : vector<256x4xf32>
    %106 = tpu.matmul %99, %105, %cst_76 {dimension_numbers = #tpu.dot_dimension_numbers<[1], [0], [0], [1], [0, 0, 1, 1], [], []>} : vector<256x4xf32>, vector<4x4xf32>, vector<256x4xf32> -> vector<256x4xf32>
    %107 = arith.addf %103, %106 : vector<256x4xf32>
    %108 = vector.extract_strided_slice %9 {offsets = [2, 2, 0], sizes = [16, 16, 4], strides = [1, 1, 1]} : vector<18x18x4xf32> to vector<16x16x4xf32>
    %109 = vector.shape_cast %108 : vector<16x16x4xf32> to vector<256x4xf32>
    %110 = vector.extract_strided_slice %10 {offsets = [2, 2, 0], sizes = [16, 16, 4], strides = [1, 1, 1]} : vector<18x18x4xf32> to vector<16x16x4xf32>
    %111 = vector.shape_cast %110 : vector<16x16x4xf32> to vector<256x4xf32>
    %c8 = arith.constant 8 : index
    %c0_77 = arith.constant 0 : index
    %c0_78 = arith.constant 0 : index
    %112 = vector.load %arg3[%c8, %c0_77, %c0_78] : memref<9x4x4xf32, #tpu.memory_space<vmem>>, vector<1x4x4xf32>
    %113 = vector.shape_cast %112 : vector<1x4x4xf32> to vector<4x4xf32>
    %cst_79 = arith.constant dense<0.000000e+00> : vector<256x4xf32>
    %114 = tpu.matmul %109, %113, %cst_79 {dimension_numbers = #tpu.dot_dimension_numbers<[1], [0], [0], [1], [0, 0, 1, 1], [], []>} : vector<256x4xf32>, vector<4x4xf32>, vector<256x4xf32> -> vector<256x4xf32>
    %115 = arith.addf %107, %114 : vector<256x4xf32>
    %c8_80 = arith.constant 8 : index
    %c0_81 = arith.constant 0 : index
    %c0_82 = arith.constant 0 : index
    %116 = vector.load %arg4[%c8_80, %c0_81, %c0_82] : memref<9x4x4xf32, #tpu.memory_space<vmem>>, vector<1x4x4xf32>
    %117 = vector.shape_cast %116 : vector<1x4x4xf32> to vector<4x4xf32>
    %cst_83 = arith.constant dense<0.000000e+00> : vector<256x4xf32>
    %118 = tpu.matmul %111, %117, %cst_83 {dimension_numbers = #tpu.dot_dimension_numbers<[1], [0], [0], [1], [0, 0, 1, 1], [], []>} : vector<256x4xf32>, vector<4x4xf32>, vector<256x4xf32> -> vector<256x4xf32>
    %119 = arith.addf %115, %118 : vector<256x4xf32>
    %c0_84 = arith.constant 0 : index
    %c0_85 = arith.constant 0 : index
    %120 = vector.load %arg5[%c0_84, %c0_85] : memref<1x4xf32, #tpu.memory_space<vmem>>, vector<1x4xf32>
    %121 = vector.broadcast %120 : vector<1x4xf32> to vector<256x4xf32>
    %122 = arith.addf %119, %121 : vector<256x4xf32>
    %c0_86 = arith.constant 0 : index
    %c0_87 = arith.constant 0 : index
    %123 = vector.load %arg11[%c0_86, %c0_87] : memref<1x4xf32, #tpu.memory_space<vmem>>, vector<1x4xf32>
    %cst_88 = arith.constant dense<0.000000e+00> : vector<4xf32>
    %124 = vector.multi_reduction <add>, %122, %cst_88 [0] : vector<256x4xf32> to vector<4xf32>
    %125 = vector.shape_cast %124 : vector<4xf32> to vector<1x4xf32>
    %126 = arith.addf %123, %125 : vector<1x4xf32>
    %c0_89 = arith.constant 0 : index
    %c0_90 = arith.constant 0 : index
    %127 = vector.load %arg11[%c0_89, %c0_90] : memref<1x4xf32, #tpu.memory_space<vmem>>, vector<1x4xf32>
    tpu.vector_store %arg11[%c0_89, %c0_90], %126 {strides = array<i32>} : memref<1x4xf32, #tpu.memory_space<vmem>>, vector<1x4xf32>,
    %c0_91 = arith.constant 0 : index
    %c0_92 = arith.constant 0 : index
    %128 = vector.load %arg12[%c0_91, %c0_92] : memref<1x4xf32, #tpu.memory_space<vmem>>, vector<1x4xf32>
    %129 = arith.mulf %122, %122 : vector<256x4xf32>
    %cst_93 = arith.constant dense<0.000000e+00> : vector<4xf32>
    %130 = vector.multi_reduction <add>, %129, %cst_93 [0] : vector<256x4xf32> to vector<4xf32>
    %131 = vector.shape_cast %130 : vector<4xf32> to vector<1x4xf32>
    %132 = arith.addf %128, %131 : vector<1x4xf32>
    %c0_94 = arith.constant 0 : index
    %c0_95 = arith.constant 0 : index
    %133 = vector.load %arg12[%c0_94, %c0_95] : memref<1x4xf32, #tpu.memory_space<vmem>>, vector<1x4xf32>
    tpu.vector_store %arg12[%c0_94, %c0_95], %132 {strides = array<i32>} : memref<1x4xf32, #tpu.memory_space<vmem>>, vector<1x4xf32>,
    %134 = vector.shape_cast %122 : vector<256x4xf32> to vector<1x16x16x4xf32>
    %135 = arith.index_cast %arg0 : i32 to index
    %c0_96 = arith.constant 0 : index
    %c0_97 = arith.constant 0 : index
    %c0_98 = arith.constant 0 : index
    %136 = vector.load %arg8[%135, %c0_96, %c0_97, %c0_98] : memref<2x16x16x4xf32, #tpu.memory_space<vmem>>, vector<1x16x16x4xf32>
    tpu.vector_store %arg8[%135, %c0_96, %c0_97, %c0_98], %134 {strides = array<i32>} : memref<2x16x16x4xf32, #tpu.memory_space<vmem>>, vector<1x16x16x4xf32>,
    %c1_i32 = arith.constant 1 : i32
    %137 = arith.cmpi eq, %arg0, %c1_i32 : i32
    %138 = arith.extui %137 : i1 to i32
    %c0_i32_99 = arith.constant 0 : i32
    %139 = arith.cmpi ne, %138, %c0_i32_99 : i32
    scf.if %139 {
      %c0_100 = arith.constant 0 : index
      %c0_101 = arith.constant 0 : index
      %140 = vector.load %arg11[%c0_100, %c0_101] : memref<1x4xf32, #tpu.memory_space<vmem>>, vector<1x4xf32>
      %cst_102 = arith.constant 5.120000e+02 : f32
      %141 = vector.broadcast %cst_102 : f32 to vector<1x4xf32>
      %142 = arith.divf %140, %141 : vector<1x4xf32>
      %c0_103 = arith.constant 0 : index
      %c0_104 = arith.constant 0 : index
      %143 = vector.load %arg12[%c0_103, %c0_104] : memref<1x4xf32, #tpu.memory_space<vmem>>, vector<1x4xf32>
      %cst_105 = arith.constant 5.120000e+02 : f32
      %144 = vector.broadcast %cst_105 : f32 to vector<1x4xf32>
      %145 = arith.divf %143, %144 : vector<1x4xf32>
      %146 = arith.mulf %142, %142 : vector<1x4xf32>
      %147 = arith.subf %145, %146 : vector<1x4xf32>
      %cst_106 = arith.constant 9.99999974E-6 : f32
      %148 = vector.broadcast %cst_106 : f32 to vector<1x4xf32>
      %149 = arith.addf %147, %148 : vector<1x4xf32>
      %150 = math.rsqrt %149 : vector<1x4xf32>
      %c0_107 = arith.constant 0 : index
      %c0_108 = arith.constant 0 : index
      %151 = vector.load %arg6[%c0_107, %c0_108] : memref<1x4xf32, #tpu.memory_space<vmem>>, vector<1x4xf32>
      %152 = arith.mulf %151, %150 : vector<1x4xf32>
      %153 = vector.shape_cast %152 : vector<1x4xf32> to vector<1x1x1x4xf32>
      %c0_109 = arith.constant 0 : index
      %c0_110 = arith.constant 0 : index
      %154 = vector.load %arg7[%c0_109, %c0_110] : memref<1x4xf32, #tpu.memory_space<vmem>>, vector<1x4xf32>
      %c0_111 = arith.constant 0 : index
      %c0_112 = arith.constant 0 : index
      %155 = vector.load %arg6[%c0_111, %c0_112] : memref<1x4xf32, #tpu.memory_space<vmem>>, vector<1x4xf32>
      %156 = arith.mulf %142, %155 : vector<1x4xf32>
      %157 = arith.mulf %156, %150 : vector<1x4xf32>
      %158 = arith.subf %154, %157 : vector<1x4xf32>
      %159 = vector.shape_cast %158 : vector<1x4xf32> to vector<1x1x1x4xf32>
      %c0_113 = arith.constant 0 : index
      %c0_114 = arith.constant 0 : index
      %c0_115 = arith.constant 0 : index
      %c0_116 = arith.constant 0 : index
      %160 = vector.load %arg8[%c0_113, %c0_114, %c0_115, %c0_116] : memref<2x16x16x4xf32, #tpu.memory_space<vmem>>, vector<2x16x16x4xf32>
      %161 = vector.broadcast %153 : vector<1x1x1x4xf32> to vector<2x16x16x4xf32>
      %162 = arith.mulf %160, %161 : vector<2x16x16x4xf32>
      %163 = vector.broadcast %159 : vector<1x1x1x4xf32> to vector<2x16x16x4xf32>
      %164 = arith.addf %162, %163 : vector<2x16x16x4xf32>
      %cst_117 = arith.constant 0.000000e+00 : f32
      %165 = vector.broadcast %cst_117 : f32 to vector<2x16x16x4xf32>
      %166 = arith.maximumf %164, %165 : vector<2x16x16x4xf32>
      %c0_118 = arith.constant 0 : index
      %c0_119 = arith.constant 0 : index
      %c0_120 = arith.constant 0 : index
      %c0_121 = arith.constant 0 : index
      %167 = vector.load %arg8[%c0_118, %c0_119, %c0_120, %c0_121] : memref<2x16x16x4xf32, #tpu.memory_space<vmem>>, vector<2x16x16x4xf32>
      tpu.vector_store %arg8[%c0_118, %c0_119, %c0_120, %c0_121], %166 {strides = array<i32>} : memref<2x16x16x4xf32, #tpu.memory_space<vmem>>, vector<2x16x16x4xf32>,
    } else {
    }
    return
  }
  func.func @transform_0(%arg0: i32) -> (i32, i32, i32, i32) {
    %c0_i32 = arith.constant 0 : i32
    %c0_i32_0 = arith.constant 0 : i32
    %c0_i32_1 = arith.constant 0 : i32
    %c0_i32_2 = arith.constant 0 : i32
    return %arg0, %c0_i32, %c0_i32_0, %c0_i32_1 : i32, i32, i32, i32
  }
  func.func @transform_1(%arg0: i32) -> (i32, i32, i32, i32) {
    %c0_i32 = arith.constant 0 : i32
    %c0_i32_0 = arith.constant 0 : i32
    %c0_i32_1 = arith.constant 0 : i32
    %c0_i32_2 = arith.constant 0 : i32
    return %arg0, %c0_i32, %c0_i32_0, %c0_i32_1 : i32, i32, i32, i32
  }
  func.func @transform_2(%arg0: i32) -> (i32, i32, i32) {
    %c0_i32 = arith.constant 0 : i32
    %c0_i32_0 = arith.constant 0 : i32
    %c0_i32_1 = arith.constant 0 : i32
    %c0_i32_2 = arith.constant 0 : i32
    return %c0_i32, %c0_i32_0, %c0_i32_1 : i32, i32, i32
  }
  func.func @transform_3(%arg0: i32) -> (i32, i32, i32) {
    %c0_i32 = arith.constant 0 : i32
    %c0_i32_0 = arith.constant 0 : i32
    %c0_i32_1 = arith.constant 0 : i32
    %c0_i32_2 = arith.constant 0 : i32
    return %c0_i32, %c0_i32_0, %c0_i32_1 : i32, i32, i32
  }
  func.func @transform_4(%arg0: i32) -> (i32, i32) {
    %c0_i32 = arith.constant 0 : i32
    %c0_i32_0 = arith.constant 0 : i32
    %c0_i32_1 = arith.constant 0 : i32
    return %c0_i32, %c0_i32_0 : i32, i32
  }
  func.func @transform_5(%arg0: i32) -> (i32, i32) {
    %c0_i32 = arith.constant 0 : i32
    %c0_i32_0 = arith.constant 0 : i32
    %c0_i32_1 = arith.constant 0 : i32
    return %c0_i32, %c0_i32_0 : i32, i32
  }
  func.func @transform_6(%arg0: i32) -> (i32, i32) {
    %c0_i32 = arith.constant 0 : i32
    %c0_i32_0 = arith.constant 0 : i32
    %c0_i32_1 = arith.constant 0 : i32
    return %c0_i32, %c0_i32_0 : i32, i32
  }
  func.func @transform_7(%arg0: i32) -> (i32, i32, i32, i32) {
    %c0_i32 = arith.constant 0 : i32
    %c0_i32_0 = arith.constant 0 : i32
    %c0_i32_1 = arith.constant 0 : i32
    %c0_i32_2 = arith.constant 0 : i32
    %c0_i32_3 = arith.constant 0 : i32
    return %c0_i32, %c0_i32_0, %c0_i32_1, %c0_i32_2 : i32, i32, i32, i32
  }
}

</mosaic_0001>

<bundles_post_ra>
// kernel: tile.8
= control target key start
LH: loop header
LB: loop body
LE: loop exit
PB: predicated region body
PF: predicated region fallthrough
CT: control target
= control target key end

     0   :  { %s22_s0 = inlined_call_operand.vmem [shape: f32[4], index: 0, kind: input, shape index: {}]   ;;  %s23_s1 = inlined_call_operand.vmem [shape: f32[4,4], index: 1, kind: output, shape index: {}]  }
   0x1   :  { %v4_v0 = vld [vmem:[%s22_s0] ss:$0 sm:$0xff] }
   0x2   :  { %5 = vst [vmem:[%s23_s1] sm:$0xf] %v4_v0 }

// kernel: tile.9
= control target key start
LH: loop header
LB: loop body
LE: loop exit
PB: predicated region body
PF: predicated region fallthrough
CT: control target
= control target key end

     0   :  { %vm8_vm0 = vcmask 31744   ;;  %s40_s8 = smov 4   ;;  %s41_s9 = smov 8   ;;  %vm14_vm1 = vcmask 130144   ;;  %vm20_vm2 = vcmask 97344   ;;  %vm26_vm3 = vcmask 64544   ;;  %s58_s0 = inlined_call_operand.vmem [shape: f32[4,4], index: 0, kind: input, shape index: {}]   ;;  %s59_s1 = inlined_call_operand.vmem [shape: f32[1,16], index: 1, kind: output, shape index: {}]  }
   0x1   :  { %v5_v0 = vld [vmem:[%s58_s0] sm:$0xf]  ;;  %s39_s0 = smov 12  }
   0x2   :  { %6 = vst [vmem:[#allocation1] sm:$0xf] %v5_v0 }
   0x9   :  { %v11_v1 = vld [vmem:[#allocation1 + $0x3] sm:$0x1]   ;;  %v23_v2 = vld [vmem:[#allocation1 + $0x1] sm:$0x1]   ;;  %v7_v3 = vld [vmem:[#allocation1] sm:$0x1]  }
   0xa   :  { %12 = vrot.lane.b32.xlu0 %v11_v1, %s39_s0  ;;  %24 = vrot.lane.b32.xlu1 %v23_v2, %s40_s8  ;;  %v17_v4 = vld [vmem:[#allocation1 + $0x2] sm:$0x1]   ;;  %9 = vst.msk [vmem:[#allocation0] sm:$0x1] %vm8_vm0, %v7_v3  }
   0xe   :  { %18 = vrot.lane.b32.xlu0 %v17_v4, %s41_s9 }
  0x7c   :  { %v13_v5 = vpop.permute.xlu0 %12   ;;  %v25_v6 = vpop.permute.xlu1 %24  }
  0x7d   :  { %15 = vst.msk [vmem:[#allocation0] sm:$0x1] %vm14_vm1, %v13_v5  }
  0x80   :  { %v19_v7 = vpop.permute.xlu0 %18  }
  0x81   :  { %21 = vst.msk [vmem:[#allocation0] sm:$0x1] %vm20_vm2, %v19_v7  }
  0x82   :  { %27 = vst.msk [vmem:[#allocation0] sm:$0x1] %vm26_vm3, %v25_v6  }
  0x89   :  { %v32_v8 = vld [vmem:[#allocation0] sm:$0x1] }
  0x8a   :  { %35 = vst [vmem:[%s59_s1] sm:$0x1] %v32_v8 }

// kernel: up_forward.2
= control target key start
LH: loop header
LB: loop body
LE: loop exit
PB: predicated region body
PF: predicated region fallthrough
CT: control target
= control target key end

     0   :  { %s522_s12 = smov 0   ;;  %s587_s0 = inlined_call_operand.vmem [shape: f32[16,8,8], index: 0, kind: input, shape index: {}]   ;;  %s588_s1 = inlined_call_operand.vmem [shape: f32[8,16], index: 1, kind: input, shape index: {}]   ;;  %s589_s2 = inlined_call_operand.vmem [shape: f32[1,16], index: 2, kind: input, shape index: {}]   ;;  %s590_s3 = inlined_call_operand.vmem [shape: f32[16,2,8,8], index: 3, kind: output, shape index: {}]  }
   0x1 LB: > { %s429_s13 = sadd.s32 4294967295, %s499_s12   ;;  %p433_p0 = scmp.ge.s32.totalorder %s499_s12, 1  ;;  %s499_s12 = sphi %s522_s12, %s13_s12  }
   0x2   : > { %p138_p1 = scmp.lt.s32.totalorder %s499_s12, 3 }
   0x4   : > { %p139_p2 = pnand %p433_p0, %p138_p1 }
   0x5   : > { %s434_s16 = sshll.u32 (!%p139_p2), %s429_s13, 3  ;;  %s501_s27 = smov (!%p139_p2), 120  }
   0x6   : > { %142 = sbr.rel (%p139_p2) target bundleno = 340 (0x154), region = 32  ;;  %p164_p3 = scmp.lt.s32.totalorder (!%p139_p2), %s434_s16, 15 }
   0xb   : > { %v184_v0 = vld [vmem:[%s588_s1] sm:$0xff]  ;;  %s592_s16 = smov (!%p164_p3, %s434_s16), 15  ;;  %vm192_vm0 = vcmask 64512  }
   0xc   : > { %468 = vmatprep.subr.mxu0 %v184_v0  ;;  %482 = vmatprep.subr.mxu1 %v184_v0  ;;  %s435_s17 = sshll.u32 %s592_s16, 3  ;;  %s458_s21 = sshll.u32 %s592_s16, 4  ;;  %v439_v9 = vld [vmem:[%s589_s2] ss:$0 sm:$0xff] }
   0xd   : > { %469 = vmatpush3.msra.mxu0 %v184_v0  ;;  %483 = vmatpush3.msra.mxu1 %v184_v0  ;;  %s167_s20 = scalar_lea.vmem %s587_s0, %s435_s17  ;;  %s550_s26 = scalar_lea.vmem %s590_s3, %s458_s21 }
   0xe   : > { %v176_v1 = vld [vmem:[%s167_s20] sm:$0xff]  ;;  %v177_v3 = vld [vmem:[%s167_s20 + $0x8] sm:$0xff]  ;;  %v178_v5 = vld [vmem:[%s167_s20 + $0x10] sm:$0xff] }
   0xf   : > { %v180_v2 = vld [vmem:[%s167_s20 + $0x20] sm:$0xff]  ;;  %470 = vmatprep.mubr.msk.f32.mxu0 %vm192_vm0, %v176_v1  ;;  %v181_v4 = vld [vmem:[%s167_s20 + $0x28] sm:$0xff]  ;;  %v182_v6 = vld [vmem:[%s167_s20 + $0x30] sm:$0xff] }
  0x10   : > { %476 = vmatprep.mubr.msk.f32.mxu1 %vm192_vm0, %v180_v2  ;;  %471 = vmatmul.mubr.msk.f32.vlgmr.msra.gmra.mxu0 %vm192_vm0, %v177_v3  ;;  %v179_v7 = vld [vmem:[%s167_s20 + $0x18] sm:$0xff] }
  0x11   : > { %477 = vmatmul.mubr.msk.f32.vlgmr.msra.gmra.mxu1 %vm192_vm0, %v181_v4  ;;  %473 = vmatprep.mubr.msk.f32.mxu0 %vm192_vm0, %v178_v5  ;;  %v183_v8 = vld [vmem:[%s167_s20 + $0x38] sm:$0xff] }
  0x12   : > { %479 = vmatprep.mubr.msk.f32.mxu1 %vm192_vm0, %v182_v6 }
  0x14   : > { %474 = vmatmul.mubr.msk.f32.gmra.mxu0 %vm192_vm0, %v179_v7 }
  0x15   : > { %480 = vmatmul.mubr.msk.f32.gmra.mxu1 %vm192_vm0, %v183_v8 }
  0xd0   : > { %v472_v10 = vpop.f32.mrf.mxu0 }
  0xd1   : > { %v478_v11 = vpop.f32.mrf.mxu1  ;;  %v289_v12 = vadd.f32 %v472_v10, %v439_v9 }
  0xd2   : > { %v309_v13 = vadd.f32 %v478_v11, %v439_v9  ;;  %v283_v14 = vpop.f32.mrf.mxu0 }
  0xd3   : > { %v303_v15 = vpop.f32.mrf.mxu1  ;;  %323 = vst.msk [vmem:[%s550_s26 + $0x10] sm:$0xff] %vm192_vm0, %v289_v12  ;;  %v284_v16 = vadd.f32 %v439_v9, %v283_v14  ;;  %340 = vrot.lane.b32.xlu0 %v289_v12, %s501_s27 }
  0xd4   : > { %327 = vst.msk [vmem:[%s550_s26 + $0x50] sm:$0xff] %vm192_vm0, %v309_v13  ;;  %v304_v17 = vadd.f32 %v439_v9, %v303_v15  ;;  %348 = vrot.lane.b32.xlu1 %v309_v13, %s501_s27  ;;  %v475_v18 = vpop.f32.mrf.mxu0 }
  0xd5   : > { %v481_v19 = vpop.f32.mrf.mxu1  ;;  %322 = vst.msk [vmem:[%s550_s26] sm:$0xff] %vm192_vm0, %v284_v16  ;;  %v299_v20 = vadd.f32 %v475_v18, %v439_v9 }
  0xd6   : > { %326 = vst.msk [vmem:[%s550_s26 + $0x40] sm:$0xff] %vm192_vm0, %v304_v17  ;;  %v319_v21 = vadd.f32 %v481_v19, %v439_v9  ;;  %v293_v22 = vpop.f32.mrf.mxu0 }
  0xd7   : > { %v313_v23 = vpop.f32.mrf.mxu1  ;;  %325 = vst.msk [vmem:[%s550_s26 + $0x30] sm:$0xff] %vm192_vm0, %v299_v20  ;;  %v294_v24 = vadd.f32 %v439_v9, %v293_v22  ;;  %338 = vrot.lane.b32.xlu0 %v284_v16, %s501_s27 }
  0xd8   : > { %344 = vrot.lane.b32.xlu1 %v299_v20, %s501_s27  ;;  %329 = vst.msk [vmem:[%s550_s26 + $0x70] sm:$0xff] %vm192_vm0, %v319_v21  ;;  %v314_v25 = vadd.f32 %v439_v9, %v313_v23 }
  0xd9   : > { %324 = vst.msk [vmem:[%s550_s26 + $0x20] sm:$0xff] %vm192_vm0, %v294_v24 }
  0xda   : > { %328 = vst.msk [vmem:[%s550_s26 + $0x60] sm:$0xff] %vm192_vm0, %v314_v25 }
  0xdb   : > { %346 = vrot.lane.b32.xlu0 %v304_v17, %s501_s27 }
  0xdc   : > { %342 = vrot.lane.b32.xlu1 %v294_v24, %s501_s27 }
  0xdf   : > { %350 = vrot.lane.b32.xlu0 %v314_v25, %s501_s27 }
  0xe0   : > { %352 = vrot.lane.b32.xlu1 %v319_v21, %s501_s27 }
 0x145   : > { %v341_v27 = vpop.permute.xlu0 %340 }
 0x146   : > { %v349_v26 = vpop.permute.xlu1 %348  ;;  %449 = vst.msk [vmem:[%s550_s26 + $0x18] sm:$0xff] %vm192_vm0, %v341_v27 }
 0x147   : > { %453 = vst.msk [vmem:[%s550_s26 + $0x58] sm:$0xff] %vm192_vm0, %v349_v26 }
 0x149   : > { %v339_v29 = vpop.permute.xlu0 %338 }
 0x14a   : > { %v345_v28 = vpop.permute.xlu1 %344  ;;  %448 = vst.msk [vmem:[%s550_s26 + $0x8] sm:$0xff] %vm192_vm0, %v339_v29 }
 0x14b   : > { %451 = vst.msk [vmem:[%s550_s26 + $0x38] sm:$0xff] %vm192_vm0, %v345_v28 }
 0x14d   : > { %v347_v31 = vpop.permute.xlu0 %346 }
 0x14e   : > { %v343_v30 = vpop.permute.xlu1 %342  ;;  %452 = vst.msk [vmem:[%s550_s26 + $0x48] sm:$0xff] %vm192_vm0, %v347_v31 }
 0x14f   : > { %450 = vst.msk [vmem:[%s550_s26 + $0x28] sm:$0xff] %vm192_vm0, %v343_v30 }
 0x151   : > { %v351_v33 = vpop.permute.xlu0 %350 }
 0x152   : > { %v353_v32 = vpop.permute.xlu1 %352  ;;  %454 = vst.msk [vmem:[%s550_s26 + $0x68] sm:$0xff] %vm192_vm0, %v351_v33 }
 0x153   : > { %455 = vst.msk [vmem:[%s550_s26 + $0x78] sm:$0xff] %vm192_vm0, %v353_v32 }
 0x154 PF: > { %s13_s12 = sadd.s32 1, %s499_s12  }
 0x155   : > { %p10_p4 = scmp.ge.s32.totalorder %s13_s12, 4  }
 0x157   :  { %12 = sbr.rel (!%p10_p4) target bundleno = 1 (0x1), region = 63 }

// kernel: up_forward.3
= control target key start
LH: loop header
LB: loop body
LE: loop exit
PB: predicated region body
PF: predicated region fallthrough
CT: control target
= control target key end

     0   :  { %s9136_s24 = smov 0   ;;  %s13154_s0 = inlined_call_operand.vmem [shape: f32[2,16,16,4], index: 0, kind: input, shape index: {}]   ;;  %s13155_s1 = inlined_call_operand.vmem [shape: f32[2,16,16,4], index: 1, kind: input, shape index: {}]   ;;  %s13156_s2 = inlined_call_operand.vmem [shape: f32[9,4,4], index: 2, kind: input, shape index: {}]   ;;  %s13157_s3 = inlined_call_operand.vmem [shape: f32[9,4,4], index: 3, kind: input, shape index: {}]   ;;  %s13158_s4 = inlined_call_operand.vmem [shape: f32[1,4], index: 4, kind: input, shape index: {}]   ;;  %s13159_s5 = inlined_call_operand.vmem [shape: f32[1,4], index: 5, kind: input, shape index: {}]   ;;  %s13160_s6 = inlined_call_operand.vmem [shape: f32[1,4], index: 6, kind: input, shape index: {}]   ;;  %s13161_s7 = inlined_call_operand.vmem [shape: f32[2,16,16,4], index: 7, kind: output, shape index: {}]  }
   0x1 LB: > { %s9142_s25 = sadd.s32 4294967295, %s9093_s24   ;;  %p6839_p0 = scmp.ge.s32.totalorder %s9093_s24, 1  ;;  %s9093_s24 = sphi %s9136_s24, %s17_s24  }
   0x2   : > { %p242_p1 = scmp.lt.s32.totalorder %s9093_s24, 3 }
   0x4   : > { %p243_p2 = pnand %p6839_p0, %p242_p1 }
   0x6   : > { %246 = sbr.rel (%p243_p2) target bundleno = 969 (0x3c9), region = 48 }
   0xb   : > { %p274_p3 = scmp.lt.s32.totalorder %s9142_s25, 1  ;;  %p6844_p4 = scmp.ne.s32.totalorder %s9142_s25, 0 }
   0xd   : > { %s275_s26 = scalar_select %p274_p3, %s9142_s25, 1 }
   0xe   : > { %287 = sbr.rel (%p6844_p4) target bundleno = 75 (0x4b), region = 52 }
   0xf   : > { %s7460_s27 = sshll.u32 %s275_s26, 8 }
  0x10   : > { %s9151_s30 = scalar_lea.vmem %s13154_s0, %s7460_s27  ;;  %s9156_s10 = scalar_lea.vmem %s13155_s1, %s7460_s27 }
  0x13   : > { %vm288_vm0 = vcmask 31744   ;;  %vm291_vm1 = vcmask 25600   ;;  %vm398_vm2 = vcmask 24576   ;;  %v9095_v0 = vmov 0.0  }
  0x14   : > { %289 = vst.msk [vmem:[#allocation2] sm:$0xff] %vm288_vm0, %v9095_v0  ;;  %290 = vst.msk [vmem:[#allocation2 + $0x8] sm:$0xff] %vm288_vm0, %v9095_v0 }
  0x15   : > { %293 = vst.msk [vmem:[#allocation2 + $0x18] sm:$0xff] %vm288_vm0, %v9095_v0  ;;  %294 = vst.msk [vmem:[#allocation2 + $0x20] sm:$0xff] %vm288_vm0, %v9095_v0 }
  0x16   : > { %296 = vst.msk [vmem:[#allocation2 + $0x30] sm:$0xff] %vm288_vm0, %v9095_v0  ;;  %297 = vst.msk [vmem:[#allocation2 + $0x38] sm:$0xff] %vm288_vm0, %v9095_v0 }
  0x17   : > { %299 = vst.msk [vmem:[#allocation2 + $0x48] sm:$0xff] %vm288_vm0, %v9095_v0  ;;  %300 = vst.msk [vmem:[#allocation2 + $0x50] sm:$0xff] %vm288_vm0, %v9095_v0 }
  0x18   : > { %302 = vst.msk [vmem:[#allocation2 + $0x60] sm:$0xff] %vm288_vm0, %v9095_v0  ;;  %303 = vst.msk [vmem:[#allocation2 + $0x68] sm:$0xff] %vm288_vm0, %v9095_v0 }
  0x19   : > { %305 = vst.msk [vmem:[#allocation2 + $0x78] sm:$0xff] %vm288_vm0, %v9095_v0  ;;  %306 = vst.msk [vmem:[#allocation2 + $0x80] sm:$0xff] %vm288_vm0, %v9095_v0 }
  0x1a   : > { %308 = vst.msk [vmem:[#allocation2 + $0x90] sm:$0xff] %vm288_vm0, %v9095_v0  ;;  %309 = vst.msk [vmem:[#allocation2 + $0x98] sm:$0xff] %vm288_vm0, %v9095_v0 }
  0x1b   : > { %311 = vst.msk [vmem:[#allocation2 + $0xa8] sm:$0xff] %vm288_vm0, %v9095_v0  ;;  %312 = vst.msk [vmem:[#allocation2 + $0xb0] sm:$0xff] %vm288_vm0, %v9095_v0 }
  0x1c   : > { %314 = vst.msk [vmem:[#allocation2 + $0xc0] sm:$0xff] %vm288_vm0, %v9095_v0  ;;  %315 = vst.msk [vmem:[#allocation2 + $0xc8] sm:$0xff] %vm288_vm0, %v9095_v0 }
  0x1d   : > { %317 = vst.msk [vmem:[#allocation2 + $0xd8] sm:$0xff] %vm288_vm0, %v9095_v0  ;;  %318 = vst.msk [vmem:[#allocation2 + $0xe0] sm:$0xff] %vm288_vm0, %v9095_v0 }
  0x1e   : > { %320 = vst.msk [vmem:[#allocation2 + $0xf0] sm:$0xff] %vm288_vm0, %v9095_v0  ;;  %321 = vst.msk [vmem:[#allocation2 + $0xf8] sm:$0xff] %vm288_vm0, %v9095_v0 }
  0x1f   : > { %323 = vst.msk [vmem:[#allocation2 + $0x108] sm:$0xff] %vm288_vm0, %v9095_v0  ;;  %324 = vst.msk [vmem:[#allocation2 + $0x110] sm:$0xff] %vm288_vm0, %v9095_v0 }
  0x20   : > { %326 = vst.msk [vmem:[#allocation2 + $0x120] sm:$0xff] %vm288_vm0, %v9095_v0  ;;  %327 = vst.msk [vmem:[#allocation2 + $0x128] sm:$0xff] %vm288_vm0, %v9095_v0 }
  0x21   : > { %329 = vst.msk [vmem:[#allocation2 + $0x138] sm:$0xff] %vm288_vm0, %v9095_v0  ;;  %330 = vst.msk [vmem:[#allocation2 + $0x140] sm:$0xff] %vm288_vm0, %v9095_v0 }
  0x22   : > { %332 = vst.msk [vmem:[#allocation2 + $0x150] sm:$0xff] %vm288_vm0, %v9095_v0  ;;  %333 = vst.msk [vmem:[#allocation2 + $0x158] sm:$0xff] %vm288_vm0, %v9095_v0 }
  0x23   : > { %335 = vst.msk [vmem:[#allocation2 + $0x168] sm:$0xff] %vm288_vm0, %v9095_v0  ;;  %336 = vst.msk [vmem:[#allocation2 + $0x170] sm:$0xff] %vm288_vm0, %v9095_v0 }
  0x24   : > { %338 = vst.msk [vmem:[#allocation2 + $0x180] sm:$0xff] %vm288_vm0, %v9095_v0  ;;  %339 = vst.msk [vmem:[#allocation2 + $0x188] sm:$0xff] %vm288_vm0, %v9095_v0 }
  0x25   : > { %341 = vst.msk [vmem:[#allocation2 + $0x198] sm:$0xff] %vm288_vm0, %v9095_v0  ;;  %342 = vst.msk [vmem:[#allocation2 + $0x1a0] sm:$0xff] %vm288_vm0, %v9095_v0 }
  0x26   : > { %344 = vst.msk [vmem:[#allocation3] sm:$0xff] %vm288_vm0, %v9095_v0  ;;  %345 = vst.msk [vmem:[#allocation3 + $0x8] sm:$0xff] %vm288_vm0, %v9095_v0 }
  0x27   : > { %347 = vst.msk [vmem:[#allocation3 + $0x18] sm:$0xff] %vm288_vm0, %v9095_v0  ;;  %348 = vst.msk [vmem:[#allocation3 + $0x20] sm:$0xff] %vm288_vm0, %v9095_v0 }
  0x28   : > { %350 = vst.msk [vmem:[#allocation3 + $0x30] sm:$0xff] %vm288_vm0, %v9095_v0  ;;  %351 = vst.msk [vmem:[#allocation3 + $0x38] sm:$0xff] %vm288_vm0, %v9095_v0 }
  0x29   : > { %353 = vst.msk [vmem:[#allocation3 + $0x48] sm:$0xff] %vm288_vm0, %v9095_v0  ;;  %354 = vst.msk [vmem:[#allocation3 + $0x50] sm:$0xff] %vm288_vm0, %v9095_v0 }
  0x2a   : > { %356 = vst.msk [vmem:[#allocation3 + $0x60] sm:$0xff] %vm288_vm0, %v9095_v0  ;;  %357 = vst.msk [vmem:[#allocation3 + $0x68] sm:$0xff] %vm288_vm0, %v9095_v0 }
  0x2b   : > { %359 = vst.msk [vmem:[#allocation3 + $0x78] sm:$0xff] %vm288_vm0, %v9095_v0  ;;  %360 = vst.msk [vmem:[#allocation3 + $0x80] sm:$0xff] %vm288_vm0, %v9095_v0 }
  0x2c   : > { %362 = vst.msk [vmem:[#allocation3 + $0x90] sm:$0xff] %vm288_vm0, %v9095_v0  ;;  %363 = vst.msk [vmem:[#allocation3 + $0x98] sm:$0xff] %vm288_vm0, %v9095_v0 }
  0x2d   : > { %365 = vst.msk [vmem:[#allocation3 + $0xa8] sm:$0xff] %vm288_vm0, %v9095_v0  ;;  %366 = vst.msk [vmem:[#allocation3 + $0xb0] sm:$0xff] %vm288_vm0, %v9095_v0 }
  0x2e   : > { %368 = vst.msk [vmem:[#allocation3 + $0xc0] sm:$0xff] %vm288_vm0, %v9095_v0  ;;  %369 = vst.msk [vmem:[#allocation3 + $0xc8] sm:$0xff] %vm288_vm0, %v9095_v0 }
  0x2f   : > { %371 = vst.msk [vmem:[#allocation3 + $0xd8] sm:$0xff] %vm288_vm0, %v9095_v0  ;;  %372 = vst.msk [vmem:[#allocation3 + $0xe0] sm:$0xff] %vm288_vm0, %v9095_v0 }
  0x30   : > { %374 = vst.msk [vmem:[#allocation3 + $0xf0] sm:$0xff] %vm288_vm0, %v9095_v0  ;;  %375 = vst.msk [vmem:[#allocation3 + $0xf8] sm:$0xff] %vm288_vm0, %v9095_v0 }
  0x31   : > { %377 = vst.msk [vmem:[#allocation3 + $0x108] sm:$0xff] %vm288_vm0, %v9095_v0  ;;  %378 = vst.msk [vmem:[#allocation3 + $0x110] sm:$0xff] %vm288_vm0, %v9095_v0 }
  0x32   : > { %380 = vst.msk [vmem:[#allocation3 + $0x120] sm:$0xff] %vm288_vm0, %v9095_v0  ;;  %381 = vst.msk [vmem:[#allocation3 + $0x128] sm:$0xff] %vm288_vm0, %v9095_v0 }
  0x33   : > { %383 = vst.msk [vmem:[#allocation3 + $0x138] sm:$0xff] %vm288_vm0, %v9095_v0  ;;  %384 = vst.msk [vmem:[#allocation3 + $0x140] sm:$0xff] %vm288_vm0, %v9095_v0 }
  0x34   : > { %386 = vst.msk [vmem:[#allocation3 + $0x150] sm:$0xff] %vm288_vm0, %v9095_v0  ;;  %387 = vst.msk [vmem:[#allocation3 + $0x158] sm:$0xff] %vm288_vm0, %v9095_v0 }
  0x35   : > { %389 = vst.msk [vmem:[#allocation3 + $0x168] sm:$0xff] %vm288_vm0, %v9095_v0  ;;  %390 = vst.msk [vmem:[#allocation3 + $0x170] sm:$0xff] %vm288_vm0, %v9095_v0 }
  0x36   : > { %392 = vst.msk [vmem:[#allocation3 + $0x180] sm:$0xff] %vm288_vm0, %v9095_v0  ;;  %393 = vst.msk [vmem:[#allocation3 + $0x188] sm:$0xff] %vm288_vm0, %v9095_v0 }
  0x37   : > { %395 = vst.msk [vmem:[#allocation3 + $0x198] sm:$0xff] %vm288_vm0, %v9095_v0  ;;  %396 = vst.msk [vmem:[#allocation3 + $0x1a0] sm:$0xff] %vm288_vm0, %v9095_v0 }
  0x38   : > { %292 = vst.msk [vmem:[#allocation2 + $0x10] sm:$0x3] %vm291_vm1, %v9095_v0  ;;  %295 = vst.msk [vmem:[#allocation2 + $0x28] sm:$0x3] %vm291_vm1, %v9095_v0 }
  0x39   : > { %298 = vst.msk [vmem:[#allocation2 + $0x40] sm:$0x3] %vm291_vm1, %v9095_v0  ;;  %301 = vst.msk [vmem:[#allocation2 + $0x58] sm:$0x3] %vm291_vm1, %v9095_v0 }
  0x3a   : > { %304 = vst.msk [vmem:[#allocation2 + $0x70] sm:$0x3] %vm291_vm1, %v9095_v0  ;;  %307 = vst.msk [vmem:[#allocation2 + $0x88] sm:$0x3] %vm291_vm1, %v9095_v0 }
  0x3b   : > { %310 = vst.msk [vmem:[#allocation2 + $0xa0] sm:$0x3] %vm291_vm1, %v9095_v0  ;;  %313 = vst.msk [vmem:[#allocation2 + $0xb8] sm:$0x3] %vm291_vm1, %v9095_v0 }
  0x3c   : > { %316 = vst.msk [vmem:[#allocation2 + $0xd0] sm:$0x3] %vm291_vm1, %v9095_v0  ;;  %319 = vst.msk [vmem:[#allocation2 + $0xe8] sm:$0x3] %vm291_vm1, %v9095_v0 }
  0x3d   : > { %322 = vst.msk [vmem:[#allocation2 + $0x100] sm:$0x3] %vm291_vm1, %v9095_v0  ;;  %325 = vst.msk [vmem:[#allocation2 + $0x118] sm:$0x3] %vm291_vm1, %v9095_v0 }
  0x3e   : > { %328 = vst.msk [vmem:[#allocation2 + $0x130] sm:$0x3] %vm291_vm1, %v9095_v0  ;;  %331 = vst.msk [vmem:[#allocation2 + $0x148] sm:$0x3] %vm291_vm1, %v9095_v0 }
  0x3f   : > { %334 = vst.msk [vmem:[#allocation2 + $0x160] sm:$0x3] %vm291_vm1, %v9095_v0  ;;  %337 = vst.msk [vmem:[#allocation2 + $0x178] sm:$0x3] %vm291_vm1, %v9095_v0 }
  0x40   : > { %340 = vst.msk [vmem:[#allocation2 + $0x190] sm:$0x3] %vm291_vm1, %v9095_v0  ;;  %343 = vst.msk [vmem:[#allocation2 + $0x1a8] sm:$0x3] %vm291_vm1, %v9095_v0 }
  0x41   : > { %346 = vst.msk [vmem:[#allocation3 + $0x10] sm:$0x3] %vm291_vm1, %v9095_v0  ;;  %349 = vst.msk [vmem:[#allocation3 + $0x28] sm:$0x3] %vm291_vm1, %v9095_v0 }
  0x42   : > { %352 = vst.msk [vmem:[#allocation3 + $0x40] sm:$0x3] %vm291_vm1, %v9095_v0  ;;  %355 = vst.msk [vmem:[#allocation3 + $0x58] sm:$0x3] %vm291_vm1, %v9095_v0 }
  0x43   : > { %358 = vst.msk [vmem:[#allocation3 + $0x70] sm:$0x3] %vm291_vm1, %v9095_v0  ;;  %361 = vst.msk [vmem:[#allocation3 + $0x88] sm:$0x3] %vm291_vm1, %v9095_v0 }
  0x44   : > { %364 = vst.msk [vmem:[#allocation3 + $0xa0] sm:$0x3] %vm291_vm1, %v9095_v0  ;;  %367 = vst.msk [vmem:[#allocation3 + $0xb8] sm:$0x3] %vm291_vm1, %v9095_v0 }
  0x45   : > { %370 = vst.msk [vmem:[#allocation3 + $0xd0] sm:$0x3] %vm291_vm1, %v9095_v0  ;;  %373 = vst.msk [vmem:[#allocation3 + $0xe8] sm:$0x3] %vm291_vm1, %v9095_v0 }
  0x46   : > { %376 = vst.msk [vmem:[#allocation3 + $0x100] sm:$0x3] %vm291_vm1, %v9095_v0  ;;  %379 = vst.msk [vmem:[#allocation3 + $0x118] sm:$0x3] %vm291_vm1, %v9095_v0 }
  0x47   : > { %382 = vst.msk [vmem:[#allocation3 + $0x130] sm:$0x3] %vm291_vm1, %v9095_v0  ;;  %385 = vst.msk [vmem:[#allocation3 + $0x148] sm:$0x3] %vm291_vm1, %v9095_v0 }
  0x48   : > { %388 = vst.msk [vmem:[#allocation3 + $0x160] sm:$0x3] %vm291_vm1, %v9095_v0  ;;  %391 = vst.msk [vmem:[#allocation3 + $0x178] sm:$0x3] %vm291_vm1, %v9095_v0 }
  0x49   : > { %394 = vst.msk [vmem:[#allocation3 + $0x190] sm:$0x3] %vm291_vm1, %v9095_v0  ;;  %397 = vst.msk [vmem:[#allocation3 + $0x1a8] sm:$0x3] %vm291_vm1, %v9095_v0 }
  0x4a   : > { %399 = vst.msk [vmem:[#allocation4] sm:$0x1] %vm398_vm2, %v9095_v0  ;;  %400 = vst.msk [vmem:[#allocation5] sm:$0x1] %vm398_vm2, %v9095_v0 }
  0x4b PF: > { %v641_v1 = vld [vmem:[%s13157_s3] sm:$0xf]  ;;  %vm738_vm3 = vcmask 1043456   ;;  %vm434_vm4 = vcmask 31744   ;;  %v586_v3 = vld [vmem:[#allocation3] sm:$0xff]  ;;  %v9389_v5 = vld [vmem:[#allocation3 + $0x8] sm:$0xff] }
  0x4c   : > { %v640_v2 = vld [vmem:[%s13156_s2] sm:$0xf]  ;;  %8056 = vmatprep.subr.msk.mxu0 %vm738_vm3, %v641_v1  ;;  %8058 = vmatprep.mubr.msk.f32.mxu0 %vm434_vm4, %v586_v3  ;;  %v1404_v6 = vrot.slane %v586_v3, 1  ;;  %v2217_v7 = vrot.slane %v586_v3, 2  ;;  %v9393_v8 = vld [vmem:[#allocation2 + $0x8] sm:$0xff]  ;;  %vm1307_vm5 = vcmask 1046528  }
  0x4d   : > { %8106 = vmatprep.subr.msk.mxu1 %vm738_vm3, %v640_v2  ;;  %v9387_v4 = vld [vmem:[#allocation2] sm:$0xff]  ;;  %8057 = vmatpush3.msk.msra.mxu0 %vm738_vm3, %v641_v1  ;;  %v13162_v11 = vrot.slane %v9389_v5, 1  ;;  %v2218_v12 = vrot.slane %v9389_v5, 2  ;;  %v2138_v13 = vrot.slane %v9393_v8, 2  ;;  %v468_v17 = vld [vmem:[%s9156_s10 + $0x8] sm:$0xff]  ;;  %v469_v19 = vld [vmem:[%s9156_s10 + $0x10] sm:$0xff] }
  0x4e   : > { %v467_v9 = vld [vmem:[%s9156_s10] sm:$0xff]  ;;  %8107 = vmatpush3.msk.msra.mxu1 %vm738_vm3, %v640_v2  ;;  %8108 = vmatprep.mubr.msk.f32.mxu1 %vm434_vm4, %v9387_v4  ;;  %v2137_v10 = vrot.slane %v9387_v4, 2  ;;  %501 = vst.msk [vmem:[#allocation3 + $0x21] sm:$0xff] %vm434_vm4, %v468_v17  ;;  %v402_v18 = vld [vmem:[%s9151_s30 + $0x8] sm:$0xff]  ;;  %v403_v20 = vld [vmem:[%s9151_s30 + $0x10] sm:$0xff]  ;;  %vm2136_vm6 = vcmask 1045504  }
  0x4f   : > { %v6911_v14 = vld [vmem:[%s13156_s2 + $0x4] sm:$0xf]  ;;  %500 = vst.msk [vmem:[#allocation3 + $0x19] sm:$0xff] %vm434_vm4, %v467_v9  ;;  %8059 = vmatmul.mubr.msk.f32.vlgmr.msra.gmra.mxu0 %vm434_vm4, %v9389_v5  ;;  %8109 = vmatmul.mubr.msk.f32.vlgmr.msra.gmra.mxu1 %vm434_vm4, %v9393_v8  ;;  %v9426_v21 = vsel %vm1307_vm5, %v1404_v6, %v13162_v11  ;;  %436 = vst.msk [vmem:[#allocation2 + $0x21] sm:$0xff] %vm434_vm4, %v402_v18  ;;  %v470_v22 = vld [vmem:[%s9156_s10 + $0x18] sm:$0xff]  ;;  %v9450_v29 = vsel %vm2136_vm6, %v2217_v7, %v2218_v12  ;;  %s7456_s28 = sshll.u32 %s9142_s25, 8 }
  0x50   : > { %v6945_v15 = vld [vmem:[%s13157_s3 + $0x4] sm:$0xf]  ;;  %8156 = vmatprep.subr.msk.mxu0 %vm738_vm3, %v6911_v14  ;;  %502 = vst.msk [vmem:[#allocation3 + $0x31] sm:$0xff] %vm434_vm4, %v469_v19  ;;  %437 = vst.msk [vmem:[#allocation2 + $0x31] sm:$0xff] %vm434_vm4, %v403_v20  ;;  %v404_v23 = vld [vmem:[%s9151_s30 + $0x18] sm:$0xff]  ;;  %v9445_v28 = vsel %vm2136_vm6, %v2137_v10, %v2138_v13  ;;  %vm6303_vm7 = vcmask 24576  }
  0x51   : > { %v401_v16 = vld [vmem:[%s9151_s30] sm:$0xff]  ;;  %8206 = vmatprep.subr.msk.mxu1 %vm738_vm3, %v6945_v15  ;;  %8157 = vmatpush3.msk.msra.mxu0 %vm738_vm3, %v6911_v14  ;;  %503 = vst.msk [vmem:[#allocation3 + $0x39] sm:$0xff] %vm434_vm4, %v470_v22  ;;  %438 = vst.msk [vmem:[#allocation2 + $0x39] sm:$0xff] %vm434_vm4, %v404_v23  ;;  %v472_v26 = vld [vmem:[%s9156_s10 + $0x28] sm:$0xff]  ;;  %p7457_p5 = scmp.ne.s32.totalorder %s9142_s25, 1 }
  0x52   : > { %435 = vst.msk [vmem:[#allocation2 + $0x19] sm:$0xff] %vm434_vm4, %v401_v16  ;;  %8207 = vmatpush3.msk.msra.mxu1 %vm738_vm3, %v6945_v15  ;;  %v471_v24 = vld [vmem:[%s9156_s10 + $0x20] sm:$0xff]  ;;  %v406_v27 = vld [vmem:[%s9151_s30 + $0x28] sm:$0xff]  ;;  %13445 = vst [vmem:[#allocation6_spill] sm:$0xff] %v9445_v28  ;;  %v1308_v28 = vrot.slane %v9387_v4, 1 }
  0x53   : > { %504 = vst.msk [vmem:[#allocation3 + $0x49] sm:$0xff] %vm434_vm4, %v471_v24  ;;  %v405_v25 = vld [vmem:[%s9151_s30 + $0x20] sm:$0xff]  ;;  %13446 = vst [vmem:[#allocation7_spill] sm:$0xff] %v9450_v29  ;;  %v473_v30 = vld [vmem:[%s9156_s10 + $0x30] sm:$0xff] }
  0x54   : > { %439 = vst.msk [vmem:[#allocation2 + $0x49] sm:$0xff] %vm434_vm4, %v405_v25  ;;  %505 = vst.msk [vmem:[#allocation3 + $0x51] sm:$0xff] %vm434_vm4, %v472_v26  ;;  %v407_v31 = vld [vmem:[%s9151_s30 + $0x30] sm:$0xff]  ;;  %v474_v32 = vld [vmem:[%s9156_s10 + $0x38] sm:$0xff] }
  0x55   : > { %440 = vst.msk [vmem:[#allocation2 + $0x51] sm:$0xff] %vm434_vm4, %v406_v27  ;;  %506 = vst.msk [vmem:[#allocation3 + $0x61] sm:$0xff] %vm434_vm4, %v473_v30  ;;  %v408_v33 = vld [vmem:[%s9151_s30 + $0x38] sm:$0xff]  ;;  %v475_v34 = vld [vmem:[%s9156_s10 + $0x40] sm:$0xff] }
  0x56   : > { %441 = vst.msk [vmem:[#allocation2 + $0x61] sm:$0xff] %vm434_vm4, %v407_v31  ;;  %507 = vst.msk [vmem:[#allocation3 + $0x69] sm:$0xff] %vm434_vm4, %v474_v32  ;;  %v409_v35 = vld [vmem:[%s9151_s30 + $0x40] sm:$0xff]  ;;  %v9464_v36 = vld [vmem:[#allocation3 + $0x18] sm:$0xff] }
  0x57   : > { %13447 = vst [vmem:[#allocation8_spill] sm:$0xff] %v9464_v36  ;;  %442 = vst.msk [vmem:[#allocation2 + $0x69] sm:$0xff] %vm434_vm4, %v408_v33  ;;  %v476_v37 = vld [vmem:[%s9156_s10 + $0x48] sm:$0xff]  ;;  %8061 = vmatprep.mubr.msk.f32.mxu0 %vm434_vm4, %v9464_v36  ;;  %v477_v39 = vld [vmem:[%s9156_s10 + $0x50] sm:$0xff] }
  0x58   : > { %508 = vst.msk [vmem:[#allocation3 + $0x79] sm:$0xff] %vm434_vm4, %v475_v34  ;;  %443 = vst.msk [vmem:[#allocation2 + $0x79] sm:$0xff] %vm434_vm4, %v409_v35  ;;  %v410_v38 = vld [vmem:[%s9151_s30 + $0x48] sm:$0xff]  ;;  %v411_v40 = vld [vmem:[%s9151_s30 + $0x50] sm:$0xff] }
  0x59   : > { %509 = vst.msk [vmem:[#allocation3 + $0x81] sm:$0xff] %vm434_vm4, %v476_v37  ;;  %444 = vst.msk [vmem:[#allocation2 + $0x81] sm:$0xff] %vm434_vm4, %v410_v38  ;;  %v478_v41 = vld [vmem:[%s9156_s10 + $0x58] sm:$0xff]  ;;  %v9480_v43 = vld [vmem:[#allocation3 + $0x20] sm:$0xff] }
  0x5a   : > { %v9478_v42 = vld [vmem:[#allocation2 + $0x18] sm:$0xff]  ;;  %13449 = vst [vmem:[#allocation10_spill] sm:$0xff] %v9480_v43  ;;  %510 = vst.msk [vmem:[#allocation3 + $0x91] sm:$0xff] %vm434_vm4, %v477_v39  ;;  %8062 = vmatmul.mubr.msk.f32.gmra.mxu0 %vm434_vm4, %v9480_v43  ;;  %v9490_v45 = vld [vmem:[#allocation2 + $0x20] sm:$0xff] }
  0x5b   : > { %13448 = vst [vmem:[#allocation9_spill] sm:$0xff] %v9478_v42  ;;  %445 = vst.msk [vmem:[#allocation2 + $0x91] sm:$0xff] %vm434_vm4, %v411_v40  ;;  %v412_v44 = vld [vmem:[%s9151_s30 + $0x58] sm:$0xff]  ;;  %8111 = vmatprep.mubr.msk.f32.mxu1 %vm434_vm4, %v9478_v42  ;;  %v9492_v46 = vld [vmem:[#allocation3 + $0x30] sm:$0xff] }
  0x5c   : > { %511 = vst.msk [vmem:[#allocation3 + $0x99] sm:$0xff] %vm434_vm4, %v478_v41  ;;  %13450 = vst [vmem:[#allocation11_spill] sm:$0xff] %v9490_v45  ;;  %8112 = vmatmul.mubr.msk.f32.gmra.mxu1 %vm434_vm4, %v9490_v45  ;;  %8064 = vmatprep.mubr.msk.f32.mxu0 %vm434_vm4, %v9492_v46  ;;  %v9499_v47 = vld [vmem:[#allocation2 + $0x30] sm:$0xff]  ;;  %v9501_v48 = vld [vmem:[#allocation3 + $0x38] sm:$0xff] }
  0x5d   : > { %446 = vst.msk [vmem:[#allocation2 + $0x99] sm:$0xff] %vm434_vm4, %v412_v44  ;;  %8114 = vmatprep.mubr.msk.f32.mxu1 %vm434_vm4, %v9499_v47  ;;  %v9505_v49 = vld [vmem:[#allocation2 + $0x38] sm:$0xff]  ;;  %v9509_v51 = vld [vmem:[#allocation2 + $0x48] sm:$0xff]  ;;  %v9517_v52 = vld [vmem:[#allocation3 + $0x50] sm:$0xff] }
  0x5e   : > { %v9507_v50 = vld [vmem:[#allocation3 + $0x48] sm:$0xff]  ;;  %13452 = vst [vmem:[#allocation13_spill] sm:$0xff] %v9509_v51  ;;  %8065 = vmatmul.mubr.msk.f32.gmra.mxu0 %vm434_vm4, %v9501_v48  ;;  %13453 = vst [vmem:[#allocation14_spill] sm:$0xff] %v9517_v52  ;;  %v9521_v53 = vld [vmem:[#allocation2 + $0x50] sm:$0xff] }
  0x5f   : > { %13451 = vst [vmem:[#allocation12_spill] sm:$0xff] %v9507_v50  ;;  %8067 = vmatprep.mubr.msk.f32.mxu0 %vm434_vm4, %v9507_v50  ;;  %v9523_v54 = vld [vmem:[#allocation3 + $0x60] sm:$0xff]  ;;  %v9525_v55 = vld [vmem:[#allocation2 + $0x60] sm:$0xff]  ;;  %v9527_v56 = vld [vmem:[#allocation3 + $0x68] sm:$0xff] }
  0x60   : > { %8115 = vmatmul.mubr.msk.f32.gmra.mxu1 %vm434_vm4, %v9505_v49  ;;  %13454 = vst [vmem:[#allocation15_spill] sm:$0xff] %v9525_v55  ;;  %13455 = vst [vmem:[#allocation16_spill] sm:$0xff] %v9527_v56  ;;  %v479_v57 = vld [vmem:[%s9156_s10 + $0x60] sm:$0xff]  ;;  %v9533_v59 = vld [vmem:[#allocation2 + $0x68] sm:$0xff] }
  0x61   : > { %8117 = vmatprep.mubr.msk.f32.mxu1 %vm434_vm4, %v9509_v51  ;;  %v413_v58 = vld [vmem:[%s9151_s30 + $0x60] sm:$0xff]  ;;  %v9535_v60 = vld [vmem:[#allocation3 + $0x78] sm:$0xff]  ;;  %512 = vst.msk [vmem:[#allocation3 + $0xa9] sm:$0xff] %vm434_vm4, %v479_v57  ;;  %v481_v63 = vld [vmem:[%s9156_s10 + $0x70] sm:$0xff] }
  0x62   : > { %8068 = vmatmul.mubr.msk.f32.gmra.mxu0 %vm434_vm4, %v9517_v52  ;;  %447 = vst.msk [vmem:[#allocation2 + $0xa9] sm:$0xff] %vm434_vm4, %v413_v58  ;;  %v480_v61 = vld [vmem:[%s9156_s10 + $0x68] sm:$0xff]  ;;  %v9546_v0 = vld [vmem:[#allocation2 + $0x78] sm:$0xff]  ;;  %514 = vst.msk [vmem:[#allocation3 + $0xc1] sm:$0xff] %vm434_vm4, %v481_v63 }
  0x63   : > { %v414_v62 = vld [vmem:[%s9151_s30 + $0x68] sm:$0xff]  ;;  %8070 = vmatprep.mubr.msk.f32.mxu0 %vm434_vm4, %v9523_v54  ;;  %13456 = vst [vmem:[#allocation17_spill] sm:$0xff] %v9546_v0  ;;  %513 = vst.msk [vmem:[#allocation3 + $0xb1] sm:$0xff] %vm434_vm4, %v480_v61  ;;  %v415_v1 = vld [vmem:[%s9151_s30 + $0x70] sm:$0xff] }
  0x64   : > { %8118 = vmatmul.mubr.msk.f32.gmra.mxu1 %vm434_vm4, %v9521_v53  ;;  %448 = vst.msk [vmem:[#allocation2 + $0xb1] sm:$0xff] %vm434_vm4, %v414_v62  ;;  %v482_v2 = vld [vmem:[%s9156_s10 + $0x78] sm:$0xff]  ;;  %449 = vst.msk [vmem:[#allocation2 + $0xc1] sm:$0xff] %vm434_vm4, %v415_v1  ;;  %v483_v6 = vld [vmem:[%s9156_s10 + $0x80] sm:$0xff] }
  0x65   : > { %v416_v3 = vld [vmem:[%s9151_s30 + $0x78] sm:$0xff]  ;;  %8120 = vmatprep.mubr.msk.f32.mxu1 %vm434_vm4, %v9525_v55  ;;  %515 = vst.msk [vmem:[#allocation3 + $0xc9] sm:$0xff] %vm434_vm4, %v482_v2  ;;  %v417_v7 = vld [vmem:[%s9151_s30 + $0x80] sm:$0xff]  ;;  %v484_v9 = vld [vmem:[%s9156_s10 + $0x88] sm:$0xff] }
  0x66   : > { %450 = vst.msk [vmem:[#allocation2 + $0xc9] sm:$0xff] %vm434_vm4, %v416_v3  ;;  %v9562_v10 = vld [vmem:[#allocation3 + $0x80] sm:$0xff]  ;;  %516 = vst.msk [vmem:[#allocation3 + $0xd9] sm:$0xff] %vm434_vm4, %v483_v6  ;;  %v418_v14 = vld [vmem:[%s9151_s30 + $0x88] sm:$0xff]  ;;  %8071 = vmatmul.mubr.msk.f32.gmra.mxu0 %vm434_vm4, %v9527_v56 }
  0x67   : > { %13457 = vst [vmem:[#allocation18_spill] sm:$0xff] %v9562_v10  ;;  %451 = vst.msk [vmem:[#allocation2 + $0xd9] sm:$0xff] %vm434_vm4, %v417_v7  ;;  %v485_v15 = vld [vmem:[%s9156_s10 + $0x90] sm:$0xff]  ;;  %v9572_v17 = vld [vmem:[#allocation2 + $0x80] sm:$0xff]  ;;  %8073 = vmatprep.mubr.msk.f32.mxu0 %vm434_vm4, %v9535_v60 }
  0x68   : > { %517 = vst.msk [vmem:[#allocation3 + $0xe1] sm:$0xff] %vm434_vm4, %v484_v9  ;;  %v419_v16 = vld [vmem:[%s9151_s30 + $0x90] sm:$0xff]  ;;  %v9574_v18 = vld [vmem:[#allocation3 + $0x90] sm:$0xff]  ;;  %452 = vst.msk [vmem:[#allocation2 + $0xe1] sm:$0xff] %vm434_vm4, %v418_v14  ;;  %8121 = vmatmul.mubr.msk.f32.gmra.mxu1 %vm434_vm4, %v9533_v59 }
  0x69   : > { %518 = vst.msk [vmem:[#allocation3 + $0xf1] sm:$0xff] %vm434_vm4, %v485_v15  ;;  %453 = vst.msk [vmem:[#allocation2 + $0xf1] sm:$0xff] %vm434_vm4, %v419_v16  ;;  %v486_v19 = vld [vmem:[%s9156_s10 + $0x98] sm:$0xff]  ;;  %v487_v22 = vld [vmem:[%s9156_s10 + $0xa0] sm:$0xff]  ;;  %8123 = vmatprep.mubr.msk.f32.mxu1 %vm434_vm4, %v9546_v0 }
  0x6a   : > { %v420_v20 = vld [vmem:[%s9151_s30 + $0x98] sm:$0xff]  ;;  %519 = vst.msk [vmem:[#allocation3 + $0xf9] sm:$0xff] %vm434_vm4, %v486_v19  ;;  %520 = vst.msk [vmem:[#allocation3 + $0x109] sm:$0xff] %vm434_vm4, %v487_v22  ;;  %v421_v23 = vld [vmem:[%s9151_s30 + $0xa0] sm:$0xff]  ;;  %8074 = vmatmul.mubr.msk.f32.gmra.mxu0 %vm434_vm4, %v9562_v10 }
  0x6b   : > { %454 = vst.msk [vmem:[#allocation2 + $0xf9] sm:$0xff] %vm434_vm4, %v420_v20  ;;  %v488_v24 = vld [vmem:[%s9156_s10 + $0xa8] sm:$0xff]  ;;  %455 = vst.msk [vmem:[#allocation2 + $0x109] sm:$0xff] %vm434_vm4, %v421_v23  ;;  %v489_v26 = vld [vmem:[%s9156_s10 + $0xb0] sm:$0xff]  ;;  %8076 = vmatprep.mubr.msk.f32.mxu0 %vm434_vm4, %v9574_v18 }
  0x6c   : > { %v422_v25 = vld [vmem:[%s9151_s30 + $0xa8] sm:$0xff]  ;;  %521 = vst.msk [vmem:[#allocation3 + $0x111] sm:$0xff] %vm434_vm4, %v488_v24  ;;  %v423_v27 = vld [vmem:[%s9151_s30 + $0xb0] sm:$0xff]  ;;  %v490_v30 = vld [vmem:[%s9156_s10 + $0xb8] sm:$0xff]  ;;  %8124 = vmatmul.mubr.msk.f32.gmra.mxu1 %vm434_vm4, %v9572_v17 }
  0x6d   : > { %456 = vst.msk [vmem:[#allocation2 + $0x111] sm:$0xff] %vm434_vm4, %v422_v25  ;;  %v9600_v31 = vld [vmem:[#allocation2 + $0x90] sm:$0xff]  ;;  %522 = vst.msk [vmem:[#allocation3 + $0x121] sm:$0xff] %vm434_vm4, %v489_v26  ;;  %v424_v32 = vld [vmem:[%s9151_s30 + $0xb8] sm:$0xff] }
  0x6e   : > { %13458 = vst [vmem:[#allocation19_spill] sm:$0xff] %v9600_v31  ;;  %457 = vst.msk [vmem:[#allocation2 + $0x121] sm:$0xff] %vm434_vm4, %v423_v27  ;;  %v9613_v33 = vld [vmem:[#allocation3 + $0x98] sm:$0xff]  ;;  %8126 = vmatprep.mubr.msk.f32.mxu1 %vm434_vm4, %v9600_v31  ;;  %v9617_v34 = vld [vmem:[#allocation2 + $0x98] sm:$0xff] }
  0x6f   : > { %523 = vst.msk [vmem:[#allocation3 + $0x129] sm:$0xff] %vm434_vm4, %v490_v30  ;;  %458 = vst.msk [vmem:[#allocation2 + $0x129] sm:$0xff] %vm434_vm4, %v424_v32  ;;  %v9619_v35 = vld [vmem:[#allocation3 + $0xa8] sm:$0xff]  ;;  %v9621_v37 = vld [vmem:[#allocation2 + $0xa8] sm:$0xff]  ;;  %8077 = vmatmul.mubr.msk.f32.gmra.mxu0 %vm434_vm4, %v9613_v33 }
  0x70   : > { %13459 = vst [vmem:[#allocation20_spill] sm:$0xff] %v9617_v34  ;;  %8127 = vmatmul.mubr.msk.f32.gmra.mxu1 %vm434_vm4, %v9617_v34  ;;  %8079 = vmatprep.mubr.msk.f32.mxu0 %vm434_vm4, %v9619_v35  ;;  %v9629_v38 = vld [vmem:[#allocation3 + $0xb0] sm:$0xff]  ;;  %v9633_v39 = vld [vmem:[#allocation2 + $0xb0] sm:$0xff]  ;;  %v9639_v44 = vld [vmem:[#allocation3 + $0xc8] sm:$0xff] }
  0x71   : > { %13460 = vst [vmem:[#allocation21_spill] sm:$0xff] %v9629_v38  ;;  %8129 = vmatprep.mubr.msk.f32.mxu1 %vm434_vm4, %v9621_v37  ;;  %v9635_v40 = vld [vmem:[#allocation3 + $0xc0] sm:$0xff]  ;;  %v9637_v41 = vld [vmem:[#allocation2 + $0xc0] sm:$0xff]  ;;  %13462 = vst [vmem:[#allocation23_spill] sm:$0xff] %v9639_v44 }
  0x72   : > { %13461 = vst [vmem:[#allocation22_spill] sm:$0xff] %v9637_v41  ;;  %v491_v57 = vld [vmem:[%s9156_s10 + $0xc0] sm:$0xff]  ;;  %v9645_v61 = vld [vmem:[#allocation2 + $0xc8] sm:$0xff]  ;;  %v493_v2 = vld [vmem:[%s9156_s10 + $0xd0] sm:$0xff] }
  0x73   : > { %v425_v58 = vld [vmem:[%s9151_s30 + $0xc0] sm:$0xff]  ;;  %8080 = vmatmul.mubr.msk.f32.gmra.mxu0 %vm434_vm4, %v9629_v38  ;;  %v9647_v62 = vld [vmem:[#allocation3 + $0xd8] sm:$0xff]  ;;  %524 = vst.msk [vmem:[#allocation3 + $0x139] sm:$0xff] %vm434_vm4, %v491_v57  ;;  %v9658_v3 = vld [vmem:[#allocation2 + $0xd8] sm:$0xff] }
  0x74   : > { %459 = vst.msk [vmem:[#allocation2 + $0x139] sm:$0xff] %vm434_vm4, %v425_v58  ;;  %v492_v63 = vld [vmem:[%s9156_s10 + $0xc8] sm:$0xff]  ;;  %8130 = vmatmul.mubr.msk.f32.gmra.mxu1 %vm434_vm4, %v9633_v39  ;;  %8082 = vmatprep.mubr.msk.f32.mxu0 %vm434_vm4, %v9635_v40  ;;  %13463 = vst [vmem:[#allocation24_spill] sm:$0xff] %v9658_v3  ;;  %v427_v6 = vld [vmem:[%s9151_s30 + $0xd0] sm:$0xff] }
  0x75   : > { %v426_v1 = vld [vmem:[%s9151_s30 + $0xc8] sm:$0xff]  ;;  %525 = vst.msk [vmem:[#allocation3 + $0x141] sm:$0xff] %vm434_vm4, %v492_v63  ;;  %526 = vst.msk [vmem:[#allocation3 + $0x151] sm:$0xff] %vm434_vm4, %v493_v2  ;;  %v494_v7 = vld [vmem:[%s9156_s10 + $0xd8] sm:$0xff]  ;;  %8132 = vmatprep.mubr.msk.f32.mxu1 %vm434_vm4, %v9637_v41 }
  0x76   : > { %460 = vst.msk [vmem:[#allocation2 + $0x141] sm:$0xff] %vm434_vm4, %v426_v1  ;;  %v428_v9 = vld [vmem:[%s9151_s30 + $0xd8] sm:$0xff]  ;;  %461 = vst.msk [vmem:[#allocation2 + $0x151] sm:$0xff] %vm434_vm4, %v427_v6  ;;  %v495_v14 = vld [vmem:[%s9156_s10 + $0xe0] sm:$0xff] }
  0x77   : > { %527 = vst.msk [vmem:[#allocation3 + $0x159] sm:$0xff] %vm434_vm4, %v494_v7  ;;  %462 = vst.msk [vmem:[#allocation2 + $0x159] sm:$0xff] %vm434_vm4, %v428_v9  ;;  %v429_v15 = vld [vmem:[%s9151_s30 + $0xe0] sm:$0xff]  ;;  %v496_v16 = vld [vmem:[%s9156_s10 + $0xe8] sm:$0xff]  ;;  %8083 = vmatmul.mubr.msk.f32.gmra.mxu0 %vm434_vm4, %v9639_v44 }
  0x78   : > { %528 = vst.msk [vmem:[#allocation3 + $0x169] sm:$0xff] %vm434_vm4, %v495_v14  ;;  %463 = vst.msk [vmem:[#allocation2 + $0x169] sm:$0xff] %vm434_vm4, %v429_v15  ;;  %v430_v19 = vld [vmem:[%s9151_s30 + $0xe8] sm:$0xff]  ;;  %v9683_v22 = vld [vmem:[#allocation2 + $0x10] sm:$0x3]  ;;  %8133 = vmatmul.mubr.msk.f32.gmra.mxu1 %vm434_vm4, %v9645_v61  ;;  %8085 = vmatprep.mubr.msk.f32.mxu0 %vm434_vm4, %v9647_v62 }
  0x79   : > { %529 = vst.msk [vmem:[#allocation3 + $0x171] sm:$0xff] %vm434_vm4, %v496_v16  ;;  %v9681_v20 = vld [vmem:[%s13156_s2 + $0x8] sm:$0xf]  ;;  %464 = vst.msk [vmem:[#allocation2 + $0x171] sm:$0xff] %vm434_vm4, %v430_v19  ;;  %v9690_v23 = vld [vmem:[#allocation3 + $0x10] sm:$0x3]  ;;  %8135 = vmatprep.mubr.msk.f32.mxu1 %vm434_vm4, %v9658_v3 }
  0x7a   : > { %8256 = vmatprep.subr.msk.mxu0 %vm738_vm3, %v9681_v20  ;;  %v9695_v24 = vld [vmem:[%s13157_s3 + $0x8] sm:$0xf]  ;;  %v2140_v25 = vrot.slane %v9683_v22, 2  ;;  %v9702_v26 = vld [vmem:[#allocation3 + $0xe0] sm:$0xff]  ;;  %v2220_v27 = vrot.slane %v9690_v23, 2  ;;  %v9707_v30 = vld [vmem:[#allocation2 + $0xe0] sm:$0xff] }
  0x7b   : > { %13464 = vst [vmem:[#allocation25_spill] sm:$0xff] %v9702_v26  ;;  %v9709_v32 = vld [vmem:[#allocation3 + $0xf0] sm:$0xff]  ;;  %8306 = vmatprep.subr.msk.mxu1 %vm738_vm3, %v9695_v24  ;;  %v9718_v58 = vld [vmem:[#allocation2 + $0xf0] sm:$0xff]  ;;  %8086 = vmatmul.mubr.msk.f32.gmra.mxu0 %vm434_vm4, %v9702_v26  ;;  %v9731_v1 = vld [vmem:[#allocation3 + $0xf8] sm:$0xff] }
  0x7c   : > { %v9716_v57 = vsel %vm2136_vm6, %v2138_v13, %v2140_v25  ;;  %13466 = vst [vmem:[#allocation27_spill] sm:$0xff] %v9718_v58  ;;  %v9723_v63 = vsel %vm2136_vm6, %v2218_v12, %v2220_v27  ;;  %8136 = vmatmul.mubr.msk.f32.gmra.mxu1 %vm434_vm4, %v9707_v30  ;;  %8088 = vmatprep.mubr.msk.f32.mxu0 %vm434_vm4, %v9709_v32  ;;  %13468 = vst [vmem:[#allocation29_spill] sm:$0xff] %v9731_v1  ;;  %v9735_v13 = vld [vmem:[#allocation2 + $0xf8] sm:$0xff]  ;;  %v9739_v12 = vld [vmem:[#allocation2 + $0x108] sm:$0xff] }
  0x7d   : > { %13465 = vst [vmem:[#allocation26_spill] sm:$0xff] %v9716_v57  ;;  %13467 = vst [vmem:[#allocation28_spill] sm:$0xff] %v9723_v63  ;;  %8138 = vmatprep.mubr.msk.f32.mxu1 %vm434_vm4, %v9718_v58  ;;  %v9737_v2 = vld [vmem:[#allocation3 + $0x108] sm:$0xff]  ;;  %v9747_v6 = vld [vmem:[#allocation3 + $0x110] sm:$0xff] }
  0x7e   : > { %13469 = vst [vmem:[#allocation30_spill] sm:$0xff] %v9737_v2  ;;  %13470 = vst [vmem:[#allocation31_spill] sm:$0xff] %v9739_v12  ;;  %v9751_v7 = vld [vmem:[#allocation2 + $0x110] sm:$0xff]  ;;  %v9755_v14 = vld [vmem:[#allocation2 + $0x120] sm:$0xff] }
  0x7f   : > { %8089 = vmatmul.mubr.msk.f32.gmra.mxu0 %vm434_vm4, %v9731_v1  ;;  %13471 = vst [vmem:[#allocation32_spill] sm:$0xff] %v9747_v6  ;;  %13472 = vst [vmem:[#allocation33_spill] sm:$0xff] %v9751_v7  ;;  %v9753_v9 = vld [vmem:[#allocation3 + $0x120] sm:$0xff]  ;;  %v9763_v15 = vld [vmem:[#allocation3 + $0x128] sm:$0xff] }
  0x80   : > { %8139 = vmatmul.mubr.msk.f32.gmra.mxu1 %vm434_vm4, %v9735_v13  ;;  %8091 = vmatprep.mubr.msk.f32.mxu0 %vm434_vm4, %v9737_v2  ;;  %13473 = vst [vmem:[#allocation34_spill] sm:$0xff] %v9753_v9  ;;  %13474 = vst [vmem:[#allocation35_spill] sm:$0xff] %v9755_v14  ;;  %v9767_v16 = vld [vmem:[#allocation2 + $0x128] sm:$0xff]  ;;  %v9771_v25 = vld [vmem:[#allocation2 + $0x138] sm:$0xff] }
  0x81   : > { %8141 = vmatprep.mubr.msk.f32.mxu1 %vm434_vm4, %v9739_v12  ;;  %13475 = vst [vmem:[#allocation36_spill] sm:$0xff] %v9763_v15  ;;  %13476 = vst [vmem:[#allocation37_spill] sm:$0xff] %v9767_v16  ;;  %v9769_v19 = vld [vmem:[#allocation3 + $0x138] sm:$0xff]  ;;  %v9779_v27 = vld [vmem:[#allocation3 + $0x140] sm:$0xff] }
  0x82   : > { %13477 = vst [vmem:[#allocation38_spill] sm:$0xff] %v9769_v19  ;;  %13478 = vst [vmem:[#allocation39_spill] sm:$0xff] %v9771_v25  ;;  %v9783_v11 = vld [vmem:[#allocation2 + $0x140] sm:$0xff]  ;;  %v9787_v57 = vld [vmem:[#allocation2 + $0x150] sm:$0xff] }
  0x83   : > { %8092 = vmatmul.mubr.msk.f32.gmra.mxu0 %vm434_vm4, %v9747_v6  ;;  %13479 = vst [vmem:[#allocation40_spill] sm:$0xff] %v9779_v27  ;;  %13480 = vst [vmem:[#allocation41_spill] sm:$0xff] %v9783_v11  ;;  %v9785_v63 = vld [vmem:[#allocation3 + $0x150] sm:$0xff]  ;;  %v9795_v29 = vld [vmem:[#allocation3 + $0x158] sm:$0xff] }
  0x84   : > { %8142 = vmatmul.mubr.msk.f32.gmra.mxu1 %vm434_vm4, %v9751_v7  ;;  %8094 = vmatprep.mubr.msk.f32.mxu0 %vm434_vm4, %v9753_v9  ;;  %13481 = vst [vmem:[#allocation42_spill] sm:$0xff] %v9785_v63  ;;  %13482 = vst [vmem:[#allocation43_spill] sm:$0xff] %v9787_v57  ;;  %v9813_v4 = vld [vmem:[#allocation3 + $0x170] sm:$0xff]  ;;  %v1314_v9 = vrot.slane %v9490_v45, 1  ;;  %v13488_v45 = vrot.slane %v9389_v5, 1 }
  0x85   : > { %8144 = vmatprep.mubr.msk.f32.mxu1 %vm434_vm4, %v9755_v14  ;;  %13483 = vst [vmem:[#allocation44_spill] sm:$0xff] %v9795_v29  ;;  %13486 = vst [vmem:[#allocation47_spill] sm:$0xff] %v9813_v4 }
  0x87   : > { %8095 = vmatmul.mubr.msk.f32.gmra.mxu0 %vm434_vm4, %v9763_v15  ;;  %v9803_v15 = vld [vmem:[#allocation3 + $0x168] sm:$0xff] }
  0x88   : > { %8145 = vmatmul.mubr.msk.f32.gmra.mxu1 %vm434_vm4, %v9767_v16  ;;  %8097 = vmatprep.mubr.msk.f32.mxu0 %vm434_vm4, %v9769_v19  ;;  %v1309_v19 = vrot.slane %v9393_v8, 1  ;;  %13485 = vst [vmem:[#allocation46_spill] sm:$0xff] %v9803_v15  ;;  %v1311_v8 = vrot.slane %v9683_v22, 1  ;;  %v1409_v16 = vrot.slane %v9464_v36, 1  ;;  %v1410_v22 = vrot.slane %v9480_v43, 1 }
  0x89   : > { %8147 = vmatprep.mubr.msk.f32.mxu1 %vm434_vm4, %v9771_v25  ;;  %v9801_v25 = vld [vmem:[#allocation2 + $0x158] sm:$0xff] }
  0x8a   : > { %13484 = vst [vmem:[#allocation45_spill] sm:$0xff] %v9801_v25  ;;  %v9856_v5 = vsel %vm1307_vm5, %v1409_v16, %v1410_v22  ;;  %v9874_v16 = vld [vmem:[%s13157_s3 + $0xc] sm:$0xf] }
  0x8b   : > { %8098 = vmatmul.mubr.msk.f32.gmra.mxu0 %vm434_vm4, %v9779_v27  ;;  %v9805_v27 = vld [vmem:[#allocation2 + $0x168] sm:$0xff]  ;;  %13490 = vst [vmem:[#allocation50_spill] sm:$0xff] %v9856_v5 }
  0x8c   : > { %8148 = vmatmul.mubr.msk.f32.gmra.mxu1 %vm434_vm4, %v9783_v11  ;;  %8100 = vmatprep.mubr.msk.f32.mxu0 %vm434_vm4, %v9785_v63  ;;  %v9818_v63 = vld [vmem:[#allocation2 + $0x170] sm:$0xff]  ;;  %v1407_v11 = vrot.slane %v9690_v23, 1 }
  0x8d   : > { %8150 = vmatprep.mubr.msk.f32.mxu1 %vm434_vm4, %v9787_v57  ;;  %13487 = vst [vmem:[#allocation48_spill] sm:$0xff] %v9818_v63  ;;  %v1310_v57 = vsel %vm1307_vm5, %v1308_v28, %v1309_v19  ;;  %v1312_v28 = vsel %vm1307_vm5, %v1309_v19, %v1311_v8  ;;  %v1414_v19 = vrot.slane %v9492_v46, 1  ;;  %v1415_v8 = vrot.slane %v9501_v48, 1 }
  0x8e   : > { %v1408_v36 = vsel %vm1307_vm5, %v13488_v45, %v1407_v11  ;;  %v9861_v11 = vld [vmem:[%s13156_s2 + $0xc] sm:$0xf] }
  0x8f   : > { %8101 = vmatmul.mubr.msk.f32.gmra.mxu0 %vm434_vm4, %v9795_v29  ;;  %v9822_v29 = vld [vmem:[#allocation2 + $0x28] sm:$0x3] }
  0x90   : > { %8151 = vmatmul.mubr.msk.f32.gmra.mxu1 %vm434_vm4, %v9801_v25  ;;  %8103 = vmatprep.mubr.msk.f32.mxu0 %vm434_vm4, %v9803_v15  ;;  %v1313_v25 = vrot.slane %v9478_v42, 1  ;;  %v9826_v15 = vld [vmem:[#allocation3 + $0x28] sm:$0x3]  ;;  %v1316_v23 = vrot.slane %v9822_v29, 1  ;;  %v1318_v42 = vrot.slane %v9499_v47, 1 }
  0x91   : > { %8153 = vmatprep.mubr.msk.f32.mxu1 %vm434_vm4, %v9805_v27  ;;  %v1412_v43 = vrot.slane %v9826_v15, 1 }
  0x92   : > { %v9867_v45 = vsel %vm1307_vm5, %v1314_v9, %v1316_v23  ;;  %v1324_v23 = vrot.slane %v9521_v53, 1 }
  0x93   : > { %8104 = vmatmul.mubr.msk.f32.gmra.mxu0 %vm434_vm4, %v9813_v4  ;;  %v1319_v4 = vrot.slane %v9505_v49, 1  ;;  %13491 = vst [vmem:[#allocation51_spill] sm:$0xff] %v9867_v45 }
  0x94   : > { %8154 = vmatmul.mubr.msk.f32.gmra.mxu1 %vm434_vm4, %v9818_v63  ;;  %8158 = vmatprep.mubr.msk.f32.mxu0 %vm434_vm4, %v1310_v57  ;;  %v9845_v63 = vld [vmem:[#allocation2 + $0x40] sm:$0x3]  ;;  %v9848_v57 = vsel %vm1307_vm5, %v1313_v25, %v1314_v9 }
  0x95   : > { %8208 = vmatprep.mubr.msk.f32.mxu1 %vm434_vm4, %v9426_v21  ;;  %13489 = vst [vmem:[#allocation49_spill] sm:$0xff] %v9848_v57  ;;  %v9852_v21 = vld [vmem:[#allocation3 + $0x40] sm:$0x3]  ;;  %v1321_v25 = vrot.slane %v9845_v63, 1 }
  0x96   : > { %v1417_v9 = vrot.slane %v9852_v21, 1 }
  0x97   : > { %8159 = vmatmul.mubr.msk.f32.vlgmr.msra.gmra.mxu0 %vm434_vm4, %v1312_v28  ;;  %v1323_v28 = vrot.slane %v9509_v51, 1  ;;  %v9888_v51 = vld [vmem:[#allocation2 + $0x58] sm:$0x3] }
  0x98   : > { %8209 = vmatmul.mubr.msk.f32.vlgmr.msra.gmra.mxu1 %vm434_vm4, %v1408_v36  ;;  %8257 = vmatpush3.msk.msra.mxu0 %vm738_vm3, %v9681_v20  ;;  %v9881_v36 = vsel %vm1307_vm5, %v1410_v22, %v1412_v43  ;;  %v9884_v20 = vsel %vm1307_vm5, %v1318_v42, %v1319_v4  ;;  %v1420_v43 = vrot.slane %v9517_v52, 1  ;;  %v9897_v22 = vld [vmem:[#allocation3 + $0x58] sm:$0x3]  ;;  %v9910_v42 = vsel %vm1307_vm5, %v1319_v4, %v1321_v25 }
  0x99   : > { %8307 = vmatpush3.msk.msra.mxu1 %vm738_vm3, %v9695_v24  ;;  %8161 = vmatprep.mubr.msk.f32.mxu0 %vm434_vm4, %v9848_v57  ;;  %13492 = vst [vmem:[#allocation52_spill] sm:$0xff] %v9881_v36  ;;  %13493 = vst [vmem:[#allocation53_spill] sm:$0xff] %v9884_v20  ;;  %v9893_v24 = vsel %vm1307_vm5, %v1414_v19, %v1415_v8  ;;  %v1419_v57 = vrot.slane %v9507_v50, 1  ;;  %v1326_v19 = vrot.slane %v9888_v51, 1  ;;  %v9924_v50 = vld [vmem:[#allocation2 + $0x70] sm:$0x3] }
  0x9a   : > { %8211 = vmatprep.mubr.msk.f32.mxu1 %vm434_vm4, %v9856_v5  ;;  %13494 = vst [vmem:[#allocation54_spill] sm:$0xff] %v9893_v24  ;;  %8356 = vmatprep.subr.msk.mxu0 %vm738_vm3, %v9861_v11  ;;  %13495 = vst [vmem:[#allocation55_spill] sm:$0xff] %v9910_v42  ;;  %v1328_v5 = vrot.slane %v9525_v55, 1  ;;  %v9920_v52 = vsel %vm1307_vm5, %v1323_v28, %v1324_v23  ;;  %v1424_v25 = vrot.slane %v9523_v54, 1  ;;  %v1425_v55 = vrot.slane %v9527_v56, 1 }
  0x9b   : > { %8162 = vmatmul.mubr.msk.f32.gmra.mxu0 %vm434_vm4, %v9867_v45  ;;  %8406 = vmatprep.subr.msk.mxu1 %vm738_vm3, %v9874_v16  ;;  %v9917_v45 = vsel %vm1307_vm5, %v1415_v8, %v1417_v9  ;;  %13497 = vst [vmem:[#allocation57_spill] sm:$0xff] %v9920_v52  ;;  %v9927_v4 = vsel %vm1307_vm5, %v1419_v57, %v1420_v43  ;;  %v1331_v57 = vrot.slane %v9924_v50, 1  ;;  %v1333_v28 = vrot.slane %v9546_v0, 1  ;;  %v9954_v56 = vld [vmem:[#allocation2 + $0x88] sm:$0x3] }
  0x9c   : > { %8212 = vmatmul.mubr.msk.f32.gmra.mxu1 %vm434_vm4, %v9881_v36  ;;  %8164 = vmatprep.mubr.msk.f32.mxu0 %vm434_vm4, %v9884_v20  ;;  %13496 = vst [vmem:[#allocation56_spill] sm:$0xff] %v9917_v45  ;;  %v1422_v36 = vrot.slane %v9897_v22, 1  ;;  %v1329_v20 = vrot.slane %v9533_v59, 1  ;;  %13498 = vst [vmem:[#allocation58_spill] sm:$0xff] %v9927_v4  ;;  %v9940_v8 = vsel %vm1307_vm5, %v1324_v23, %v1326_v19  ;;  %v1429_v19 = vrot.slane %v9535_v60, 1 }
  0x9d   : > { %8214 = vmatprep.mubr.msk.f32.mxu1 %vm434_vm4, %v9893_v24  ;;  %v9931_v24 = vld [vmem:[#allocation3 + $0x70] sm:$0x3]  ;;  %13499 = vst [vmem:[#allocation59_spill] sm:$0xff] %v9940_v8  ;;  %v9957_v23 = vsel %vm1307_vm5, %v1424_v25, %v1425_v55  ;;  %v1430_v0 = vrot.slane %v9562_v10, 1  ;;  %v1339_v25 = vrot.slane %v9617_v34, 1  ;;  %v1435_v34 = vrot.slane %v9613_v33, 1 }
  0x9e   : > { %v9947_v9 = vsel %vm1307_vm5, %v1420_v43, %v1422_v36  ;;  %13502 = vst [vmem:[#allocation62_spill] sm:$0xff] %v9957_v23  ;;  %v1336_v36 = vrot.slane %v9954_v56, 1  ;;  %v1338_v43 = vrot.slane %v9600_v31, 1  ;;  %v9984_v10 = vld [vmem:[#allocation2 + $0xa0] sm:$0x3] }
  0x9f   : > { %8165 = vmatmul.mubr.msk.f32.gmra.mxu0 %vm434_vm4, %v9910_v42  ;;  %13500 = vst [vmem:[#allocation60_spill] sm:$0xff] %v9947_v9  ;;  %v9950_v42 = vsel %vm1307_vm5, %v1328_v5, %v1329_v20  ;;  %v9970_v5 = vsel %vm1307_vm5, %v1329_v20, %v1331_v57  ;;  %13506 = vst [vmem:[#allocation66_spill] sm:$0xff] %v9984_v10  ;;  %v9987_v20 = vsel %vm1307_vm5, %v1429_v19, %v1430_v0  ;;  %v9991_v31 = vld [vmem:[#allocation3 + $0xa0] sm:$0x3] }
  0xa0   : > { %8215 = vmatmul.mubr.msk.f32.gmra.mxu1 %vm434_vm4, %v9917_v45  ;;  %8167 = vmatprep.mubr.msk.f32.mxu0 %vm434_vm4, %v9920_v52  ;;  %13501 = vst [vmem:[#allocation61_spill] sm:$0xff] %v9950_v42  ;;  %v1427_v45 = vrot.slane %v9931_v24, 1  ;;  %v1334_v52 = vrot.slane %v9572_v17, 1  ;;  %13503 = vst [vmem:[#allocation63_spill] sm:$0xff] %v9970_v5  ;;  %v1434_v57 = vrot.slane %v9574_v18, 1 }
  0xa1   : > { %8217 = vmatprep.mubr.msk.f32.mxu1 %vm434_vm4, %v9927_v4  ;;  %v9961_v4 = vld [vmem:[#allocation3 + $0x88] sm:$0x3]  ;;  %13507 = vst [vmem:[#allocation67_spill] sm:$0xff] %v9987_v20 }
  0xa3   : > { %8168 = vmatmul.mubr.msk.f32.gmra.mxu0 %vm434_vm4, %v9940_v8  ;;  %v9978_v8 = vsel %vm1307_vm5, %v1425_v55, %v1427_v45  ;;  %v10000_v55 = vsel %vm1307_vm5, %v1334_v52, %v1336_v36  ;;  %v10003_v45 = vsel %vm1307_vm5, %v1338_v43, %v1339_v25  ;;  %v1439_v36 = vrot.slane %v9619_v35, 1 }
  0xa4   : > { %8218 = vmatmul.mubr.msk.f32.gmra.mxu1 %vm434_vm4, %v9947_v9  ;;  %8170 = vmatprep.mubr.msk.f32.mxu0 %vm434_vm4, %v9950_v42  ;;  %13504 = vst [vmem:[#allocation64_spill] sm:$0xff] %v9978_v8  ;;  %v9981_v9 = vsel %vm1307_vm5, %v1333_v28, %v1334_v52  ;;  %v1432_v42 = vrot.slane %v9961_v4, 1  ;;  %13508 = vst [vmem:[#allocation68_spill] sm:$0xff] %v10000_v55  ;;  %v1341_v28 = vrot.slane %v9984_v10, 1  ;;  %v1440_v43 = vrot.slane %v9629_v38, 1 }
  0xa5   : > { %8220 = vmatprep.mubr.msk.f32.mxu1 %vm434_vm4, %v9957_v23  ;;  %13505 = vst [vmem:[#allocation65_spill] sm:$0xff] %v9981_v9  ;;  %13509 = vst [vmem:[#allocation69_spill] sm:$0xff] %v10003_v45  ;;  %v10014_v23 = vld [vmem:[#allocation2 + $0xb8] sm:$0x3]  ;;  %v10017_v52 = vsel %vm1307_vm5, %v1434_v57, %v1435_v34  ;;  %v10021_v10 = vld [vmem:[#allocation3 + $0xb8] sm:$0x3] }
  0xa6   : > { %v10009_v19 = vsel %vm1307_vm5, %v1430_v0, %v1432_v42  ;;  %13511 = vst [vmem:[#allocation71_spill] sm:$0xff] %v10017_v52  ;;  %v10030_v0 = vsel %vm1307_vm5, %v1339_v25, %v1341_v28  ;;  %v1346_v42 = vrot.slane %v10014_v23, 1  ;;  %v1348_v57 = vrot.slane %v9637_v41, 1  ;;  %v10044_v38 = vld [vmem:[#allocation2 + $0xd0] sm:$0x3] }
  0xa7   : > { %8171 = vmatmul.mubr.msk.f32.gmra.mxu0 %vm434_vm4, %v9970_v5  ;;  %13510 = vst [vmem:[#allocation70_spill] sm:$0xff] %v10009_v19  ;;  %v1437_v5 = vrot.slane %v9991_v31, 1  ;;  %13512 = vst [vmem:[#allocation72_spill] sm:$0xff] %v10030_v0  ;;  %v10047_v25 = vsel %vm1307_vm5, %v1439_v36, %v1440_v43  ;;  %v1444_v28 = vrot.slane %v9635_v40, 1  ;;  %v1445_v41 = vrot.slane %v9639_v44, 1 }
  0xa8   : > { %8221 = vmatmul.mubr.msk.f32.gmra.mxu1 %vm434_vm4, %v9978_v8  ;;  %8173 = vmatprep.mubr.msk.f32.mxu0 %vm434_vm4, %v9981_v9  ;;  %v1343_v8 = vrot.slane %v9621_v37, 1  ;;  %v1344_v9 = vrot.slane %v9633_v39, 1  ;;  %13515 = vst [vmem:[#allocation75_spill] sm:$0xff] %v10047_v25  ;;  %v10074_v44 = vld [vmem:[#allocation2 + $0xe8] sm:$0x3] }
  0xa9   : > { %8223 = vmatprep.mubr.msk.f32.mxu1 %vm434_vm4, %v9987_v20  ;;  %v10037_v20 = vsel %vm1307_vm5, %v1435_v34, %v1437_v5  ;;  %v1353_v5 = vrot.slane %v9658_v3, 1  ;;  %v1450_v3 = vrot.slane %v9702_v26, 1  ;;  %v10104_v26 = vld [vmem:[#allocation2 + $0x100] sm:$0x3] }
  0xaa   : > { %13513 = vst [vmem:[#allocation73_spill] sm:$0xff] %v10037_v20  ;;  %v10060_v34 = vsel %vm1307_vm5, %v1344_v9, %v1346_v42  ;;  %v1449_v42 = vrot.slane %v9647_v62, 1 }
  0xab   : > { %8174 = vmatmul.mubr.msk.f32.gmra.mxu0 %vm434_vm4, %v10000_v55  ;;  %v10040_v55 = vsel %vm1307_vm5, %v1343_v8, %v1344_v9  ;;  %13516 = vst [vmem:[#allocation76_spill] sm:$0xff] %v10060_v34  ;;  %v1351_v8 = vrot.slane %v10044_v38, 1  ;;  %v10077_v9 = vsel %vm1307_vm5, %v1444_v28, %v1445_v41 }
  0xac   : > { %8224 = vmatmul.mubr.msk.f32.gmra.mxu1 %vm434_vm4, %v10009_v19  ;;  %8176 = vmatprep.mubr.msk.f32.mxu0 %vm434_vm4, %v10003_v45  ;;  %13514 = vst [vmem:[#allocation74_spill] sm:$0xff] %v10040_v55  ;;  %v1442_v19 = vrot.slane %v10021_v10, 1  ;;  %v1349_v45 = vrot.slane %v9645_v61, 1  ;;  %13519 = vst [vmem:[#allocation79_spill] sm:$0xff] %v10077_v9 }
  0xad   : > { %8226 = vmatprep.mubr.msk.f32.mxu1 %vm434_vm4, %v10017_v52  ;;  %v10051_v52 = vld [vmem:[#allocation3 + $0xd0] sm:$0x3] }
  0xae   : > { %v10067_v36 = vsel %vm1307_vm5, %v1440_v43, %v1442_v19  ;;  %v10090_v19 = vsel %vm1307_vm5, %v1349_v45, %v1351_v8  ;;  %v1356_v43 = vrot.slane %v10074_v44, 1  ;;  %v1454_v8 = vrot.slane %v9709_v32, 1 }
  0xaf   : > { %8177 = vmatmul.mubr.msk.f32.gmra.mxu0 %vm434_vm4, %v10030_v0  ;;  %13517 = vst [vmem:[#allocation77_spill] sm:$0xff] %v10067_v36  ;;  %v10070_v0 = vsel %vm1307_vm5, %v1348_v57, %v1349_v45  ;;  %13520 = vst [vmem:[#allocation80_spill] sm:$0xff] %v10090_v19  ;;  %v1358_v57 = vrot.slane %v9718_v58, 1  ;;  %v10107_v45 = vsel %vm1307_vm5, %v1449_v42, %v1450_v3  ;;  %v1455_v58 = vrot.slane %v9731_v1, 1  ;;  %v10134_v1 = vld [vmem:[#allocation2 + $0x118] sm:$0x3] }
  0xb0   : > { %8227 = vmatmul.mubr.msk.f32.gmra.mxu1 %vm434_vm4, %v10037_v20  ;;  %8179 = vmatprep.mubr.msk.f32.mxu0 %vm434_vm4, %v10040_v55  ;;  %13518 = vst [vmem:[#allocation78_spill] sm:$0xff] %v10070_v0  ;;  %v1447_v20 = vrot.slane %v10051_v52, 1  ;;  %v1354_v55 = vrot.slane %v9707_v30, 1  ;;  %13523 = vst [vmem:[#allocation83_spill] sm:$0xff] %v10107_v45 }
  0xb1   : > { %8229 = vmatprep.mubr.msk.f32.mxu1 %vm434_vm4, %v10047_v25  ;;  %v10081_v25 = vld [vmem:[#allocation3 + $0xe8] sm:$0x3]  ;;  %13528 = vst [vmem:[#allocation88_spill] sm:$0xff] %v10134_v1 }
  0xb2   : > { %v10097_v28 = vsel %vm1307_vm5, %v1445_v41, %v1447_v20  ;;  %v10120_v41 = vsel %vm1307_vm5, %v1354_v55, %v1356_v43  ;;  %v1361_v20 = vrot.slane %v10104_v26, 1  ;;  %v1459_v43 = vrot.slane %v9737_v2, 1  ;;  %v10164_v2 = vld [vmem:[#allocation2 + $0x130] sm:$0x3] }
  0xb3   : > { %8180 = vmatmul.mubr.msk.f32.gmra.mxu0 %vm434_vm4, %v10060_v34  ;;  %13521 = vst [vmem:[#allocation81_spill] sm:$0xff] %v10097_v28  ;;  %v10100_v34 = vsel %vm1307_vm5, %v1353_v5, %v1354_v55  ;;  %13525 = vst [vmem:[#allocation85_spill] sm:$0xff] %v10120_v41  ;;  %v1363_v5 = vrot.slane %v9739_v12, 1  ;;  %v10137_v55 = vsel %vm1307_vm5, %v1454_v8, %v1455_v58  ;;  %v1460_v12 = vrot.slane %v9747_v6, 1  ;;  %v13532_v8 = vld [vmem:[#allocation37_spill] sm:$0xff] }
  0xb4   : > { %8230 = vmatmul.mubr.msk.f32.gmra.mxu1 %vm434_vm4, %v10067_v36  ;;  %8182 = vmatprep.mubr.msk.f32.mxu0 %vm434_vm4, %v10070_v0  ;;  %13522 = vst [vmem:[#allocation82_spill] sm:$0xff] %v10100_v34  ;;  %v1452_v36 = vrot.slane %v10081_v25, 1  ;;  %v1359_v0 = vrot.slane %v9735_v13, 1  ;;  %13529 = vst [vmem:[#allocation89_spill] sm:$0xff] %v10137_v55  ;;  %v1369_v6 = vrot.slane %v13532_v8, 1 }
  0xb5   : > { %8232 = vmatprep.mubr.msk.f32.mxu1 %vm434_vm4, %v10077_v9  ;;  %v10111_v9 = vld [vmem:[#allocation3 + $0x100] sm:$0x3]  ;;  %13535 = vst [vmem:[#allocation94_spill] sm:$0xff] %v10164_v2 }
  0xb6   : > { %13524 = vst [vmem:[#allocation84_spill] sm:$0xff] %v10111_v9  ;;  %v10127_v42 = vsel %vm1307_vm5, %v1450_v3, %v1452_v36  ;;  %v10150_v3 = vsel %vm1307_vm5, %v1359_v0, %v1361_v20  ;;  %v1366_v36 = vrot.slane %v10134_v1, 1  ;;  %v13537_v20 = vld [vmem:[#allocation34_spill] sm:$0xff]  ;;  %v13538_v1 = vld [vmem:[#allocation36_spill] sm:$0xff] }
  0xb7   : > { %8183 = vmatmul.mubr.msk.f32.gmra.mxu0 %vm434_vm4, %v10090_v19  ;;  %13526 = vst [vmem:[#allocation86_spill] sm:$0xff] %v10127_v42  ;;  %v10130_v19 = vsel %vm1307_vm5, %v1358_v57, %v1359_v0  ;;  %13531 = vst [vmem:[#allocation91_spill] sm:$0xff] %v10150_v3  ;;  %v1368_v57 = vrot.slane %v9755_v14, 1  ;;  %v10167_v0 = vsel %vm1307_vm5, %v1459_v43, %v1460_v12  ;;  %v1464_v14 = vrot.slane %v13537_v20, 1  ;;  %v10194_v20 = vld [vmem:[#allocation2 + $0x148] sm:$0x3] }
  0xb8   : > { %8233 = vmatmul.mubr.msk.f32.gmra.mxu1 %vm434_vm4, %v10097_v28  ;;  %8185 = vmatprep.mubr.msk.f32.mxu0 %vm434_vm4, %v10100_v34  ;;  %13527 = vst [vmem:[#allocation87_spill] sm:$0xff] %v10130_v19  ;;  %v1457_v28 = vrot.slane %v10111_v9, 1  ;;  %v1364_v34 = vrot.slane %v9751_v7, 1  ;;  %13536 = vst [vmem:[#allocation95_spill] sm:$0xff] %v10167_v0  ;;  %v1465_v8 = vrot.slane %v13538_v1, 1  ;;  %v13543_v1 = vld [vmem:[#allocation41_spill] sm:$0xff] }
  0xb9   : > { %8235 = vmatprep.mubr.msk.f32.mxu1 %vm434_vm4, %v10107_v45  ;;  %v10141_v45 = vld [vmem:[#allocation3 + $0x118] sm:$0x3]  ;;  %v10171_v7 = vld [vmem:[#allocation3 + $0x130] sm:$0x3]  ;;  %13544 = vst [vmem:[#allocation99_spill] sm:$0xff] %v10194_v20 }
  0xba   : > { %13530 = vst [vmem:[#allocation90_spill] sm:$0xff] %v10141_v45  ;;  %v10201_v9 = vld [vmem:[#allocation3 + $0x148] sm:$0x3] }
  0xbb   : > { %8186 = vmatmul.mubr.msk.f32.gmra.mxu0 %vm434_vm4, %v10120_v41  ;;  %v10158_v41 = vsel %vm1307_vm5, %v1455_v58, %v1457_v28  ;;  %v10180_v58 = vsel %vm1307_vm5, %v1364_v34, %v1366_v36  ;;  %v10183_v28 = vsel %vm1307_vm5, %v1368_v57, %v1369_v6  ;;  %v13546_v36 = vld [vmem:[#allocation38_spill] sm:$0xff]  ;;  %13548 = vst [vmem:[#allocation101_spill] sm:$0xff] %v10201_v9 }
  0xbc   : > { %8236 = vmatmul.mubr.msk.f32.gmra.mxu1 %vm434_vm4, %v10127_v42  ;;  %8188 = vmatprep.mubr.msk.f32.mxu0 %vm434_vm4, %v10130_v19  ;;  %13533 = vst [vmem:[#allocation92_spill] sm:$0xff] %v10158_v41  ;;  %v10161_v42 = vsel %vm1307_vm5, %v1363_v5, %v1364_v34  ;;  %v1462_v19 = vrot.slane %v10141_v45, 1  ;;  %13539 = vst [vmem:[#allocation96_spill] sm:$0xff] %v10180_v58  ;;  %v1371_v5 = vrot.slane %v10164_v2, 1  ;;  %v1469_v57 = vrot.slane %v13546_v36, 1  ;;  %v13547_v2 = vld [vmem:[#allocation40_spill] sm:$0xff] }
  0xbd   : > { %8238 = vmatprep.mubr.msk.f32.mxu1 %vm434_vm4, %v10137_v55  ;;  %13534 = vst [vmem:[#allocation93_spill] sm:$0xff] %v10161_v42  ;;  %13540 = vst [vmem:[#allocation97_spill] sm:$0xff] %v10183_v28  ;;  %v10197_v34 = vsel %vm1307_vm5, %v1464_v14, %v1465_v8  ;;  %v1470_v45 = vrot.slane %v13547_v2, 1  ;;  %v1376_v14 = vrot.slane %v10194_v20, 1  ;;  %v13551_v36 = vld [vmem:[#allocation45_spill] sm:$0xff]  ;;  %v13557_v20 = vld [vmem:[#allocation44_spill] sm:$0xff] }
  0xbe   : > { %v10189_v43 = vsel %vm1307_vm5, %v1460_v12, %v1462_v19  ;;  %13545 = vst [vmem:[#allocation100_spill] sm:$0xff] %v10197_v34  ;;  %v10210_v12 = vsel %vm1307_vm5, %v1369_v6, %v1371_v5  ;;  %v13550_v19 = vld [vmem:[#allocation43_spill] sm:$0xff]  ;;  %v1379_v2 = vrot.slane %v13551_v36, 1  ;;  %v13556_v5 = vld [vmem:[#allocation42_spill] sm:$0xff]  ;;  %v1475_v36 = vrot.slane %v13557_v20, 1 }
  0xbf   : > { %8189 = vmatmul.mubr.msk.f32.gmra.mxu0 %vm434_vm4, %v10150_v3  ;;  %13541 = vst [vmem:[#allocation98_spill] sm:$0xff] %v10189_v43  ;;  %v1467_v3 = vrot.slane %v10171_v7, 1  ;;  %13549 = vst [vmem:[#allocation102_spill] sm:$0xff] %v10210_v12  ;;  %v10227_v6 = vsel %vm1307_vm5, %v1469_v57, %v1470_v45  ;;  %v13564_v20 = vld [vmem:[#allocation47_spill] sm:$0xff] }
  0xc0   : > { %8239 = vmatmul.mubr.msk.f32.gmra.mxu1 %vm434_vm4, %v10158_v41  ;;  %8191 = vmatprep.mubr.msk.f32.mxu0 %vm434_vm4, %v10161_v42  ;;  %v13542_v41 = vld [vmem:[#allocation39_spill] sm:$0xff]  ;;  %v1374_v42 = vrot.slane %v13543_v1, 1  ;;  %v10224_v1 = vld [vmem:[#allocation2 + $0x160] sm:$0x3]  ;;  %13555 = vst [vmem:[#allocation106_spill] sm:$0xff] %v10227_v6 }
  0xc1   : > { %8241 = vmatprep.mubr.msk.f32.mxu1 %vm434_vm4, %v10167_v0  ;;  %v1373_v55 = vrot.slane %v13542_v41, 1  ;;  %v1378_v0 = vrot.slane %v13550_v19, 1  ;;  %13554 = vst [vmem:[#allocation105_spill] sm:$0xff] %v10224_v1  ;;  %v1474_v19 = vrot.slane %v13556_v5, 1  ;;  %v10231_v41 = vld [vmem:[#allocation3 + $0x160] sm:$0x3] }
  0xc2   : > { %v1480_v5 = vrot.slane %v13564_v20, 1 }
  0xc3   : > { %8192 = vmatmul.mubr.msk.f32.gmra.mxu0 %vm434_vm4, %v10180_v58  ;;  %v10218_v58 = vsel %vm1307_vm5, %v1465_v8, %v1467_v3  ;;  %v10243_v3 = vsel %vm1307_vm5, %v1378_v0, %v1379_v2  ;;  %v1381_v8 = vrot.slane %v10224_v1, 1  ;;  %v10257_v0 = vsel %vm1307_vm5, %v1474_v19, %v1475_v36 }
  0xc4   : > { %8242 = vmatmul.mubr.msk.f32.gmra.mxu1 %vm434_vm4, %v10189_v43  ;;  %8194 = vmatprep.mubr.msk.f32.mxu0 %vm434_vm4, %v10183_v28  ;;  %13552 = vst [vmem:[#allocation103_spill] sm:$0xff] %v10218_v58  ;;  %v10221_v43 = vsel %vm1307_vm5, %v1373_v55, %v1374_v42  ;;  %v1472_v28 = vrot.slane %v10201_v9, 1  ;;  %v10240_v55 = vsel %vm1307_vm5, %v1374_v42, %v1376_v14  ;;  %13559 = vst [vmem:[#allocation108_spill] sm:$0xff] %v10243_v3  ;;  %v10254_v14 = vld [vmem:[#allocation2 + $0x178] sm:$0x3]  ;;  %v431_v9 = vld [vmem:[%s9151_s30 + $0xf0] sm:$0xff] }
  0xc5   : > { %8244 = vmatprep.mubr.msk.f32.mxu1 %vm434_vm4, %v10197_v34  ;;  %13553 = vst [vmem:[#allocation104_spill] sm:$0xff] %v10221_v43  ;;  %13558 = vst [vmem:[#allocation107_spill] sm:$0xff] %v10240_v55  ;;  %v13563_v34 = vld [vmem:[#allocation46_spill] sm:$0xff]  ;;  %v10276_v19 = vsel %vm1307_vm5, %v1379_v2, %v1381_v8  ;;  %v1386_v20 = vrot.slane %v10254_v14, 1 }
  0xc6   : > { %v10249_v57 = vsel %vm1307_vm5, %v1470_v45, %v1472_v28  ;;  %13562 = vst [vmem:[#allocation110_spill] sm:$0xff] %v10257_v0  ;;  %v1479_v1 = vrot.slane %v13563_v34, 1  ;;  %v497_v45 = vld [vmem:[%s9156_s10 + $0xf0] sm:$0xff]  ;;  %465 = vst.msk [vmem:[#allocation2 + $0x181] sm:$0xff] %vm434_vm4, %v431_v9  ;;  %v432_v28 = vld [vmem:[%s9151_s30 + $0xf8] sm:$0xff] }
  0xc7   : > { %8195 = vmatmul.mubr.msk.f32.gmra.mxu0 %vm434_vm4, %v10210_v12  ;;  %13560 = vst [vmem:[#allocation109_spill] sm:$0xff] %v10249_v57  ;;  %v13561_v12 = vld [vmem:[#allocation48_spill] sm:$0xff]  ;;  %530 = vst.msk [vmem:[#allocation3 + $0x181] sm:$0xff] %vm434_vm4, %v497_v45 }
  0xc8   : > { %8245 = vmatmul.mubr.msk.f32.gmra.mxu1 %vm434_vm4, %v10218_v58  ;;  %8197 = vmatprep.mubr.msk.f32.mxu0 %vm434_vm4, %v10221_v43  ;;  %v1477_v58 = vrot.slane %v10231_v41, 1  ;;  %v1383_v43 = vrot.slane %v9805_v27, 1  ;;  %v1384_v42 = vrot.slane %v13561_v12, 1  ;;  %v498_v12 = vld [vmem:[%s9156_s10 + $0xf8] sm:$0xff]  ;;  %13565 = vst [vmem:[#allocation46_spill] sm:$0xff] %v10276_v19  ;;  %466 = vst.msk [vmem:[#allocation2 + $0x189] sm:$0xff] %vm434_vm4, %v432_v28  ;;  %v10291_v2 = vsel %vm1307_vm5, %v1479_v1, %v1480_v5  ;;  %s12334_s10 = scalar_lea.vmem %s13161_s7, %s7456_s28 }
  0xc9   : > { %8247 = vmatprep.mubr.msk.f32.mxu1 %vm434_vm4, %v10227_v6  ;;  %v10261_v6 = vld [vmem:[#allocation3 + $0x178] sm:$0x3]  ;;  %531 = vst.msk [vmem:[#allocation3 + $0x189] sm:$0xff] %vm434_vm4, %v498_v12  ;;  %13568 = vst [vmem:[#allocation113_spill] sm:$0xff] %v10291_v2  ;;  %v13571_v1 = vld [vmem:[#allocation9_spill] sm:$0xff] }
  0xca   : > { %v10284_v9 = vsel %vm1307_vm5, %v1475_v36, %v1477_v58  ;;  %v10287_v45 = vsel %vm1307_vm5, %v1383_v43, %v1384_v42  ;;  %v10300_v58 = vsel %vm1307_vm5, %v1384_v42, %v1386_v20  ;;  %v2142_v36 = vrot.slane %v13571_v1, 2  ;;  %v13572_v12 = vld [vmem:[#allocation11_spill] sm:$0xff]  ;;  %v13573_v28 = vld [vmem:[#allocation8_spill] sm:$0xff]  ;;  %v13575_v20 = vld [vmem:[#allocation6_spill] sm:$0xff] }
  0xcb   : > { %8198 = vmatmul.mubr.msk.f32.gmra.mxu0 %vm434_vm4, %v10240_v55  ;;  %13566 = vst [vmem:[#allocation111_spill] sm:$0xff] %v10284_v9  ;;  %13567 = vst [vmem:[#allocation112_spill] sm:$0xff] %v10287_v45  ;;  %v2143_v8 = vrot.slane %v13572_v12, 2  ;;  %v2225_v42 = vrot.slane %v9826_v15, 2  ;;  %v2147_v1 = vrot.slane %v9499_v47, 2  ;;  %v13578_v47 = vld [vmem:[#allocation28_spill] sm:$0xff] }
  0xcc   : > { %8248 = vmatmul.mubr.msk.f32.gmra.mxu1 %vm434_vm4, %v10249_v57  ;;  %8200 = vmatprep.mubr.msk.f32.mxu0 %vm434_vm4, %v10243_v3  ;;  %v1482_v3 = vrot.slane %v10261_v6, 1  ;;  %13569 = vst [vmem:[#allocation114_spill] sm:$0xff] %v10300_v58  ;;  %v10336_v15 = vld [vmem:[%s13156_s2 + $0x10] sm:$0xf] }
  0xcd   : > { %8250 = vmatprep.mubr.msk.f32.mxu1 %vm434_vm4, %v10257_v0  ;;  %v13574_v0 = vld [vmem:[#allocation10_spill] sm:$0xff]  ;;  %v10324_v12 = vsel %vm2136_vm6, %v2142_v36, %v2143_v8 }
  0xce   : > { %v10305_v43 = vsel %vm1307_vm5, %v1480_v5, %v1482_v3  ;;  %v2145_v5 = vrot.slane %v9822_v29, 2  ;;  %v13576_v3 = vld [vmem:[#allocation7_spill] sm:$0xff] }
  0xcf   : > { %8201 = vmatmul.mubr.msk.f32.gmra.mxu0 %vm434_vm4, %v10276_v19  ;;  %13570 = vst [vmem:[#allocation115_spill] sm:$0xff] %v10305_v43  ;;  %v2222_v19 = vrot.slane %v13573_v28, 2  ;;  %v2227_v28 = vrot.slane %v9492_v46, 2 }
  0xd0   : > { %8251 = vmatmul.mubr.msk.f32.gmra.mxu1 %vm434_vm4, %v10284_v9  ;;  %8203 = vmatprep.mubr.msk.f32.mxu0 %vm434_vm4, %v10287_v45  ;;  %v2223_v9 = vrot.slane %v13574_v0, 2  ;;  %v2148_v0 = vrot.slane %v9505_v49, 2  ;;  %v10343_v46 = vsel %vm2136_vm6, %v2143_v8, %v2145_v5  ;;  %v13579_v49 = vld [vmem:[#allocation13_spill] sm:$0xff]  ;;  %v2153_v8 = vrot.slane %v9521_v53, 2 }
  0xd1   : > { %8253 = vmatprep.mubr.msk.f32.mxu1 %vm434_vm4, %v10291_v2 }
  0xd2   : > { %v10331_v29 = vsel %vm2136_vm6, %v2222_v19, %v2223_v9  ;;  %v10350_v19 = vld [vmem:[%s13157_s3 + $0x10] sm:$0xf]  ;;  %v10360_v36 = vsel %vm2136_vm6, %v2147_v1, %v2148_v0 }
  0xd3   : > { %8204 = vmatmul.mubr.msk.f32.gmra.mxu0 %vm434_vm4, %v10300_v58  ;;  %v13577_v58 = vld [vmem:[#allocation26_spill] sm:$0xff] }
  0xd4   : > { %8254 = vmatmul.mubr.msk.f32.gmra.mxu1 %vm434_vm4, %v10305_v43  ;;  %8258 = vmatprep.mubr.msk.f32.mxu0 %vm434_vm4, %v13575_v20  ;;  %v2228_v43 = vrot.slane %v9501_v48, 2  ;;  %v2150_v48 = vrot.slane %v9845_v63, 2  ;;  %v2230_v63 = vrot.slane %v9852_v21, 2  ;;  %v2155_v21 = vrot.slane %v9888_v51, 2 }
  0xd5   : > { %8308 = vmatprep.mubr.msk.f32.mxu1 %vm434_vm4, %v13576_v3  ;;  %v13581_v3 = vld [vmem:[#allocation14_spill] sm:$0xff]  ;;  %v2237_v51 = vrot.slane %v9523_v54, 2  ;;  %v2163_v54 = vrot.slane %v9572_v17, 2 }
  0xd6   : > { %v10367_v20 = vsel %vm2136_vm6, %v2227_v28, %v2228_v43  ;;  %v10382_v53 = vsel %vm2136_vm6, %v2148_v0, %v2150_v48  ;;  %v10389_v1 = vsel %vm2136_vm6, %v2228_v43, %v2230_v63  ;;  %v13584_v48 = vld [vmem:[#allocation16_spill] sm:$0xff]  ;;  %v13586_v43 = vld [vmem:[#allocation17_spill] sm:$0xff] }
  0xd7   : > { %8259 = vmatmul.mubr.msk.f32.vlgmr.msra.gmra.mxu0 %vm434_vm4, %v13577_v58  ;;  %v2152_v58 = vrot.slane %v13579_v49, 2  ;;  %v2235_v49 = vrot.slane %v9897_v22, 2  ;;  %v10408_v22 = vsel %vm2136_vm6, %v2153_v8, %v2155_v21  ;;  %v13590_v21 = vld [vmem:[#allocation18_spill] sm:$0xff] }
  0xd8   : > { %8309 = vmatmul.mubr.msk.f32.vlgmr.msra.gmra.mxu1 %vm434_vm4, %v13578_v47  ;;  %8357 = vmatpush3.msk.msra.mxu0 %vm738_vm3, %v9861_v11  ;;  %v10357_v11 = vsel %vm2136_vm6, %v2223_v9, %v2225_v42  ;;  %v2233_v47 = vrot.slane %v13581_v3, 2  ;;  %v13582_v9 = vld [vmem:[#allocation15_spill] sm:$0xff]  ;;  %v2238_v3 = vrot.slane %v13584_v48, 2  ;;  %13585 = vst [vmem:[#allocation11_spill] sm:$0xff] %v10408_v22  ;;  %v2243_v48 = vrot.slane %v13590_v21, 2 }
  0xd9   : > { %8407 = vmatpush3.msk.msra.mxu1 %vm738_vm3, %v9874_v16  ;;  %8261 = vmatprep.mubr.msk.f32.mxu0 %vm434_vm4, %v10324_v12  ;;  %v13580_v16 = vld [vmem:[#allocation12_spill] sm:$0xff]  ;;  %v2157_v42 = vrot.slane %v13582_v9, 2  ;;  %v10392_v28 = vsel %vm2136_vm6, %v2152_v58, %v2153_v8  ;;  %v2162_v58 = vrot.slane %v13586_v43, 2  ;;  %v2240_v9 = vrot.slane %v9931_v24, 2 }
  0xda   : > { %8311 = vmatprep.mubr.msk.f32.mxu1 %vm434_vm4, %v10331_v29  ;;  %v2232_v5 = vrot.slane %v13580_v16, 2  ;;  %8456 = vmatprep.subr.msk.mxu0 %vm738_vm3, %v10336_v15  ;;  %v2158_v16 = vrot.slane %v9533_v59, 2  ;;  %v2160_v59 = vrot.slane %v9924_v50, 2  ;;  %v10416_v63 = vsel %vm2136_vm6, %v2233_v47, %v2235_v49  ;;  %v13594_v49 = vld [vmem:[#allocation19_spill] sm:$0xff]  ;;  %v13595_v43 = vld [vmem:[#allocation20_spill] sm:$0xff] }
  0xdb   : > { %8262 = vmatmul.mubr.msk.f32.gmra.mxu0 %vm434_vm4, %v10343_v46  ;;  %8506 = vmatprep.subr.msk.mxu1 %vm738_vm3, %v10350_v19  ;;  %13587 = vst [vmem:[#allocation8_spill] sm:$0xff] %v10416_v63  ;;  %v10423_v8 = vsel %vm2136_vm6, %v2237_v51, %v2238_v3  ;;  %v2242_v50 = vrot.slane %v9535_v60, 2  ;;  %v10437_v24 = vsel %vm2136_vm6, %v2162_v58, %v2163_v54  ;;  %v2167_v51 = vrot.slane %v13594_v49, 2 }
  0xdc   : > { %8312 = vmatmul.mubr.msk.f32.gmra.mxu1 %vm434_vm4, %v10357_v11  ;;  %8264 = vmatprep.mubr.msk.f32.mxu0 %vm434_vm4, %v10360_v36  ;;  %v10397_v0 = vsel %vm2136_vm6, %v2232_v5, %v2233_v47  ;;  %v10419_v5 = vsel %vm2136_vm6, %v2157_v42, %v2158_v16  ;;  %13589 = vst [vmem:[#allocation6_spill] sm:$0xff] %v10423_v8  ;;  %13592 = vst [vmem:[#allocation26_spill] sm:$0xff] %v10437_v24  ;;  %v2165_v47 = vrot.slane %v9954_v56, 2 }
  0xdd   : > { %8314 = vmatprep.mubr.msk.f32.mxu1 %vm434_vm4, %v10367_v20  ;;  %13583 = vst [vmem:[#allocation9_spill] sm:$0xff] %v10397_v0  ;;  %13588 = vst [vmem:[#allocation10_spill] sm:$0xff] %v10419_v5  ;;  %v10434_v17 = vsel %vm2136_vm6, %v2158_v16, %v2160_v59  ;;  %v10443_v60 = vsel %vm2136_vm6, %v2238_v3, %v2240_v9  ;;  %v2245_v42 = vrot.slane %v9961_v4, 2  ;;  %v2168_v21 = vrot.slane %v13595_v43, 2  ;;  %v13598_v4 = vld [vmem:[#allocation66_spill] sm:$0xff]  ;;  %v13602_v43 = vld [vmem:[#allocation21_spill] sm:$0xff] }
  0xde   : > { %13591 = vst [vmem:[#allocation7_spill] sm:$0xff] %v10434_v17  ;;  %13593 = vst [vmem:[#allocation28_spill] sm:$0xff] %v10443_v60  ;;  %v10449_v16 = vsel %vm2136_vm6, %v2242_v50, %v2243_v48  ;;  %v2247_v59 = vrot.slane %v9574_v18, 2  ;;  %v2248_v58 = vrot.slane %v9613_v33, 2  ;;  %v10460_v56 = vsel %vm2136_vm6, %v2163_v54, %v2165_v47 }
  0xdf   : > { %8265 = vmatmul.mubr.msk.f32.gmra.mxu0 %vm434_vm4, %v10382_v53  ;;  %13596 = vst [vmem:[#allocation13_spill] sm:$0xff] %v10449_v16  ;;  %13597 = vst [vmem:[#allocation12_spill] sm:$0xff] %v10460_v56  ;;  %v2170_v3 = vrot.slane %v13598_v4, 2  ;;  %v2172_v9 = vrot.slane %v9621_v37, 2  ;;  %v10467_v18 = vsel %vm2136_vm6, %v2243_v48, %v2245_v42  ;;  %v10470_v33 = vsel %vm2136_vm6, %v2167_v51, %v2168_v21  ;;  %v13606_v51 = vld [vmem:[#allocation22_spill] sm:$0xff] }
  0xe0   : > { %8315 = vmatmul.mubr.msk.f32.gmra.mxu1 %vm434_vm4, %v10389_v1  ;;  %8267 = vmatprep.mubr.msk.f32.mxu0 %vm434_vm4, %v10392_v28  ;;  %13599 = vst [vmem:[#allocation14_spill] sm:$0xff] %v10467_v18  ;;  %13600 = vst [vmem:[#allocation15_spill] sm:$0xff] %v10470_v33  ;;  %v2250_v50 = vrot.slane %v9991_v31, 2  ;;  %v2173_v49 = vrot.slane %v9633_v39, 2  ;;  %v10475_v54 = vsel %vm2136_vm6, %v2247_v59, %v2248_v58  ;;  %v2252_v47 = vrot.slane %v9619_v35, 2 }
  0xe1   : > { %8317 = vmatprep.mubr.msk.f32.mxu1 %vm434_vm4, %v10397_v0  ;;  %13601 = vst [vmem:[#allocation16_spill] sm:$0xff] %v10475_v54  ;;  %v2253_v37 = vrot.slane %v13602_v43, 2  ;;  %v10486_v31 = vsel %vm2136_vm6, %v2168_v21, %v2170_v3  ;;  %v2175_v39 = vrot.slane %v10014_v23, 2  ;;  %v2255_v48 = vrot.slane %v10021_v10, 2  ;;  %v13608_v3 = vld [vmem:[#allocation23_spill] sm:$0xff]  ;;  %v13685_v0 = vld [vmem:[#allocation60_spill] sm:$0xff] }
  0xe2   : > { %13603 = vst [vmem:[#allocation17_spill] sm:$0xff] %v10486_v31  ;;  %v10493_v35 = vsel %vm2136_vm6, %v2248_v58, %v2250_v50  ;;  %v10496_v42 = vsel %vm2136_vm6, %v2172_v9, %v2173_v49  ;;  %v2177_v59 = vrot.slane %v13606_v51, 2  ;;  %v2178_v4 = vrot.slane %v9645_v61, 2 }
  0xe3   : > { %8268 = vmatmul.mubr.msk.f32.gmra.mxu0 %vm434_vm4, %v10408_v22  ;;  %13604 = vst [vmem:[#allocation18_spill] sm:$0xff] %v10493_v35  ;;  %13605 = vst [vmem:[#allocation19_spill] sm:$0xff] %v10496_v42  ;;  %v10501_v21 = vsel %vm2136_vm6, %v2252_v47, %v2253_v37  ;;  %v2257_v23 = vrot.slane %v9635_v40, 2  ;;  %v2258_v10 = vrot.slane %v13608_v3, 2  ;;  %v10512_v58 = vsel %vm2136_vm6, %v2173_v49, %v2175_v39  ;;  %v13612_v47 = vld [vmem:[#allocation24_spill] sm:$0xff]  ;;  %v13614_v39 = vld [vmem:[#allocation25_spill] sm:$0xff] }
  0xe4   : > { %8318 = vmatmul.mubr.msk.f32.gmra.mxu1 %vm434_vm4, %v10416_v63  ;;  %8270 = vmatprep.mubr.msk.f32.mxu0 %vm434_vm4, %v10419_v5  ;;  %13607 = vst [vmem:[#allocation20_spill] sm:$0xff] %v10501_v21  ;;  %13609 = vst [vmem:[#allocation66_spill] sm:$0xff] %v10512_v58  ;;  %v10515_v61 = vsel %vm2136_vm6, %v2253_v37, %v2255_v48  ;;  %v2180_v9 = vrot.slane %v10044_v38, 2  ;;  %v10521_v40 = vsel %vm2136_vm6, %v2177_v59, %v2178_v4  ;;  %v13680_v5 = vld [vmem:[#allocation55_spill] sm:$0xff] }
  0xe5   : > { %8320 = vmatprep.mubr.msk.f32.mxu1 %vm434_vm4, %v10423_v8  ;;  %13610 = vst [vmem:[#allocation21_spill] sm:$0xff] %v10515_v61  ;;  %13611 = vst [vmem:[#allocation22_spill] sm:$0xff] %v10521_v40  ;;  %v2260_v50 = vrot.slane %v10051_v52, 2  ;;  %v2182_v43 = vrot.slane %v13612_v47, 2  ;;  %v2183_v51 = vrot.slane %v9707_v30, 2  ;;  %v10527_v49 = vsel %vm2136_vm6, %v2257_v23, %v2258_v10  ;;  %v13618_v23 = vld [vmem:[#allocation27_spill] sm:$0xff] }
  0xe6   : > { %13613 = vst [vmem:[#allocation23_spill] sm:$0xff] %v10527_v49  ;;  %v2262_v37 = vrot.slane %v9647_v62, 2  ;;  %v2263_v48 = vrot.slane %v13614_v39, 2  ;;  %v10538_v38 = vsel %vm2136_vm6, %v2178_v4, %v2180_v9  ;;  %v2185_v30 = vrot.slane %v10074_v44, 2  ;;  %v13620_v9 = vld [vmem:[#allocation29_spill] sm:$0xff]  ;;  %v13625_v39 = vld [vmem:[#allocation31_spill] sm:$0xff] }
  0xe7   : > { %8271 = vmatmul.mubr.msk.f32.gmra.mxu0 %vm434_vm4, %v10434_v17  ;;  %13615 = vst [vmem:[#allocation24_spill] sm:$0xff] %v10538_v38  ;;  %v2265_v52 = vrot.slane %v10081_v25, 2  ;;  %v10545_v62 = vsel %vm2136_vm6, %v2258_v10, %v2260_v50  ;;  %v10548_v59 = vsel %vm2136_vm6, %v2182_v43, %v2183_v51  ;;  %v2187_v3 = vrot.slane %v13618_v23, 2  ;;  %v13624_v43 = vld [vmem:[#allocation84_spill] sm:$0xff]  ;;  %v13676_v17 = vld [vmem:[#allocation51_spill] sm:$0xff] }
  0xe8   : > { %8321 = vmatmul.mubr.msk.f32.gmra.mxu1 %vm434_vm4, %v10443_v60  ;;  %8273 = vmatprep.mubr.msk.f32.mxu0 %vm434_vm4, %v10437_v24  ;;  %13616 = vst [vmem:[#allocation25_spill] sm:$0xff] %v10545_v62  ;;  %13617 = vst [vmem:[#allocation116_spill] sm:$0xff] %v10548_v59  ;;  %v2188_v47 = vrot.slane %v9735_v13, 2  ;;  %v10553_v4 = vsel %vm2136_vm6, %v2262_v37, %v2263_v48  ;;  %v2267_v44 = vrot.slane %v9709_v32, 2  ;;  %v2268_v25 = vrot.slane %v13620_v9, 2  ;;  %v13626_v9 = vld [vmem:[#allocation33_spill] sm:$0xff] }
  0xe9   : > { %8323 = vmatprep.mubr.msk.f32.mxu1 %vm434_vm4, %v10449_v16  ;;  %13619 = vst [vmem:[#allocation27_spill] sm:$0xff] %v10553_v4  ;;  %v10564_v10 = vsel %vm2136_vm6, %v2183_v51, %v2185_v30  ;;  %v10567_v13 = vsel %vm2136_vm6, %v2263_v48, %v2265_v52  ;;  %v2190_v50 = vrot.slane %v10104_v26, 2  ;;  %v2270_v37 = vrot.slane %v13624_v43, 2  ;;  %v13628_v30 = vld [vmem:[#allocation30_spill] sm:$0xff]  ;;  %v13629_v52 = vld [vmem:[#allocation32_spill] sm:$0xff]  ;;  %v13674_v16 = vld [vmem:[#allocation49_spill] sm:$0xff] }
  0xea   : > { %13621 = vst [vmem:[#allocation29_spill] sm:$0xff] %v10564_v10  ;;  %13622 = vst [vmem:[#allocation117_spill] sm:$0xff] %v10567_v13  ;;  %v10573_v32 = vsel %vm2136_vm6, %v2187_v3, %v2188_v47  ;;  %v2192_v23 = vrot.slane %v13625_v39, 2  ;;  %v10579_v51 = vsel %vm2136_vm6, %v2267_v44, %v2268_v25  ;;  %v2272_v48 = vrot.slane %v13628_v30, 2  ;;  %v13631_v3 = vld [vmem:[#allocation88_spill] sm:$0xff]  ;;  %v13632_v44 = vld [vmem:[#allocation90_spill] sm:$0xff] }
  0xeb   : > { %8274 = vmatmul.mubr.msk.f32.gmra.mxu0 %vm434_vm4, %v10460_v56  ;;  %13623 = vst [vmem:[#allocation118_spill] sm:$0xff] %v10573_v32  ;;  %13627 = vst [vmem:[#allocation84_spill] sm:$0xff] %v10579_v51  ;;  %v10590_v26 = vsel %vm2136_vm6, %v2188_v47, %v2190_v50  ;;  %v2195_v43 = vrot.slane %v13631_v3, 2  ;;  %v2275_v39 = vrot.slane %v13632_v44, 2  ;;  %v13638_v50 = vld [vmem:[#allocation34_spill] sm:$0xff] }
  0xec   : > { %8324 = vmatmul.mubr.msk.f32.gmra.mxu1 %vm434_vm4, %v10467_v18  ;;  %8276 = vmatprep.mubr.msk.f32.mxu0 %vm434_vm4, %v10470_v33  ;;  %13630 = vst [vmem:[#allocation31_spill] sm:$0xff] %v10590_v26  ;;  %v2277_v3 = vrot.slane %v13638_v50, 2  ;;  %v9023_v18 = vld [vmem:[#allocation2 + $0x170] sm:$0xff]  ;;  %v9024_v56 = vld [vmem:[#allocation3 + $0x170] sm:$0xff]  ;;  %v10894_v8 = vld [vmem:[%s13156_s2 + $0x18] sm:$0xf] }
  0xed   : > { %8326 = vmatprep.mubr.msk.f32.mxu1 %vm434_vm4, %v10475_v54  ;;  %v9020_v54 = vld [vmem:[#allocation3 + $0x158] sm:$0xff] }
  0xee   : > { %v13675_v24 = vld [vmem:[#allocation50_spill] sm:$0xff] }
  0xef   : > { %8277 = vmatmul.mubr.msk.f32.gmra.mxu0 %vm434_vm4, %v10486_v31  ;;  %v9019_v31 = vld [vmem:[#allocation2 + $0x158] sm:$0xff] }
  0xf0   : > { %8327 = vmatmul.mubr.msk.f32.gmra.mxu1 %vm434_vm4, %v10493_v35  ;;  %8279 = vmatprep.mubr.msk.f32.mxu0 %vm434_vm4, %v10496_v42  ;;  %v9015_v42 = vld [vmem:[#allocation2 + $0x140] sm:$0xff]  ;;  %v9016_v35 = vld [vmem:[#allocation3 + $0x140] sm:$0xff] }
  0xf1   : > { %8329 = vmatprep.mubr.msk.f32.mxu1 %vm434_vm4, %v10501_v21  ;;  %v9012_v21 = vld [vmem:[#allocation3 + $0x128] sm:$0xff] }
  0xf3   : > { %8280 = vmatmul.mubr.msk.f32.gmra.mxu0 %vm434_vm4, %v10512_v58  ;;  %v9011_v58 = vld [vmem:[#allocation2 + $0x128] sm:$0xff] }
  0xf4   : > { %8330 = vmatmul.mubr.msk.f32.gmra.mxu1 %vm434_vm4, %v10515_v61  ;;  %8282 = vmatprep.mubr.msk.f32.mxu0 %vm434_vm4, %v10521_v40  ;;  %v9007_v40 = vld [vmem:[#allocation2 + $0x110] sm:$0xff]  ;;  %v9008_v61 = vld [vmem:[#allocation3 + $0x110] sm:$0xff] }
  0xf5   : > { %8332 = vmatprep.mubr.msk.f32.mxu1 %vm434_vm4, %v10527_v49  ;;  %v9004_v49 = vld [vmem:[#allocation3 + $0xf8] sm:$0xff] }
  0xf7   : > { %8283 = vmatmul.mubr.msk.f32.gmra.mxu0 %vm434_vm4, %v10538_v38  ;;  %v9003_v38 = vld [vmem:[#allocation2 + $0xf8] sm:$0xff] }
  0xf8   : > { %8333 = vmatmul.mubr.msk.f32.gmra.mxu1 %vm434_vm4, %v10545_v62  ;;  %8285 = vmatprep.mubr.msk.f32.mxu0 %vm434_vm4, %v10548_v59  ;;  %v2193_v59 = vrot.slane %v13626_v9, 2  ;;  %v2273_v62 = vrot.slane %v13629_v52, 2  ;;  %v10597_v9 = vsel %vm2136_vm6, %v2268_v25, %v2270_v37  ;;  %v13635_v52 = vld [vmem:[#allocation35_spill] sm:$0xff]  ;;  %v13642_v37 = vld [vmem:[#allocation94_spill] sm:$0xff] }
  0xf9   : > { %8335 = vmatprep.mubr.msk.f32.mxu1 %vm434_vm4, %v10553_v4  ;;  %13633 = vst [vmem:[#allocation33_spill] sm:$0xff] %v10597_v9  ;;  %v13639_v4 = vld [vmem:[#allocation36_spill] sm:$0xff] }
  0xfa   : > { %v10600_v30 = vsel %vm2136_vm6, %v2192_v23, %v2193_v59  ;;  %v10605_v47 = vsel %vm2136_vm6, %v2272_v48, %v2273_v62  ;;  %v2278_v44 = vrot.slane %v13639_v4, 2  ;;  %v10616_v25 = vsel %vm2136_vm6, %v2193_v59, %v2195_v43  ;;  %v13647_v43 = vld [vmem:[#allocation38_spill] sm:$0xff] }
  0xfb   : > { %8286 = vmatmul.mubr.msk.f32.gmra.mxu0 %vm434_vm4, %v10564_v10  ;;  %13634 = vst [vmem:[#allocation30_spill] sm:$0xff] %v10600_v30  ;;  %v13636_v10 = vld [vmem:[#allocation37_spill] sm:$0xff]  ;;  %13637 = vst [vmem:[#allocation32_spill] sm:$0xff] %v10605_v47  ;;  %v2200_v23 = vrot.slane %v13642_v37, 2  ;;  %v2280_v48 = vrot.slane %v10171_v7, 2 }
  0xfc   : > { %8336 = vmatmul.mubr.msk.f32.gmra.mxu1 %vm434_vm4, %v10567_v13  ;;  %8288 = vmatprep.mubr.msk.f32.mxu0 %vm434_vm4, %v10573_v32  ;;  %v2197_v13 = vrot.slane %v13635_v52, 2  ;;  %v2198_v32 = vrot.slane %v13636_v10, 2  ;;  %13640 = vst [vmem:[#allocation88_spill] sm:$0xff] %v10616_v25  ;;  %v10619_v10 = vsel %vm2136_vm6, %v2273_v62, %v2275_v39  ;;  %v13644_v52 = vld [vmem:[#allocation39_spill] sm:$0xff]  ;;  %v10631_v59 = vsel %vm2136_vm6, %v2277_v3, %v2278_v44  ;;  %v13648_v39 = vld [vmem:[#allocation40_spill] sm:$0xff]  ;;  %v13651_v3 = vld [vmem:[#allocation101_spill] sm:$0xff] }
  0xfd   : > { %8338 = vmatprep.mubr.msk.f32.mxu1 %vm434_vm4, %v10579_v51  ;;  %13641 = vst [vmem:[#allocation90_spill] sm:$0xff] %v10619_v10  ;;  %v2202_v50 = vrot.slane %v13644_v52, 2  ;;  %13646 = vst [vmem:[#allocation37_spill] sm:$0xff] %v10631_v59  ;;  %v2282_v62 = vrot.slane %v13647_v43, 2  ;;  %v2285_v37 = vrot.slane %v13651_v3, 2  ;;  %v10649_v52 = vsel %vm2136_vm6, %v2278_v44, %v2280_v48  ;;  %v13661_v48 = vld [vmem:[#allocation105_spill] sm:$0xff] }
  0xfe   : > { %v10625_v4 = vsel %vm2136_vm6, %v2197_v13, %v2198_v32  ;;  %v10642_v7 = vsel %vm2136_vm6, %v2198_v32, %v2200_v23  ;;  %v13650_v13 = vld [vmem:[#allocation99_spill] sm:$0xff]  ;;  %13652 = vst [vmem:[#allocation36_spill] sm:$0xff] %v10649_v52  ;;  %v13657_v23 = vld [vmem:[#allocation42_spill] sm:$0xff] }
  0xff   : > { %8289 = vmatmul.mubr.msk.f32.gmra.mxu0 %vm434_vm4, %v10590_v26  ;;  %13643 = vst [vmem:[#allocation35_spill] sm:$0xff] %v10625_v4  ;;  %v2283_v26 = vrot.slane %v13648_v39, 2  ;;  %13649 = vst [vmem:[#allocation34_spill] sm:$0xff] %v10642_v7  ;;  %v13654_v39 = vld [vmem:[#allocation43_spill] sm:$0xff] }
 0x100   : > { %8339 = vmatmul.mubr.msk.f32.gmra.mxu1 %vm434_vm4, %v10597_v9  ;;  %8291 = vmatprep.mubr.msk.f32.mxu0 %vm434_vm4, %v10600_v30  ;;  %v13645_v9 = vld [vmem:[#allocation41_spill] sm:$0xff]  ;;  %v9000_v51 = vld [vmem:[#allocation3 + $0xe0] sm:$0xff] }
 0x101   : > { %8341 = vmatprep.mubr.msk.f32.mxu1 %vm434_vm4, %v10605_v47  ;;  %v2203_v30 = vrot.slane %v13645_v9, 2  ;;  %v2205_v9 = vrot.slane %v13650_v13, 2  ;;  %v10657_v32 = vsel %vm2136_vm6, %v2282_v62, %v2283_v26  ;;  %v2287_v13 = vrot.slane %v13657_v23, 2  ;;  %v13658_v47 = vld [vmem:[#allocation44_spill] sm:$0xff] }
 0x102   : > { %13656 = vst [vmem:[#allocation39_spill] sm:$0xff] %v10657_v32  ;;  %v2288_v3 = vrot.slane %v13658_v47, 2  ;;  %v2290_v62 = vrot.slane %v10231_v41, 2  ;;  %v13663_v23 = vld [vmem:[#allocation48_spill] sm:$0xff]  ;;  %v2215_v41 = vrot.slane %v10254_v14, 2 }
 0x103   : > { %8292 = vmatmul.mubr.msk.f32.gmra.mxu0 %vm434_vm4, %v10616_v25  ;;  %v10652_v43 = vsel %vm2136_vm6, %v2202_v50, %v2203_v30  ;;  %v13655_v25 = vld [vmem:[#allocation45_spill] sm:$0xff]  ;;  %v10668_v44 = vsel %vm2136_vm6, %v2203_v30, %v2205_v9  ;;  %v2210_v50 = vrot.slane %v13661_v48, 2  ;;  %v13665_v9 = vld [vmem:[#allocation47_spill] sm:$0xff] }
 0x104   : > { %8342 = vmatmul.mubr.msk.f32.gmra.mxu1 %vm434_vm4, %v10619_v10  ;;  %8294 = vmatprep.mubr.msk.f32.mxu0 %vm434_vm4, %v10625_v4  ;;  %13653 = vst [vmem:[#allocation94_spill] sm:$0xff] %v10652_v43  ;;  %v2207_v10 = vrot.slane %v13654_v39, 2  ;;  %v2208_v4 = vrot.slane %v13655_v25, 2  ;;  %13659 = vst [vmem:[#allocation41_spill] sm:$0xff] %v10668_v44  ;;  %v10671_v25 = vsel %vm2136_vm6, %v2283_v26, %v2285_v37  ;;  %v2212_v39 = vrot.slane %v9805_v27, 2 }
 0x105   : > { %8344 = vmatprep.mubr.msk.f32.mxu1 %vm434_vm4, %v10631_v59  ;;  %13660 = vst [vmem:[#allocation38_spill] sm:$0xff] %v10671_v25  ;;  %v10683_v30 = vsel %vm2136_vm6, %v2287_v13, %v2288_v3  ;;  %v2292_v26 = vrot.slane %v13563_v34, 2  ;;  %v2293_v37 = vrot.slane %v13665_v9, 2  ;;  %v10700_v34 = vsel %vm2136_vm6, %v2288_v3, %v2290_v62  ;;  %v8965_v62 = vld [vmem:[#allocation2 + $0x18] sm:$0xff]  ;;  %v8967_v9 = vld [vmem:[#allocation2 + $0x20] sm:$0xff] }
 0x106   : > { %v10677_v47 = vsel %vm2136_vm6, %v2207_v10, %v2208_v4  ;;  %13664 = vst [vmem:[#allocation99_spill] sm:$0xff] %v10683_v30  ;;  %v10694_v27 = vsel %vm2136_vm6, %v2208_v4, %v2210_v50  ;;  %13667 = vst [vmem:[#allocation43_spill] sm:$0xff] %v10700_v34  ;;  %v2295_v13 = vrot.slane %v10261_v6, 2  ;;  %v8999_v59 = vld [vmem:[#allocation2 + $0xe0] sm:$0xff] }
 0x107   : > { %8295 = vmatmul.mubr.msk.f32.gmra.mxu0 %vm434_vm4, %v10642_v7  ;;  %13662 = vst [vmem:[#allocation40_spill] sm:$0xff] %v10677_v47  ;;  %13666 = vst [vmem:[#allocation101_spill] sm:$0xff] %v10694_v27  ;;  %v10707_v48 = vsel %vm2136_vm6, %v2292_v26, %v2293_v37  ;;  %v8996_v7 = vld [vmem:[#allocation3 + $0xc8] sm:$0xff] }
 0x108   : > { %8345 = vmatmul.mubr.msk.f32.gmra.mxu1 %vm434_vm4, %v10649_v52  ;;  %8297 = vmatprep.mubr.msk.f32.mxu0 %vm434_vm4, %v10652_v43  ;;  %v2213_v43 = vrot.slane %v13663_v23, 2  ;;  %13669 = vst [vmem:[#allocation42_spill] sm:$0xff] %v10707_v48  ;;  %v10721_v6 = vsel %vm2136_vm6, %v2293_v37, %v2295_v13  ;;  %v8966_v23 = vld [vmem:[#allocation3 + $0x18] sm:$0xff]  ;;  %v10737_v37 = vld [vmem:[%s13156_s2 + $0x14] sm:$0xf] }
 0x109   : > { %8347 = vmatprep.mubr.msk.f32.mxu1 %vm434_vm4, %v10657_v32  ;;  %13671 = vst [vmem:[#allocation105_spill] sm:$0xff] %v10721_v6  ;;  %v10745_v13 = vld [vmem:[%s13157_s3 + $0x14] sm:$0xf]  ;;  %v8992_v32 = vld [vmem:[#allocation3 + $0xb0] sm:$0xff]  ;;  %v8995_v52 = vld [vmem:[#allocation2 + $0xc8] sm:$0xff] }
 0x10a   : > { %v10703_v10 = vsel %vm2136_vm6, %v2212_v39, %v2213_v43  ;;  %v10716_v14 = vsel %vm2136_vm6, %v2213_v43, %v2215_v41  ;;  %v8968_v41 = vld [vmem:[#allocation3 + $0x20] sm:$0xff] }
 0x10b   : > { %8298 = vmatmul.mubr.msk.f32.gmra.mxu0 %vm434_vm4, %v10668_v44  ;;  %13668 = vst [vmem:[#allocation45_spill] sm:$0xff] %v10703_v10  ;;  %13670 = vst [vmem:[#allocation44_spill] sm:$0xff] %v10716_v14  ;;  %v8991_v44 = vld [vmem:[#allocation2 + $0xb0] sm:$0xff] }
 0x10c   : > { %8348 = vmatmul.mubr.msk.f32.gmra.mxu1 %vm434_vm4, %v10671_v25  ;;  %8300 = vmatprep.mubr.msk.f32.mxu0 %vm434_vm4, %v10677_v47  ;;  %v8987_v47 = vld [vmem:[#allocation2 + $0x98] sm:$0xff]  ;;  %v8988_v25 = vld [vmem:[#allocation3 + $0x98] sm:$0xff] }
 0x10d   : > { %8350 = vmatprep.mubr.msk.f32.mxu1 %vm434_vm4, %v10683_v30  ;;  %v8984_v30 = vld [vmem:[#allocation3 + $0x80] sm:$0xff] }
 0x10f   : > { %8301 = vmatmul.mubr.msk.f32.gmra.mxu0 %vm434_vm4, %v10694_v27  ;;  %v8060_v4 = vpop.f32.mrf.mxu0  ;;  %v8110_v3 = vpop.f32.mrf.mxu1  ;;  %v8983_v27 = vld [vmem:[#allocation2 + $0x80] sm:$0xff] }
 0x110   : > { %8351 = vmatmul.mubr.msk.f32.gmra.mxu1 %vm434_vm4, %v10700_v34  ;;  %8303 = vmatprep.mubr.msk.f32.mxu0 %vm434_vm4, %v10703_v10  ;;  %v10725_v50 = vadd.f32 %v8110_v3, %v8060_v4  ;;  %v8969_v4 = vld [vmem:[#allocation2 + $0x30] sm:$0xff]  ;;  %v8970_v3 = vld [vmem:[#allocation3 + $0x30] sm:$0xff]  ;;  %v8979_v10 = vld [vmem:[#allocation2 + $0x68] sm:$0xff] }
 0x111   : > { %8353 = vmatprep.mubr.msk.f32.mxu1 %vm434_vm4, %v10707_v48  ;;  %v808_v43 = vpop.f32.mrf.mxu0  ;;  %v1132_v39 = vpop.f32.mrf.mxu1  ;;  %v8976_v48 = vld [vmem:[#allocation3 + $0x50] sm:$0xff]  ;;  %v8980_v34 = vld [vmem:[#allocation3 + $0x68] sm:$0xff] }
 0x112   : > { %v10731_v26 = vadd.f32 %v1132_v39, %v808_v43  ;;  %v8971_v43 = vld [vmem:[#allocation2 + $0x38] sm:$0xff]  ;;  %v8972_v39 = vld [vmem:[#allocation3 + $0x38] sm:$0xff] }
 0x113   : > { %8304 = vmatmul.mubr.msk.f32.gmra.mxu0 %vm434_vm4, %v10716_v14 }
 0x114   : > { %8354 = vmatmul.mubr.msk.f32.gmra.mxu1 %vm434_vm4, %v10721_v6  ;;  %8358 = vmatprep.mubr.msk.f32.mxu0 %vm434_vm4, %v8965_v62  ;;  %v8975_v6 = vld [vmem:[#allocation2 + $0x50] sm:$0xff] }
 0x115   : > { %8408 = vmatprep.mubr.msk.f32.mxu1 %vm434_vm4, %v8966_v23 }
 0x117   : > { %8359 = vmatmul.mubr.msk.f32.vlgmr.msra.gmra.mxu0 %vm434_vm4, %v8967_v9 }
 0x118   : > { %8409 = vmatmul.mubr.msk.f32.vlgmr.msra.gmra.mxu1 %vm434_vm4, %v8968_v41  ;;  %8457 = vmatpush3.msk.msra.mxu0 %vm738_vm3, %v10336_v15  ;;  %v8974_v41 = vld [vmem:[#allocation3 + $0x48] sm:$0xff] }
 0x119   : > { %8507 = vmatpush3.msk.msra.mxu1 %vm738_vm3, %v10350_v19  ;;  %8361 = vmatprep.mubr.msk.f32.mxu0 %vm434_vm4, %v8969_v4  ;;  %v8973_v19 = vld [vmem:[#allocation2 + $0x48] sm:$0xff] }
 0x11a   : > { %8411 = vmatprep.mubr.msk.f32.mxu1 %vm434_vm4, %v8970_v3  ;;  %8556 = vmatprep.subr.msk.mxu0 %vm738_vm3, %v10737_v37  ;;  %v8063_v62 = vpop.f32.mrf.mxu0 }
 0x11b   : > { %8362 = vmatmul.mubr.msk.f32.gmra.mxu0 %vm434_vm4, %v8971_v43  ;;  %8606 = vmatprep.subr.msk.mxu1 %vm738_vm3, %v10745_v13 }
 0x11c   : > { %v8113_v15 = vpop.f32.mrf.mxu1  ;;  %8412 = vmatmul.mubr.msk.f32.gmra.mxu1 %vm434_vm4, %v8972_v39  ;;  %8364 = vmatprep.mubr.msk.f32.mxu0 %vm434_vm4, %v8973_v19  ;;  %v818_v9 = vpop.f32.mrf.mxu0  ;;  %v8977_v39 = vld [vmem:[#allocation2 + $0x60] sm:$0xff]  ;;  %v8978_v19 = vld [vmem:[#allocation3 + $0x60] sm:$0xff] }
 0x11d   : > { %v10758_v23 = vadd.f32 %v8113_v15, %v8063_v62  ;;  %8414 = vmatprep.mubr.msk.f32.mxu1 %vm434_vm4, %v8974_v41 }
 0x11e   : > { %v1142_v4 = vpop.f32.mrf.mxu1  ;;  %v8066_v43 = vpop.f32.mrf.mxu0 }
 0x11f   : > { %v10761_v3 = vadd.f32 %v1142_v4, %v818_v9  ;;  %8365 = vmatmul.mubr.msk.f32.gmra.mxu0 %vm434_vm4, %v8975_v6 }
 0x120   : > { %v8116_v14 = vpop.f32.mrf.mxu1  ;;  %8415 = vmatmul.mubr.msk.f32.gmra.mxu1 %vm434_vm4, %v8976_v48  ;;  %8367 = vmatprep.mubr.msk.f32.mxu0 %vm434_vm4, %v8977_v39  ;;  %v828_v15 = vpop.f32.mrf.mxu0  ;;  %v8981_v48 = vld [vmem:[#allocation2 + $0x78] sm:$0xff]  ;;  %v8982_v39 = vld [vmem:[#allocation3 + $0x78] sm:$0xff] }
 0x121   : > { %v10766_v62 = vadd.f32 %v8116_v14, %v8066_v43  ;;  %8417 = vmatprep.mubr.msk.f32.mxu1 %vm434_vm4, %v8978_v19 }
 0x122   : > { %v1152_v41 = vpop.f32.mrf.mxu1  ;;  %v8069_v4 = vpop.f32.mrf.mxu0 }
 0x123   : > { %v10769_v9 = vadd.f32 %v1152_v41, %v828_v15  ;;  %8368 = vmatmul.mubr.msk.f32.gmra.mxu0 %vm434_vm4, %v8979_v10 }
 0x124   : > { %v8119_v6 = vpop.f32.mrf.mxu1  ;;  %8418 = vmatmul.mubr.msk.f32.gmra.mxu1 %vm434_vm4, %v8980_v34  ;;  %8370 = vmatprep.mubr.msk.f32.mxu0 %vm434_vm4, %v8981_v48  ;;  %v838_v43 = vpop.f32.mrf.mxu0  ;;  %v8985_v34 = vld [vmem:[#allocation2 + $0x90] sm:$0xff]  ;;  %v8986_v48 = vld [vmem:[#allocation3 + $0x90] sm:$0xff] }
 0x125   : > { %v10774_v14 = vadd.f32 %v8119_v6, %v8069_v4  ;;  %8420 = vmatprep.mubr.msk.f32.mxu1 %vm434_vm4, %v8982_v39 }
 0x126   : > { %v1162_v19 = vpop.f32.mrf.mxu1  ;;  %v8072_v41 = vpop.f32.mrf.mxu0 }
 0x127   : > { %v10777_v15 = vadd.f32 %v1162_v19, %v838_v43  ;;  %8371 = vmatmul.mubr.msk.f32.gmra.mxu0 %vm434_vm4, %v8983_v27 }
 0x128   : > { %v8122_v10 = vpop.f32.mrf.mxu1  ;;  %8421 = vmatmul.mubr.msk.f32.gmra.mxu1 %vm434_vm4, %v8984_v30  ;;  %8373 = vmatprep.mubr.msk.f32.mxu0 %vm434_vm4, %v8985_v34  ;;  %v848_v6 = vpop.f32.mrf.mxu0  ;;  %v8989_v30 = vld [vmem:[#allocation2 + $0xa8] sm:$0xff]  ;;  %v8990_v34 = vld [vmem:[#allocation3 + $0xa8] sm:$0xff] }
 0x129   : > { %v10782_v4 = vadd.f32 %v8122_v10, %v8072_v41  ;;  %8423 = vmatprep.mubr.msk.f32.mxu1 %vm434_vm4, %v8986_v48 }
 0x12a   : > { %v1172_v39 = vpop.f32.mrf.mxu1  ;;  %v8075_v19 = vpop.f32.mrf.mxu0 }
 0x12b   : > { %v10785_v43 = vadd.f32 %v1172_v39, %v848_v6  ;;  %8374 = vmatmul.mubr.msk.f32.gmra.mxu0 %vm434_vm4, %v8987_v47 }
 0x12c   : > { %v8125_v27 = vpop.f32.mrf.mxu1  ;;  %8424 = vmatmul.mubr.msk.f32.gmra.mxu1 %vm434_vm4, %v8988_v25  ;;  %8376 = vmatprep.mubr.msk.f32.mxu0 %vm434_vm4, %v8989_v30  ;;  %v858_v10 = vpop.f32.mrf.mxu0  ;;  %v8993_v25 = vld [vmem:[#allocation2 + $0xc0] sm:$0xff]  ;;  %v8994_v30 = vld [vmem:[#allocation3 + $0xc0] sm:$0xff] }
 0x12d   : > { %v10790_v41 = vadd.f32 %v8125_v27, %v8075_v19  ;;  %8426 = vmatprep.mubr.msk.f32.mxu1 %vm434_vm4, %v8990_v34 }
 0x12e   : > { %v1182_v48 = vpop.f32.mrf.mxu1 }
 0x12f   : > { %v10793_v6 = vadd.f32 %v1182_v48, %v858_v10  ;;  %v8078_v39 = vpop.f32.mrf.mxu0  ;;  %8377 = vmatmul.mubr.msk.f32.gmra.mxu0 %vm434_vm4, %v8991_v44 }
 0x130   : > { %v8128_v47 = vpop.f32.mrf.mxu1  ;;  %8427 = vmatmul.mubr.msk.f32.gmra.mxu1 %vm434_vm4, %v8992_v32  ;;  %8379 = vmatprep.mubr.msk.f32.mxu0 %vm434_vm4, %v8993_v25  ;;  %v8997_v32 = vld [vmem:[#allocation2 + $0xd8] sm:$0xff]  ;;  %v8998_v25 = vld [vmem:[#allocation3 + $0xd8] sm:$0xff] }
 0x131   : > { %v10798_v19 = vadd.f32 %v8128_v47, %v8078_v39  ;;  %v868_v27 = vpop.f32.mrf.mxu0  ;;  %8429 = vmatprep.mubr.msk.f32.mxu1 %vm434_vm4, %v8994_v30 }
 0x132   : > { %v1192_v34 = vpop.f32.mrf.mxu1 }
 0x133   : > { %v10801_v10 = vadd.f32 %v1192_v34, %v868_v27  ;;  %v8081_v48 = vpop.f32.mrf.mxu0  ;;  %8380 = vmatmul.mubr.msk.f32.gmra.mxu0 %vm434_vm4, %v8995_v52 }
 0x134   : > { %v8131_v44 = vpop.f32.mrf.mxu1  ;;  %8430 = vmatmul.mubr.msk.f32.gmra.mxu1 %vm434_vm4, %v8996_v7  ;;  %8382 = vmatprep.mubr.msk.f32.mxu0 %vm434_vm4, %v8997_v32  ;;  %v9001_v7 = vld [vmem:[#allocation2 + $0xf0] sm:$0xff]  ;;  %v9002_v32 = vld [vmem:[#allocation3 + $0xf0] sm:$0xff] }
 0x135   : > { %v10806_v39 = vadd.f32 %v8131_v44, %v8081_v48  ;;  %v878_v47 = vpop.f32.mrf.mxu0  ;;  %8432 = vmatprep.mubr.msk.f32.mxu1 %vm434_vm4, %v8998_v25 }
 0x136   : > { %v1202_v30 = vpop.f32.mrf.mxu1 }
 0x137   : > { %v10809_v27 = vadd.f32 %v1202_v30, %v878_v47  ;;  %v8084_v34 = vpop.f32.mrf.mxu0  ;;  %8383 = vmatmul.mubr.msk.f32.gmra.mxu0 %vm434_vm4, %v8999_v59 }
 0x138   : > { %v8134_v52 = vpop.f32.mrf.mxu1  ;;  %8433 = vmatmul.mubr.msk.f32.gmra.mxu1 %vm434_vm4, %v9000_v51  ;;  %8385 = vmatprep.mubr.msk.f32.mxu0 %vm434_vm4, %v9001_v7  ;;  %v9005_v51 = vld [vmem:[#allocation2 + $0x108] sm:$0xff]  ;;  %v9006_v7 = vld [vmem:[#allocation3 + $0x108] sm:$0xff] }
 0x139   : > { %v10814_v48 = vadd.f32 %v8134_v52, %v8084_v34  ;;  %v888_v44 = vpop.f32.mrf.mxu0  ;;  %8435 = vmatprep.mubr.msk.f32.mxu1 %vm434_vm4, %v9002_v32 }
 0x13a   : > { %v1212_v25 = vpop.f32.mrf.mxu1 }
 0x13b   : > { %v10817_v47 = vadd.f32 %v1212_v25, %v888_v44  ;;  %v8087_v30 = vpop.f32.mrf.mxu0  ;;  %8386 = vmatmul.mubr.msk.f32.gmra.mxu0 %vm434_vm4, %v9003_v38 }
 0x13c   : > { %v8137_v59 = vpop.f32.mrf.mxu1  ;;  %8436 = vmatmul.mubr.msk.f32.gmra.mxu1 %vm434_vm4, %v9004_v49  ;;  %8388 = vmatprep.mubr.msk.f32.mxu0 %vm434_vm4, %v9005_v51  ;;  %v9009_v49 = vld [vmem:[#allocation2 + $0x120] sm:$0xff]  ;;  %v9010_v51 = vld [vmem:[#allocation3 + $0x120] sm:$0xff] }
 0x13d   : > { %v10822_v34 = vadd.f32 %v8137_v59, %v8087_v30  ;;  %v898_v52 = vpop.f32.mrf.mxu0  ;;  %8438 = vmatprep.mubr.msk.f32.mxu1 %vm434_vm4, %v9006_v7 }
 0x13e   : > { %v1222_v32 = vpop.f32.mrf.mxu1 }
 0x13f   : > { %v10825_v44 = vadd.f32 %v1222_v32, %v898_v52  ;;  %v8090_v25 = vpop.f32.mrf.mxu0  ;;  %8389 = vmatmul.mubr.msk.f32.gmra.mxu0 %vm434_vm4, %v9007_v40 }
 0x140   : > { %v8140_v38 = vpop.f32.mrf.mxu1  ;;  %8439 = vmatmul.mubr.msk.f32.gmra.mxu1 %vm434_vm4, %v9008_v61  ;;  %8391 = vmatprep.mubr.msk.f32.mxu0 %vm434_vm4, %v9009_v49  ;;  %v9013_v61 = vld [vmem:[#allocation2 + $0x138] sm:$0xff]  ;;  %v9014_v49 = vld [vmem:[#allocation3 + $0x138] sm:$0xff] }
 0x141   : > { %v10830_v30 = vadd.f32 %v8140_v38, %v8090_v25  ;;  %v908_v59 = vpop.f32.mrf.mxu0  ;;  %8441 = vmatprep.mubr.msk.f32.mxu1 %vm434_vm4, %v9010_v51 }
 0x142   : > { %v1232_v7 = vpop.f32.mrf.mxu1 }
 0x143   : > { %v10833_v52 = vadd.f32 %v1232_v7, %v908_v59  ;;  %v8093_v32 = vpop.f32.mrf.mxu0  ;;  %8392 = vmatmul.mubr.msk.f32.gmra.mxu0 %vm434_vm4, %v9011_v58 }
 0x144   : > { %v8143_v40 = vpop.f32.mrf.mxu1  ;;  %8442 = vmatmul.mubr.msk.f32.gmra.mxu1 %vm434_vm4, %v9012_v21  ;;  %8394 = vmatprep.mubr.msk.f32.mxu0 %vm434_vm4, %v9013_v61  ;;  %v9017_v21 = vld [vmem:[#allocation2 + $0x150] sm:$0xff]  ;;  %v9018_v61 = vld [vmem:[#allocation3 + $0x150] sm:$0xff] }
 0x145   : > { %v10838_v25 = vadd.f32 %v8143_v40, %v8093_v32  ;;  %v918_v38 = vpop.f32.mrf.mxu0  ;;  %8444 = vmatprep.mubr.msk.f32.mxu1 %vm434_vm4, %v9014_v49 }
 0x146   : > { %v1242_v51 = vpop.f32.mrf.mxu1 }
 0x147   : > { %v10841_v59 = vadd.f32 %v1242_v51, %v918_v38  ;;  %v8096_v7 = vpop.f32.mrf.mxu0  ;;  %8395 = vmatmul.mubr.msk.f32.gmra.mxu0 %vm434_vm4, %v9015_v42 }
 0x148   : > { %v8146_v58 = vpop.f32.mrf.mxu1  ;;  %8445 = vmatmul.mubr.msk.f32.gmra.mxu1 %vm434_vm4, %v9016_v35  ;;  %8397 = vmatprep.mubr.msk.f32.mxu0 %vm434_vm4, %v9017_v21  ;;  %v9021_v35 = vld [vmem:[#allocation2 + $0x168] sm:$0xff]  ;;  %v9022_v21 = vld [vmem:[#allocation3 + $0x168] sm:$0xff] }
 0x149   : > { %v10846_v32 = vadd.f32 %v8146_v58, %v8096_v7  ;;  %v928_v40 = vpop.f32.mrf.mxu0  ;;  %8447 = vmatprep.mubr.msk.f32.mxu1 %vm434_vm4, %v9018_v61  ;;  %v10857_v61 = vld [vmem:[#allocation2 + $0x180] sm:$0xff] }
 0x14a   : > { %v1252_v49 = vpop.f32.mrf.mxu1  ;;  %13672 = vst [vmem:[#allocation48_spill] sm:$0xff] %v10857_v61 }
 0x14b   : > { %v10849_v38 = vadd.f32 %v1252_v49, %v928_v40  ;;  %v8099_v51 = vpop.f32.mrf.mxu0  ;;  %8398 = vmatmul.mubr.msk.f32.gmra.mxu0 %vm434_vm4, %v9019_v31  ;;  %v10859_v49 = vld [vmem:[#allocation3 + $0x180] sm:$0xff] }
 0x14c   : > { %v8149_v42 = vpop.f32.mrf.mxu1  ;;  %8448 = vmatmul.mubr.msk.f32.gmra.mxu1 %vm434_vm4, %v9020_v54  ;;  %8400 = vmatprep.mubr.msk.f32.mxu0 %vm434_vm4, %v9021_v35 }
 0x14d   : > { %v10854_v7 = vadd.f32 %v8149_v42, %v8099_v51  ;;  %v938_v58 = vpop.f32.mrf.mxu0  ;;  %8450 = vmatprep.mubr.msk.f32.mxu1 %vm434_vm4, %v9022_v21  ;;  %v10867_v51 = vld [vmem:[#allocation2 + $0x188] sm:$0xff] }
 0x14e   : > { %v1262_v40 = vpop.f32.mrf.mxu1  ;;  %13673 = vst [vmem:[#allocation47_spill] sm:$0xff] %v10867_v51 }
 0x14f   : > { %v10861_v33 = vadd.f32 %v1262_v40, %v938_v58  ;;  %v8102_v31 = vpop.f32.mrf.mxu0  ;;  %8401 = vmatmul.mubr.msk.f32.gmra.mxu0 %vm434_vm4, %v9023_v18  ;;  %v10873_v58 = vld [vmem:[#allocation3 + $0x188] sm:$0xff] }
 0x150   : > { %v8152_v54 = vpop.f32.mrf.mxu1  ;;  %8451 = vmatmul.mubr.msk.f32.gmra.mxu1 %vm434_vm4, %v9024_v56  ;;  %8403 = vmatprep.mubr.msk.f32.mxu0 %vm434_vm4, %v10857_v61 }
 0x151   : > { %v10869_v42 = vadd.f32 %v8152_v54, %v8102_v31  ;;  %v948_v35 = vpop.f32.mrf.mxu0  ;;  %8453 = vmatprep.mubr.msk.f32.mxu1 %vm434_vm4, %v10859_v49 }
 0x152   : > { %v1272_v21 = vpop.f32.mrf.mxu1 }
 0x153   : > { %v10875_v40 = vadd.f32 %v1272_v21, %v948_v35  ;;  %v8105_v18 = vpop.f32.mrf.mxu0  ;;  %8404 = vmatmul.mubr.msk.f32.gmra.mxu0 %vm434_vm4, %v10867_v51 }
 0x154   : > { %v8155_v56 = vpop.f32.mrf.mxu1  ;;  %8454 = vmatmul.mubr.msk.f32.gmra.mxu1 %vm434_vm4, %v10873_v58  ;;  %8458 = vmatprep.mubr.msk.f32.mxu0 %vm434_vm4, %v13674_v16 }
 0x155   : > { %v10883_v31 = vadd.f32 %v8155_v56, %v8105_v18  ;;  %v958_v54 = vpop.f32.mrf.mxu0  ;;  %8508 = vmatprep.mubr.msk.f32.mxu1 %vm434_vm4, %v13675_v24  ;;  %v13677_v56 = vld [vmem:[#allocation52_spill] sm:$0xff] }
 0x156   : > { %v1282_v60 = vpop.f32.mrf.mxu1  ;;  %v10904_v24 = vld [vmem:[%s13157_s3 + $0x18] sm:$0xf] }
 0x157   : > { %v10887_v35 = vadd.f32 %v1282_v60, %v958_v54  ;;  %v8160_v21 = vpop.f32.mrf.mxu0  ;;  %8459 = vmatmul.mubr.msk.f32.vlgmr.msra.gmra.mxu0 %vm434_vm4, %v13676_v17  ;;  %v13678_v60 = vld [vmem:[#allocation53_spill] sm:$0xff] }
 0x158   : > { %v1779_v16 = vadd.f32 %v8160_v21, %v10725_v50  ;;  %v8210_v18 = vpop.f32.mrf.mxu1  ;;  %8509 = vmatmul.mubr.msk.f32.vlgmr.msra.gmra.mxu1 %vm434_vm4, %v13677_v56  ;;  %8557 = vmatpush3.msk.msra.mxu0 %vm738_vm3, %v10737_v37  ;;  %v13679_v56 = vld [vmem:[#allocation54_spill] sm:$0xff] }
 0x159   : > { %v1619_v17 = vpop.f32.mrf.mxu0  ;;  %8607 = vmatpush3.msk.msra.mxu1 %vm738_vm3, %v10745_v13  ;;  %8461 = vmatprep.mubr.msk.f32.mxu0 %vm434_vm4, %v13678_v60  ;;  %v13683_v60 = vld [vmem:[#allocation58_spill] sm:$0xff] }
 0x15a   : > { %v10910_v50 = vadd.f32 %v8210_v18, %v1779_v16  ;;  %v1778_v54 = vadd.f32 %v1619_v17, %v10731_v26  ;;  %v1945_v21 = vpop.f32.mrf.mxu1  ;;  %8511 = vmatprep.mubr.msk.f32.mxu1 %vm434_vm4, %v13679_v56  ;;  %8656 = vmatprep.subr.msk.mxu0 %vm738_vm3, %v10894_v8  ;;  %v13681_v26 = vld [vmem:[#allocation56_spill] sm:$0xff]  ;;  %v13682_v17 = vld [vmem:[#allocation57_spill] sm:$0xff] }
 0x15b   : > { %v8163_v37 = vpop.f32.mrf.mxu0  ;;  %8462 = vmatmul.mubr.msk.f32.gmra.mxu0 %vm434_vm4, %v13680_v5  ;;  %8706 = vmatprep.subr.msk.mxu1 %vm738_vm3, %v10904_v24 }
 0x15c   : > { %v10921_v13 = vadd.f32 %v1945_v21, %v1778_v54  ;;  %v1781_v16 = vadd.f32 %v8163_v37, %v10758_v23  ;;  %v8213_v18 = vpop.f32.mrf.mxu1  ;;  %8512 = vmatmul.mubr.msk.f32.gmra.mxu1 %vm434_vm4, %v13681_v26  ;;  %8464 = vmatprep.mubr.msk.f32.mxu0 %vm434_vm4, %v13682_v17  ;;  %v13684_v21 = vld [vmem:[#allocation59_spill] sm:$0xff]  ;;  %v13686_v17 = vld [vmem:[#allocation61_spill] sm:$0xff] }
 0x15d   : > { %v1629_v56 = vpop.f32.mrf.mxu0  ;;  %8514 = vmatprep.mubr.msk.f32.mxu1 %vm434_vm4, %v13683_v60  ;;  %v13689_v60 = vld [vmem:[#allocation64_spill] sm:$0xff] }
 0x15e   : > { %v10930_v63 = vadd.f32 %v8213_v18, %v1781_v16  ;;  %v1780_v5 = vadd.f32 %v1629_v56, %v10761_v3  ;;  %v1955_v22 = vpop.f32.mrf.mxu1  ;;  %v13687_v18 = vld [vmem:[#allocation62_spill] sm:$0xff] }
 0x15f   : > { %v8166_v54 = vpop.f32.mrf.mxu0  ;;  %8465 = vmatmul.mubr.msk.f32.gmra.mxu0 %vm434_vm4, %v13684_v21 }
 0x160   : > { %v10935_v23 = vadd.f32 %v1955_v22, %v1780_v5  ;;  %v1783_v37 = vadd.f32 %v8166_v54, %v10766_v62  ;;  %v8216_v26 = vpop.f32.mrf.mxu1  ;;  %8515 = vmatmul.mubr.msk.f32.gmra.mxu1 %vm434_vm4, %v13685_v0  ;;  %8467 = vmatprep.mubr.msk.f32.mxu0 %vm434_vm4, %v13686_v17  ;;  %v13688_v5 = vld [vmem:[#allocation63_spill] sm:$0xff]  ;;  %v13690_v17 = vld [vmem:[#allocation65_spill] sm:$0xff] }
 0x161   : > { %v1639_v16 = vpop.f32.mrf.mxu0  ;;  %8517 = vmatprep.mubr.msk.f32.mxu1 %vm434_vm4, %v13687_v18  ;;  %v13693_v18 = vld [vmem:[#allocation70_spill] sm:$0xff] }
 0x162   : > { %v10944_v3 = vadd.f32 %v8216_v26, %v1783_v37  ;;  %v1782_v56 = vadd.f32 %v1639_v16, %v10769_v9  ;;  %v1965_v21 = vpop.f32.mrf.mxu1  ;;  %v13691_v37 = vld [vmem:[#allocation67_spill] sm:$0xff] }
 0x163   : > { %v8169_v22 = vpop.f32.mrf.mxu0  ;;  %8468 = vmatmul.mubr.msk.f32.gmra.mxu0 %vm434_vm4, %v13688_v5 }
 0x164   : > { %v10949_v62 = vadd.f32 %v1965_v21, %v1782_v56  ;;  %v1785_v54 = vadd.f32 %v8169_v22, %v10774_v14  ;;  %v8219_v0 = vpop.f32.mrf.mxu1  ;;  %8518 = vmatmul.mubr.msk.f32.gmra.mxu1 %vm434_vm4, %v13689_v60  ;;  %8470 = vmatprep.mubr.msk.f32.mxu0 %vm434_vm4, %v13690_v17  ;;  %v13692_v56 = vld [vmem:[#allocation68_spill] sm:$0xff]  ;;  %v13694_v17 = vld [vmem:[#allocation69_spill] sm:$0xff] }
 0x165   : > { %v1649_v26 = vpop.f32.mrf.mxu0  ;;  %8520 = vmatprep.mubr.msk.f32.mxu1 %vm434_vm4, %v13691_v37  ;;  %v13697_v37 = vld [vmem:[#allocation73_spill] sm:$0xff] }
 0x166   : > { %v10958_v9 = vadd.f32 %v8219_v0, %v1785_v54  ;;  %v1784_v16 = vadd.f32 %v1649_v26, %v10777_v15  ;;  %v1975_v5 = vpop.f32.mrf.mxu1  ;;  %v13695_v54 = vld [vmem:[#allocation71_spill] sm:$0xff] }
 0x167   : > { %v8172_v21 = vpop.f32.mrf.mxu0  ;;  %8471 = vmatmul.mubr.msk.f32.gmra.mxu0 %vm434_vm4, %v13692_v56 }
 0x168   : > { %v10963_v14 = vadd.f32 %v1975_v5, %v1784_v16  ;;  %v1787_v22 = vadd.f32 %v8172_v21, %v10782_v4  ;;  %v8222_v60 = vpop.f32.mrf.mxu1  ;;  %8521 = vmatmul.mubr.msk.f32.gmra.mxu1 %vm434_vm4, %v13693_v18  ;;  %8473 = vmatprep.mubr.msk.f32.mxu0 %vm434_vm4, %v13694_v17  ;;  %v13696_v16 = vld [vmem:[#allocation72_spill] sm:$0xff]  ;;  %v13698_v17 = vld [vmem:[#allocation74_spill] sm:$0xff] }
 0x169   : > { %v1659_v0 = vpop.f32.mrf.mxu0  ;;  %8523 = vmatprep.mubr.msk.f32.mxu1 %vm434_vm4, %v13695_v54  ;;  %v13701_v54 = vld [vmem:[#allocation77_spill] sm:$0xff] }
 0x16a   : > { %v10972_v15 = vadd.f32 %v8222_v60, %v1787_v22  ;;  %v1786_v26 = vadd.f32 %v1659_v0, %v10785_v43  ;;  %v1985_v56 = vpop.f32.mrf.mxu1  ;;  %v13699_v22 = vld [vmem:[#allocation75_spill] sm:$0xff] }
 0x16b   : > { %v8175_v5 = vpop.f32.mrf.mxu0  ;;  %8474 = vmatmul.mubr.msk.f32.gmra.mxu0 %vm434_vm4, %v13696_v16 }
 0x16c   : > { %v10977_v4 = vadd.f32 %v1985_v56, %v1786_v26  ;;  %v1789_v21 = vadd.f32 %v8175_v5, %v10790_v41  ;;  %v8225_v18 = vpop.f32.mrf.mxu1  ;;  %8524 = vmatmul.mubr.msk.f32.gmra.mxu1 %vm434_vm4, %v13697_v37  ;;  %8476 = vmatprep.mubr.msk.f32.mxu0 %vm434_vm4, %v13698_v17  ;;  %v13700_v26 = vld [vmem:[#allocation76_spill] sm:$0xff]  ;;  %v13702_v17 = vld [vmem:[#allocation78_spill] sm:$0xff] }
 0x16d   : > { %v1669_v60 = vpop.f32.mrf.mxu0  ;;  %8526 = vmatprep.mubr.msk.f32.mxu1 %vm434_vm4, %v13699_v22  ;;  %v13705_v22 = vld [vmem:[#allocation81_spill] sm:$0xff] }
 0x16e   : > { %v10986_v43 = vadd.f32 %v8225_v18, %v1789_v21  ;;  %v1788_v0 = vadd.f32 %v1669_v60, %v10793_v6  ;;  %v1995_v16 = vpop.f32.mrf.mxu1  ;;  %v13703_v21 = vld [vmem:[#allocation79_spill] sm:$0xff] }
 0x16f   : > { %v8178_v56 = vpop.f32.mrf.mxu0  ;;  %8477 = vmatmul.mubr.msk.f32.gmra.mxu0 %vm434_vm4, %v13700_v26 }
 0x170   : > { %v10991_v41 = vadd.f32 %v1995_v16, %v1788_v0  ;;  %v1791_v5 = vadd.f32 %v8178_v56, %v10798_v19  ;;  %v8228_v37 = vpop.f32.mrf.mxu1  ;;  %8527 = vmatmul.mubr.msk.f32.gmra.mxu1 %vm434_vm4, %v13701_v54  ;;  %8479 = vmatprep.mubr.msk.f32.mxu0 %vm434_vm4, %v13702_v17  ;;  %v13704_v0 = vld [vmem:[#allocation80_spill] sm:$0xff]  ;;  %v13706_v17 = vld [vmem:[#allocation82_spill] sm:$0xff] }
 0x171   : > { %v1679_v18 = vpop.f32.mrf.mxu0  ;;  %8529 = vmatprep.mubr.msk.f32.mxu1 %vm434_vm4, %v13703_v21  ;;  %v13709_v21 = vld [vmem:[#allocation86_spill] sm:$0xff] }
 0x172   : > { %v11000_v6 = vadd.f32 %v8228_v37, %v1791_v5  ;;  %v1790_v60 = vadd.f32 %v1679_v18, %v10801_v10  ;;  %v2005_v26 = vpop.f32.mrf.mxu1  ;;  %v13707_v5 = vld [vmem:[#allocation83_spill] sm:$0xff] }
 0x173   : > { %v8181_v16 = vpop.f32.mrf.mxu0  ;;  %8480 = vmatmul.mubr.msk.f32.gmra.mxu0 %vm434_vm4, %v13704_v0 }
 0x174   : > { %v11005_v19 = vadd.f32 %v2005_v26, %v1790_v60  ;;  %v1793_v56 = vadd.f32 %v8181_v16, %v10806_v39  ;;  %v8231_v54 = vpop.f32.mrf.mxu1  ;;  %8530 = vmatmul.mubr.msk.f32.gmra.mxu1 %vm434_vm4, %v13705_v22  ;;  %8482 = vmatprep.mubr.msk.f32.mxu0 %vm434_vm4, %v13706_v17  ;;  %v13708_v60 = vld [vmem:[#allocation85_spill] sm:$0xff]  ;;  %v13710_v17 = vld [vmem:[#allocation87_spill] sm:$0xff] }
 0x175   : > { %v1689_v37 = vpop.f32.mrf.mxu0  ;;  %8532 = vmatprep.mubr.msk.f32.mxu1 %vm434_vm4, %v13707_v5  ;;  %v13713_v5 = vld [vmem:[#allocation92_spill] sm:$0xff] }
 0x176   : > { %v11014_v10 = vadd.f32 %v8231_v54, %v1793_v56  ;;  %v1792_v18 = vadd.f32 %v1689_v37, %v10809_v27  ;;  %v2015_v0 = vpop.f32.mrf.mxu1  ;;  %v13711_v56 = vld [vmem:[#allocation89_spill] sm:$0xff] }
 0x177   : > { %v8184_v26 = vpop.f32.mrf.mxu0  ;;  %8483 = vmatmul.mubr.msk.f32.gmra.mxu0 %vm434_vm4, %v13708_v60 }
 0x178   : > { %v11019_v39 = vadd.f32 %v2015_v0, %v1792_v18  ;;  %v1795_v16 = vadd.f32 %v8184_v26, %v10814_v48  ;;  %v8234_v22 = vpop.f32.mrf.mxu1  ;;  %8533 = vmatmul.mubr.msk.f32.gmra.mxu1 %vm434_vm4, %v13709_v21  ;;  %8485 = vmatprep.mubr.msk.f32.mxu0 %vm434_vm4, %v13710_v17  ;;  %v13712_v18 = vld [vmem:[#allocation91_spill] sm:$0xff]  ;;  %v13714_v17 = vld [vmem:[#allocation93_spill] sm:$0xff] }
 0x179   : > { %v1699_v54 = vpop.f32.mrf.mxu0  ;;  %8535 = vmatprep.mubr.msk.f32.mxu1 %vm434_vm4, %v13711_v56  ;;  %v13717_v56 = vld [vmem:[#allocation98_spill] sm:$0xff] }
 0x17a   : > { %v11028_v27 = vadd.f32 %v8234_v22, %v1795_v16  ;;  %v1794_v37 = vadd.f32 %v1699_v54, %v10817_v47  ;;  %v2025_v60 = vpop.f32.mrf.mxu1  ;;  %v13715_v16 = vld [vmem:[#allocation95_spill] sm:$0xff] }
 0x17b   : > { %v8187_v0 = vpop.f32.mrf.mxu0  ;;  %8486 = vmatmul.mubr.msk.f32.gmra.mxu0 %vm434_vm4, %v13712_v18 }
 0x17c   : > { %v11033_v48 = vadd.f32 %v2025_v60, %v1794_v37  ;;  %v1797_v26 = vadd.f32 %v8187_v0, %v10822_v34  ;;  %v8237_v21 = vpop.f32.mrf.mxu1  ;;  %8536 = vmatmul.mubr.msk.f32.gmra.mxu1 %vm434_vm4, %v13713_v5  ;;  %8488 = vmatprep.mubr.msk.f32.mxu0 %vm434_vm4, %v13714_v17  ;;  %v13716_v37 = vld [vmem:[#allocation96_spill] sm:$0xff]  ;;  %v13718_v17 = vld [vmem:[#allocation97_spill] sm:$0xff] }
 0x17d   : > { %v1709_v22 = vpop.f32.mrf.mxu0  ;;  %8538 = vmatprep.mubr.msk.f32.mxu1 %vm434_vm4, %v13715_v16  ;;  %v13721_v16 = vld [vmem:[#allocation103_spill] sm:$0xff] }
 0x17e   : > { %v11042_v47 = vadd.f32 %v8237_v21, %v1797_v26  ;;  %v1796_v54 = vadd.f32 %v1709_v22, %v10825_v44  ;;  %v2035_v18 = vpop.f32.mrf.mxu1  ;;  %v13719_v26 = vld [vmem:[#allocation100_spill] sm:$0xff] }
 0x17f   : > { %v8190_v60 = vpop.f32.mrf.mxu0  ;;  %8489 = vmatmul.mubr.msk.f32.gmra.mxu0 %vm434_vm4, %v13716_v37 }
 0x180   : > { %v11047_v34 = vadd.f32 %v2035_v18, %v1796_v54  ;;  %v1799_v0 = vadd.f32 %v8190_v60, %v10830_v30  ;;  %v8240_v5 = vpop.f32.mrf.mxu1  ;;  %8539 = vmatmul.mubr.msk.f32.gmra.mxu1 %vm434_vm4, %v13717_v56  ;;  %8491 = vmatprep.mubr.msk.f32.mxu0 %vm434_vm4, %v13718_v17  ;;  %v13720_v54 = vld [vmem:[#allocation102_spill] sm:$0xff]  ;;  %v13722_v17 = vld [vmem:[#allocation104_spill] sm:$0xff] }
 0x181   : > { %v1719_v21 = vpop.f32.mrf.mxu0  ;;  %8541 = vmatprep.mubr.msk.f32.mxu1 %vm434_vm4, %v13719_v26 }
 0x182   : > { %v11056_v44 = vadd.f32 %v8240_v5, %v1799_v0  ;;  %v1798_v22 = vadd.f32 %v1719_v21, %v10833_v52  ;;  %v2045_v37 = vpop.f32.mrf.mxu1  ;;  %v13723_v0 = vld [vmem:[#allocation106_spill] sm:$0xff] }
 0x183   : > { %v8193_v18 = vpop.f32.mrf.mxu0  ;;  %8492 = vmatmul.mubr.msk.f32.gmra.mxu0 %vm434_vm4, %v13720_v54 }
 0x184   : > { %v11061_v30 = vadd.f32 %v2045_v37, %v1798_v22  ;;  %v1801_v60 = vadd.f32 %v8193_v18, %v10838_v25  ;;  %v8243_v56 = vpop.f32.mrf.mxu1  ;;  %8542 = vmatmul.mubr.msk.f32.gmra.mxu1 %vm434_vm4, %v13721_v16  ;;  %8494 = vmatprep.mubr.msk.f32.mxu0 %vm434_vm4, %v13722_v17  ;;  %v13724_v17 = vld [vmem:[#allocation108_spill] sm:$0xff]  ;;  %v13727_v16 = vld [vmem:[#allocation46_spill] sm:$0xff] }
 0x185   : > { %v1729_v5 = vpop.f32.mrf.mxu0  ;;  %8544 = vmatprep.mubr.msk.f32.mxu1 %vm434_vm4, %v13723_v0 }
 0x186   : > { %v11070_v52 = vadd.f32 %v8243_v56, %v1801_v60  ;;  %v1800_v21 = vadd.f32 %v1729_v5, %v10841_v59  ;;  %v2055_v54 = vpop.f32.mrf.mxu1  ;;  %v3486_v56 = vrot.slane %v10857_v61, 1  ;;  %v13725_v59 = vld [vmem:[#allocation110_spill] sm:$0xff]  ;;  %v3487_v5 = vrot.slane %v10867_v51, 1  ;;  %v13728_v61 = vld [vmem:[#allocation111_spill] sm:$0xff] }
 0x187   : > { %v8196_v37 = vpop.f32.mrf.mxu0  ;;  %8495 = vmatmul.mubr.msk.f32.gmra.mxu0 %vm434_vm4, %v10240_v55  ;;  %v11086_v55 = vld [vmem:[#allocation2 + $0x190] sm:$0x3] }
 0x188   : > { %v11075_v25 = vadd.f32 %v2055_v54, %v1800_v21  ;;  %v1803_v22 = vadd.f32 %v8196_v37, %v10846_v32  ;;  %v8246_v18 = vpop.f32.mrf.mxu1  ;;  %8545 = vmatmul.mubr.msk.f32.gmra.mxu1 %vm434_vm4, %v10249_v57  ;;  %8497 = vmatprep.mubr.msk.f32.mxu0 %vm434_vm4, %v13724_v17  ;;  %13726 = vst [vmem:[#allocation49_spill] sm:$0xff] %v11086_v55  ;;  %v3492_v54 = vrot.slane %v10859_v49, 1  ;;  %v3493_v57 = vrot.slane %v10873_v58, 1  ;;  %v11093_v17 = vld [vmem:[#allocation3 + $0x190] sm:$0x3] }
 0x189   : > { %v1739_v60 = vpop.f32.mrf.mxu0  ;;  %8547 = vmatprep.mubr.msk.f32.mxu1 %vm434_vm4, %v13725_v59 }
 0x18a   : > { %v11089_v32 = vadd.f32 %v8246_v18, %v1803_v22  ;;  %v1802_v21 = vadd.f32 %v1739_v60, %v10849_v38  ;;  %v2065_v37 = vpop.f32.mrf.mxu1  ;;  %v3489_v38 = vrot.slane %v11086_v55, 1  ;;  %v11108_v18 = vsel %vm1307_vm5, %v3486_v56, %v3487_v5  ;;  %v13730_v55 = vld [vmem:[#allocation115_spill] sm:$0xff] }
 0x18b   : > { %v8199_v0 = vpop.f32.mrf.mxu0  ;;  %8498 = vmatmul.mubr.msk.f32.gmra.mxu0 %vm434_vm4, %v13727_v16  ;;  %v3495_v60 = vrot.slane %v11093_v17, 1 }
 0x18c   : > { %v11097_v59 = vadd.f32 %v2065_v37, %v1802_v21  ;;  %v1805_v26 = vadd.f32 %v8199_v0, %v10854_v7  ;;  %v8249_v51 = vpop.f32.mrf.mxu1  ;;  %8548 = vmatmul.mubr.msk.f32.gmra.mxu1 %vm434_vm4, %v13728_v61  ;;  %8500 = vmatprep.mubr.msk.f32.mxu0 %vm434_vm4, %v10287_v45  ;;  %v11115_v37 = vsel %vm1307_vm5, %v3492_v54, %v3493_v57  ;;  %v13729_v61 = vld [vmem:[#allocation114_spill] sm:$0xff] }
 0x18d   : > { %v1749_v22 = vpop.f32.mrf.mxu0  ;;  %8550 = vmatprep.mubr.msk.f32.mxu1 %vm434_vm4, %v10291_v2 }
 0x18e   : > { %v11111_v21 = vadd.f32 %v8249_v51, %v1805_v26  ;;  %v1804_v7 = vadd.f32 %v1749_v22, %v10861_v33  ;;  %v2075_v0 = vpop.f32.mrf.mxu1  ;;  %v11127_v33 = vsel %vm1307_vm5, %v3487_v5, %v3489_v38  ;;  %v11132_v26 = vsel %vm1307_vm5, %v3493_v57, %v3495_v60 }
 0x18f   : > { %v8202_v45 = vpop.f32.mrf.mxu0  ;;  %8501 = vmatmul.mubr.msk.f32.gmra.mxu0 %vm434_vm4, %v13729_v61 }
 0x190   : > { %v11119_v16 = vadd.f32 %v2075_v0, %v1804_v7  ;;  %v1807_v2 = vadd.f32 %v8202_v45, %v10869_v42  ;;  %v8252_v56 = vpop.f32.mrf.mxu1  ;;  %8551 = vmatmul.mubr.msk.f32.gmra.mxu1 %vm434_vm4, %v13730_v55  ;;  %8503 = vmatprep.mubr.msk.f32.mxu0 %vm434_vm4, %v11108_v18 }
 0x191   : > { %v1759_v51 = vpop.f32.mrf.mxu0  ;;  %8553 = vmatprep.mubr.msk.f32.mxu1 %vm434_vm4, %v11115_v37 }
 0x192   : > { %v11134_v54 = vadd.f32 %v8252_v56, %v1807_v2  ;;  %v1806_v45 = vadd.f32 %v1759_v51, %v10875_v40  ;;  %v2085_v42 = vpop.f32.mrf.mxu1 }
 0x193   : > { %v8205_v22 = vpop.f32.mrf.mxu0  ;;  %8504 = vmatmul.mubr.msk.f32.gmra.mxu0 %vm434_vm4, %v11127_v33 }
 0x194   : > { %v11139_v7 = vadd.f32 %v2085_v42, %v1806_v45  ;;  %v1809_v5 = vadd.f32 %v8205_v22, %v10883_v31  ;;  %v8255_v38 = vpop.f32.mrf.mxu1  ;;  %8554 = vmatmul.mubr.msk.f32.gmra.mxu1 %vm434_vm4, %v11132_v26  ;;  %8558 = vmatprep.mubr.msk.f32.mxu0 %vm434_vm4, %v10324_v12  ;;  %v11156_v31 = vld [vmem:[%s13156_s2 + $0x1c] sm:$0xf] }
 0x195   : > { %v1769_v57 = vpop.f32.mrf.mxu0  ;;  %8608 = vmatprep.mubr.msk.f32.mxu1 %vm434_vm4, %v10331_v29  ;;  %v11168_v29 = vld [vmem:[%s13157_s3 + $0x1c] sm:$0xf] }
 0x196   : > { %v11148_v2 = vadd.f32 %v8255_v38, %v1809_v5  ;;  %v1808_v40 = vadd.f32 %v1769_v57, %v10887_v35  ;;  %v2095_v60 = vpop.f32.mrf.mxu1  ;;  %v13731_v22 = vld [vmem:[#allocation9_spill] sm:$0xff] }
 0x197   : > { %v8260_v0 = vpop.f32.mrf.mxu0  ;;  %8559 = vmatmul.mubr.msk.f32.vlgmr.msra.gmra.mxu0 %vm434_vm4, %v10343_v46 }
 0x198   : > { %v11158_v56 = vadd.f32 %v2095_v60, %v1808_v40  ;;  %v2592_v12 = vadd.f32 %v8260_v0, %v10910_v50  ;;  %v8310_v51 = vpop.f32.mrf.mxu1  ;;  %8609 = vmatmul.mubr.msk.f32.vlgmr.msra.gmra.mxu1 %vm434_vm4, %v10357_v11  ;;  %8657 = vmatpush3.msk.msra.mxu0 %vm738_vm3, %v10894_v8  ;;  %v13732_v60 = vld [vmem:[#allocation11_spill] sm:$0xff] }
 0x199   : > { %v2432_v46 = vpop.f32.mrf.mxu0  ;;  %8707 = vmatpush3.msk.msra.mxu1 %vm738_vm3, %v10904_v24  ;;  %8561 = vmatprep.mubr.msk.f32.mxu0 %vm434_vm4, %v10360_v36 }
 0x19a   : > { %v11174_v35 = vadd.f32 %v8310_v51, %v2592_v12  ;;  %v2591_v50 = vadd.f32 %v2432_v46, %v10921_v13  ;;  %v2758_v11 = vpop.f32.mrf.mxu1  ;;  %8611 = vmatprep.mubr.msk.f32.mxu1 %vm434_vm4, %v10367_v20  ;;  %8756 = vmatprep.subr.msk.mxu0 %vm738_vm3, %v11156_v31  ;;  %v13733_v51 = vld [vmem:[#allocation8_spill] sm:$0xff]  ;;  %v13734_v46 = vld [vmem:[#allocation10_spill] sm:$0xff] }
 0x19b   : > { %v8263_v8 = vpop.f32.mrf.mxu0  ;;  %8562 = vmatmul.mubr.msk.f32.gmra.mxu0 %vm434_vm4, %v10382_v53  ;;  %8806 = vmatprep.subr.msk.mxu1 %vm738_vm3, %v11168_v29 }
 0x19c   : > { %v11185_v24 = vadd.f32 %v2758_v11, %v2591_v50  ;;  %v2594_v45 = vadd.f32 %v8263_v8, %v10930_v63  ;;  %v8313_v42 = vpop.f32.mrf.mxu1  ;;  %8612 = vmatmul.mubr.msk.f32.gmra.mxu1 %vm434_vm4, %v10389_v1  ;;  %8564 = vmatprep.mubr.msk.f32.mxu0 %vm434_vm4, %v10392_v28  ;;  %v13735_v11 = vld [vmem:[#allocation6_spill] sm:$0xff] }
 0x19d   : > { %v2442_v13 = vpop.f32.mrf.mxu0  ;;  %8614 = vmatprep.mubr.msk.f32.mxu1 %vm434_vm4, %v13731_v22  ;;  %v13779_v22 = vld [vmem:[#allocation43_spill] sm:$0xff] }
 0x19e   : > { %v11194_v5 = vadd.f32 %v8313_v42, %v2594_v45  ;;  %v2593_v38 = vadd.f32 %v2442_v13, %v10935_v23  ;;  %v2768_v57 = vpop.f32.mrf.mxu1  ;;  %v13736_v13 = vld [vmem:[#allocation7_spill] sm:$0xff] }
 0x19f   : > { %v8266_v40 = vpop.f32.mrf.mxu0  ;;  %8565 = vmatmul.mubr.msk.f32.gmra.mxu0 %vm434_vm4, %v13732_v60  ;;  %v13778_v60 = vld [vmem:[#allocation101_spill] sm:$0xff] }
 0x1a0   : > { %v11199_v63 = vadd.f32 %v2768_v57, %v2593_v38  ;;  %v2596_v0 = vadd.f32 %v8266_v40, %v10944_v3  ;;  %v8316_v12 = vpop.f32.mrf.mxu1  ;;  %8615 = vmatmul.mubr.msk.f32.gmra.mxu1 %vm434_vm4, %v13733_v51  ;;  %8567 = vmatprep.mubr.msk.f32.mxu0 %vm434_vm4, %v13734_v46  ;;  %v13737_v40 = vld [vmem:[#allocation28_spill] sm:$0xff]  ;;  %v13738_v46 = vld [vmem:[#allocation26_spill] sm:$0xff] }
 0x1a1   : > { %v2452_v50 = vpop.f32.mrf.mxu0  ;;  %8617 = vmatprep.mubr.msk.f32.mxu1 %vm434_vm4, %v13735_v11  ;;  %v13741_v11 = vld [vmem:[#allocation14_spill] sm:$0xff] }
 0x1a2   : > { %v11208_v23 = vadd.f32 %v8316_v12, %v2596_v0  ;;  %v2595_v8 = vadd.f32 %v2452_v50, %v10949_v62  ;;  %v2778_v45 = vpop.f32.mrf.mxu1  ;;  %v13739_v12 = vld [vmem:[#allocation13_spill] sm:$0xff] }
 0x1a3   : > { %v8269_v42 = vpop.f32.mrf.mxu0  ;;  %8568 = vmatmul.mubr.msk.f32.gmra.mxu0 %vm434_vm4, %v13736_v13 }
 0x1a4   : > { %v11213_v3 = vadd.f32 %v2778_v45, %v2595_v8  ;;  %v2598_v38 = vadd.f32 %v8269_v42, %v10958_v9  ;;  %v8319_v57 = vpop.f32.mrf.mxu1  ;;  %8618 = vmatmul.mubr.msk.f32.gmra.mxu1 %vm434_vm4, %v13737_v40  ;;  %8570 = vmatprep.mubr.msk.f32.mxu0 %vm434_vm4, %v13738_v46  ;;  %v13740_v45 = vld [vmem:[#allocation12_spill] sm:$0xff]  ;;  %v13742_v46 = vld [vmem:[#allocation15_spill] sm:$0xff] }
 0x1a5   : > { %v2462_v0 = vpop.f32.mrf.mxu0  ;;  %8620 = vmatprep.mubr.msk.f32.mxu1 %vm434_vm4, %v13739_v12  ;;  %v13745_v12 = vld [vmem:[#allocation18_spill] sm:$0xff] }
 0x1a6   : > { %v11222_v62 = vadd.f32 %v8319_v57, %v2598_v38  ;;  %v2597_v50 = vadd.f32 %v2462_v0, %v10963_v14  ;;  %v2788_v13 = vpop.f32.mrf.mxu1  ;;  %v13743_v57 = vld [vmem:[#allocation16_spill] sm:$0xff] }
 0x1a7   : > { %v8272_v8 = vpop.f32.mrf.mxu0  ;;  %8571 = vmatmul.mubr.msk.f32.gmra.mxu0 %vm434_vm4, %v13740_v45 }
 0x1a8   : > { %v11227_v9 = vadd.f32 %v2788_v13, %v2597_v50  ;;  %v2600_v42 = vadd.f32 %v8272_v8, %v10972_v15  ;;  %v8322_v40 = vpop.f32.mrf.mxu1  ;;  %8621 = vmatmul.mubr.msk.f32.gmra.mxu1 %vm434_vm4, %v13741_v11  ;;  %8573 = vmatprep.mubr.msk.f32.mxu0 %vm434_vm4, %v13742_v46  ;;  %v13744_v50 = vld [vmem:[#allocation17_spill] sm:$0xff]  ;;  %v13746_v46 = vld [vmem:[#allocation19_spill] sm:$0xff] }
 0x1a9   : > { %v2472_v38 = vpop.f32.mrf.mxu0  ;;  %8623 = vmatprep.mubr.msk.f32.mxu1 %vm434_vm4, %v13743_v57  ;;  %v13749_v57 = vld [vmem:[#allocation21_spill] sm:$0xff] }
 0x1aa   : > { %v11236_v14 = vadd.f32 %v8322_v40, %v2600_v42  ;;  %v2599_v0 = vadd.f32 %v2472_v38, %v10977_v4  ;;  %v2798_v45 = vpop.f32.mrf.mxu1  ;;  %v13747_v42 = vld [vmem:[#allocation20_spill] sm:$0xff] }
 0x1ab   : > { %v8275_v13 = vpop.f32.mrf.mxu0  ;;  %8574 = vmatmul.mubr.msk.f32.gmra.mxu0 %vm434_vm4, %v13744_v50 }
 0x1ac   : > { %v11241_v15 = vadd.f32 %v2798_v45, %v2599_v0  ;;  %v2602_v8 = vadd.f32 %v8275_v13, %v10986_v43  ;;  %v8325_v11 = vpop.f32.mrf.mxu1  ;;  %8624 = vmatmul.mubr.msk.f32.gmra.mxu1 %vm434_vm4, %v13745_v12  ;;  %8576 = vmatprep.mubr.msk.f32.mxu0 %vm434_vm4, %v13746_v46  ;;  %v13748_v0 = vld [vmem:[#allocation66_spill] sm:$0xff] }
 0x1ad   : > { %v2482_v40 = vpop.f32.mrf.mxu0  ;;  %8626 = vmatprep.mubr.msk.f32.mxu1 %vm434_vm4, %v13747_v42  ;;  %v13750_v46 = vld [vmem:[#allocation22_spill] sm:$0xff]  ;;  %v13753_v42 = vld [vmem:[#allocation25_spill] sm:$0xff] }
 0x1ae   : > { %v11250_v4 = vadd.f32 %v8325_v11, %v2602_v8  ;;  %v2601_v38 = vadd.f32 %v2482_v40, %v10991_v41  ;;  %v2808_v50 = vpop.f32.mrf.mxu1  ;;  %v13751_v8 = vld [vmem:[#allocation23_spill] sm:$0xff] }
 0x1af   : > { %v8278_v45 = vpop.f32.mrf.mxu0  ;;  %8577 = vmatmul.mubr.msk.f32.gmra.mxu0 %vm434_vm4, %v13748_v0 }
 0x1b0   : > { %v11255_v43 = vadd.f32 %v2808_v50, %v2601_v38  ;;  %v2604_v13 = vadd.f32 %v8278_v45, %v11000_v6  ;;  %v8328_v12 = vpop.f32.mrf.mxu1  ;;  %8627 = vmatmul.mubr.msk.f32.gmra.mxu1 %vm434_vm4, %v13749_v57  ;;  %8579 = vmatprep.mubr.msk.f32.mxu0 %vm434_vm4, %v13750_v46  ;;  %v13752_v38 = vld [vmem:[#allocation24_spill] sm:$0xff] }
 0x1b1   : > { %v2492_v11 = vpop.f32.mrf.mxu0  ;;  %8629 = vmatprep.mubr.msk.f32.mxu1 %vm434_vm4, %v13751_v8  ;;  %v13754_v46 = vld [vmem:[#allocation116_spill] sm:$0xff]  ;;  %v13757_v8 = vld [vmem:[#allocation117_spill] sm:$0xff] }
 0x1b2   : > { %v11264_v41 = vadd.f32 %v8328_v12, %v2604_v13  ;;  %v2603_v40 = vadd.f32 %v2492_v11, %v11005_v19  ;;  %v2818_v0 = vpop.f32.mrf.mxu1  ;;  %v13755_v13 = vld [vmem:[#allocation27_spill] sm:$0xff] }
 0x1b3   : > { %v8281_v50 = vpop.f32.mrf.mxu0  ;;  %8580 = vmatmul.mubr.msk.f32.gmra.mxu0 %vm434_vm4, %v13752_v38 }
 0x1b4   : > { %v11269_v6 = vadd.f32 %v2818_v0, %v2603_v40  ;;  %v2606_v45 = vadd.f32 %v8281_v50, %v11014_v10  ;;  %v8331_v57 = vpop.f32.mrf.mxu1  ;;  %8630 = vmatmul.mubr.msk.f32.gmra.mxu1 %vm434_vm4, %v13753_v42  ;;  %8582 = vmatprep.mubr.msk.f32.mxu0 %vm434_vm4, %v13754_v46  ;;  %v13756_v40 = vld [vmem:[#allocation29_spill] sm:$0xff]  ;;  %v13758_v46 = vld [vmem:[#allocation118_spill] sm:$0xff] }
 0x1b5   : > { %v2502_v12 = vpop.f32.mrf.mxu0  ;;  %8632 = vmatprep.mubr.msk.f32.mxu1 %vm434_vm4, %v13755_v13  ;;  %v13761_v13 = vld [vmem:[#allocation33_spill] sm:$0xff] }
 0x1b6   : > { %v11278_v19 = vadd.f32 %v8331_v57, %v2606_v45  ;;  %v2605_v11 = vadd.f32 %v2502_v12, %v11019_v39  ;;  %v2828_v38 = vpop.f32.mrf.mxu1  ;;  %v13759_v45 = vld [vmem:[#allocation84_spill] sm:$0xff] }
 0x1b7   : > { %v8284_v0 = vpop.f32.mrf.mxu0  ;;  %8583 = vmatmul.mubr.msk.f32.gmra.mxu0 %vm434_vm4, %v13756_v40 }
 0x1b8   : > { %v11283_v10 = vadd.f32 %v2828_v38, %v2605_v11  ;;  %v2608_v50 = vadd.f32 %v8284_v0, %v11028_v27  ;;  %v8334_v42 = vpop.f32.mrf.mxu1  ;;  %8633 = vmatmul.mubr.msk.f32.gmra.mxu1 %vm434_vm4, %v13757_v8  ;;  %8585 = vmatprep.mubr.msk.f32.mxu0 %vm434_vm4, %v13758_v46  ;;  %v13760_v11 = vld [vmem:[#allocation31_spill] sm:$0xff]  ;;  %v13762_v46 = vld [vmem:[#allocation30_spill] sm:$0xff] }
 0x1b9   : > { %v2512_v57 = vpop.f32.mrf.mxu0  ;;  %8635 = vmatprep.mubr.msk.f32.mxu1 %vm434_vm4, %v13759_v45  ;;  %v13765_v45 = vld [vmem:[#allocation90_spill] sm:$0xff] }
 0x1ba   : > { %v11292_v39 = vadd.f32 %v8334_v42, %v2608_v50  ;;  %v2607_v12 = vadd.f32 %v2512_v57, %v11033_v48  ;;  %v2838_v40 = vpop.f32.mrf.mxu1  ;;  %v13763_v50 = vld [vmem:[#allocation32_spill] sm:$0xff] }
 0x1bb   : > { %v8287_v38 = vpop.f32.mrf.mxu0  ;;  %8586 = vmatmul.mubr.msk.f32.gmra.mxu0 %vm434_vm4, %v13760_v11 }
 0x1bc   : > { %v11297_v27 = vadd.f32 %v2838_v40, %v2607_v12  ;;  %v2610_v0 = vadd.f32 %v8287_v38, %v11042_v47  ;;  %v8337_v8 = vpop.f32.mrf.mxu1  ;;  %8636 = vmatmul.mubr.msk.f32.gmra.mxu1 %vm434_vm4, %v13761_v13  ;;  %8588 = vmatprep.mubr.msk.f32.mxu0 %vm434_vm4, %v13762_v46  ;;  %v13764_v12 = vld [vmem:[#allocation88_spill] sm:$0xff]  ;;  %v13766_v46 = vld [vmem:[#allocation35_spill] sm:$0xff] }
 0x1bd   : > { %v2522_v42 = vpop.f32.mrf.mxu0  ;;  %8638 = vmatprep.mubr.msk.f32.mxu1 %vm434_vm4, %v13763_v50  ;;  %v13769_v50 = vld [vmem:[#allocation36_spill] sm:$0xff] }
 0x1be   : > { %v11306_v48 = vadd.f32 %v8337_v8, %v2610_v0  ;;  %v2609_v57 = vadd.f32 %v2522_v42, %v11047_v34  ;;  %v2848_v11 = vpop.f32.mrf.mxu1  ;;  %v13767_v0 = vld [vmem:[#allocation37_spill] sm:$0xff] }
 0x1bf   : > { %v8290_v40 = vpop.f32.mrf.mxu0  ;;  %8589 = vmatmul.mubr.msk.f32.gmra.mxu0 %vm434_vm4, %v13764_v12 }
 0x1c0   : > { %v11311_v47 = vadd.f32 %v2848_v11, %v2609_v57  ;;  %v2612_v38 = vadd.f32 %v8290_v40, %v11056_v44  ;;  %v8340_v13 = vpop.f32.mrf.mxu1  ;;  %8639 = vmatmul.mubr.msk.f32.gmra.mxu1 %vm434_vm4, %v13765_v45  ;;  %8591 = vmatprep.mubr.msk.f32.mxu0 %vm434_vm4, %v13766_v46  ;;  %v13768_v57 = vld [vmem:[#allocation34_spill] sm:$0xff] }
 0x1c1   : > { %v2532_v8 = vpop.f32.mrf.mxu0  ;;  %8641 = vmatprep.mubr.msk.f32.mxu1 %vm434_vm4, %v13767_v0  ;;  %v13770_v46 = vld [vmem:[#allocation94_spill] sm:$0xff] }
 0x1c2   : > { %v11320_v34 = vadd.f32 %v8340_v13, %v2612_v38  ;;  %v2611_v42 = vadd.f32 %v2532_v8, %v11061_v30  ;;  %v2858_v12 = vpop.f32.mrf.mxu1  ;;  %v13771_v38 = vld [vmem:[#allocation39_spill] sm:$0xff]  ;;  %v13773_v0 = vld [vmem:[#allocation38_spill] sm:$0xff] }
 0x1c3   : > { %v8293_v11 = vpop.f32.mrf.mxu0  ;;  %8592 = vmatmul.mubr.msk.f32.gmra.mxu0 %vm434_vm4, %v13768_v57 }
 0x1c4   : > { %v11325_v44 = vadd.f32 %v2858_v12, %v2611_v42  ;;  %v2614_v40 = vadd.f32 %v8293_v11, %v11070_v52  ;;  %v8343_v45 = vpop.f32.mrf.mxu1  ;;  %8642 = vmatmul.mubr.msk.f32.gmra.mxu1 %vm434_vm4, %v13769_v50  ;;  %8594 = vmatprep.mubr.msk.f32.mxu0 %vm434_vm4, %v13770_v46  ;;  %v13772_v42 = vld [vmem:[#allocation41_spill] sm:$0xff]  ;;  %v13774_v46 = vld [vmem:[#allocation40_spill] sm:$0xff] }
 0x1c5   : > { %v2542_v13 = vpop.f32.mrf.mxu0  ;;  %8644 = vmatprep.mubr.msk.f32.mxu1 %vm434_vm4, %v13771_v38 }
 0x1c6   : > { %v11334_v30 = vadd.f32 %v8343_v45, %v2614_v40  ;;  %v2613_v8 = vadd.f32 %v2542_v13, %v11075_v25  ;;  %v2868_v57 = vpop.f32.mrf.mxu1  ;;  %v13775_v45 = vld [vmem:[#allocation48_spill] sm:$0xff]  ;;  %v13776_v25 = vld [vmem:[#allocation99_spill] sm:$0xff] }
 0x1c7   : > { %v8296_v12 = vpop.f32.mrf.mxu0  ;;  %8595 = vmatmul.mubr.msk.f32.gmra.mxu0 %vm434_vm4, %v13772_v42  ;;  %v4029_v40 = vrot.slane %v13775_v45, 2  ;;  %v13777_v13 = vld [vmem:[#allocation47_spill] sm:$0xff] }
 0x1c8   : > { %v11339_v52 = vadd.f32 %v2868_v57, %v2613_v8  ;;  %v2616_v11 = vadd.f32 %v8296_v12, %v11089_v32  ;;  %v8346_v50 = vpop.f32.mrf.mxu1  ;;  %8645 = vmatmul.mubr.msk.f32.gmra.mxu1 %vm434_vm4, %v13773_v0  ;;  %8597 = vmatprep.mubr.msk.f32.mxu0 %vm434_vm4, %v13774_v46  ;;  %v4030_v51 = vrot.slane %v13777_v13, 2  ;;  %v4034_v57 = vrot.slane %v10859_v49, 2  ;;  %v13780_v49 = vld [vmem:[#allocation45_spill] sm:$0xff] }
 0x1c9   : > { %v2552_v38 = vpop.f32.mrf.mxu0  ;;  %8647 = vmatprep.mubr.msk.f32.mxu1 %vm434_vm4, %v13776_v25  ;;  %v4035_v0 = vrot.slane %v10873_v58, 2  ;;  %v4037_v13 = vrot.slane %v11093_v17, 2 }
 0x1ca   : > { %v11351_v8 = vadd.f32 %v8346_v50, %v2616_v11  ;;  %v2615_v32 = vadd.f32 %v2552_v38, %v11097_v59  ;;  %v2878_v12 = vpop.f32.mrf.mxu1  ;;  %v13781_v50 = vld [vmem:[#allocation49_spill] sm:$0xff]  ;;  %v13782_v11 = vld [vmem:[#allocation42_spill] sm:$0xff]  ;;  %v11368_v58 = vsel %vm2136_vm6, %v4029_v40, %v4030_v51 }
 0x1cb   : > { %v8299_v42 = vpop.f32.mrf.mxu0  ;;  %8598 = vmatmul.mubr.msk.f32.gmra.mxu0 %vm434_vm4, %v13778_v60  ;;  %v4032_v59 = vrot.slane %v13781_v50, 2  ;;  %13783 = vst [vmem:[#allocation50_spill] sm:$0xff] %v11368_v58  ;;  %v13786_v60 = vld [vmem:[#allocation105_spill] sm:$0xff] }
 0x1cc   : > { %v11357_v45 = vadd.f32 %v2878_v12, %v2615_v32  ;;  %v2618_v46 = vadd.f32 %v8299_v42, %v11111_v21  ;;  %v8349_v25 = vpop.f32.mrf.mxu1  ;;  %8648 = vmatmul.mubr.msk.f32.gmra.mxu1 %vm434_vm4, %v13779_v22  ;;  %8600 = vmatprep.mubr.msk.f32.mxu0 %vm434_vm4, %v13780_v49  ;;  %v11375_v12 = vsel %vm2136_vm6, %v4034_v57, %v4035_v0  ;;  %v13785_v22 = vld [vmem:[#allocation44_spill] sm:$0xff] }
 0x1cd   : > { %v2562_v38 = vpop.f32.mrf.mxu0  ;;  %8650 = vmatprep.mubr.msk.f32.mxu1 %vm434_vm4, %v13782_v11  ;;  %13784 = vst [vmem:[#allocation51_spill] sm:$0xff] %v11375_v12  ;;  %v11387_v17 = vsel %vm2136_vm6, %v4030_v51, %v4032_v59 }
 0x1ce   : > { %v11371_v32 = vadd.f32 %v8349_v25, %v2618_v46  ;;  %v2617_v21 = vadd.f32 %v2562_v38, %v11119_v16  ;;  %v2888_v42 = vpop.f32.mrf.mxu1  ;;  %13787 = vst [vmem:[#allocation52_spill] sm:$0xff] %v11387_v17  ;;  %v11392_v46 = vsel %vm2136_vm6, %v4035_v0, %v4037_v13 }
 0x1cf   : > { %v8302_v49 = vpop.f32.mrf.mxu0  ;;  %8601 = vmatmul.mubr.msk.f32.gmra.mxu0 %vm434_vm4, %v13785_v22  ;;  %13788 = vst [vmem:[#allocation114_spill] sm:$0xff] %v11392_v46 }
 0x1d0   : > { %v11379_v50 = vadd.f32 %v2888_v42, %v2617_v21  ;;  %v2620_v11 = vadd.f32 %v8302_v49, %v11134_v54  ;;  %v8352_v40 = vpop.f32.mrf.mxu1  ;;  %8651 = vmatmul.mubr.msk.f32.gmra.mxu1 %vm434_vm4, %v13786_v60  ;;  %8603 = vmatprep.mubr.msk.f32.mxu0 %vm434_vm4, %v11368_v58  ;;  %v9025_v21 = vld [vmem:[#allocation2 + $0x30] sm:$0xff] }
 0x1d1   : > { %v2572_v16 = vpop.f32.mrf.mxu0  ;;  %8653 = vmatprep.mubr.msk.f32.mxu1 %vm434_vm4, %v11375_v12  ;;  %v13792_v58 = vld [vmem:[#allocation56_spill] sm:$0xff] }
 0x1d2   : > { %v11394_v25 = vadd.f32 %v8352_v40, %v2620_v11  ;;  %v2619_v54 = vadd.f32 %v2572_v16, %v11139_v7  ;;  %v2898_v57 = vpop.f32.mrf.mxu1  ;;  %v9026_v11 = vld [vmem:[#allocation3 + $0x30] sm:$0xff]  ;;  %v9027_v16 = vld [vmem:[#allocation2 + $0x38] sm:$0xff] }
 0x1d3   : > { %v8305_v49 = vpop.f32.mrf.mxu0  ;;  %8604 = vmatmul.mubr.msk.f32.gmra.mxu0 %vm434_vm4, %v11387_v17 }
 0x1d4   : > { %v11399_v38 = vadd.f32 %v2898_v57, %v2619_v54  ;;  %v2622_v51 = vadd.f32 %v8305_v49, %v11148_v2  ;;  %v8355_v59 = vpop.f32.mrf.mxu1  ;;  %8654 = vmatmul.mubr.msk.f32.gmra.mxu1 %vm434_vm4, %v11392_v46  ;;  %8658 = vmatprep.mubr.msk.f32.mxu0 %vm434_vm4, %v9025_v21  ;;  %v11413_v2 = vld [vmem:[%s13156_s2 + $0x20] sm:$0xf]  ;;  %v9028_v21 = vld [vmem:[#allocation3 + $0x38] sm:$0xff]  ;;  %v9084_v46 = vld [vmem:[#allocation3 + $0x188] sm:$0xff] }
 0x1d5   : > { %v2582_v0 = vpop.f32.mrf.mxu0  ;;  %8708 = vmatprep.mubr.msk.f32.mxu1 %vm434_vm4, %v9026_v11 }
 0x1d6   : > { %v11406_v7 = vadd.f32 %v8355_v59, %v2622_v51  ;;  %v2621_v13 = vadd.f32 %v2582_v0, %v11158_v56  ;;  %v2908_v42 = vpop.f32.mrf.mxu1  ;;  %v11424_v56 = vld [vmem:[%s13157_s3 + $0x20] sm:$0xf]  ;;  %v9029_v59 = vld [vmem:[#allocation2 + $0x48] sm:$0xff] }
 0x1d7   : > { %v8360_v40 = vpop.f32.mrf.mxu0  ;;  %8659 = vmatmul.mubr.msk.f32.vlgmr.msra.gmra.mxu0 %vm434_vm4, %v9027_v16 }
 0x1d8   : > { %v11415_v54 = vadd.f32 %v2908_v42, %v2621_v13  ;;  %v3186_v57 = vadd.f32 %v8360_v40, %v11174_v35  ;;  %v8410_v49 = vpop.f32.mrf.mxu1  ;;  %8709 = vmatmul.mubr.msk.f32.vlgmr.msra.gmra.mxu1 %vm434_vm4, %v9028_v21  ;;  %8757 = vmatpush3.msk.msra.mxu0 %vm738_vm3, %v11156_v31  ;;  %v9030_v13 = vld [vmem:[#allocation3 + $0x48] sm:$0xff]  ;;  %v9031_v42 = vld [vmem:[#allocation2 + $0x50] sm:$0xff] }
 0x1d9   : > { %v3026_v51 = vpop.f32.mrf.mxu0  ;;  %8807 = vmatpush3.msk.msra.mxu1 %vm738_vm3, %v11168_v29  ;;  %8661 = vmatprep.mubr.msk.f32.mxu0 %vm434_vm4, %v9029_v59  ;;  %v9034_v21 = vld [vmem:[#allocation3 + $0x60] sm:$0xff] }
 0x1da   : > { %v11429_v35 = vadd.f32 %v8410_v49, %v3186_v57  ;;  %v3185_v0 = vadd.f32 %v3026_v51, %v11185_v24  ;;  %v3294_v11 = vpop.f32.mrf.mxu1  ;;  %8711 = vmatprep.mubr.msk.f32.mxu1 %vm434_vm4, %v9030_v13  ;;  %8856 = vmatprep.subr.msk.mxu0 %vm738_vm3, %v11413_v2  ;;  %v9032_v24 = vld [vmem:[#allocation3 + $0x50] sm:$0xff] }
 0x1db   : > { %v8363_v31 = vpop.f32.mrf.mxu0  ;;  %8662 = vmatmul.mubr.msk.f32.gmra.mxu0 %vm434_vm4, %v9031_v42  ;;  %8906 = vmatprep.subr.msk.mxu1 %vm738_vm3, %v11424_v56  ;;  %v9033_v57 = vld [vmem:[#allocation2 + $0x60] sm:$0xff] }
 0x1dc   : > { %v11438_v29 = vadd.f32 %v3294_v11, %v3185_v0  ;;  %v3188_v40 = vadd.f32 %v8363_v31, %v11194_v5  ;;  %v8413_v16 = vpop.f32.mrf.mxu1  ;;  %8712 = vmatmul.mubr.msk.f32.gmra.mxu1 %vm434_vm4, %v9032_v24  ;;  %8664 = vmatprep.mubr.msk.f32.mxu0 %vm434_vm4, %v9033_v57  ;;  %v9035_v11 = vld [vmem:[#allocation2 + $0x68] sm:$0xff]  ;;  %v9036_v24 = vld [vmem:[#allocation3 + $0x68] sm:$0xff] }
 0x1dd   : > { %v3036_v49 = vpop.f32.mrf.mxu0  ;;  %8714 = vmatprep.mubr.msk.f32.mxu1 %vm434_vm4, %v9034_v21  ;;  %v9037_v57 = vld [vmem:[#allocation2 + $0x78] sm:$0xff] }
 0x1de   : > { %v11444_v51 = vadd.f32 %v8413_v16, %v3188_v40  ;;  %v3187_v59 = vadd.f32 %v3036_v49, %v11199_v63  ;;  %v3304_v13 = vpop.f32.mrf.mxu1  ;;  %v9038_v16 = vld [vmem:[#allocation3 + $0x78] sm:$0xff] }
 0x1df   : > { %v8366_v0 = vpop.f32.mrf.mxu0  ;;  %8665 = vmatmul.mubr.msk.f32.gmra.mxu0 %vm434_vm4, %v9035_v11 }
 0x1e0   : > { %v11448_v5 = vadd.f32 %v3304_v13, %v3187_v59  ;;  %v3190_v31 = vadd.f32 %v8366_v0, %v11208_v23  ;;  %v8416_v42 = vpop.f32.mrf.mxu1  ;;  %8715 = vmatmul.mubr.msk.f32.gmra.mxu1 %vm434_vm4, %v9036_v24  ;;  %8667 = vmatprep.mubr.msk.f32.mxu0 %vm434_vm4, %v9037_v57  ;;  %v9039_v13 = vld [vmem:[#allocation2 + $0x80] sm:$0xff]  ;;  %v9040_v24 = vld [vmem:[#allocation3 + $0x80] sm:$0xff] }
 0x1e1   : > { %v3046_v40 = vpop.f32.mrf.mxu0  ;;  %8717 = vmatprep.mubr.msk.f32.mxu1 %vm434_vm4, %v9038_v16  ;;  %v9041_v57 = vld [vmem:[#allocation2 + $0x90] sm:$0xff] }
 0x1e2   : > { %v11454_v63 = vadd.f32 %v8416_v42, %v3190_v31  ;;  %v3189_v49 = vadd.f32 %v3046_v40, %v11213_v3  ;;  %v3314_v21 = vpop.f32.mrf.mxu1  ;;  %v9042_v42 = vld [vmem:[#allocation3 + $0x90] sm:$0xff] }
 0x1e3   : > { %v8369_v59 = vpop.f32.mrf.mxu0  ;;  %8668 = vmatmul.mubr.msk.f32.gmra.mxu0 %vm434_vm4, %v9039_v13 }
 0x1e4   : > { %v11458_v23 = vadd.f32 %v3314_v21, %v3189_v49  ;;  %v3192_v0 = vadd.f32 %v8369_v59, %v11222_v62  ;;  %v8419_v11 = vpop.f32.mrf.mxu1  ;;  %8718 = vmatmul.mubr.msk.f32.gmra.mxu1 %vm434_vm4, %v9040_v24  ;;  %8670 = vmatprep.mubr.msk.f32.mxu0 %vm434_vm4, %v9041_v57  ;;  %v9043_v21 = vld [vmem:[#allocation2 + $0x98] sm:$0xff]  ;;  %v9044_v24 = vld [vmem:[#allocation3 + $0x98] sm:$0xff] }
 0x1e5   : > { %v3056_v31 = vpop.f32.mrf.mxu0  ;;  %8720 = vmatprep.mubr.msk.f32.mxu1 %vm434_vm4, %v9042_v42  ;;  %v9045_v57 = vld [vmem:[#allocation2 + $0xa8] sm:$0xff] }
 0x1e6   : > { %v11464_v3 = vadd.f32 %v8419_v11, %v3192_v0  ;;  %v3191_v40 = vadd.f32 %v3056_v31, %v11227_v9  ;;  %v3324_v16 = vpop.f32.mrf.mxu1  ;;  %v9046_v11 = vld [vmem:[#allocation3 + $0xa8] sm:$0xff] }
 0x1e7   : > { %v8372_v49 = vpop.f32.mrf.mxu0  ;;  %8671 = vmatmul.mubr.msk.f32.gmra.mxu0 %vm434_vm4, %v9043_v21 }
 0x1e8   : > { %v11468_v62 = vadd.f32 %v3324_v16, %v3191_v40  ;;  %v3194_v59 = vadd.f32 %v8372_v49, %v11236_v14  ;;  %v8422_v13 = vpop.f32.mrf.mxu1  ;;  %8721 = vmatmul.mubr.msk.f32.gmra.mxu1 %vm434_vm4, %v9044_v24  ;;  %8673 = vmatprep.mubr.msk.f32.mxu0 %vm434_vm4, %v9045_v57  ;;  %v9047_v16 = vld [vmem:[#allocation2 + $0xb0] sm:$0xff]  ;;  %v9048_v24 = vld [vmem:[#allocation3 + $0xb0] sm:$0xff] }
 0x1e9   : > { %v3066_v0 = vpop.f32.mrf.mxu0  ;;  %8723 = vmatprep.mubr.msk.f32.mxu1 %vm434_vm4, %v9046_v11  ;;  %v9049_v57 = vld [vmem:[#allocation2 + $0xc0] sm:$0xff] }
 0x1ea   : > { %v11474_v9 = vadd.f32 %v8422_v13, %v3194_v59  ;;  %v3193_v31 = vadd.f32 %v3066_v0, %v11241_v15  ;;  %v3334_v42 = vpop.f32.mrf.mxu1  ;;  %v9050_v13 = vld [vmem:[#allocation3 + $0xc0] sm:$0xff] }
 0x1eb   : > { %v8375_v40 = vpop.f32.mrf.mxu0  ;;  %8674 = vmatmul.mubr.msk.f32.gmra.mxu0 %vm434_vm4, %v9047_v16 }
 0x1ec   : > { %v11478_v14 = vadd.f32 %v3334_v42, %v3193_v31  ;;  %v3196_v49 = vadd.f32 %v8375_v40, %v11250_v4  ;;  %v8425_v21 = vpop.f32.mrf.mxu1  ;;  %8724 = vmatmul.mubr.msk.f32.gmra.mxu1 %vm434_vm4, %v9048_v24  ;;  %8676 = vmatprep.mubr.msk.f32.mxu0 %vm434_vm4, %v9049_v57  ;;  %v9051_v42 = vld [vmem:[#allocation2 + $0xc8] sm:$0xff]  ;;  %v9052_v24 = vld [vmem:[#allocation3 + $0xc8] sm:$0xff] }
 0x1ed   : > { %v3076_v59 = vpop.f32.mrf.mxu0  ;;  %8726 = vmatprep.mubr.msk.f32.mxu1 %vm434_vm4, %v9050_v13  ;;  %v9053_v57 = vld [vmem:[#allocation2 + $0xd8] sm:$0xff] }
 0x1ee   : > { %v11484_v15 = vadd.f32 %v8425_v21, %v3196_v49  ;;  %v3195_v0 = vadd.f32 %v3076_v59, %v11255_v43  ;;  %v3344_v11 = vpop.f32.mrf.mxu1  ;;  %v9054_v21 = vld [vmem:[#allocation3 + $0xd8] sm:$0xff] }
 0x1ef   : > { %v8378_v31 = vpop.f32.mrf.mxu0  ;;  %8677 = vmatmul.mubr.msk.f32.gmra.mxu0 %vm434_vm4, %v9051_v42 }
 0x1f0   : > { %v11488_v4 = vadd.f32 %v3344_v11, %v3195_v0  ;;  %v3198_v40 = vadd.f32 %v8378_v31, %v11264_v41  ;;  %v8428_v16 = vpop.f32.mrf.mxu1  ;;  %8727 = vmatmul.mubr.msk.f32.gmra.mxu1 %vm434_vm4, %v9052_v24  ;;  %8679 = vmatprep.mubr.msk.f32.mxu0 %vm434_vm4, %v9053_v57  ;;  %v9055_v11 = vld [vmem:[#allocation2 + $0xe0] sm:$0xff]  ;;  %v9056_v24 = vld [vmem:[#allocation3 + $0xe0] sm:$0xff] }
 0x1f1   : > { %v3086_v49 = vpop.f32.mrf.mxu0  ;;  %8729 = vmatprep.mubr.msk.f32.mxu1 %vm434_vm4, %v9054_v21  ;;  %v9057_v57 = vld [vmem:[#allocation2 + $0xf0] sm:$0xff] }
 0x1f2   : > { %v11494_v43 = vadd.f32 %v8428_v16, %v3198_v40  ;;  %v3197_v59 = vadd.f32 %v3086_v49, %v11269_v6  ;;  %v3354_v13 = vpop.f32.mrf.mxu1  ;;  %v9058_v16 = vld [vmem:[#allocation3 + $0xf0] sm:$0xff] }
 0x1f3   : > { %v8381_v0 = vpop.f32.mrf.mxu0  ;;  %8680 = vmatmul.mubr.msk.f32.gmra.mxu0 %vm434_vm4, %v9055_v11 }
 0x1f4   : > { %v11498_v41 = vadd.f32 %v3354_v13, %v3197_v59  ;;  %v3200_v31 = vadd.f32 %v8381_v0, %v11278_v19  ;;  %v8431_v42 = vpop.f32.mrf.mxu1  ;;  %8730 = vmatmul.mubr.msk.f32.gmra.mxu1 %vm434_vm4, %v9056_v24  ;;  %8682 = vmatprep.mubr.msk.f32.mxu0 %vm434_vm4, %v9057_v57  ;;  %v9059_v13 = vld [vmem:[#allocation2 + $0xf8] sm:$0xff]  ;;  %v9060_v24 = vld [vmem:[#allocation3 + $0xf8] sm:$0xff] }
 0x1f5   : > { %v3096_v40 = vpop.f32.mrf.mxu0  ;;  %8732 = vmatprep.mubr.msk.f32.mxu1 %vm434_vm4, %v9058_v16  ;;  %v9061_v57 = vld [vmem:[#allocation2 + $0x108] sm:$0xff] }
 0x1f6   : > { %v11504_v6 = vadd.f32 %v8431_v42, %v3200_v31  ;;  %v3199_v49 = vadd.f32 %v3096_v40, %v11283_v10  ;;  %v3364_v21 = vpop.f32.mrf.mxu1  ;;  %v9062_v42 = vld [vmem:[#allocation3 + $0x108] sm:$0xff] }
 0x1f7   : > { %v8384_v59 = vpop.f32.mrf.mxu0  ;;  %8683 = vmatmul.mubr.msk.f32.gmra.mxu0 %vm434_vm4, %v9059_v13 }
 0x1f8   : > { %v11508_v19 = vadd.f32 %v3364_v21, %v3199_v49  ;;  %v3202_v0 = vadd.f32 %v8384_v59, %v11292_v39  ;;  %v8434_v11 = vpop.f32.mrf.mxu1  ;;  %8733 = vmatmul.mubr.msk.f32.gmra.mxu1 %vm434_vm4, %v9060_v24  ;;  %8685 = vmatprep.mubr.msk.f32.mxu0 %vm434_vm4, %v9061_v57  ;;  %v9063_v21 = vld [vmem:[#allocation2 + $0x110] sm:$0xff]  ;;  %v9064_v24 = vld [vmem:[#allocation3 + $0x110] sm:$0xff] }
 0x1f9   : > { %v3106_v31 = vpop.f32.mrf.mxu0  ;;  %8735 = vmatprep.mubr.msk.f32.mxu1 %vm434_vm4, %v9062_v42  ;;  %v9065_v57 = vld [vmem:[#allocation2 + $0x120] sm:$0xff] }
 0x1fa   : > { %v11514_v10 = vadd.f32 %v8434_v11, %v3202_v0  ;;  %v3201_v40 = vadd.f32 %v3106_v31, %v11297_v27  ;;  %v3374_v16 = vpop.f32.mrf.mxu1  ;;  %v9066_v11 = vld [vmem:[#allocation3 + $0x120] sm:$0xff] }
 0x1fb   : > { %v8387_v49 = vpop.f32.mrf.mxu0  ;;  %8686 = vmatmul.mubr.msk.f32.gmra.mxu0 %vm434_vm4, %v9063_v21 }
 0x1fc   : > { %v11518_v39 = vadd.f32 %v3374_v16, %v3201_v40  ;;  %v3204_v59 = vadd.f32 %v8387_v49, %v11306_v48  ;;  %v8437_v13 = vpop.f32.mrf.mxu1  ;;  %8736 = vmatmul.mubr.msk.f32.gmra.mxu1 %vm434_vm4, %v9064_v24  ;;  %8688 = vmatprep.mubr.msk.f32.mxu0 %vm434_vm4, %v9065_v57  ;;  %v9067_v16 = vld [vmem:[#allocation2 + $0x128] sm:$0xff]  ;;  %v9068_v24 = vld [vmem:[#allocation3 + $0x128] sm:$0xff] }
 0x1fd   : > { %v3116_v0 = vpop.f32.mrf.mxu0  ;;  %8738 = vmatprep.mubr.msk.f32.mxu1 %vm434_vm4, %v9066_v11  ;;  %v9069_v57 = vld [vmem:[#allocation2 + $0x138] sm:$0xff] }
 0x1fe   : > { %v11524_v27 = vadd.f32 %v8437_v13, %v3204_v59  ;;  %v3203_v31 = vadd.f32 %v3116_v0, %v11311_v47  ;;  %v3384_v42 = vpop.f32.mrf.mxu1  ;;  %v9070_v13 = vld [vmem:[#allocation3 + $0x138] sm:$0xff] }
 0x1ff   : > { %v8390_v40 = vpop.f32.mrf.mxu0  ;;  %8689 = vmatmul.mubr.msk.f32.gmra.mxu0 %vm434_vm4, %v9067_v16 }
 0x200   : > { %v11528_v48 = vadd.f32 %v3384_v42, %v3203_v31  ;;  %v3206_v49 = vadd.f32 %v8390_v40, %v11320_v34  ;;  %v8440_v21 = vpop.f32.mrf.mxu1  ;;  %8739 = vmatmul.mubr.msk.f32.gmra.mxu1 %vm434_vm4, %v9068_v24  ;;  %8691 = vmatprep.mubr.msk.f32.mxu0 %vm434_vm4, %v9069_v57  ;;  %v9071_v42 = vld [vmem:[#allocation2 + $0x140] sm:$0xff]  ;;  %v9072_v24 = vld [vmem:[#allocation3 + $0x140] sm:$0xff] }
 0x201   : > { %v3126_v59 = vpop.f32.mrf.mxu0  ;;  %8741 = vmatprep.mubr.msk.f32.mxu1 %vm434_vm4, %v9070_v13  ;;  %v9073_v57 = vld [vmem:[#allocation2 + $0x150] sm:$0xff] }
 0x202   : > { %v11534_v47 = vadd.f32 %v8440_v21, %v3206_v49  ;;  %v3205_v0 = vadd.f32 %v3126_v59, %v11325_v44  ;;  %v3394_v11 = vpop.f32.mrf.mxu1  ;;  %v9074_v21 = vld [vmem:[#allocation3 + $0x150] sm:$0xff] }
 0x203   : > { %v8393_v31 = vpop.f32.mrf.mxu0  ;;  %8692 = vmatmul.mubr.msk.f32.gmra.mxu0 %vm434_vm4, %v9071_v42 }
 0x204   : > { %v11538_v34 = vadd.f32 %v3394_v11, %v3205_v0  ;;  %v3208_v40 = vadd.f32 %v8393_v31, %v11334_v30  ;;  %v8443_v16 = vpop.f32.mrf.mxu1  ;;  %8742 = vmatmul.mubr.msk.f32.gmra.mxu1 %vm434_vm4, %v9072_v24  ;;  %8694 = vmatprep.mubr.msk.f32.mxu0 %vm434_vm4, %v9073_v57  ;;  %v9075_v11 = vld [vmem:[#allocation2 + $0x158] sm:$0xff]  ;;  %v9076_v24 = vld [vmem:[#allocation3 + $0x158] sm:$0xff] }
 0x205   : > { %v3136_v49 = vpop.f32.mrf.mxu0  ;;  %8744 = vmatprep.mubr.msk.f32.mxu1 %vm434_vm4, %v9074_v21  ;;  %v9077_v57 = vld [vmem:[#allocation2 + $0x168] sm:$0xff] }
 0x206   : > { %v11544_v44 = vadd.f32 %v8443_v16, %v3208_v40  ;;  %v3207_v59 = vadd.f32 %v3136_v49, %v11339_v52  ;;  %v3404_v13 = vpop.f32.mrf.mxu1  ;;  %v9078_v16 = vld [vmem:[#allocation3 + $0x168] sm:$0xff] }
 0x207   : > { %v8396_v0 = vpop.f32.mrf.mxu0  ;;  %8695 = vmatmul.mubr.msk.f32.gmra.mxu0 %vm434_vm4, %v9075_v11 }
 0x208   : > { %v11548_v30 = vadd.f32 %v3404_v13, %v3207_v59  ;;  %v3210_v31 = vadd.f32 %v8396_v0, %v11351_v8  ;;  %v8446_v42 = vpop.f32.mrf.mxu1  ;;  %8745 = vmatmul.mubr.msk.f32.gmra.mxu1 %vm434_vm4, %v9076_v24  ;;  %8697 = vmatprep.mubr.msk.f32.mxu0 %vm434_vm4, %v9077_v57  ;;  %v9079_v13 = vld [vmem:[#allocation2 + $0x170] sm:$0xff]  ;;  %v9080_v24 = vld [vmem:[#allocation3 + $0x170] sm:$0xff] }
 0x209   : > { %v3146_v40 = vpop.f32.mrf.mxu0  ;;  %8747 = vmatprep.mubr.msk.f32.mxu1 %vm434_vm4, %v9078_v16  ;;  %v9081_v57 = vld [vmem:[#allocation2 + $0x180] sm:$0xff] }
 0x20a   : > { %v11554_v52 = vadd.f32 %v8446_v42, %v3210_v31  ;;  %v3209_v49 = vadd.f32 %v3146_v40, %v11357_v45  ;;  %v3414_v21 = vpop.f32.mrf.mxu1  ;;  %v9082_v42 = vld [vmem:[#allocation3 + $0x180] sm:$0xff]  ;;  %v11564_v45 = vld [vmem:[#allocation2 + $0x198] sm:$0xff] }
 0x20b   : > { %v8399_v59 = vpop.f32.mrf.mxu0  ;;  %8698 = vmatmul.mubr.msk.f32.gmra.mxu0 %vm434_vm4, %v9079_v13 }
 0x20c   : > { %v11558_v8 = vadd.f32 %v3414_v21, %v3209_v49  ;;  %v3212_v0 = vadd.f32 %v8399_v59, %v11371_v32  ;;  %v8449_v11 = vpop.f32.mrf.mxu1  ;;  %8748 = vmatmul.mubr.msk.f32.gmra.mxu1 %vm434_vm4, %v9080_v24  ;;  %8700 = vmatprep.mubr.msk.f32.mxu0 %vm434_vm4, %v9081_v57  ;;  %v11569_v21 = vld [vmem:[#allocation3 + $0x198] sm:$0xff] }
 0x20d   : > { %v3156_v31 = vpop.f32.mrf.mxu0  ;;  %8750 = vmatprep.mubr.msk.f32.mxu1 %vm434_vm4, %v9082_v42  ;;  %v9083_v59 = vld [vmem:[#allocation2 + $0x188] sm:$0xff] }
 0x20e   : > { %v11566_v40 = vadd.f32 %v8449_v11, %v3212_v0  ;;  %v3211_v16 = vadd.f32 %v3156_v31, %v11379_v50  ;;  %v3424_v49 = vpop.f32.mrf.mxu1  ;;  %v11578_v0 = vld [vmem:[#allocation2 + $0x1a0] sm:$0xff]  ;;  %v11582_v11 = vld [vmem:[#allocation3 + $0x1a0] sm:$0xff] }
 0x20f   : > { %v8402_v32 = vpop.f32.mrf.mxu0  ;;  %8701 = vmatmul.mubr.msk.f32.gmra.mxu0 %vm434_vm4, %v9083_v59  ;;  %v13789_v59 = vld [vmem:[#allocation53_spill] sm:$0xff] }
 0x210   : > { %v11572_v13 = vadd.f32 %v3424_v49, %v3211_v16  ;;  %v3214_v24 = vadd.f32 %v8402_v32, %v11394_v25  ;;  %v8452_v57 = vpop.f32.mrf.mxu1  ;;  %8751 = vmatmul.mubr.msk.f32.gmra.mxu1 %vm434_vm4, %v9084_v46  ;;  %8703 = vmatprep.mubr.msk.f32.mxu0 %vm434_vm4, %v11564_v45 }
 0x211   : > { %v3166_v50 = vpop.f32.mrf.mxu0  ;;  %8753 = vmatprep.mubr.msk.f32.mxu1 %vm434_vm4, %v11569_v21 }
 0x212   : > { %v11584_v31 = vadd.f32 %v8452_v57, %v3214_v24  ;;  %v3213_v42 = vadd.f32 %v3166_v50, %v11399_v38  ;;  %v3434_v25 = vpop.f32.mrf.mxu1  ;;  %v13790_v57 = vld [vmem:[#allocation54_spill] sm:$0xff] }
 0x213   : > { %v8405_v16 = vpop.f32.mrf.mxu0  ;;  %8704 = vmatmul.mubr.msk.f32.gmra.mxu0 %vm434_vm4, %v11578_v0 }
 0x214   : > { %v11589_v46 = vadd.f32 %v3434_v25, %v3213_v42  ;;  %v3216_v49 = vadd.f32 %v8405_v16, %v11406_v7  ;;  %v8455_v32 = vpop.f32.mrf.mxu1  ;;  %8754 = vmatmul.mubr.msk.f32.gmra.mxu1 %vm434_vm4, %v11582_v11  ;;  %8758 = vmatprep.mubr.msk.f32.mxu0 %vm434_vm4, %v13789_v59  ;;  %v13791_v25 = vld [vmem:[#allocation55_spill] sm:$0xff] }
 0x215   : > { %v3176_v24 = vpop.f32.mrf.mxu0  ;;  %8808 = vmatprep.mubr.msk.f32.mxu1 %vm434_vm4, %v13790_v57 }
 0x216   : > { %v11598_v38 = vadd.f32 %v8455_v32, %v3216_v49  ;;  %v3215_v50 = vadd.f32 %v3176_v24, %v11415_v54  ;;  %v3444_v17 = vpop.f32.mrf.mxu1  ;;  %v13793_v54 = vld [vmem:[#allocation57_spill] sm:$0xff] }
 0x217   : > { %v8460_v42 = vpop.f32.mrf.mxu0  ;;  %8759 = vmatmul.mubr.msk.f32.vlgmr.msra.gmra.mxu0 %vm434_vm4, %v13791_v25 }
 0x218   : > { %v11603_v7 = vadd.f32 %v3444_v17, %v3215_v50  ;;  %v3732_v16 = vadd.f32 %v8460_v42, %v11429_v35  ;;  %v8510_v12 = vpop.f32.mrf.mxu1  ;;  %8809 = vmatmul.mubr.msk.f32.vlgmr.msra.gmra.mxu1 %vm434_vm4, %v13792_v58  ;;  %8857 = vmatpush3.msk.msra.mxu0 %vm738_vm3, %v11413_v2  ;;  %v13794_v35 = vld [vmem:[#allocation58_spill] sm:$0xff]  ;;  %v13795_v58 = vld [vmem:[#allocation59_spill] sm:$0xff]  ;;  %v13796_v50 = vld [vmem:[#allocation60_spill] sm:$0xff] }
 0x219   : > { %v3572_v49 = vpop.f32.mrf.mxu0  ;;  %8907 = vmatpush3.msk.msra.mxu1 %vm738_vm3, %v11424_v56  ;;  %8761 = vmatprep.mubr.msk.f32.mxu0 %vm434_vm4, %v13793_v54  ;;  %v13798_v42 = vld [vmem:[#allocation62_spill] sm:$0xff] }
 0x21a   : > { %v11614_v32 = vadd.f32 %v8510_v12, %v3732_v16  ;;  %v3731_v17 = vadd.f32 %v3572_v49, %v11438_v29  ;;  %v3838_v59 = vpop.f32.mrf.mxu1  ;;  %8811 = vmatprep.mubr.msk.f32.mxu1 %vm434_vm4, %v13794_v35  ;;  %v13797_v12 = vld [vmem:[#allocation61_spill] sm:$0xff] }
 0x21b   : > { %v8463_v24 = vpop.f32.mrf.mxu0  ;;  %8762 = vmatmul.mubr.msk.f32.gmra.mxu0 %vm434_vm4, %v13795_v58  ;;  %v13801_v58 = vld [vmem:[#allocation65_spill] sm:$0xff] }
 0x21c   : > { %v11621_v2 = vadd.f32 %v3838_v59, %v3731_v17  ;;  %v3734_v57 = vadd.f32 %v8463_v24, %v11444_v51  ;;  %v8513_v56 = vpop.f32.mrf.mxu1  ;;  %8812 = vmatmul.mubr.msk.f32.gmra.mxu1 %vm434_vm4, %v13796_v50  ;;  %8764 = vmatprep.mubr.msk.f32.mxu0 %vm434_vm4, %v13797_v12  ;;  %v13799_v17 = vld [vmem:[#allocation63_spill] sm:$0xff]  ;;  %v13800_v24 = vld [vmem:[#allocation64_spill] sm:$0xff] }
 0x21d   : > { %v3582_v29 = vpop.f32.mrf.mxu0  ;;  %8814 = vmatprep.mubr.msk.f32.mxu1 %vm434_vm4, %v13798_v42  ;;  %v13803_v42 = vld [vmem:[#allocation68_spill] sm:$0xff] }
 0x21e   : > { %v11630_v25 = vadd.f32 %v8513_v56, %v3734_v57  ;;  %v3733_v16 = vadd.f32 %v3582_v29, %v11448_v5  ;;  %v3848_v49 = vpop.f32.mrf.mxu1  ;;  %v13802_v56 = vld [vmem:[#allocation67_spill] sm:$0xff] }
 0x21f   : > { %v8466_v54 = vpop.f32.mrf.mxu0  ;;  %8765 = vmatmul.mubr.msk.f32.gmra.mxu0 %vm434_vm4, %v13799_v17  ;;  %v13805_v17 = vld [vmem:[#allocation69_spill] sm:$0xff] }
 0x220   : > { %v11635_v51 = vadd.f32 %v3848_v49, %v3733_v16  ;;  %v3736_v59 = vadd.f32 %v8466_v54, %v11454_v63  ;;  %v8516_v35 = vpop.f32.mrf.mxu1  ;;  %8815 = vmatmul.mubr.msk.f32.gmra.mxu1 %vm434_vm4, %v13800_v24  ;;  %8767 = vmatprep.mubr.msk.f32.mxu0 %vm434_vm4, %v13801_v58  ;;  %v13804_v54 = vld [vmem:[#allocation70_spill] sm:$0xff] }
 0x221   : > { %v3592_v57 = vpop.f32.mrf.mxu0  ;;  %8817 = vmatprep.mubr.msk.f32.mxu1 %vm434_vm4, %v13802_v56  ;;  %v13807_v56 = vld [vmem:[#allocation72_spill] sm:$0xff] }
 0x222   : > { %v11644_v5 = vadd.f32 %v8516_v35, %v3736_v59  ;;  %v3735_v50 = vadd.f32 %v3592_v57, %v11458_v23  ;;  %v3858_v12 = vpop.f32.mrf.mxu1  ;;  %v13806_v35 = vld [vmem:[#allocation71_spill] sm:$0xff] }
 0x223   : > { %v8469_v29 = vpop.f32.mrf.mxu0  ;;  %8768 = vmatmul.mubr.msk.f32.gmra.mxu0 %vm434_vm4, %v13803_v42  ;;  %v13809_v42 = vld [vmem:[#allocation74_spill] sm:$0xff] }
 0x224   : > { %v11649_v63 = vadd.f32 %v3858_v12, %v3735_v50  ;;  %v3738_v16 = vadd.f32 %v8469_v29, %v11464_v3  ;;  %v8519_v49 = vpop.f32.mrf.mxu1  ;;  %8818 = vmatmul.mubr.msk.f32.gmra.mxu1 %vm434_vm4, %v13804_v54  ;;  %8770 = vmatprep.mubr.msk.f32.mxu0 %vm434_vm4, %v13805_v17  ;;  %v13808_v29 = vld [vmem:[#allocation73_spill] sm:$0xff] }
 0x225   : > { %v3602_v59 = vpop.f32.mrf.mxu0  ;;  %8820 = vmatprep.mubr.msk.f32.mxu1 %vm434_vm4, %v13806_v35  ;;  %v13811_v35 = vld [vmem:[#allocation76_spill] sm:$0xff] }
 0x226   : > { %v11658_v23 = vadd.f32 %v8519_v49, %v3738_v16  ;;  %v3737_v24 = vadd.f32 %v3602_v59, %v11468_v62  ;;  %v3868_v58 = vpop.f32.mrf.mxu1  ;;  %v13810_v49 = vld [vmem:[#allocation75_spill] sm:$0xff] }
 0x227   : > { %v8472_v57 = vpop.f32.mrf.mxu0  ;;  %8771 = vmatmul.mubr.msk.f32.gmra.mxu0 %vm434_vm4, %v13807_v56  ;;  %v13813_v56 = vld [vmem:[#allocation78_spill] sm:$0xff] }
 0x228   : > { %v11663_v3 = vadd.f32 %v3868_v58, %v3737_v24  ;;  %v3740_v50 = vadd.f32 %v8472_v57, %v11474_v9  ;;  %v8522_v12 = vpop.f32.mrf.mxu1  ;;  %8821 = vmatmul.mubr.msk.f32.gmra.mxu1 %vm434_vm4, %v13808_v29  ;;  %8773 = vmatprep.mubr.msk.f32.mxu0 %vm434_vm4, %v13809_v42  ;;  %v13812_v57 = vld [vmem:[#allocation77_spill] sm:$0xff] }
 0x229   : > { %v3612_v16 = vpop.f32.mrf.mxu0  ;;  %8823 = vmatprep.mubr.msk.f32.mxu1 %vm434_vm4, %v13810_v49  ;;  %v13815_v49 = vld [vmem:[#allocation80_spill] sm:$0xff] }
 0x22a   : > { %v11672_v62 = vadd.f32 %v8522_v12, %v3740_v50  ;;  %v3739_v54 = vadd.f32 %v3612_v16, %v11478_v14  ;;  %v3878_v17 = vpop.f32.mrf.mxu1  ;;  %v13814_v12 = vld [vmem:[#allocation79_spill] sm:$0xff] }
 0x22b   : > { %v8475_v59 = vpop.f32.mrf.mxu0  ;;  %8774 = vmatmul.mubr.msk.f32.gmra.mxu0 %vm434_vm4, %v13811_v35  ;;  %v13817_v35 = vld [vmem:[#allocation82_spill] sm:$0xff] }
 0x22c   : > { %v11677_v9 = vadd.f32 %v3878_v17, %v3739_v54  ;;  %v3742_v24 = vadd.f32 %v8475_v59, %v11484_v15  ;;  %v8525_v58 = vpop.f32.mrf.mxu1  ;;  %8824 = vmatmul.mubr.msk.f32.gmra.mxu1 %vm434_vm4, %v13812_v57  ;;  %8776 = vmatprep.mubr.msk.f32.mxu0 %vm434_vm4, %v13813_v56  ;;  %v13816_v59 = vld [vmem:[#allocation81_spill] sm:$0xff] }
 0x22d   : > { %v3622_v50 = vpop.f32.mrf.mxu0  ;;  %8826 = vmatprep.mubr.msk.f32.mxu1 %vm434_vm4, %v13814_v12  ;;  %v13819_v12 = vld [vmem:[#allocation85_spill] sm:$0xff] }
 0x22e   : > { %v11686_v14 = vadd.f32 %v8525_v58, %v3742_v24  ;;  %v3741_v29 = vadd.f32 %v3622_v50, %v11488_v4  ;;  %v3888_v42 = vpop.f32.mrf.mxu1  ;;  %v13818_v58 = vld [vmem:[#allocation83_spill] sm:$0xff] }
 0x22f   : > { %v8478_v16 = vpop.f32.mrf.mxu0  ;;  %8777 = vmatmul.mubr.msk.f32.gmra.mxu0 %vm434_vm4, %v13815_v49  ;;  %v13821_v49 = vld [vmem:[#allocation87_spill] sm:$0xff] }
 0x230   : > { %v11691_v15 = vadd.f32 %v3888_v42, %v3741_v29  ;;  %v3744_v54 = vadd.f32 %v8478_v16, %v11494_v43  ;;  %v8528_v17 = vpop.f32.mrf.mxu1  ;;  %8827 = vmatmul.mubr.msk.f32.gmra.mxu1 %vm434_vm4, %v13816_v59  ;;  %8779 = vmatprep.mubr.msk.f32.mxu0 %vm434_vm4, %v13817_v35  ;;  %v13820_v16 = vld [vmem:[#allocation86_spill] sm:$0xff] }
 0x231   : > { %v3632_v24 = vpop.f32.mrf.mxu0  ;;  %8829 = vmatprep.mubr.msk.f32.mxu1 %vm434_vm4, %v13818_v58  ;;  %v13823_v58 = vld [vmem:[#allocation91_spill] sm:$0xff] }
 0x232   : > { %v11700_v4 = vadd.f32 %v8528_v17, %v3744_v54  ;;  %v3743_v57 = vadd.f32 %v3632_v24, %v11498_v41  ;;  %v3898_v56 = vpop.f32.mrf.mxu1  ;;  %v13822_v17 = vld [vmem:[#allocation89_spill] sm:$0xff] }
 0x233   : > { %v8481_v50 = vpop.f32.mrf.mxu0  ;;  %8780 = vmatmul.mubr.msk.f32.gmra.mxu0 %vm434_vm4, %v13819_v12  ;;  %v13825_v12 = vld [vmem:[#allocation93_spill] sm:$0xff] }
 0x234   : > { %v11705_v43 = vadd.f32 %v3898_v56, %v3743_v57  ;;  %v3746_v29 = vadd.f32 %v8481_v50, %v11504_v6  ;;  %v8531_v42 = vpop.f32.mrf.mxu1  ;;  %8830 = vmatmul.mubr.msk.f32.gmra.mxu1 %vm434_vm4, %v13820_v16  ;;  %8782 = vmatprep.mubr.msk.f32.mxu0 %vm434_vm4, %v13821_v49  ;;  %v13824_v50 = vld [vmem:[#allocation92_spill] sm:$0xff] }
 0x235   : > { %v3642_v54 = vpop.f32.mrf.mxu0  ;;  %8832 = vmatprep.mubr.msk.f32.mxu1 %vm434_vm4, %v13822_v17  ;;  %v13827_v17 = vld [vmem:[#allocation96_spill] sm:$0xff] }
 0x236   : > { %v11714_v41 = vadd.f32 %v8531_v42, %v3746_v29  ;;  %v3745_v59 = vadd.f32 %v3642_v54, %v11508_v19  ;;  %v3908_v35 = vpop.f32.mrf.mxu1  ;;  %v13826_v42 = vld [vmem:[#allocation95_spill] sm:$0xff] }
 0x237   : > { %v8484_v24 = vpop.f32.mrf.mxu0  ;;  %8783 = vmatmul.mubr.msk.f32.gmra.mxu0 %vm434_vm4, %v13823_v58  ;;  %v13829_v58 = vld [vmem:[#allocation97_spill] sm:$0xff] }
 0x238   : > { %v11719_v6 = vadd.f32 %v3908_v35, %v3745_v59  ;;  %v3748_v57 = vadd.f32 %v8484_v24, %v11514_v10  ;;  %v8534_v56 = vpop.f32.mrf.mxu1  ;;  %8833 = vmatmul.mubr.msk.f32.gmra.mxu1 %vm434_vm4, %v13824_v50  ;;  %8785 = vmatprep.mubr.msk.f32.mxu0 %vm434_vm4, %v13825_v12  ;;  %v13828_v24 = vld [vmem:[#allocation98_spill] sm:$0xff] }
 0x239   : > { %v3652_v29 = vpop.f32.mrf.mxu0  ;;  %8835 = vmatprep.mubr.msk.f32.mxu1 %vm434_vm4, %v13826_v42  ;;  %v13831_v42 = vld [vmem:[#allocation102_spill] sm:$0xff] }
 0x23a   : > { %v11728_v19 = vadd.f32 %v8534_v56, %v3748_v57  ;;  %v3747_v16 = vadd.f32 %v3652_v29, %v11518_v39  ;;  %v3918_v49 = vpop.f32.mrf.mxu1  ;;  %v13830_v56 = vld [vmem:[#allocation100_spill] sm:$0xff] }
 0x23b   : > { %v8487_v54 = vpop.f32.mrf.mxu0  ;;  %8786 = vmatmul.mubr.msk.f32.gmra.mxu0 %vm434_vm4, %v13827_v17  ;;  %v13833_v17 = vld [vmem:[#allocation104_spill] sm:$0xff] }
 0x23c   : > { %v11733_v10 = vadd.f32 %v3918_v49, %v3747_v16  ;;  %v3750_v59 = vadd.f32 %v8487_v54, %v11524_v27  ;;  %v8537_v35 = vpop.f32.mrf.mxu1  ;;  %8836 = vmatmul.mubr.msk.f32.gmra.mxu1 %vm434_vm4, %v13828_v24  ;;  %8788 = vmatprep.mubr.msk.f32.mxu0 %vm434_vm4, %v13829_v58  ;;  %v13832_v54 = vld [vmem:[#allocation103_spill] sm:$0xff] }
 0x23d   : > { %v3662_v57 = vpop.f32.mrf.mxu0  ;;  %8838 = vmatprep.mubr.msk.f32.mxu1 %vm434_vm4, %v13830_v56  ;;  %v13835_v56 = vld [vmem:[#allocation107_spill] sm:$0xff] }
 0x23e   : > { %v11742_v39 = vadd.f32 %v8537_v35, %v3750_v59  ;;  %v3749_v50 = vadd.f32 %v3662_v57, %v11528_v48  ;;  %v3928_v12 = vpop.f32.mrf.mxu1  ;;  %v13834_v35 = vld [vmem:[#allocation106_spill] sm:$0xff] }
 0x23f   : > { %v8490_v29 = vpop.f32.mrf.mxu0  ;;  %8789 = vmatmul.mubr.msk.f32.gmra.mxu0 %vm434_vm4, %v13831_v42  ;;  %v13837_v42 = vld [vmem:[#allocation108_spill] sm:$0xff] }
 0x240   : > { %v11747_v27 = vadd.f32 %v3928_v12, %v3749_v50  ;;  %v3752_v16 = vadd.f32 %v8490_v29, %v11534_v47  ;;  %v8540_v49 = vpop.f32.mrf.mxu1  ;;  %8839 = vmatmul.mubr.msk.f32.gmra.mxu1 %vm434_vm4, %v13832_v54  ;;  %8791 = vmatprep.mubr.msk.f32.mxu0 %vm434_vm4, %v13833_v17  ;;  %v13836_v29 = vld [vmem:[#allocation109_spill] sm:$0xff] }
 0x241   : > { %v3672_v59 = vpop.f32.mrf.mxu0  ;;  %8841 = vmatprep.mubr.msk.f32.mxu1 %vm434_vm4, %v13834_v35  ;;  %v13839_v35 = vld [vmem:[#allocation46_spill] sm:$0xff] }
 0x242   : > { %v11756_v48 = vadd.f32 %v8540_v49, %v3752_v16  ;;  %v3751_v24 = vadd.f32 %v3672_v59, %v11538_v34  ;;  %v3938_v58 = vpop.f32.mrf.mxu1  ;;  %v13838_v49 = vld [vmem:[#allocation110_spill] sm:$0xff] }
 0x243   : > { %v8493_v57 = vpop.f32.mrf.mxu0  ;;  %8792 = vmatmul.mubr.msk.f32.gmra.mxu0 %vm434_vm4, %v13835_v56  ;;  %v13841_v56 = vld [vmem:[#allocation112_spill] sm:$0xff] }
 0x244   : > { %v11761_v47 = vadd.f32 %v3938_v58, %v3751_v24  ;;  %v3754_v50 = vadd.f32 %v8493_v57, %v11544_v44  ;;  %v8543_v12 = vpop.f32.mrf.mxu1  ;;  %8842 = vmatmul.mubr.msk.f32.gmra.mxu1 %vm434_vm4, %v13836_v29  ;;  %8794 = vmatprep.mubr.msk.f32.mxu0 %vm434_vm4, %v13837_v42  ;;  %v13840_v57 = vld [vmem:[#allocation111_spill] sm:$0xff]  ;;  %v5109_v29 = vrot.slane %v11578_v0, 1  ;;  %v11786_v42 = vld [vmem:[#allocation2 + $0x1a8] sm:$0x3] }
 0x245   : > { %v3682_v16 = vpop.f32.mrf.mxu0  ;;  %8844 = vmatprep.mubr.msk.f32.mxu1 %vm434_vm4, %v13838_v49 }
 0x246   : > { %v11770_v34 = vadd.f32 %v8543_v12, %v3754_v50  ;;  %v3753_v54 = vadd.f32 %v3682_v16, %v11548_v30  ;;  %v3948_v17 = vpop.f32.mrf.mxu1  ;;  %v5108_v50 = vrot.slane %v11564_v45, 1  ;;  %v13842_v30 = vld [vmem:[#allocation113_spill] sm:$0xff]  ;;  %v5114_v16 = vrot.slane %v11569_v21, 1 }
 0x247   : > { %v8496_v59 = vpop.f32.mrf.mxu0  ;;  %8795 = vmatmul.mubr.msk.f32.gmra.mxu0 %vm434_vm4, %v13839_v35 }
 0x248   : > { %v11775_v44 = vadd.f32 %v3948_v17, %v3753_v54  ;;  %v3756_v24 = vadd.f32 %v8496_v59, %v11554_v52  ;;  %v8546_v58 = vpop.f32.mrf.mxu1  ;;  %8845 = vmatmul.mubr.msk.f32.gmra.mxu1 %vm434_vm4, %v13840_v57  ;;  %8797 = vmatprep.mubr.msk.f32.mxu0 %vm434_vm4, %v13841_v56  ;;  %v5115_v17 = vrot.slane %v11582_v11, 1  ;;  %v11793_v59 = vld [vmem:[#allocation3 + $0x1a8] sm:$0x3] }
 0x249   : > { %v3692_v12 = vpop.f32.mrf.mxu0  ;;  %8847 = vmatprep.mubr.msk.f32.mxu1 %vm434_vm4, %v13842_v30 }
 0x24a   : > { %v11789_v52 = vadd.f32 %v8546_v58, %v3756_v24  ;;  %v3755_v49 = vadd.f32 %v3692_v12, %v11558_v8  ;;  %v3958_v54 = vpop.f32.mrf.mxu1  ;;  %v5111_v8 = vrot.slane %v11786_v42, 1  ;;  %v5110_v58 = vsel %vm1307_vm5, %v5108_v50, %v5109_v29 }
 0x24b   : > { %v8499_v35 = vpop.f32.mrf.mxu0  ;;  %8798 = vmatmul.mubr.msk.f32.gmra.mxu0 %vm434_vm4, %v13729_v61  ;;  %v5117_v61 = vrot.slane %v11793_v59, 1 }
 0x24c   : > { %v11797_v57 = vadd.f32 %v3958_v54, %v3755_v49  ;;  %v3758_v56 = vadd.f32 %v8499_v35, %v11566_v40  ;;  %v8549_v30 = vpop.f32.mrf.mxu1  ;;  %8848 = vmatmul.mubr.msk.f32.gmra.mxu1 %vm434_vm4, %v13730_v55  ;;  %8800 = vmatprep.mubr.msk.f32.mxu0 %vm434_vm4, %v11108_v18  ;;  %v5116_v55 = vsel %vm1307_vm5, %v5114_v16, %v5115_v17 }
 0x24d   : > { %v3702_v24 = vpop.f32.mrf.mxu0  ;;  %8850 = vmatprep.mubr.msk.f32.mxu1 %vm434_vm4, %v11115_v37  ;;  %v5112_v50 = vsel %vm1307_vm5, %v5109_v29, %v5111_v8  ;;  %v5118_v16 = vsel %vm1307_vm5, %v5115_v17, %v5117_v61 }
 0x24e   : > { %v11809_v12 = vadd.f32 %v8549_v30, %v3758_v56  ;;  %v3757_v40 = vadd.f32 %v3702_v24, %v11572_v13  ;;  %v3968_v49 = vpop.f32.mrf.mxu1 }
 0x24f   : > { %v8502_v54 = vpop.f32.mrf.mxu0  ;;  %8801 = vmatmul.mubr.msk.f32.gmra.mxu0 %vm434_vm4, %v11127_v33 }
 0x250   : > { %v11815_v18 = vadd.f32 %v3968_v49, %v3757_v40  ;;  %v3760_v35 = vadd.f32 %v8502_v54, %v11584_v31  ;;  %v8552_v37 = vpop.f32.mrf.mxu1  ;;  %8851 = vmatmul.mubr.msk.f32.gmra.mxu1 %vm434_vm4, %v11132_v26  ;;  %8803 = vmatprep.mubr.msk.f32.mxu0 %vm434_vm4, %v5110_v58 }
 0x251   : > { %v3712_v13 = vpop.f32.mrf.mxu0  ;;  %8853 = vmatprep.mubr.msk.f32.mxu1 %vm434_vm4, %v5116_v55 }
 0x252   : > { %v11824_v56 = vadd.f32 %v8552_v37, %v3760_v35  ;;  %v3759_v33 = vadd.f32 %v3712_v13, %v11589_v46  ;;  %v3978_v30 = vpop.f32.mrf.mxu1  ;;  %v13844_v35 = vld [vmem:[#allocation11_spill] sm:$0xff] }
 0x253   : > { %v8505_v24 = vpop.f32.mrf.mxu0  ;;  %8804 = vmatmul.mubr.msk.f32.gmra.mxu0 %vm434_vm4, %v5112_v50  ;;  %v13845_v50 = vld [vmem:[#allocation8_spill] sm:$0xff] }
 0x254   : > { %v11828_v31 = vadd.f32 %v3978_v30, %v3759_v33  ;;  %v3762_v26 = vadd.f32 %v8505_v24, %v11598_v38  ;;  %v8555_v58 = vpop.f32.mrf.mxu1  ;;  %8854 = vmatmul.mubr.msk.f32.gmra.mxu1 %vm434_vm4, %v5118_v16  ;;  %8858 = vmatprep.mubr.msk.f32.mxu0 %vm434_vm4, %v10360_v36  ;;  %v13847_v16 = vld [vmem:[#allocation6_spill] sm:$0xff] }
 0x255   : > { %v3722_v29 = vpop.f32.mrf.mxu0  ;;  %8908 = vmatprep.mubr.msk.f32.mxu1 %vm434_vm4, %v10367_v20  ;;  %v13843_v20 = vld [vmem:[#allocation9_spill] sm:$0xff] }
 0x256   : > { %v11836_v17 = vadd.f32 %v8555_v58, %v3762_v26  ;;  %v3761_v46 = vadd.f32 %v3722_v29, %v11603_v7  ;;  %v3988_v8 = vpop.f32.mrf.mxu1  ;;  %v13848_v26 = vld [vmem:[#allocation7_spill] sm:$0xff] }
 0x257   : > { %v8560_v61 = vpop.f32.mrf.mxu0  ;;  %8859 = vmatmul.mubr.msk.f32.vlgmr.msra.gmra.mxu0 %vm434_vm4, %v10382_v53 }
 0x258   : > { %v11841_v38 = vadd.f32 %v3988_v8, %v3761_v46  ;;  %v4274_v40 = vadd.f32 %v8560_v61, %v11614_v32  ;;  %v8610_v49 = vpop.f32.mrf.mxu1  ;;  %8909 = vmatmul.mubr.msk.f32.vlgmr.msra.gmra.mxu1 %vm434_vm4, %v10389_v1  ;;  %8861 = vmatprep.mubr.msk.f32.mxu0 %vm434_vm4, %v10392_v28  ;;  %v13846_v28 = vld [vmem:[#allocation10_spill] sm:$0xff]  ;;  %v13849_v46 = vld [vmem:[#allocation28_spill] sm:$0xff] }
 0x259   : > { %v4114_v36 = vpop.f32.mrf.mxu0  ;;  %8911 = vmatprep.mubr.msk.f32.mxu1 %vm434_vm4, %v13843_v20  ;;  %v13850_v8 = vld [vmem:[#allocation26_spill] sm:$0xff] }
 0x25a   : > { %v11850_v7 = vadd.f32 %v8610_v49, %v4274_v40  ;;  %v4273_v55 = vadd.f32 %v4114_v36, %v11621_v2  ;;  %v4380_v53 = vpop.f32.mrf.mxu1  ;;  %v13851_v40 = vld [vmem:[#allocation13_spill] sm:$0xff] }
 0x25b   : > { %v8563_v54 = vpop.f32.mrf.mxu0  ;;  %8862 = vmatmul.mubr.msk.f32.gmra.mxu0 %vm434_vm4, %v13844_v35  ;;  %v13853_v35 = vld [vmem:[#allocation14_spill] sm:$0xff] }
 0x25c   : > { %v11855_v32 = vadd.f32 %v4380_v53, %v4273_v55  ;;  %v4276_v1 = vadd.f32 %v8563_v54, %v11630_v25  ;;  %v8613_v37 = vpop.f32.mrf.mxu1  ;;  %8912 = vmatmul.mubr.msk.f32.gmra.mxu1 %vm434_vm4, %v13845_v50  ;;  %8864 = vmatprep.mubr.msk.f32.mxu0 %vm434_vm4, %v13846_v28  ;;  %v13852_v55 = vld [vmem:[#allocation12_spill] sm:$0xff] }
 0x25d   : > { %v4124_v13 = vpop.f32.mrf.mxu0  ;;  %8914 = vmatprep.mubr.msk.f32.mxu1 %vm434_vm4, %v13847_v16  ;;  %v13855_v50 = vld [vmem:[#allocation16_spill] sm:$0xff] }
 0x25e   : > { %v11864_v2 = vadd.f32 %v8613_v37, %v4276_v1  ;;  %v4275_v33 = vadd.f32 %v4124_v13, %v11635_v51  ;;  %v4390_v30 = vpop.f32.mrf.mxu1  ;;  %v13854_v1 = vld [vmem:[#allocation15_spill] sm:$0xff] }
 0x25f   : > { %v8566_v24 = vpop.f32.mrf.mxu0  ;;  %8865 = vmatmul.mubr.msk.f32.gmra.mxu0 %vm434_vm4, %v13848_v26  ;;  %v13857_v26 = vld [vmem:[#allocation18_spill] sm:$0xff] }
 0x260   : > { %v11869_v25 = vadd.f32 %v4390_v30, %v4275_v33  ;;  %v4278_v58 = vadd.f32 %v8566_v24, %v11644_v5  ;;  %v8616_v29 = vpop.f32.mrf.mxu1  ;;  %8915 = vmatmul.mubr.msk.f32.gmra.mxu1 %vm434_vm4, %v13849_v46  ;;  %8867 = vmatprep.mubr.msk.f32.mxu0 %vm434_vm4, %v13850_v8  ;;  %v13856_v33 = vld [vmem:[#allocation17_spill] sm:$0xff]  ;;  %v13859_v46 = vld [vmem:[#allocation20_spill] sm:$0xff] }
 0x261   : > { %v4134_v61 = vpop.f32.mrf.mxu0  ;;  %8917 = vmatprep.mubr.msk.f32.mxu1 %vm434_vm4, %v13851_v40 }
 0x262   : > { %v11878_v51 = vadd.f32 %v8616_v29, %v4278_v58  ;;  %v4277_v49 = vadd.f32 %v4134_v61, %v11649_v63  ;;  %v4400_v36 = vpop.f32.mrf.mxu1  ;;  %v13858_v58 = vld [vmem:[#allocation19_spill] sm:$0xff] }
 0x263   : > { %v8569_v20 = vpop.f32.mrf.mxu0  ;;  %8868 = vmatmul.mubr.msk.f32.gmra.mxu0 %vm434_vm4, %v13852_v55  ;;  %v13861_v55 = vld [vmem:[#allocation21_spill] sm:$0xff] }
 0x264   : > { %v11883_v5 = vadd.f32 %v4400_v36, %v4277_v49  ;;  %v4280_v53 = vadd.f32 %v8569_v20, %v11658_v23  ;;  %v8619_v54 = vpop.f32.mrf.mxu1  ;;  %8918 = vmatmul.mubr.msk.f32.gmra.mxu1 %vm434_vm4, %v13853_v35  ;;  %8870 = vmatprep.mubr.msk.f32.mxu0 %vm434_vm4, %v13854_v1  ;;  %v13860_v49 = vld [vmem:[#allocation66_spill] sm:$0xff]  ;;  %v13863_v35 = vld [vmem:[#allocation23_spill] sm:$0xff] }
 0x265   : > { %v4144_v37 = vpop.f32.mrf.mxu0  ;;  %8920 = vmatprep.mubr.msk.f32.mxu1 %vm434_vm4, %v13855_v50 }
 0x266   : > { %v11892_v63 = vadd.f32 %v8619_v54, %v4280_v53  ;;  %v4279_v28 = vadd.f32 %v4144_v37, %v11663_v3  ;;  %v4410_v13 = vpop.f32.mrf.mxu1  ;;  %v13862_v53 = vld [vmem:[#allocation22_spill] sm:$0xff] }
 0x267   : > { %v8572_v16 = vpop.f32.mrf.mxu0  ;;  %8871 = vmatmul.mubr.msk.f32.gmra.mxu0 %vm434_vm4, %v13856_v33  ;;  %v13865_v33 = vld [vmem:[#allocation25_spill] sm:$0xff] }
 0x268   : > { %v11897_v23 = vadd.f32 %v4410_v13, %v4279_v28  ;;  %v4282_v30 = vadd.f32 %v8572_v16, %v11672_v62  ;;  %v8622_v24 = vpop.f32.mrf.mxu1  ;;  %8921 = vmatmul.mubr.msk.f32.gmra.mxu1 %vm434_vm4, %v13857_v26  ;;  %8873 = vmatprep.mubr.msk.f32.mxu0 %vm434_vm4, %v13858_v58  ;;  %v13864_v28 = vld [vmem:[#allocation24_spill] sm:$0xff]  ;;  %v13867_v26 = vld [vmem:[#allocation27_spill] sm:$0xff] }
 0x269   : > { %v4154_v29 = vpop.f32.mrf.mxu0  ;;  %8923 = vmatprep.mubr.msk.f32.mxu1 %vm434_vm4, %v13859_v46 }
 0x26a   : > { %v11906_v3 = vadd.f32 %v8622_v24, %v4282_v30  ;;  %v4281_v8 = vadd.f32 %v4154_v29, %v11677_v9  ;;  %v4420_v61 = vpop.f32.mrf.mxu1  ;;  %v13866_v30 = vld [vmem:[#allocation116_spill] sm:$0xff] }
 0x26b   : > { %v8575_v40 = vpop.f32.mrf.mxu0  ;;  %8874 = vmatmul.mubr.msk.f32.gmra.mxu0 %vm434_vm4, %v13860_v49  ;;  %v13869_v49 = vld [vmem:[#allocation117_spill] sm:$0xff] }
 0x26c   : > { %v11911_v62 = vadd.f32 %v4420_v61, %v4281_v8  ;;  %v4284_v36 = vadd.f32 %v8575_v40, %v11686_v14  ;;  %v8625_v20 = vpop.f32.mrf.mxu1  ;;  %8924 = vmatmul.mubr.msk.f32.gmra.mxu1 %vm434_vm4, %v13861_v55  ;;  %8876 = vmatprep.mubr.msk.f32.mxu0 %vm434_vm4, %v13862_v53  ;;  %v13868_v8 = vld [vmem:[#allocation29_spill] sm:$0xff]  ;;  %v13871_v55 = vld [vmem:[#allocation84_spill] sm:$0xff] }
 0x26d   : > { %v4164_v54 = vpop.f32.mrf.mxu0  ;;  %8926 = vmatprep.mubr.msk.f32.mxu1 %vm434_vm4, %v13863_v35 }
 0x26e   : > { %v11920_v9 = vadd.f32 %v8625_v20, %v4284_v36  ;;  %v4283_v1 = vadd.f32 %v4164_v54, %v11691_v15  ;;  %v4430_v37 = vpop.f32.mrf.mxu1  ;;  %v13870_v36 = vld [vmem:[#allocation118_spill] sm:$0xff] }
 0x26f   : > { %v8578_v50 = vpop.f32.mrf.mxu0  ;;  %8877 = vmatmul.mubr.msk.f32.gmra.mxu0 %vm434_vm4, %v13864_v28  ;;  %v13873_v28 = vld [vmem:[#allocation33_spill] sm:$0xff] }
 0x270   : > { %v11925_v14 = vadd.f32 %v4430_v37, %v4283_v1  ;;  %v4286_v13 = vadd.f32 %v8578_v50, %v11700_v4  ;;  %v8628_v16 = vpop.f32.mrf.mxu1  ;;  %8927 = vmatmul.mubr.msk.f32.gmra.mxu1 %vm434_vm4, %v13865_v33  ;;  %8879 = vmatprep.mubr.msk.f32.mxu0 %vm434_vm4, %v13866_v30  ;;  %v13872_v1 = vld [vmem:[#allocation31_spill] sm:$0xff]  ;;  %v13875_v33 = vld [vmem:[#allocation32_spill] sm:$0xff] }
 0x271   : > { %v4174_v24 = vpop.f32.mrf.mxu0  ;;  %8929 = vmatprep.mubr.msk.f32.mxu1 %vm434_vm4, %v13867_v26 }
 0x272   : > { %v11934_v15 = vadd.f32 %v8628_v16, %v4286_v13  ;;  %v4285_v58 = vadd.f32 %v4174_v24, %v11705_v43  ;;  %v4440_v29 = vpop.f32.mrf.mxu1  ;;  %v13874_v13 = vld [vmem:[#allocation30_spill] sm:$0xff] }
 0x273   : > { %v8581_v46 = vpop.f32.mrf.mxu0  ;;  %8880 = vmatmul.mubr.msk.f32.gmra.mxu0 %vm434_vm4, %v13868_v8  ;;  %v13877_v8 = vld [vmem:[#allocation90_spill] sm:$0xff] }
 0x274   : > { %v11939_v4 = vadd.f32 %v4440_v29, %v4285_v58  ;;  %v4288_v61 = vadd.f32 %v8581_v46, %v11714_v41  ;;  %v8631_v40 = vpop.f32.mrf.mxu1  ;;  %8930 = vmatmul.mubr.msk.f32.gmra.mxu1 %vm434_vm4, %v13869_v49  ;;  %8882 = vmatprep.mubr.msk.f32.mxu0 %vm434_vm4, %v13870_v36  ;;  %v13876_v58 = vld [vmem:[#allocation88_spill] sm:$0xff]  ;;  %v13879_v49 = vld [vmem:[#allocation37_spill] sm:$0xff] }
 0x275   : > { %v4184_v20 = vpop.f32.mrf.mxu0  ;;  %8932 = vmatprep.mubr.msk.f32.mxu1 %vm434_vm4, %v13871_v55 }
 0x276   : > { %v11948_v43 = vadd.f32 %v8631_v40, %v4288_v61  ;;  %v4287_v53 = vadd.f32 %v4184_v20, %v11719_v6  ;;  %v4450_v54 = vpop.f32.mrf.mxu1  ;;  %v13878_v61 = vld [vmem:[#allocation35_spill] sm:$0xff] }
 0x277   : > { %v8584_v35 = vpop.f32.mrf.mxu0  ;;  %8883 = vmatmul.mubr.msk.f32.gmra.mxu0 %vm434_vm4, %v13872_v1  ;;  %v13881_v1 = vld [vmem:[#allocation36_spill] sm:$0xff] }
 0x278   : > { %v11953_v41 = vadd.f32 %v4450_v54, %v4287_v53  ;;  %v4290_v37 = vadd.f32 %v8584_v35, %v11728_v19  ;;  %v8634_v50 = vpop.f32.mrf.mxu1  ;;  %8933 = vmatmul.mubr.msk.f32.gmra.mxu1 %vm434_vm4, %v13873_v28  ;;  %8885 = vmatprep.mubr.msk.f32.mxu0 %vm434_vm4, %v13874_v13  ;;  %v13880_v53 = vld [vmem:[#allocation34_spill] sm:$0xff]  ;;  %v13883_v28 = vld [vmem:[#allocation39_spill] sm:$0xff] }
 0x279   : > { %v4194_v16 = vpop.f32.mrf.mxu0  ;;  %8935 = vmatprep.mubr.msk.f32.mxu1 %vm434_vm4, %v13875_v33 }
 0x27a   : > { %v11962_v6 = vadd.f32 %v8634_v50, %v4290_v37  ;;  %v4289_v30 = vadd.f32 %v4194_v16, %v11733_v10  ;;  %v4460_v24 = vpop.f32.mrf.mxu1  ;;  %v13882_v37 = vld [vmem:[#allocation94_spill] sm:$0xff] }
 0x27b   : > { %v8587_v26 = vpop.f32.mrf.mxu0  ;;  %8886 = vmatmul.mubr.msk.f32.gmra.mxu0 %vm434_vm4, %v13876_v58  ;;  %v13885_v58 = vld [vmem:[#allocation38_spill] sm:$0xff] }
 0x27c   : > { %v11967_v19 = vadd.f32 %v4460_v24, %v4289_v30  ;;  %v4292_v29 = vadd.f32 %v8587_v26, %v11742_v39  ;;  %v8637_v46 = vpop.f32.mrf.mxu1  ;;  %8936 = vmatmul.mubr.msk.f32.gmra.mxu1 %vm434_vm4, %v13877_v8  ;;  %8888 = vmatprep.mubr.msk.f32.mxu0 %vm434_vm4, %v13878_v61  ;;  %v13884_v30 = vld [vmem:[#allocation41_spill] sm:$0xff]  ;;  %v13887_v8 = vld [vmem:[#allocation99_spill] sm:$0xff] }
 0x27d   : > { %v4204_v40 = vpop.f32.mrf.mxu0  ;;  %8938 = vmatprep.mubr.msk.f32.mxu1 %vm434_vm4, %v13879_v49 }
 0x27e   : > { %v11976_v10 = vadd.f32 %v8637_v46, %v4292_v29  ;;  %v4291_v36 = vadd.f32 %v4204_v40, %v11747_v27  ;;  %v4470_v20 = vpop.f32.mrf.mxu1  ;;  %v13886_v29 = vld [vmem:[#allocation40_spill] sm:$0xff] }
 0x27f   : > { %v8590_v55 = vpop.f32.mrf.mxu0  ;;  %8889 = vmatmul.mubr.msk.f32.gmra.mxu0 %vm434_vm4, %v13880_v53  ;;  %v13889_v53 = vld [vmem:[#allocation43_spill] sm:$0xff] }
 0x280   : > { %v11981_v39 = vadd.f32 %v4470_v20, %v4291_v36  ;;  %v4294_v54 = vadd.f32 %v8590_v55, %v11756_v48  ;;  %v8640_v35 = vpop.f32.mrf.mxu1  ;;  %8939 = vmatmul.mubr.msk.f32.gmra.mxu1 %vm434_vm4, %v13881_v1  ;;  %8891 = vmatprep.mubr.msk.f32.mxu0 %vm434_vm4, %v13882_v37  ;;  %v13888_v36 = vld [vmem:[#allocation101_spill] sm:$0xff]  ;;  %v5652_v37 = vrot.slane %v11578_v0, 2  ;;  %v5654_v0 = vrot.slane %v11786_v42, 2 }
 0x281   : > { %v4214_v50 = vpop.f32.mrf.mxu0  ;;  %8941 = vmatprep.mubr.msk.f32.mxu1 %vm434_vm4, %v13883_v28 }
 0x282   : > { %v11990_v27 = vadd.f32 %v8640_v35, %v4294_v54  ;;  %v4293_v13 = vadd.f32 %v4214_v50, %v11761_v47  ;;  %v4480_v16 = vpop.f32.mrf.mxu1  ;;  %v13890_v54 = vld [vmem:[#allocation45_spill] sm:$0xff]  ;;  %v5651_v35 = vrot.slane %v11564_v45, 2  ;;  %v5656_v50 = vrot.slane %v11569_v21, 2  ;;  %v13892_v21 = vld [vmem:[#allocation50_spill] sm:$0xff] }
 0x283   : > { %v8593_v33 = vpop.f32.mrf.mxu0  ;;  %8892 = vmatmul.mubr.msk.f32.gmra.mxu0 %vm434_vm4, %v13884_v30 }
 0x284   : > { %v11995_v48 = vadd.f32 %v4480_v16, %v4293_v13  ;;  %v4296_v24 = vadd.f32 %v8593_v33, %v11770_v34  ;;  %v8643_v26 = vpop.f32.mrf.mxu1  ;;  %8942 = vmatmul.mubr.msk.f32.gmra.mxu1 %vm434_vm4, %v13885_v58  ;;  %8894 = vmatprep.mubr.msk.f32.mxu0 %vm434_vm4, %v13886_v29  ;;  %v5657_v16 = vrot.slane %v11582_v11, 2  ;;  %v5653_v11 = vsel %vm2136_vm6, %v5651_v35, %v5652_v37 }
 0x285   : > { %v4224_v46 = vpop.f32.mrf.mxu0  ;;  %8944 = vmatprep.mubr.msk.f32.mxu1 %vm434_vm4, %v13887_v8  ;;  %v13894_v8 = vld [vmem:[#allocation52_spill] sm:$0xff] }
 0x286   : > { %v12004_v47 = vadd.f32 %v8643_v26, %v4296_v24  ;;  %v4295_v61 = vadd.f32 %v4224_v46, %v11775_v44  ;;  %v4490_v40 = vpop.f32.mrf.mxu1  ;;  %v13891_v44 = vld [vmem:[#allocation42_spill] sm:$0xff]  ;;  %v13893_v26 = vld [vmem:[#allocation51_spill] sm:$0xff] }
 0x287   : > { %v8596_v49 = vpop.f32.mrf.mxu0  ;;  %8895 = vmatmul.mubr.msk.f32.gmra.mxu0 %vm434_vm4, %v13888_v36 }
 0x288   : > { %v12009_v34 = vadd.f32 %v4490_v40, %v4295_v61  ;;  %v4298_v20 = vadd.f32 %v8596_v49, %v11789_v52  ;;  %v8646_v55 = vpop.f32.mrf.mxu1  ;;  %8945 = vmatmul.mubr.msk.f32.gmra.mxu1 %vm434_vm4, %v13889_v53  ;;  %8897 = vmatprep.mubr.msk.f32.mxu0 %vm434_vm4, %v13890_v54  ;;  %v13895_v49 = vld [vmem:[#allocation114_spill] sm:$0xff] }
 0x289   : > { %v4234_v1 = vpop.f32.mrf.mxu0  ;;  %8947 = vmatprep.mubr.msk.f32.mxu1 %vm434_vm4, %v13891_v44 }
 0x28a   : > { %v12021_v28 = vadd.f32 %v8646_v55, %v4298_v20  ;;  %v4297_v52 = vadd.f32 %v4234_v1, %v11797_v57  ;;  %v4500_v13 = vpop.f32.mrf.mxu1 }
 0x28b   : > { %v8599_v33 = vpop.f32.mrf.mxu0  ;;  %8898 = vmatmul.mubr.msk.f32.gmra.mxu0 %vm434_vm4, %v13785_v22  ;;  %v5659_v22 = vrot.slane %v11793_v59, 2  ;;  %v5655_v59 = vsel %vm2136_vm6, %v5652_v37, %v5654_v0 }
 0x28c   : > { %v12027_v45 = vadd.f32 %v4500_v13, %v4297_v52  ;;  %v4300_v30 = vadd.f32 %v8599_v33, %v11809_v12  ;;  %v8649_v24 = vpop.f32.mrf.mxu1  ;;  %8948 = vmatmul.mubr.msk.f32.gmra.mxu1 %vm434_vm4, %v13786_v60  ;;  %8900 = vmatprep.mubr.msk.f32.mxu0 %vm434_vm4, %v13892_v21  ;;  %v5658_v60 = vsel %vm2136_vm6, %v5656_v50, %v5657_v16 }
 0x28d   : > { %v4244_v57 = vpop.f32.mrf.mxu0  ;;  %8950 = vmatprep.mubr.msk.f32.mxu1 %vm434_vm4, %v13893_v26  ;;  %v5660_v36 = vsel %vm2136_vm6, %v5657_v16, %v5659_v22 }
 0x28e   : > { %v12039_v58 = vadd.f32 %v8649_v24, %v4300_v30  ;;  %v4299_v12 = vadd.f32 %v4244_v57, %v11815_v18  ;;  %v4510_v29 = vpop.f32.mrf.mxu1 }
 0x28f   : > { %v8602_v46 = vpop.f32.mrf.mxu0  ;;  %8901 = vmatmul.mubr.msk.f32.gmra.mxu0 %vm434_vm4, %v13894_v8 }
 0x290   : > { %v12045_v42 = vadd.f32 %v4510_v29, %v4299_v12  ;;  %v4302_v61 = vadd.f32 %v8602_v46, %v11824_v56  ;;  %v8652_v40 = vpop.f32.mrf.mxu1  ;;  %8951 = vmatmul.mubr.msk.f32.gmra.mxu1 %vm434_vm4, %v13895_v49  ;;  %8903 = vmatprep.mubr.msk.f32.mxu0 %vm434_vm4, %v5653_v11 }
 0x291   : > { %v4254_v18 = vpop.f32.mrf.mxu0  ;;  %8953 = vmatprep.mubr.msk.f32.mxu1 %vm434_vm4, %v5658_v60 }
 0x292   : > { %v12054_v20 = vadd.f32 %v8652_v40, %v4302_v61  ;;  %v4301_v55 = vadd.f32 %v4254_v18, %v11828_v31  ;;  %v4520_v53 = vpop.f32.mrf.mxu1 }
 0x293   : > { %v8605_v54 = vpop.f32.mrf.mxu0  ;;  %8904 = vmatmul.mubr.msk.f32.gmra.mxu0 %vm434_vm4, %v5655_v59 }
 0x294   : > { %v12058_v56 = vadd.f32 %v4520_v53, %v4301_v55  ;;  %v4304_v35 = vadd.f32 %v8605_v54, %v11836_v17  ;;  %v8655_v1 = vpop.f32.mrf.mxu1  ;;  %8954 = vmatmul.mubr.msk.f32.gmra.mxu1 %vm434_vm4, %v5660_v36 }
 0x295   : > { %v4264_v44 = vpop.f32.mrf.mxu0 }
 0x296   : > { %v12062_v37 = vadd.f32 %v8655_v1, %v4304_v35  ;;  %v4303_v50 = vadd.f32 %v4264_v44, %v11841_v38  ;;  %v4530_v52 = vpop.f32.mrf.mxu1 }
 0x297   : > { %v8660_v13 = vpop.f32.mrf.mxu0 }
 0x298   : > { %v12065_v16 = vadd.f32 %v4530_v52, %v4303_v50  ;;  %v4808_v31 = vadd.f32 %v8660_v13, %v11850_v7  ;;  %v8710_v33 = vpop.f32.mrf.mxu1 }
 0x299   : > { %v4648_v30 = vpop.f32.mrf.mxu0 }
 0x29a   : > { %v12068_v24 = vadd.f32 %v8710_v33, %v4808_v31  ;;  %v4807_v17 = vadd.f32 %v4648_v30, %v11855_v32  ;;  %v4916_v21 = vpop.f32.mrf.mxu1 }
 0x29b   : > { %v8663_v0 = vpop.f32.mrf.mxu0 }
 0x29c   : > { %v12071_v57 = vadd.f32 %v4916_v21, %v4807_v17  ;;  %v4810_v26 = vadd.f32 %v8663_v0, %v11864_v2  ;;  %v8713_v11 = vpop.f32.mrf.mxu1 }
 0x29d   : > { %v4658_v38 = vpop.f32.mrf.mxu0 }
 0x29e   : > { %v12074_v22 = vadd.f32 %v8713_v11, %v4810_v26  ;;  %v4809_v12 = vadd.f32 %v4658_v38, %v11869_v25  ;;  %v4926_v29 = vpop.f32.mrf.mxu1 }
 0x29f   : > { %v8666_v7 = vpop.f32.mrf.mxu0 }
 0x2a0   : > { %v12077_v60 = vadd.f32 %v4926_v29, %v4809_v12  ;;  %v4812_v46 = vadd.f32 %v8666_v7, %v11878_v51  ;;  %v8716_v8 = vpop.f32.mrf.mxu1 }
 0x2a1   : > { %v4668_v32 = vpop.f32.mrf.mxu0 }
 0x2a2   : > { %v12080_v61 = vadd.f32 %v8716_v8, %v4812_v46  ;;  %v4811_v40 = vadd.f32 %v4668_v32, %v11883_v5  ;;  %v4936_v49 = vpop.f32.mrf.mxu1 }
 0x2a3   : > { %v8669_v2 = vpop.f32.mrf.mxu0 }
 0x2a4   : > { %v12083_v59 = vadd.f32 %v4936_v49, %v4811_v40  ;;  %v4814_v18 = vadd.f32 %v8669_v2, %v11892_v63  ;;  %v8719_v36 = vpop.f32.mrf.mxu1 }
 0x2a5   : > { %v4678_v25 = vpop.f32.mrf.mxu0 }
 0x2a6   : > { %v12086_v55 = vadd.f32 %v8719_v36, %v4814_v18  ;;  %v4813_v53 = vadd.f32 %v4678_v25, %v11897_v23  ;;  %v4946_v54 = vpop.f32.mrf.mxu1 }
 0x2a7   : > { %v8672_v51 = vpop.f32.mrf.mxu0 }
 0x2a8   : > { %v12089_v35 = vadd.f32 %v4946_v54, %v4813_v53  ;;  %v4816_v1 = vadd.f32 %v8672_v51, %v11906_v3  ;;  %v8722_v44 = vpop.f32.mrf.mxu1 }
 0x2a9   : > { %v4688_v5 = vpop.f32.mrf.mxu0 }
 0x2aa   : > { %v12092_v50 = vadd.f32 %v8722_v44, %v4816_v1  ;;  %v4815_v52 = vadd.f32 %v4688_v5, %v11911_v62  ;;  %v4956_v13 = vpop.f32.mrf.mxu1 }
 0x2ab   : > { %v8675_v63 = vpop.f32.mrf.mxu0 }
 0x2ac   : > { %v12095_v31 = vadd.f32 %v4956_v13, %v4815_v52  ;;  %v4818_v33 = vadd.f32 %v8675_v63, %v11920_v9  ;;  %v8725_v30 = vpop.f32.mrf.mxu1 }
 0x2ad   : > { %v4698_v23 = vpop.f32.mrf.mxu0 }
 0x2ae   : > { %v12098_v17 = vadd.f32 %v8725_v30, %v4818_v33  ;;  %v4817_v21 = vadd.f32 %v4698_v23, %v11925_v14  ;;  %v4966_v0 = vpop.f32.mrf.mxu1 }
 0x2af   : > { %v8678_v3 = vpop.f32.mrf.mxu0 }
 0x2b0   : > { %v12101_v26 = vadd.f32 %v4966_v0, %v4817_v21  ;;  %v4820_v11 = vadd.f32 %v8678_v3, %v11934_v15  ;;  %v8728_v38 = vpop.f32.mrf.mxu1 }
 0x2b1   : > { %v4708_v62 = vpop.f32.mrf.mxu0 }
 0x2b2   : > { %v12104_v12 = vadd.f32 %v8728_v38, %v4820_v11  ;;  %v4819_v29 = vadd.f32 %v4708_v62, %v11939_v4  ;;  %v4976_v7 = vpop.f32.mrf.mxu1 }
 0x2b3   : > { %v8681_v9 = vpop.f32.mrf.mxu0 }
 0x2b4   : > { %v12107_v46 = vadd.f32 %v4976_v7, %v4819_v29  ;;  %v4822_v8 = vadd.f32 %v8681_v9, %v11948_v43  ;;  %v8731_v32 = vpop.f32.mrf.mxu1 }
 0x2b5   : > { %v4718_v14 = vpop.f32.mrf.mxu0 }
 0x2b6   : > { %v12110_v40 = vadd.f32 %v8731_v32, %v4822_v8  ;;  %v4821_v49 = vadd.f32 %v4718_v14, %v11953_v41  ;;  %v4986_v2 = vpop.f32.mrf.mxu1 }
 0x2b7   : > { %v8684_v15 = vpop.f32.mrf.mxu0 }
 0x2b8   : > { %v12113_v18 = vadd.f32 %v4986_v2, %v4821_v49  ;;  %v4824_v36 = vadd.f32 %v8684_v15, %v11962_v6  ;;  %v8734_v25 = vpop.f32.mrf.mxu1 }
 0x2b9   : > { %v4728_v4 = vpop.f32.mrf.mxu0 }
 0x2ba   : > { %v12116_v53 = vadd.f32 %v8734_v25, %v4824_v36  ;;  %v4823_v54 = vadd.f32 %v4728_v4, %v11967_v19  ;;  %v4996_v51 = vpop.f32.mrf.mxu1 }
 0x2bb   : > { %v8687_v43 = vpop.f32.mrf.mxu0 }
 0x2bc   : > { %13896 = vst [vmem:[#allocation115_spill] sm:$0xff] %v12116_v53  ;;  %v12119_v1 = vadd.f32 %v4996_v51, %v4823_v54  ;;  %v4826_v44 = vadd.f32 %v8687_v43, %v11976_v10  ;;  %v8737_v5 = vpop.f32.mrf.mxu1 }
 0x2bd   : > { %v4738_v41 = vpop.f32.mrf.mxu0 }
 0x2be   : > { %13897 = vst [vmem:[#allocation48_spill] sm:$0xff] %v12119_v1  ;;  %v12122_v52 = vadd.f32 %v8737_v5, %v4826_v44  ;;  %v4825_v13 = vadd.f32 %v4738_v41, %v11981_v39  ;;  %v5006_v63 = vpop.f32.mrf.mxu1 }
 0x2bf   : > { %v8690_v6 = vpop.f32.mrf.mxu0 }
 0x2c0   : > { %13898 = vst [vmem:[#allocation47_spill] sm:$0xff] %v12122_v52  ;;  %v12125_v33 = vadd.f32 %v5006_v63, %v4825_v13  ;;  %v4828_v30 = vadd.f32 %v8690_v6, %v11990_v27  ;;  %v8740_v23 = vpop.f32.mrf.mxu1 }
 0x2c1   : > { %v4748_v19 = vpop.f32.mrf.mxu0 }
 0x2c2   : > { %13899 = vst [vmem:[#allocation49_spill] sm:$0xff] %v12125_v33  ;;  %v12128_v21 = vadd.f32 %v8740_v23, %v4828_v30  ;;  %v4827_v0 = vadd.f32 %v4748_v19, %v11995_v48  ;;  %v5016_v3 = vpop.f32.mrf.mxu1 }
 0x2c3   : > { %v8693_v10 = vpop.f32.mrf.mxu0 }
 0x2c4   : > { %13900 = vst [vmem:[#allocation44_spill] sm:$0xff] %v12128_v21  ;;  %v12131_v11 = vadd.f32 %v5016_v3, %v4827_v0  ;;  %v4830_v38 = vadd.f32 %v8693_v10, %v12004_v47  ;;  %v8743_v62 = vpop.f32.mrf.mxu1 }
 0x2c5   : > { %v4758_v39 = vpop.f32.mrf.mxu0 }
 0x2c6   : > { %13901 = vst [vmem:[#allocation105_spill] sm:$0xff] %v12131_v11  ;;  %v12134_v29 = vadd.f32 %v8743_v62, %v4830_v38  ;;  %v4829_v7 = vadd.f32 %v4758_v39, %v12009_v34  ;;  %v5026_v9 = vpop.f32.mrf.mxu1 }
 0x2c7   : > { %v8696_v27 = vpop.f32.mrf.mxu0 }
 0x2c8   : > { %13902 = vst [vmem:[#allocation53_spill] sm:$0xff] %v12134_v29  ;;  %v12137_v8 = vadd.f32 %v5026_v9, %v4829_v7  ;;  %v4832_v32 = vadd.f32 %v8696_v27, %v12021_v28  ;;  %v8746_v14 = vpop.f32.mrf.mxu1 }
 0x2c9   : > { %v4768_v48 = vpop.f32.mrf.mxu0 }
 0x2ca   : > { %13903 = vst [vmem:[#allocation54_spill] sm:$0xff] %v12137_v8  ;;  %v12140_v49 = vadd.f32 %v8746_v14, %v4832_v32  ;;  %v4831_v2 = vadd.f32 %v4768_v48, %v12027_v45  ;;  %v5036_v15 = vpop.f32.mrf.mxu1 }
 0x2cb   : > { %v8699_v47 = vpop.f32.mrf.mxu0 }
 0x2cc   : > { %13904 = vst [vmem:[#allocation55_spill] sm:$0xff] %v12140_v49  ;;  %v12143_v36 = vadd.f32 %v5036_v15, %v4831_v2  ;;  %v4834_v25 = vadd.f32 %v8699_v47, %v12039_v58  ;;  %v8749_v4 = vpop.f32.mrf.mxu1 }
 0x2cd   : > { %v4778_v34 = vpop.f32.mrf.mxu0 }
 0x2ce   : > { %13905 = vst [vmem:[#allocation56_spill] sm:$0xff] %v12143_v36  ;;  %v12146_v54 = vadd.f32 %v8749_v4, %v4834_v25  ;;  %v4833_v51 = vadd.f32 %v4778_v34, %v12045_v42  ;;  %v5046_v43 = vpop.f32.mrf.mxu1 }
 0x2cf   : > { %v8702_v28 = vpop.f32.mrf.mxu0 }
 0x2d0   : > { %13906 = vst [vmem:[#allocation57_spill] sm:$0xff] %v12146_v54  ;;  %v12149_v44 = vadd.f32 %v5046_v43, %v4833_v51  ;;  %v4836_v5 = vadd.f32 %v8702_v28, %v12054_v20  ;;  %v8752_v41 = vpop.f32.mrf.mxu1 }
 0x2d1   : > { %v4788_v45 = vpop.f32.mrf.mxu0 }
 0x2d2   : > { %13907 = vst [vmem:[#allocation58_spill] sm:$0xff] %v12149_v44  ;;  %v12152_v13 = vadd.f32 %v8752_v41, %v4836_v5  ;;  %v4835_v63 = vadd.f32 %v4788_v45, %v12058_v56  ;;  %v5056_v6 = vpop.f32.mrf.mxu1 }
 0x2d3   : > { %v8705_v58 = vpop.f32.mrf.mxu0 }
 0x2d4   : > { %13908 = vst [vmem:[#allocation59_spill] sm:$0xff] %v12152_v13  ;;  %v12155_v30 = vadd.f32 %v5056_v6, %v4835_v63  ;;  %v4838_v23 = vadd.f32 %v8705_v58, %v12062_v37  ;;  %v8755_v19 = vpop.f32.mrf.mxu1 }
 0x2d5   : > { %v4798_v42 = vpop.f32.mrf.mxu0 }
 0x2d6   : > { %13909 = vst [vmem:[#allocation60_spill] sm:$0xff] %v12155_v30  ;;  %v12158_v0 = vadd.f32 %v8755_v19, %v4838_v23  ;;  %v4837_v3 = vadd.f32 %v4798_v42, %v12065_v16  ;;  %v5066_v10 = vpop.f32.mrf.mxu1 }
 0x2d7   : > { %v8760_v20 = vpop.f32.mrf.mxu0 }
 0x2d8   : > { %13910 = vst [vmem:[#allocation61_spill] sm:$0xff] %v12158_v0  ;;  %v12161_v38 = vadd.f32 %v5066_v10, %v4837_v3  ;;  %v12163_v62 = vpop.f32.mrf.mxu1 }
 0x2d9   : > { %v5194_v39 = vpop.f32.mrf.mxu0 }
 0x2da   : > { %13911 = vst [vmem:[#allocation62_spill] sm:$0xff] %v12161_v38  ;;  %v12165_v56 = vpop.f32.mrf.mxu1 }
 0x2db   : > { %v8763_v7 = vpop.f32.mrf.mxu0 }
 0x2dc   : > { %v12167_v9 = vpop.f32.mrf.mxu1 }
 0x2dd   : > { %v5204_v27 = vpop.f32.mrf.mxu0 }
 0x2de   : > { %v12169_v37 = vpop.f32.mrf.mxu1 }
 0x2df   : > { %v8766_v32 = vpop.f32.mrf.mxu0 }
 0x2e0   : > { %v12171_v14 = vpop.f32.mrf.mxu1 }
 0x2e1   : > { %v5214_v48 = vpop.f32.mrf.mxu0 }
 0x2e2   : > { %v12173_v16 = vpop.f32.mrf.mxu1 }
 0x2e3   : > { %v8769_v2 = vpop.f32.mrf.mxu0 }
 0x2e4   : > { %v12175_v15 = vpop.f32.mrf.mxu1 }
 0x2e5   : > { %v5224_v47 = vpop.f32.mrf.mxu0 }
 0x2e6   : > { %v12177_v25 = vpop.f32.mrf.mxu1 }
 0x2e7   : > { %v8772_v4 = vpop.f32.mrf.mxu0 }
 0x2e8   : > { %v12179_v34 = vpop.f32.mrf.mxu1 }
 0x2e9   : > { %v5234_v51 = vpop.f32.mrf.mxu0 }
 0x2ea   : > { %v12181_v43 = vpop.f32.mrf.mxu1 }
 0x2eb   : > { %v8775_v28 = vpop.f32.mrf.mxu0 }
 0x2ec   : > { %v12183_v5 = vpop.f32.mrf.mxu1 }
 0x2ed   : > { %v5244_v41 = vpop.f32.mrf.mxu0 }
 0x2ee   : > { %v12185_v45 = vpop.f32.mrf.mxu1 }
 0x2ef   : > { %13912 = vst [vmem:[#allocation63_spill] sm:$0xff] %v12185_v45  ;;  %v8778_v63 = vpop.f32.mrf.mxu0 }
 0x2f0   : > { %v12187_v6 = vpop.f32.mrf.mxu1 }
 0x2f1   : > { %13913 = vst [vmem:[#allocation64_spill] sm:$0xff] %v12187_v6  ;;  %v5254_v58 = vpop.f32.mrf.mxu0 }
 0x2f2   : > { %v12189_v23 = vpop.f32.mrf.mxu1 }
 0x2f3   : > { %13914 = vst [vmem:[#allocation65_spill] sm:$0xff] %v12189_v23  ;;  %v8781_v19 = vpop.f32.mrf.mxu0 }
 0x2f4   : > { %v12191_v42 = vpop.f32.mrf.mxu1 }
 0x2f5   : > { %13915 = vst [vmem:[#allocation67_spill] sm:$0xff] %v12191_v42  ;;  %v5264_v3 = vpop.f32.mrf.mxu0 }
 0x2f6   : > { %v12193_v10 = vpop.f32.mrf.mxu1 }
 0x2f7   : > { %13916 = vst [vmem:[#allocation68_spill] sm:$0xff] %v12193_v10  ;;  %v8784_v38 = vpop.f32.mrf.mxu0 }
 0x2f8   : > { %v12195_v0 = vpop.f32.mrf.mxu1 }
 0x2f9   : > { %13917 = vst [vmem:[#allocation70_spill] sm:$0xff] %v12195_v0  ;;  %v5274_v30 = vpop.f32.mrf.mxu0 }
 0x2fa   : > { %v12197_v13 = vpop.f32.mrf.mxu1 }
 0x2fb   : > { %13918 = vst [vmem:[#allocation69_spill] sm:$0xff] %v12197_v13  ;;  %v8787_v44 = vpop.f32.mrf.mxu0 }
 0x2fc   : > { %v12199_v54 = vpop.f32.mrf.mxu1 }
 0x2fd   : > { %13919 = vst [vmem:[#allocation71_spill] sm:$0xff] %v12199_v54  ;;  %v5284_v36 = vpop.f32.mrf.mxu0 }
 0x2fe   : > { %v12201_v49 = vpop.f32.mrf.mxu1 }
 0x2ff   : > { %13920 = vst [vmem:[#allocation72_spill] sm:$0xff] %v12201_v49  ;;  %v8790_v8 = vpop.f32.mrf.mxu0 }
 0x300   : > { %v12203_v29 = vpop.f32.mrf.mxu1 }
 0x301   : > { %13921 = vst [vmem:[#allocation73_spill] sm:$0xff] %v12203_v29  ;;  %v5294_v11 = vpop.f32.mrf.mxu0  ;;  %v5354_v29 = vadd.f32 %v8760_v20, %v12068_v24  ;;  %v5359_v24 = vadd.f32 %v5224_v47, %v12089_v35  ;;  %v5366_v35 = vadd.f32 %v8778_v63, %v12104_v12  ;;  %v5368_v12 = vadd.f32 %v8781_v19, %v12110_v40 }
 0x302   : > { %v12205_v42 = vpop.f32.mrf.mxu1 }
 0x303   : > { %13922 = vst [vmem:[#allocation74_spill] sm:$0xff] %v12205_v42  ;;  %v8793_v21 = vpop.f32.mrf.mxu0  ;;  %v5353_v42 = vadd.f32 %v5194_v39, %v12071_v57  ;;  %v5620_v57 = vadd.f32 %v12163_v62, %v5354_v29  ;;  %v5361_v39 = vadd.f32 %v5234_v51, %v12095_v31  ;;  %v13934_v51 = vld [vmem:[#allocation49_spill] sm:$0xff] }
 0x304   : > { %v12207_v10 = vpop.f32.mrf.mxu1 }
 0x305   : > { %13923 = vst [vmem:[#allocation75_spill] sm:$0xff] %v12207_v10  ;;  %v5304_v33 = vpop.f32.mrf.mxu0  ;;  %v5356_v10 = vadd.f32 %v8763_v7, %v12074_v22  ;;  %v5362_v22 = vadd.f32 %v8772_v4, %v12092_v50  ;;  %v13933_v4 = vld [vmem:[#allocation65_spill] sm:$0xff] }
 0x306   : > { %v12209_v0 = vpop.f32.mrf.mxu1 }
 0x307   : > { %13924 = vst [vmem:[#allocation76_spill] sm:$0xff] %v12209_v0  ;;  %v8796_v23 = vpop.f32.mrf.mxu0  ;;  %v5355_v0 = vadd.f32 %v5204_v27, %v12077_v60  ;;  %v5364_v60 = vadd.f32 %v8775_v28, %v12098_v17  ;;  %v5365_v17 = vadd.f32 %v5254_v58, %v12107_v46  ;;  %v13937_v58 = vld [vmem:[#allocation67_spill] sm:$0xff] }
 0x308   : > { %v12211_v13 = vpop.f32.mrf.mxu1  ;;  %v12296_v19 = vadd.f32 %v13937_v58, %v5368_v12 }
 0x309   : > { %13925 = vst [vmem:[#allocation77_spill] sm:$0xff] %v12211_v13  ;;  %v5314_v52 = vpop.f32.mrf.mxu0  ;;  %v5358_v13 = vadd.f32 %v8766_v32, %v12080_v61  ;;  %v5619_v61 = vadd.f32 %v12165_v56, %v5353_v42  ;;  %v12248_v29 = vadd.f32 %v12169_v37, %v5355_v0  ;;  %v5367_v0 = vadd.f32 %v5264_v3, %v12113_v18  ;;  %v13930_v18 = vld [vmem:[#allocation64_spill] sm:$0xff] }
 0x30a   : > { %v12213_v54 = vpop.f32.mrf.mxu1  ;;  %v12274_v46 = vadd.f32 %v12183_v5, %v5364_v60  ;;  %v13936_v5 = vld [vmem:[#allocation105_spill] sm:$0xff]  ;;  %v13938_v42 = vld [vmem:[#allocation68_spill] sm:$0xff] }
 0x30b   : > { %13926 = vst [vmem:[#allocation78_spill] sm:$0xff] %v12213_v54  ;;  %v12215_v1 = vpop.f32.mrf.mxu0  ;;  %v5357_v54 = vadd.f32 %v5214_v48, %v12083_v59  ;;  %v5622_v59 = vadd.f32 %v12167_v9, %v5356_v10  ;;  %v12251_v50 = vadd.f32 %v12171_v14, %v5358_v13  ;;  %v12268_v13 = vadd.f32 %v12179_v34, %v5362_v22  ;;  %v13929_v14 = vld [vmem:[#allocation63_spill] sm:$0xff]  ;;  %v13940_v22 = vld [vmem:[#allocation70_spill] sm:$0xff] }
 0x30c   : > { %v12217_v49 = vpop.f32.mrf.mxu1  ;;  %v12283_v48 = vadd.f32 %v13930_v18, %v5366_v35  ;;  %v12290_v34 = vadd.f32 %v13933_v4, %v5365_v17  ;;  %v12299_v3 = vadd.f32 %v13938_v42, %v5367_v0  ;;  %v12312_v17 = vld [vmem:[%s13158_s4] ss:$0 sm:$0xff] }
 0x30d   : > { %13927 = vst [vmem:[#allocation79_spill] sm:$0xff] %v12217_v49  ;;  %v12220_v6 = vpop.f32.mrf.mxu0  ;;  %v5360_v49 = vadd.f32 %v8769_v2, %v12086_v55  ;;  %v5363_v55 = vadd.f32 %v5244_v41, %v12101_v26  ;;  %v12254_v31 = vadd.f32 %v12173_v16, %v5357_v54  ;;  %v12261_v26 = vadd.f32 %v12177_v25, %v5359_v24  ;;  %v13931_v16 = vld [vmem:[#allocation48_spill] sm:$0xff]  ;;  %v13944_v0 = vld [vmem:[#allocation69_spill] sm:$0xff] }
 0x30e   : > { %v12224_v45 = vpop.f32.mrf.mxu1  ;;  %v12271_v54 = vadd.f32 %v12181_v43, %v5361_v39  ;;  %v5369_v2 = vadd.f32 %v5274_v30, %v13931_v16  ;;  %v13935_v43 = vld [vmem:[#allocation44_spill] sm:$0xff]  ;;  %v5373_v41 = vadd.f32 %v5294_v11, %v13936_v5  ;;  %v13939_v30 = vld [vmem:[#allocation53_spill] sm:$0xff] }
 0x30f   : > { %v12229_v53 = vpop.f32.mrf.mxu0  ;;  %v12258_v56 = vadd.f32 %v12175_v15, %v5360_v49  ;;  %v13928_v49 = vld [vmem:[#allocation115_spill] sm:$0xff]  ;;  %v12280_v40 = vadd.f32 %v13929_v14, %v5363_v55  ;;  %v5374_v28 = vadd.f32 %v8790_v8, %v13935_v43  ;;  %v13943_v11 = vld [vmem:[#allocation56_spill] sm:$0xff] }
 0x310   : > { %v12233_v20 = vpop.f32.mrf.mxu1  ;;  %v5370_v37 = vadd.f32 %v8784_v38, %v13928_v49  ;;  %v13932_v15 = vld [vmem:[#allocation47_spill] sm:$0xff]  ;;  %v5371_v38 = vadd.f32 %v5284_v36, %v13934_v51  ;;  %v13941_v36 = vld [vmem:[#allocation54_spill] sm:$0xff]  ;;  %v5377_v35 = vadd.f32 %v5314_v52, %v13943_v11  ;;  %v13949_v51 = vld [vmem:[#allocation57_spill] sm:$0xff] }
 0x311   : > { %v12239_v7 = vpop.f32.mrf.mxu0  ;;  %v5372_v47 = vadd.f32 %v8787_v44, %v13932_v15  ;;  %v5376_v44 = vadd.f32 %v8793_v21, %v13939_v30  ;;  %v5375_v60 = vadd.f32 %v5304_v33, %v13941_v36  ;;  %v13942_v8 = vld [vmem:[#allocation55_spill] sm:$0xff]  ;;  %v12315_v21 = vadd.f32 %v13944_v0, %v5369_v2  ;;  %v13946_v33 = vld [vmem:[#allocation72_spill] sm:$0xff]  ;;  %v13948_v15 = vld [vmem:[#allocation74_spill] sm:$0xff] }
 0x312   : > { %v12245_v27 = vpop.f32.mrf.mxu1  ;;  %v12304_v39 = vadd.f32 %v13940_v22, %v5370_v37  ;;  %v5378_v55 = vadd.f32 %v8796_v23, %v13942_v8  ;;  %v12321_v16 = vadd.f32 %v13946_v33, %v5371_v38  ;;  %v13947_v23 = vld [vmem:[#allocation73_spill] sm:$0xff]  ;;  %v12327_v4 = vadd.f32 %v13948_v15, %v5373_v41  ;;  %v13950_v2 = vld [vmem:[#allocation75_spill] sm:$0xff]  ;;  %v13951_v41 = vld [vmem:[#allocation76_spill] sm:$0xff] }
 0x313   : > { %v8805_v62 = vpop.f32.mrf.mxu0  ;;  %v12324_v52 = vadd.f32 %v13947_v23, %v5374_v28  ;;  %v5380_v43 = vadd.f32 %v12215_v1, %v13949_v51  ;;  %v12341_v58 = vadd.f32 %v13951_v41, %v5375_v60  ;;  %v13952_v42 = vld [vmem:[#allocation77_spill] sm:$0xff]  ;;  %v13953_v30 = vld [vmem:[#allocation78_spill] sm:$0xff]  ;;  %v13955_v36 = vld [vmem:[#allocation59_spill] sm:$0xff] }
 0x314   : > { %v12265_v9 = vpop.f32.mrf.mxu1  ;;  %v12344_v1 = vadd.f32 %v13952_v42, %v5378_v55  ;;  %v5382_v8 = vadd.f32 %v12229_v53, %v13955_v36  ;;  %v13956_v55 = vld [vmem:[#allocation79_spill] sm:$0xff] }
 0x315   : > { %v12277_v32 = vpop.f32.mrf.mxu0  ;;  %v12357_v0 = vadd.f32 %v13956_v55, %v5380_v43 }
 0x316   : > { %v12287_v25 = vpop.f32.mrf.mxu1 }
 0x317   : > { %v8860_v63 = vpop.f32.mrf.mxu0 }
 0x318   : > { %v5896_v10 = vadd.f32 %v8860_v63, %v5620_v57  ;;  %v8910_v24 = vpop.f32.mrf.mxu1  ;;  %v13945_v57 = vld [vmem:[#allocation71_spill] sm:$0xff] }
 0x319   : > { %v5736_v12 = vpop.f32.mrf.mxu0  ;;  %v12318_v49 = vadd.f32 %v13945_v57, %v5372_v47  ;;  %v12337_v47 = vadd.f32 %v13950_v2, %v5376_v44  ;;  %v12373_v2 = vadd.f32 %v12233_v20, %v5382_v8 }
 0x31a   : > { %v6162_v37 = vadd.f32 %v8910_v24, %v5896_v10  ;;  %v5895_v14 = vadd.f32 %v5736_v12, %v5619_v61  ;;  %v6002_v18 = vpop.f32.mrf.mxu1  ;;  %v12347_v10 = vadd.f32 %v13953_v30, %v5377_v35  ;;  %v13954_v24 = vld [vmem:[#allocation58_spill] sm:$0xff]  ;;  %v13957_v35 = vld [vmem:[#allocation60_spill] sm:$0xff] }
 0x31b   : > { %v8863_v61 = vpop.f32.mrf.mxu0  ;;  %v5379_v22 = vadd.f32 %v12220_v6, %v13954_v24  ;;  %v5381_v57 = vadd.f32 %v12239_v7, %v13957_v35 }
 0x31c   : > { %v6201_v38 = vadd.f32 %v12312_v17, %v6162_v37  ;;  %v6161_v28 = vadd.f32 %v6002_v18, %v5895_v14  ;;  %v5898_v5 = vadd.f32 %v8863_v61, %v5622_v59  ;;  %v8913_v63 = vpop.f32.mrf.mxu1  ;;  %v13958_v37 = vld [vmem:[#allocation61_spill] sm:$0xff] }
 0x31d   : > { %v5746_v44 = vpop.f32.mrf.mxu0  ;;  %v5384_v6 = vadd.f32 %v8805_v62, %v13958_v37  ;;  %v12369_v43 = vadd.f32 %v12224_v45, %v5379_v22  ;;  %v13959_v45 = vld [vmem:[#allocation62_spill] sm:$0xff]  ;;  %v12384_v20 = vadd.f32 %v12245_v27, %v5381_v57 }
 0x31e   : > { %v6307_v11 = vmul.f32 %v6201_v38, %v6201_v38  ;;  %6412 = vst.msk [vmem:[%s12334_s10 + $0x8] sm:$0xff] %vm434_vm4, %v6201_v38  ;;  %v6200_v59 = vadd.f32 %v12312_v17, %v6161_v28  ;;  %v6164_v60 = vadd.f32 %v8913_v63, %v5898_v5  ;;  %v6012_v12 = vpop.f32.mrf.mxu1  ;;  %v5897_v14 = vadd.f32 %v5746_v44, %v12248_v29 }
 0x31f   : > { %v8866_v18 = vpop.f32.mrf.mxu0  ;;  %v6234_v53 = vsel %vm434_vm4, %v6201_v38, 0.0  ;;  %v5383_v41 = vadd.f32 %v12277_v32, %v13959_v45  ;;  %v12387_v22 = vadd.f32 %v12265_v9, %v5384_v6 }
 0x320   : > { %v6233_v33 = vsel %vm434_vm4, %v6200_v59, 0.0  ;;  %v6306_v23 = vmul.f32 %v6200_v59, %v6200_v59  ;;  %6411 = vst.msk [vmem:[%s12334_s10] sm:$0xff] %vm434_vm4, %v6200_v59  ;;  %v6203_v15 = vadd.f32 %v12312_v17, %v6164_v60  ;;  %v8916_v51 = vpop.f32.mrf.mxu1  ;;  %v6163_v61 = vadd.f32 %v6012_v12, %v5897_v14 }
 0x321   : > { %v6235_v7 = vadd.f32 %v6234_v53, %v6233_v33  ;;  %v5900_v62 = vadd.f32 %v8866_v18, %v12251_v50  ;;  %v5756_v29 = vpop.f32.mrf.mxu0  ;;  %v6339_v38 = vsel %vm434_vm4, %v6307_v11, 0.0 }
 0x322   : > { %v6338_v28 = vsel %vm434_vm4, %v6306_v23, 0.0  ;;  %6414 = vst.msk [vmem:[%s12334_s10 + $0x18] sm:$0xff] %vm434_vm4, %v6203_v15  ;;  %v5899_v5 = vadd.f32 %v5756_v29, %v12254_v31  ;;  %v6022_v63 = vpop.f32.mrf.mxu1  ;;  %v6202_v50 = vadd.f32 %v12312_v17, %v6163_v61  ;;  %v6309_v31 = vmul.f32 %v6203_v15, %v6203_v15 }
 0x323   : > { %v6340_v42 = vadd.f32 %v6339_v38, %v6338_v28  ;;  %v6166_v30 = vadd.f32 %v8916_v51, %v5900_v62  ;;  %v8869_v24 = vpop.f32.mrf.mxu0  ;;  %v6238_v57 = vsel %vm434_vm4, %v6203_v15, 0.0 }
 0x324   : > { %v6165_v44 = vadd.f32 %v6022_v63, %v5899_v5  ;;  %v5902_v36 = vadd.f32 %v8869_v24, %v12258_v56  ;;  %v8919_v8 = vpop.f32.mrf.mxu1  ;;  %v6236_v11 = vsel %vm434_vm4, %v6202_v50, 0.0  ;;  %v6308_v32 = vmul.f32 %v6202_v50, %v6202_v50  ;;  %6413 = vst.msk [vmem:[%s12334_s10 + $0x10] sm:$0xff] %vm434_vm4, %v6202_v50 }
 0x325   : > { %v6205_v59 = vadd.f32 %v12312_v17, %v6166_v30  ;;  %v5766_v60 = vpop.f32.mrf.mxu0  ;;  %v6237_v27 = vadd.f32 %v6236_v11, %v6235_v7  ;;  %v12397_v56 = vadd.f32 %v12287_v25, %v5383_v41  ;;  %v6343_v25 = vsel %vm434_vm4, %v6309_v31, 0.0 }
 0x326   : > { %v6204_v12 = vadd.f32 %v12312_v17, %v6165_v44  ;;  %v6168_v9 = vadd.f32 %v8919_v8, %v5902_v36  ;;  %v5901_v55 = vadd.f32 %v5766_v60, %v12261_v26  ;;  %v6032_v35 = vpop.f32.mrf.mxu1  ;;  %v6341_v37 = vsel %vm434_vm4, %v6308_v32, 0.0 }
 0x327   : > { %v6311_v6 = vmul.f32 %v6205_v59, %v6205_v59  ;;  %6416 = vst.msk [vmem:[%s12334_s10 + $0x28] sm:$0xff] %vm434_vm4, %v6205_v59  ;;  %v8872_v14 = vpop.f32.mrf.mxu0  ;;  %v6342_v18 = vadd.f32 %v6341_v37, %v6340_v42  ;;  %v6239_v53 = vadd.f32 %v6238_v57, %v6237_v27  ;;  %v6242_v63 = vsel %vm434_vm4, %v6205_v59, 0.0 }
 0x328   : > { %v6240_v33 = vsel %vm434_vm4, %v6204_v12, 0.0  ;;  %v6310_v23 = vmul.f32 %v6204_v12, %v6204_v12  ;;  %6415 = vst.msk [vmem:[%s12334_s10 + $0x20] sm:$0xff] %vm434_vm4, %v6204_v12  ;;  %v8922_v26 = vpop.f32.mrf.mxu1  ;;  %v6207_v51 = vadd.f32 %v12312_v17, %v6168_v9  ;;  %v6167_v15 = vadd.f32 %v6032_v35, %v5901_v55 }
 0x329   : > { %v5904_v7 = vadd.f32 %v8872_v14, %v12268_v13  ;;  %v5776_v61 = vpop.f32.mrf.mxu0  ;;  %v6241_v62 = vadd.f32 %v6240_v33, %v6239_v53  ;;  %v6344_v29 = vadd.f32 %v6343_v25, %v6342_v18  ;;  %v6347_v45 = vsel %vm434_vm4, %v6311_v6, 0.0 }
 0x32a   : > { %v6345_v38 = vsel %vm434_vm4, %v6310_v23, 0.0  ;;  %v5903_v28 = vadd.f32 %v5776_v61, %v12271_v54  ;;  %v6042_v5 = vpop.f32.mrf.mxu1  ;;  %6418 = vst.msk [vmem:[%s12334_s10 + $0x38] sm:$0xff] %vm434_vm4, %v6207_v51  ;;  %v6206_v41 = vadd.f32 %v12312_v17, %v6167_v15  ;;  %v6313_v54 = vmul.f32 %v6207_v51, %v6207_v51 }
 0x32b   : > { %v6170_v42 = vadd.f32 %v8922_v26, %v5904_v7  ;;  %v8875_v50 = vpop.f32.mrf.mxu0  ;;  %v6346_v13 = vadd.f32 %v6345_v38, %v6344_v29  ;;  %v6243_v30 = vadd.f32 %v6242_v63, %v6241_v62 }
 0x32c   : > { %v6169_v24 = vadd.f32 %v6042_v5, %v5903_v28  ;;  %v5906_v44 = vadd.f32 %v8875_v50, %v12274_v46  ;;  %v8925_v36 = vpop.f32.mrf.mxu1  ;;  %v6244_v8 = vsel %vm434_vm4, %v6206_v41, 0.0  ;;  %v6312_v31 = vmul.f32 %v6206_v41, %v6206_v41  ;;  %6417 = vst.msk [vmem:[%s12334_s10 + $0x30] sm:$0xff] %vm434_vm4, %v6206_v41 }
 0x32d   : > { %v6209_v11 = vadd.f32 %v12312_v17, %v6170_v42  ;;  %v5786_v32 = vpop.f32.mrf.mxu0  ;;  %v6245_v59 = vadd.f32 %v6244_v8, %v6243_v30  ;;  %v6348_v60 = vadd.f32 %v6347_v45, %v6346_v13  ;;  %v6246_v46 = vsel %vm434_vm4, %v6207_v51, 0.0 }
 0x32e   : > { %v6208_v27 = vadd.f32 %v12312_v17, %v6169_v24  ;;  %v6172_v12 = vadd.f32 %v8925_v36, %v5906_v44  ;;  %v6052_v9 = vpop.f32.mrf.mxu1  ;;  %v6349_v55 = vsel %vm434_vm4, %v6312_v31, 0.0  ;;  %v5905_v57 = vadd.f32 %v5786_v32, %v12280_v40 }
 0x32f   : > { %v6315_v35 = vmul.f32 %v6209_v11, %v6209_v11  ;;  %6420 = vst.msk [vmem:[%s12334_s10 + $0x48] sm:$0xff] %vm434_vm4, %v6209_v11  ;;  %v8878_v37 = vpop.f32.mrf.mxu0  ;;  %v6350_v6 = vadd.f32 %v6349_v55, %v6348_v60  ;;  %v6247_v14 = vadd.f32 %v6246_v46, %v6245_v59  ;;  %v6351_v23 = vsel %vm434_vm4, %v6313_v54, 0.0 }
 0x330   : > { %v6248_v18 = vsel %vm434_vm4, %v6208_v27, 0.0  ;;  %v6314_v53 = vmul.f32 %v6208_v27, %v6208_v27  ;;  %6419 = vst.msk [vmem:[%s12334_s10 + $0x40] sm:$0xff] %vm434_vm4, %v6208_v27  ;;  %v8928_v33 = vpop.f32.mrf.mxu1  ;;  %v6211_v26 = vadd.f32 %v12312_v17, %v6172_v12  ;;  %v6171_v25 = vadd.f32 %v6052_v9, %v5905_v57 }
 0x331   : > { %v5908_v51 = vadd.f32 %v8878_v37, %v12283_v48  ;;  %v5796_v15 = vpop.f32.mrf.mxu0  ;;  %v6249_v7 = vadd.f32 %v6248_v18, %v6247_v14  ;;  %v6352_v40 = vadd.f32 %v6351_v23, %v6350_v6  ;;  %v6250_v38 = vsel %vm434_vm4, %v6209_v11, 0.0 }
 0x332   : > { %v6353_v61 = vsel %vm434_vm4, %v6314_v53, 0.0  ;;  %v5907_v62 = vadd.f32 %v5796_v15, %v12290_v34  ;;  %v6062_v29 = vpop.f32.mrf.mxu1  ;;  %v6355_v28 = vsel %vm434_vm4, %v6315_v35, 0.0  ;;  %6422 = vst.msk [vmem:[%s12334_s10 + $0x58] sm:$0xff] %vm434_vm4, %v6211_v26  ;;  %v6210_v5 = vadd.f32 %v12312_v17, %v6171_v25 }
 0x333   : > { %v6174_v63 = vadd.f32 %v8928_v33, %v5908_v51  ;;  %v8881_v45 = vpop.f32.mrf.mxu0  ;;  %v6354_v48 = vadd.f32 %v6353_v61, %v6352_v40  ;;  %v6251_v41 = vadd.f32 %v6250_v38, %v6249_v7  ;;  %v6317_v34 = vmul.f32 %v6211_v26, %v6211_v26 }
 0x334   : > { %v6173_v42 = vadd.f32 %v6062_v29, %v5907_v62  ;;  %v5910_v50 = vadd.f32 %v8881_v45, %v12296_v19  ;;  %v8931_v13 = vpop.f32.mrf.mxu1  ;;  %v6252_v30 = vsel %vm434_vm4, %v6210_v5, 0.0  ;;  %v6316_v24 = vmul.f32 %v6210_v5, %v6210_v5  ;;  %6421 = vst.msk [vmem:[%s12334_s10 + $0x50] sm:$0xff] %vm434_vm4, %v6210_v5 }
 0x335   : > { %v6213_v44 = vadd.f32 %v12312_v17, %v6174_v63  ;;  %v5806_v36 = vpop.f32.mrf.mxu0  ;;  %v6253_v54 = vadd.f32 %v6252_v30, %v6251_v41  ;;  %v6356_v8 = vadd.f32 %v6355_v28, %v6354_v48  ;;  %v6254_v19 = vsel %vm434_vm4, %v6211_v26, 0.0 }
 0x336   : > { %v6212_v31 = vadd.f32 %v12312_v17, %v6173_v42  ;;  %v6176_v11 = vadd.f32 %v8931_v13, %v5910_v50  ;;  %v6072_v32 = vpop.f32.mrf.mxu1  ;;  %v6357_v59 = vsel %vm434_vm4, %v6316_v24, 0.0  ;;  %v5909_v27 = vadd.f32 %v5806_v36, %v12299_v3 }
 0x337   : > { %v6319_v60 = vmul.f32 %v6213_v44, %v6213_v44  ;;  %6424 = vst.msk [vmem:[%s12334_s10 + $0x68] sm:$0xff] %vm434_vm4, %v6213_v44  ;;  %v8884_v12 = vpop.f32.mrf.mxu0  ;;  %v6358_v9 = vadd.f32 %v6357_v59, %v6356_v8  ;;  %v6255_v46 = vadd.f32 %v6254_v19, %v6253_v54  ;;  %v6359_v37 = vsel %vm434_vm4, %v6317_v34, 0.0 }
 0x338   : > { %v6256_v55 = vsel %vm434_vm4, %v6212_v31, 0.0  ;;  %v6318_v35 = vmul.f32 %v6212_v31, %v6212_v31  ;;  %6423 = vst.msk [vmem:[%s12334_s10 + $0x60] sm:$0xff] %vm434_vm4, %v6212_v31  ;;  %v8934_v57 = vpop.f32.mrf.mxu1  ;;  %v6215_v6 = vadd.f32 %v12312_v17, %v6176_v11  ;;  %v6175_v14 = vadd.f32 %v6072_v32, %v5909_v27 }
 0x339   : > { %v5912_v18 = vadd.f32 %v8884_v12, %v12304_v39  ;;  %v5816_v53 = vpop.f32.mrf.mxu0  ;;  %v6257_v33 = vadd.f32 %v6256_v55, %v6255_v46  ;;  %v6360_v3 = vadd.f32 %v6359_v37, %v6358_v9  ;;  %v6258_v51 = vsel %vm434_vm4, %v6213_v44, 0.0 }
 0x33a   : > { %v6361_v23 = vsel %vm434_vm4, %v6318_v35, 0.0  ;;  %v5911_v26 = vadd.f32 %v5816_v53, %v12315_v21  ;;  %v6082_v25 = vpop.f32.mrf.mxu1  ;;  %v6363_v15 = vsel %vm434_vm4, %v6319_v60, 0.0  ;;  %6426 = vst.msk [vmem:[%s12334_s10 + $0x78] sm:$0xff] %vm434_vm4, %v6215_v6  ;;  %v6214_v7 = vadd.f32 %v12312_v17, %v6175_v14 }
 0x33b   : > { %v6178_v40 = vadd.f32 %v8934_v57, %v5912_v18  ;;  %v8887_v61 = vpop.f32.mrf.mxu0  ;;  %v6362_v39 = vadd.f32 %v6361_v23, %v6360_v3  ;;  %v6259_v62 = vadd.f32 %v6258_v51, %v6257_v33  ;;  %v6321_v21 = vmul.f32 %v6215_v6, %v6215_v6 }
 0x33c   : > { %v6177_v29 = vadd.f32 %v6082_v25, %v5911_v26  ;;  %v5914_v38 = vadd.f32 %v8887_v61, %v12318_v49  ;;  %v8937_v28 = vpop.f32.mrf.mxu1  ;;  %v6260_v5 = vsel %vm434_vm4, %v6214_v7, 0.0  ;;  %v6320_v63 = vmul.f32 %v6214_v7, %v6214_v7  ;;  %6425 = vst.msk [vmem:[%s12334_s10 + $0x70] sm:$0xff] %vm434_vm4, %v6214_v7 }
 0x33d   : > { %v6217_v45 = vadd.f32 %v12312_v17, %v6178_v40  ;;  %v5826_v48 = vpop.f32.mrf.mxu0  ;;  %v6261_v41 = vadd.f32 %v6260_v5, %v6259_v62  ;;  %v6364_v42 = vadd.f32 %v6363_v15, %v6362_v39  ;;  %v6262_v49 = vsel %vm434_vm4, %v6215_v6, 0.0 }
 0x33e   : > { %v6216_v50 = vadd.f32 %v12312_v17, %v6177_v29  ;;  %v6180_v13 = vadd.f32 %v8937_v28, %v5914_v38  ;;  %v6092_v34 = vpop.f32.mrf.mxu1  ;;  %v6365_v30 = vsel %vm434_vm4, %v6320_v63, 0.0  ;;  %v5913_v44 = vadd.f32 %v5826_v48, %v12321_v16 }
 0x33f   : > { %v6323_v24 = vmul.f32 %v6217_v45, %v6217_v45  ;;  %6428 = vst.msk [vmem:[%s12334_s10 + $0x88] sm:$0xff] %vm434_vm4, %v6217_v45  ;;  %v8890_v36 = vpop.f32.mrf.mxu0  ;;  %v6366_v54 = vadd.f32 %v6365_v30, %v6364_v42  ;;  %v6263_v8 = vadd.f32 %v6262_v49, %v6261_v41  ;;  %v6367_v19 = vsel %vm434_vm4, %v6321_v21, 0.0 }
 0x340   : > { %v6264_v31 = vsel %vm434_vm4, %v6216_v50, 0.0  ;;  %v6322_v11 = vmul.f32 %v6216_v50, %v6216_v50  ;;  %6427 = vst.msk [vmem:[%s12334_s10 + $0x80] sm:$0xff] %vm434_vm4, %v6216_v50  ;;  %v8940_v32 = vpop.f32.mrf.mxu1  ;;  %v6219_v59 = vadd.f32 %v12312_v17, %v6180_v13  ;;  %v6179_v60 = vadd.f32 %v6092_v34, %v5913_v44 }
 0x341   : > { %v5916_v27 = vadd.f32 %v8890_v36, %v12324_v52  ;;  %v5836_v12 = vpop.f32.mrf.mxu0  ;;  %v6265_v9 = vadd.f32 %v6264_v31, %v6263_v8  ;;  %v6368_v16 = vadd.f32 %v6367_v19, %v6366_v54  ;;  %v6266_v57 = vsel %vm434_vm4, %v6217_v45, 0.0 }
 0x342   : > { %v6369_v46 = vsel %vm434_vm4, %v6322_v11, 0.0  ;;  %v5915_v55 = vadd.f32 %v5836_v12, %v12327_v4  ;;  %v6102_v35 = vpop.f32.mrf.mxu1  ;;  %v6371_v37 = vsel %vm434_vm4, %v6323_v24, 0.0  ;;  %6430 = vst.msk [vmem:[%s12334_s10 + $0x98] sm:$0xff] %vm434_vm4, %v6219_v59  ;;  %v6218_v6 = vadd.f32 %v12312_v17, %v6179_v60 }
 0x343   : > { %v6182_v14 = vadd.f32 %v8940_v32, %v5916_v27  ;;  %v8893_v18 = vpop.f32.mrf.mxu0  ;;  %v6370_v52 = vadd.f32 %v6369_v46, %v6368_v16  ;;  %v6267_v53 = vadd.f32 %v6266_v57, %v6265_v9  ;;  %v6325_v4 = vmul.f32 %v6219_v59, %v6219_v59 }
 0x344   : > { %v6181_v33 = vadd.f32 %v6102_v35, %v5915_v55  ;;  %v5918_v3 = vadd.f32 %v8893_v18, %v12337_v47  ;;  %v8943_v23 = vpop.f32.mrf.mxu1  ;;  %v6268_v26 = vsel %vm434_vm4, %v6218_v6, 0.0  ;;  %v6324_v25 = vmul.f32 %v6218_v6, %v6218_v6  ;;  %6429 = vst.msk [vmem:[%s12334_s10 + $0x90] sm:$0xff] %vm434_vm4, %v6218_v6 }
 0x345   : > { %v6221_v51 = vadd.f32 %v12312_v17, %v6182_v14  ;;  %v5846_v15 = vpop.f32.mrf.mxu0  ;;  %v6269_v7 = vadd.f32 %v6268_v26, %v6267_v53  ;;  %v6372_v40 = vadd.f32 %v6371_v37, %v6370_v52  ;;  %v6270_v47 = vsel %vm434_vm4, %v6219_v59, 0.0 }
 0x346   : > { %v6220_v61 = vadd.f32 %v12312_v17, %v6181_v33  ;;  %v6184_v39 = vadd.f32 %v8943_v23, %v5918_v3  ;;  %v6112_v62 = vpop.f32.mrf.mxu1  ;;  %v6373_v29 = vsel %vm434_vm4, %v6324_v25, 0.0  ;;  %v5917_v28 = vadd.f32 %v5846_v15, %v12341_v58 }
 0x347   : > { %v6327_v38 = vmul.f32 %v6221_v51, %v6221_v51  ;;  %6432 = vst.msk [vmem:[%s12334_s10 + $0xa8] sm:$0xff] %vm434_vm4, %v6221_v51  ;;  %v8896_v21 = vpop.f32.mrf.mxu0  ;;  %v6374_v5 = vadd.f32 %v6373_v29, %v6372_v40  ;;  %v6271_v63 = vadd.f32 %v6270_v47, %v6269_v7  ;;  %v6375_v42 = vsel %vm434_vm4, %v6325_v4, 0.0 }
 0x348   : > { %v6272_v45 = vsel %vm434_vm4, %v6220_v61, 0.0  ;;  %v6326_v48 = vmul.f32 %v6220_v61, %v6220_v61  ;;  %6431 = vst.msk [vmem:[%s12334_s10 + $0xa0] sm:$0xff] %vm434_vm4, %v6220_v61  ;;  %v8946_v41 = vpop.f32.mrf.mxu1  ;;  %v6223_v50 = vadd.f32 %v12312_v17, %v6184_v39  ;;  %v6183_v13 = vadd.f32 %v6112_v62, %v5917_v28 }
 0x349   : > { %v5920_v34 = vadd.f32 %v8896_v21, %v12344_v1  ;;  %v5856_v49 = vpop.f32.mrf.mxu0  ;;  %v6273_v30 = vadd.f32 %v6272_v45, %v6271_v63  ;;  %v6376_v58 = vadd.f32 %v6375_v42, %v6374_v5  ;;  %v6274_v54 = vsel %vm434_vm4, %v6221_v51, 0.0 }
 0x34a   : > { %v6377_v24 = vsel %vm434_vm4, %v6326_v48, 0.0  ;;  %v5919_v44 = vadd.f32 %v5856_v49, %v12347_v10  ;;  %v6122_v36 = vpop.f32.mrf.mxu1  ;;  %v6379_v8 = vsel %vm434_vm4, %v6327_v38, 0.0  ;;  %6434 = vst.msk [vmem:[%s12334_s10 + $0xb8] sm:$0xff] %vm434_vm4, %v6223_v50  ;;  %v6222_v31 = vadd.f32 %v12312_v17, %v6183_v13 }
 0x34b   : > { %v6186_v11 = vadd.f32 %v8946_v41, %v5920_v34  ;;  %v8899_v32 = vpop.f32.mrf.mxu0  ;;  %v6378_v1 = vadd.f32 %v6377_v24, %v6376_v58  ;;  %v6275_v19 = vadd.f32 %v6274_v54, %v6273_v30  ;;  %v6329_v10 = vmul.f32 %v6223_v50, %v6223_v50 }
 0x34c   : > { %v6185_v59 = vadd.f32 %v6122_v36, %v5919_v44  ;;  %v5922_v60 = vadd.f32 %v8899_v32, %v12357_v0  ;;  %v8949_v27 = vpop.f32.mrf.mxu1  ;;  %v6276_v12 = vsel %vm434_vm4, %v6222_v31, 0.0  ;;  %v6328_v9 = vmul.f32 %v6222_v31, %v6222_v31  ;;  %6433 = vst.msk [vmem:[%s12334_s10 + $0xb0] sm:$0xff] %vm434_vm4, %v6222_v31 }
 0x34d   : > { %v6225_v16 = vadd.f32 %v12312_v17, %v6186_v11  ;;  %v5866_v46 = vpop.f32.mrf.mxu0  ;;  %v6277_v55 = vadd.f32 %v6276_v12, %v6275_v19  ;;  %v6380_v35 = vadd.f32 %v6379_v8, %v6378_v1  ;;  %v6278_v0 = vsel %vm434_vm4, %v6223_v50, 0.0 }
 0x34e   : > { %v6224_v57 = vadd.f32 %v12312_v17, %v6185_v59  ;;  %v6188_v37 = vadd.f32 %v8949_v27, %v5922_v60  ;;  %v6132_v6 = vpop.f32.mrf.mxu1  ;;  %v6381_v14 = vsel %vm434_vm4, %v6328_v9, 0.0  ;;  %v5921_v52 = vadd.f32 %v5866_v46, %v12369_v43 }
 0x34f   : > { %v6331_v18 = vmul.f32 %v6225_v16, %v6225_v16  ;;  %6436 = vst.msk [vmem:[%s12334_s10 + $0xc8] sm:$0xff] %vm434_vm4, %v6225_v16  ;;  %v8902_v53 = vpop.f32.mrf.mxu0  ;;  %v6382_v33 = vadd.f32 %v6381_v14, %v6380_v35  ;;  %v6279_v3 = vadd.f32 %v6278_v0, %v6277_v55  ;;  %v6383_v25 = vsel %vm434_vm4, %v6329_v10, 0.0 }
 0x350   : > { %v6280_v23 = vsel %vm434_vm4, %v6224_v57, 0.0  ;;  %v6330_v4 = vmul.f32 %v6224_v57, %v6224_v57  ;;  %6435 = vst.msk [vmem:[%s12334_s10 + $0xc0] sm:$0xff] %vm434_vm4, %v6224_v57  ;;  %v8952_v26 = vpop.f32.mrf.mxu1  ;;  %v6227_v51 = vadd.f32 %v12312_v17, %v6188_v37  ;;  %v6187_v15 = vadd.f32 %v6132_v6, %v5921_v52 }
 0x351   : > { %v5924_v7 = vadd.f32 %v8902_v53, %v12373_v2  ;;  %v5876_v40 = vpop.f32.mrf.mxu0  ;;  %v6281_v61 = vadd.f32 %v6280_v23, %v6279_v3  ;;  %v6384_v43 = vadd.f32 %v6383_v25, %v6382_v33  ;;  %v6282_v29 = vsel %vm434_vm4, %v6225_v16, 0.0 }
 0x352   : > { %v6385_v39 = vsel %vm434_vm4, %v6330_v4, 0.0  ;;  %v5923_v62 = vadd.f32 %v5876_v40, %v12384_v20  ;;  %v6142_v47 = vpop.f32.mrf.mxu1  ;;  %v6387_v38 = vsel %vm434_vm4, %v6331_v18, 0.0  ;;  %6438 = vst.msk [vmem:[%s12334_s10 + $0xd8] sm:$0xff] %vm434_vm4, %v6227_v51  ;;  %v6226_v28 = vadd.f32 %v12312_v17, %v6187_v15 }
 0x353   : > { %v6190_v21 = vadd.f32 %v8952_v26, %v5924_v7  ;;  %v8905_v5 = vpop.f32.mrf.mxu0  ;;  %v6386_v2 = vadd.f32 %v6385_v39, %v6384_v43  ;;  %v6283_v63 = vadd.f32 %v6282_v29, %v6281_v61  ;;  %v6333_v20 = vmul.f32 %v6227_v51, %v6227_v51  ;;  %v6232_v61 = vld [vmem:[#allocation4] sm:$0x1] }
 0x354   : > { %v6189_v45 = vadd.f32 %v6142_v47, %v5923_v62  ;;  %v5926_v48 = vadd.f32 %v8905_v5, %v12387_v22  ;;  %v8955_v41 = vpop.f32.mrf.mxu1  ;;  %v6284_v42 = vsel %vm434_vm4, %v6226_v28, 0.0  ;;  %v6332_v50 = vmul.f32 %v6226_v28, %v6226_v28  ;;  %6437 = vst.msk [vmem:[%s12334_s10 + $0xd0] sm:$0xff] %vm434_vm4, %v6226_v28  ;;  %v6305_v62 = vld [vmem:[#allocation5] sm:$0x1] }
 0x355   : > { %v6229_v13 = vadd.f32 %v12312_v17, %v6190_v21  ;;  %v5886_v34 = vpop.f32.mrf.mxu0  ;;  %v6285_v49 = vadd.f32 %v6284_v42, %v6283_v63  ;;  %v6388_v30 = vadd.f32 %v6387_v38, %v6386_v2  ;;  %v6286_v44 = vsel %vm434_vm4, %v6227_v51, 0.0 }
 0x356   : > { %v6228_v58 = vadd.f32 %v12312_v17, %v6189_v45  ;;  %v6192_v24 = vadd.f32 %v8955_v41, %v5926_v48  ;;  %v6389_v22 = vsel %vm434_vm4, %v6332_v50, 0.0  ;;  %v5925_v36 = vadd.f32 %v5886_v34, %v12397_v56  ;;  %v6152_v32 = vpop.f32.mrf.mxu1 }
 0x357   : > { %6440 = vst.msk [vmem:[%s12334_s10 + $0xe8] sm:$0xff] %vm434_vm4, %v6229_v13  ;;  %v6390_v54 = vadd.f32 %v6389_v22, %v6388_v30  ;;  %v6287_v8 = vadd.f32 %v6286_v44, %v6285_v49  ;;  %v6391_v1 = vsel %vm434_vm4, %v6333_v20, 0.0  ;;  %v6335_v19 = vmul.f32 %v6229_v13, %v6229_v13 }
 0x358   : > { %v6288_v31 = vsel %vm434_vm4, %v6228_v58, 0.0  ;;  %v6334_v11 = vmul.f32 %v6228_v58, %v6228_v58  ;;  %6439 = vst.msk [vmem:[%s12334_s10 + $0xe0] sm:$0xff] %vm434_vm4, %v6228_v58  ;;  %v6231_v59 = vadd.f32 %v12312_v17, %v6192_v24  ;;  %v6191_v60 = vadd.f32 %v6152_v32, %v5925_v36 }
 0x359   : > { %v6289_v27 = vadd.f32 %v6288_v31, %v6287_v8  ;;  %v6392_v10 = vadd.f32 %v6391_v1, %v6390_v54  ;;  %v6290_v56 = vsel %vm434_vm4, %v6229_v13, 0.0  ;;  %v6395_v55 = vsel %vm434_vm4, %v6335_v19, 0.0 }
 0x35a   : > { %v6393_v12 = vsel %vm434_vm4, %v6334_v11, 0.0  ;;  %6442 = vst.msk [vmem:[%s12334_s10 + $0xf8] sm:$0xff] %vm434_vm4, %v6231_v59  ;;  %v6230_v9 = vadd.f32 %v12312_v17, %v6191_v60  ;;  %v6337_v35 = vmul.f32 %v6231_v59, %v6231_v59  ;;  %v6294_v14 = vsel %vm434_vm4, %v6231_v59, 0.0 }
 0x35b   : > { %v6394_v16 = vadd.f32 %v6393_v12, %v6392_v10  ;;  %v6291_v46 = vadd.f32 %v6290_v56, %v6289_v27 }
 0x35c   : > { %v6292_v57 = vsel %vm434_vm4, %v6230_v9, 0.0  ;;  %v6336_v37 = vmul.f32 %v6230_v9, %v6230_v9  ;;  %6441 = vst.msk [vmem:[%s12334_s10 + $0xf0] sm:$0xff] %vm434_vm4, %v6230_v9  ;;  %v6399_v17 = vsel %vm434_vm4, %v6337_v35, 0.0 }
 0x35d   : > { %v6293_v6 = vadd.f32 %v6292_v57, %v6291_v46  ;;  %v6396_v0 = vadd.f32 %v6395_v55, %v6394_v16 }
 0x35e   : > { %v6397_v18 = vsel %vm434_vm4, %v6336_v37, 0.0 }
 0x35f   : > { %v6295_v52 = vadd.f32 %v6294_v14, %v6293_v6  ;;  %v6398_v53 = vadd.f32 %v6397_v18, %v6396_v0 }
 0x361   : > { %v6296_v33 = vrot.slane %v6295_v52, 4  ;;  %v6400_v3 = vadd.f32 %v6399_v17, %v6398_v53 }
 0x363   : > { %v6297_v23 = vadd.f32 %v6296_v33, %v6295_v52  ;;  %v6401_v4 = vrot.slane %v6400_v3, 4 }
 0x365   : > { %v6298_v26 = vrot.slane %v6297_v23, 2  ;;  %v6402_v25 = vadd.f32 %v6401_v4, %v6400_v3 }
 0x367   : > { %v6299_v51 = vadd.f32 %v6298_v26, %v6297_v23  ;;  %v6403_v15 = vrot.slane %v6402_v25, 2 }
 0x369   : > { %v6300_v7 = vrot.slane %v6299_v51, 1  ;;  %v6404_v40 = vadd.f32 %v6403_v15, %v6402_v25 }
 0x36b   : > { %v6301_v43 = vadd.f32 %v6300_v7, %v6299_v51  ;;  %v6405_v39 = vrot.slane %v6404_v40, 1 }
 0x36d   : > { %v6302_v47 = vadd.f32 %v6301_v43, %v6232_v61  ;;  %v6406_v29 = vadd.f32 %v6405_v39, %v6404_v40  ;;  %6446 = sbr.rel (%p7457_p5) target bundleno = 969 (0x3c9), region = 56 }
 0x36f   : > { %6304 = vst.msk [vmem:[#allocation4] sm:$0x1] %vm6303_vm7, %v6302_v47  ;;  %v6407_v38 = vadd.f32 %v6406_v29, %v6305_v62 }
 0x371   : > { %6408 = vst.msk [vmem:[#allocation5] sm:$0x1] %vm6303_vm7, %v6407_v38 }
 0x372   : > { %v6527_v41 = vlaneseq  ;;  %v6456_v20 = vld [vmem:[%s13159_s5] sm:$0x1]  ;;  %v6463_v44 = vld [vmem:[%s13161_s7 + $0x8] sm:$0xff]  ;;  %v6464_v22 = vld [vmem:[%s13161_s7 + $0x10] sm:$0xff] }
 0x373   : > { %v6458_v49 = vld [vmem:[%s13160_s6] sm:$0x1]  ;;  %v6465_v36 = vld [vmem:[%s13161_s7 + $0x18] sm:$0xff]  ;;  %v6467_v11 = vld [vmem:[%s13161_s7 + $0x28] sm:$0xff] }
 0x374   : > { %v6528_v42 = vshrl.u32 %v6527_v41, 7  ;;  %v6462_v24 = vld [vmem:[%s13161_s7] sm:$0xff]  ;;  %v6468_v32 = vld [vmem:[%s13161_s7 + $0x30] sm:$0xff]  ;;  %v6469_v1 = vld [vmem:[%s13161_s7 + $0x38] sm:$0xff] }
 0x375   : > { %v6466_v31 = vld [vmem:[%s13161_s7 + $0x20] sm:$0xff]  ;;  %v6471_v18 = vld [vmem:[%s13161_s7 + $0x48] sm:$0xff]  ;;  %v6472_v52 = vld [vmem:[%s13161_s7 + $0x50] sm:$0xff] }
 0x376   : > { %v6447_v28 = vld [vmem:[#allocation4] sm:$0x1]  ;;  %v6529_v13 = vsub.s32 0, %v6528_v42  ;;  %v6473_v53 = vld [vmem:[%s13161_s7 + $0x58] sm:$0xff]  ;;  %v6475_v26 = vld [vmem:[%s13161_s7 + $0x68] sm:$0xff] }
 0x377   : > { %v6449_v5 = vmul.f32 0.001953125, %v6447_v28  ;;  %v6470_v57 = vld [vmem:[%s13161_s7 + $0x40] sm:$0xff]  ;;  %v6476_v25 = vld [vmem:[%s13161_s7 + $0x70] sm:$0xff]  ;;  %v6477_v61 = vld [vmem:[%s13161_s7 + $0x78] sm:$0xff] }
 0x378   : > { %v6450_v21 = vld [vmem:[#allocation5] sm:$0x1] }
 0x379   : > { %v6451_v2 = vmul.f32 0.001953125, %v6450_v21  ;;  %v6452_v63 = vmul.f32 %v6449_v5, %v6449_v5  ;;  %v6459_v50 = vmul.f32 %v6456_v20, %v6449_v5  ;;  %v6474_v4 = vld [vmem:[%s13161_s7 + $0x60] sm:$0xff] }
 0x37b   : > { %v6453_v45 = vsub.f32 %v6451_v2, %v6452_v63 }
 0x37d   : > { %v6454_v48 = vadd.f32 1e-05, %v6453_v45 }
 0x37f   : > { %9085 = vrsqrt.f32 %v6454_v48  ;;  %v6478_v48 = vld [vmem:[%s13161_s7 + $0x80] sm:$0xff] }
 0x38c   : > { %v9086_v34 = vpop.eup %9085 }
 0x38d   : > { %v6457_v30 = vmul.f32 %v9086_v34, %v6456_v20  ;;  %v6460_v58 = vmul.f32 %v9086_v34, %v6459_v50  ;;  %v6480_v34 = vld [vmem:[%s13161_s7 + $0x90] sm:$0xff] }
 0x38f   : > { %v6461_v54 = vsub.f32 %v6458_v49, %v6460_v58  ;;  %v12583_v8 = vrot.slane %v6457_v30, %v6529_v13  ;;  %v6481_v49 = vld [vmem:[%s13161_s7 + $0x98] sm:$0xff] }
 0x391   : > { %v6532_v19 = vmul.f32 %v12583_v8, %v6462_v24  ;;  %v12598_v59 = vrot.slane %v6461_v54, %v6529_v13  ;;  %v6533_v60 = vmul.f32 %v12583_v8, %v6463_v44  ;;  %v6534_v27 = vmul.f32 %v12583_v8, %v6464_v22  ;;  %v6479_v13 = vld [vmem:[%s13161_s7 + $0x88] sm:$0xff]  ;;  %v6482_v22 = vld [vmem:[%s13161_s7 + $0xa0] sm:$0xff]  ;;  %v6484_v54 = vld [vmem:[%s13161_s7 + $0xb0] sm:$0xff] }
 0x392   : > { %v6535_v10 = vmul.f32 %v12583_v8, %v6465_v36  ;;  %v6536_v12 = vmul.f32 %v12583_v8, %v6466_v31  ;;  %v6537_v56 = vmul.f32 %v12583_v8, %v6467_v11  ;;  %v6538_v9 = vmul.f32 %v12583_v8, %v6468_v32  ;;  %v6483_v36 = vld [vmem:[%s13161_s7 + $0xa8] sm:$0xff] }
 0x393   : > { %v6602_v16 = vadd.f32 %v12598_v59, %v6532_v19  ;;  %v6603_v46 = vadd.f32 %v12598_v59, %v6533_v60  ;;  %v6604_v55 = vadd.f32 %v12598_v59, %v6534_v27  ;;  %v6539_v35 = vmul.f32 %v12583_v8, %v6469_v1  ;;  %v6485_v19 = vld [vmem:[%s13161_s7 + $0xb8] sm:$0xff] }
 0x394   : > { %v6605_v37 = vadd.f32 %v12598_v59, %v6535_v10  ;;  %v6606_v6 = vadd.f32 %v12598_v59, %v6536_v12  ;;  %v6607_v0 = vadd.f32 %v12598_v59, %v6537_v56  ;;  %v6608_v14 = vadd.f32 %v12598_v59, %v6538_v9 }
 0x395   : > { %v6666_v17 = vmax.f32 %v6602_v16, 0.0  ;;  %v6667_v33 = vmax.f32 %v6603_v46, 0.0  ;;  %v6668_v3 = vmax.f32 %v6604_v55, 0.0  ;;  %v6609_v23 = vadd.f32 %v12598_v59, %v6539_v35 }
 0x396   : > { %v6669_v51 = vmax.f32 %v6605_v37, 0.0  ;;  %v6670_v15 = vmax.f32 %v6606_v6, 0.0  ;;  %v6671_v7 = vmax.f32 %v6607_v0, 0.0  ;;  %v6672_v40 = vmax.f32 %v6608_v14, 0.0  ;;  %v6486_v6 = vld [vmem:[%s13161_s7 + $0xc0] sm:$0xff] }
 0x397   : > { %6730 = vst.msk [vmem:[%s13161_s7] sm:$0xff] %vm434_vm4, %v6666_v17  ;;  %6731 = vst.msk [vmem:[%s13161_s7 + $0x8] sm:$0xff] %vm434_vm4, %v6667_v33  ;;  %v6673_v43 = vmax.f32 %v6609_v23, 0.0  ;;  %v6540_v39 = vmul.f32 %v12583_v8, %v6470_v57  ;;  %v6541_v62 = vmul.f32 %v12583_v8, %v6471_v18  ;;  %v6542_v47 = vmul.f32 %v12583_v8, %v6472_v52  ;;  %v6488_v17 = vld [vmem:[%s13161_s7 + $0xd0] sm:$0xff]  ;;  %v6489_v33 = vld [vmem:[%s13161_s7 + $0xd8] sm:$0xff] }
 0x398   : > { %6732 = vst.msk [vmem:[%s13161_s7 + $0x10] sm:$0xff] %vm434_vm4, %v6668_v3  ;;  %6733 = vst.msk [vmem:[%s13161_s7 + $0x18] sm:$0xff] %vm434_vm4, %v6669_v51  ;;  %v6543_v29 = vmul.f32 %v12583_v8, %v6473_v53  ;;  %v6544_v38 = vmul.f32 %v12583_v8, %v6474_v4  ;;  %v6545_v28 = vmul.f32 %v12583_v8, %v6475_v26  ;;  %v6487_v53 = vld [vmem:[%s13161_s7 + $0xc8] sm:$0xff] }
 0x399   : > { %6734 = vst.msk [vmem:[%s13161_s7 + $0x20] sm:$0xff] %vm434_vm4, %v6670_v15  ;;  %6735 = vst.msk [vmem:[%s13161_s7 + $0x28] sm:$0xff] %vm434_vm4, %v6671_v7  ;;  %v6546_v21 = vmul.f32 %v12583_v8, %v6476_v25  ;;  %v6610_v5 = vadd.f32 %v12598_v59, %v6540_v39  ;;  %v6611_v2 = vadd.f32 %v12598_v59, %v6541_v62  ;;  %v6490_v25 = vld [vmem:[%s13161_s7 + $0xe0] sm:$0xff]  ;;  %v6491_v51 = vld [vmem:[%s13161_s7 + $0xe8] sm:$0xff] }
 0x39a   : > { %6736 = vst.msk [vmem:[%s13161_s7 + $0x30] sm:$0xff] %vm434_vm4, %v6672_v40  ;;  %6737 = vst.msk [vmem:[%s13161_s7 + $0x38] sm:$0xff] %vm434_vm4, %v6673_v43  ;;  %v6612_v63 = vadd.f32 %v12598_v59, %v6542_v47  ;;  %v6547_v45 = vmul.f32 %v12583_v8, %v6477_v61  ;;  %v6613_v41 = vadd.f32 %v12598_v59, %v6543_v29  ;;  %v6492_v15 = vld [vmem:[%s13161_s7 + $0xf0] sm:$0xff]  ;;  %v6493_v39 = vld [vmem:[%s13161_s7 + $0xf8] sm:$0xff] }
 0x39b   : > { %v6614_v20 = vadd.f32 %v12598_v59, %v6544_v38  ;;  %v6615_v42 = vadd.f32 %v12598_v59, %v6545_v28  ;;  %v6616_v50 = vadd.f32 %v12598_v59, %v6546_v21  ;;  %v6674_v30 = vmax.f32 %v6610_v5, 0.0 }
 0x39c   : > { %v6675_v58 = vmax.f32 %v6611_v2, 0.0  ;;  %v6676_v24 = vmax.f32 %v6612_v63, 0.0  ;;  %v6617_v44 = vadd.f32 %v12598_v59, %v6547_v45  ;;  %v6677_v31 = vmax.f32 %v6613_v41, 0.0 }
 0x39d   : > { %v6678_v11 = vmax.f32 %v6614_v20, 0.0  ;;  %v6679_v32 = vmax.f32 %v6615_v42, 0.0  ;;  %v6680_v1 = vmax.f32 %v6616_v50, 0.0  ;;  %6738 = vst.msk [vmem:[%s13161_s7 + $0x40] sm:$0xff] %vm434_vm4, %v6674_v30  ;;  %v6548_v27 = vmul.f32 %v12583_v8, %v6478_v48  ;;  %v6494_v20 = vld [vmem:[%s13161_s7 + $0x100] sm:$0xff]  ;;  %v6496_v30 = vld [vmem:[%s13161_s7 + $0x110] sm:$0xff] }
 0x39e   : > { %6739 = vst.msk [vmem:[%s13161_s7 + $0x48] sm:$0xff] %vm434_vm4, %v6675_v58  ;;  %6740 = vst.msk [vmem:[%s13161_s7 + $0x50] sm:$0xff] %vm434_vm4, %v6676_v24  ;;  %v6681_v60 = vmax.f32 %v6617_v44, 0.0  ;;  %v6549_v10 = vmul.f32 %v12583_v8, %v6479_v13  ;;  %v6550_v12 = vmul.f32 %v12583_v8, %v6480_v34  ;;  %v6551_v56 = vmul.f32 %v12583_v8, %v6481_v49  ;;  %v6495_v49 = vld [vmem:[%s13161_s7 + $0x108] sm:$0xff]  ;;  %v6497_v58 = vld [vmem:[%s13161_s7 + $0x118] sm:$0xff] }
 0x39f   : > { %6741 = vst.msk [vmem:[%s13161_s7 + $0x58] sm:$0xff] %vm434_vm4, %v6677_v31  ;;  %6742 = vst.msk [vmem:[%s13161_s7 + $0x60] sm:$0xff] %vm434_vm4, %v6678_v11  ;;  %v6552_v9 = vmul.f32 %v12583_v8, %v6482_v22  ;;  %v6553_v16 = vmul.f32 %v12583_v8, %v6483_v36  ;;  %v6554_v46 = vmul.f32 %v12583_v8, %v6484_v54  ;;  %v6498_v54 = vld [vmem:[%s13161_s7 + $0x120] sm:$0xff]  ;;  %v6499_v31 = vld [vmem:[%s13161_s7 + $0x128] sm:$0xff] }
 0x3a0   : > { %6743 = vst.msk [vmem:[%s13161_s7 + $0x68] sm:$0xff] %vm434_vm4, %v6679_v32  ;;  %6744 = vst.msk [vmem:[%s13161_s7 + $0x70] sm:$0xff] %vm434_vm4, %v6680_v1  ;;  %v6618_v55 = vadd.f32 %v12598_v59, %v6548_v27  ;;  %v6619_v35 = vadd.f32 %v12598_v59, %v6549_v10  ;;  %v6620_v57 = vadd.f32 %v12598_v59, %v6550_v12  ;;  %v6500_v11 = vld [vmem:[%s13161_s7 + $0x130] sm:$0xff]  ;;  %v6501_v27 = vld [vmem:[%s13161_s7 + $0x138] sm:$0xff] }
 0x3a1   : > { %6745 = vst.msk [vmem:[%s13161_s7 + $0x78] sm:$0xff] %vm434_vm4, %v6681_v60  ;;  %v6555_v37 = vmul.f32 %v12583_v8, %v6485_v19  ;;  %v6621_v0 = vadd.f32 %v12598_v59, %v6551_v56  ;;  %v6622_v14 = vadd.f32 %v12598_v59, %v6552_v9  ;;  %v6623_v18 = vadd.f32 %v12598_v59, %v6553_v16 }
 0x3a2   : > { %v6624_v52 = vadd.f32 %v12598_v59, %v6554_v46  ;;  %v6682_v3 = vmax.f32 %v6618_v55, 0.0  ;;  %v6683_v23 = vmax.f32 %v6619_v35, 0.0  ;;  %v6684_v4 = vmax.f32 %v6620_v57, 0.0 }
 0x3a3   : > { %v6625_v26 = vadd.f32 %v12598_v59, %v6555_v37  ;;  %v6685_v7 = vmax.f32 %v6621_v0, 0.0  ;;  %v6686_v40 = vmax.f32 %v6622_v14, 0.0  ;;  %v6687_v61 = vmax.f32 %v6623_v18, 0.0  ;;  %v6502_v14 = vld [vmem:[%s13161_s7 + $0x140] sm:$0xff] }
 0x3a4   : > { %v6688_v43 = vmax.f32 %v6624_v52, 0.0  ;;  %6746 = vst.msk [vmem:[%s13161_s7 + $0x80] sm:$0xff] %vm434_vm4, %v6682_v3  ;;  %6747 = vst.msk [vmem:[%s13161_s7 + $0x88] sm:$0xff] %vm434_vm4, %v6683_v23  ;;  %v6556_v47 = vmul.f32 %v12583_v8, %v6486_v6  ;;  %v6557_v29 = vmul.f32 %v12583_v8, %v6487_v53  ;;  %v6558_v38 = vmul.f32 %v12583_v8, %v6488_v17  ;;  %v6504_v3 = vld [vmem:[%s13161_s7 + $0x150] sm:$0xff]  ;;  %v6505_v23 = vld [vmem:[%s13161_s7 + $0x158] sm:$0xff] }
 0x3a5   : > { %6748 = vst.msk [vmem:[%s13161_s7 + $0x90] sm:$0xff] %vm434_vm4, %v6684_v4  ;;  %v6689_v62 = vmax.f32 %v6625_v26, 0.0  ;;  %6749 = vst.msk [vmem:[%s13161_s7 + $0x98] sm:$0xff] %vm434_vm4, %v6685_v7  ;;  %v6559_v28 = vmul.f32 %v12583_v8, %v6489_v33  ;;  %v6560_v21 = vmul.f32 %v12583_v8, %v6490_v25  ;;  %v6561_v5 = vmul.f32 %v12583_v8, %v6491_v51  ;;  %v6503_v33 = vld [vmem:[%s13161_s7 + $0x148] sm:$0xff] }
 0x3a6   : > { %6750 = vst.msk [vmem:[%s13161_s7 + $0xa0] sm:$0xff] %vm434_vm4, %v6686_v40  ;;  %6751 = vst.msk [vmem:[%s13161_s7 + $0xa8] sm:$0xff] %vm434_vm4, %v6687_v61  ;;  %v6562_v2 = vmul.f32 %v12583_v8, %v6492_v15  ;;  %v6626_v63 = vadd.f32 %v12598_v59, %v6556_v47  ;;  %v6627_v45 = vadd.f32 %v12598_v59, %v6557_v29  ;;  %v6506_v15 = vld [vmem:[%s13161_s7 + $0x160] sm:$0xff]  ;;  %v6507_v7 = vld [vmem:[%s13161_s7 + $0x168] sm:$0xff] }
 0x3a7   : > { %6752 = vst.msk [vmem:[%s13161_s7 + $0xb0] sm:$0xff] %vm434_vm4, %v6688_v43  ;;  %6753 = vst.msk [vmem:[%s13161_s7 + $0xb8] sm:$0xff] %vm434_vm4, %v6689_v62  ;;  %v6628_v48 = vadd.f32 %v12598_v59, %v6558_v38  ;;  %v6563_v41 = vmul.f32 %v12583_v8, %v6493_v39  ;;  %v6629_v42 = vadd.f32 %v12598_v59, %v6559_v28  ;;  %v6508_v40 = vld [vmem:[%s13161_s7 + $0x170] sm:$0xff]  ;;  %v6509_v47 = vld [vmem:[%s13161_s7 + $0x178] sm:$0xff] }
 0x3a8   : > { %v6630_v50 = vadd.f32 %v12598_v59, %v6560_v21  ;;  %v6631_v13 = vadd.f32 %v12598_v59, %v6561_v5  ;;  %v6632_v34 = vadd.f32 %v12598_v59, %v6562_v2  ;;  %v6690_v24 = vmax.f32 %v6626_v63, 0.0 }
 0x3a9   : > { %v6691_v44 = vmax.f32 %v6627_v45, 0.0  ;;  %v6692_v22 = vmax.f32 %v6628_v48, 0.0  ;;  %v6633_v36 = vadd.f32 %v12598_v59, %v6563_v41  ;;  %v6693_v32 = vmax.f32 %v6629_v42, 0.0 }
 0x3aa   : > { %v6694_v1 = vmax.f32 %v6630_v50, 0.0  ;;  %v6695_v19 = vmax.f32 %v6631_v13, 0.0  ;;  %v6696_v60 = vmax.f32 %v6632_v34, 0.0  ;;  %6754 = vst.msk [vmem:[%s13161_s7 + $0xc0] sm:$0xff] %vm434_vm4, %v6690_v24  ;;  %v6564_v12 = vmul.f32 %v12583_v8, %v6494_v20  ;;  %v6510_v50 = vld [vmem:[%s13161_s7 + $0x180] sm:$0xff]  ;;  %v6512_v24 = vld [vmem:[%s13161_s7 + $0x190] sm:$0xff] }
 0x3ab   : > { %6755 = vst.msk [vmem:[%s13161_s7 + $0xc8] sm:$0xff] %vm434_vm4, %v6691_v44  ;;  %6756 = vst.msk [vmem:[%s13161_s7 + $0xd0] sm:$0xff] %vm434_vm4, %v6692_v22  ;;  %v6697_v10 = vmax.f32 %v6633_v36, 0.0  ;;  %v6565_v56 = vmul.f32 %v12583_v8, %v6495_v49  ;;  %v6566_v9 = vmul.f32 %v12583_v8, %v6496_v30  ;;  %v6567_v16 = vmul.f32 %v12583_v8, %v6497_v58  ;;  %v6511_v58 = vld [vmem:[%s13161_s7 + $0x188] sm:$0xff]  ;;  %v6513_v44 = vld [vmem:[%s13161_s7 + $0x198] sm:$0xff] }
 0x3ac   : > { %6757 = vst.msk [vmem:[%s13161_s7 + $0xd8] sm:$0xff] %vm434_vm4, %v6693_v32  ;;  %6758 = vst.msk [vmem:[%s13161_s7 + $0xe0] sm:$0xff] %vm434_vm4, %v6694_v1  ;;  %v6568_v46 = vmul.f32 %v12583_v8, %v6498_v54  ;;  %v6569_v55 = vmul.f32 %v12583_v8, %v6499_v31  ;;  %v6570_v35 = vmul.f32 %v12583_v8, %v6500_v11  ;;  %v6514_v11 = vld [vmem:[%s13161_s7 + $0x1a0] sm:$0xff]  ;;  %v6515_v32 = vld [vmem:[%s13161_s7 + $0x1a8] sm:$0xff] }
 0x3ad   : > { %6759 = vst.msk [vmem:[%s13161_s7 + $0xe8] sm:$0xff] %vm434_vm4, %v6695_v19  ;;  %6760 = vst.msk [vmem:[%s13161_s7 + $0xf0] sm:$0xff] %vm434_vm4, %v6696_v60  ;;  %v6634_v57 = vadd.f32 %v12598_v59, %v6564_v12  ;;  %v6635_v37 = vadd.f32 %v12598_v59, %v6565_v56  ;;  %v6636_v6 = vadd.f32 %v12598_v59, %v6566_v9  ;;  %v6516_v1 = vld [vmem:[%s13161_s7 + $0x1b0] sm:$0xff]  ;;  %v6517_v12 = vld [vmem:[%s13161_s7 + $0x1b8] sm:$0xff] }
 0x3ae   : > { %6761 = vst.msk [vmem:[%s13161_s7 + $0xf8] sm:$0xff] %vm434_vm4, %v6697_v10  ;;  %v6571_v0 = vmul.f32 %v12583_v8, %v6501_v27  ;;  %v6637_v18 = vadd.f32 %v12598_v59, %v6567_v16  ;;  %v6638_v52 = vadd.f32 %v12598_v59, %v6568_v46  ;;  %v6639_v53 = vadd.f32 %v12598_v59, %v6569_v55 }
 0x3af   : > { %v6640_v17 = vadd.f32 %v12598_v59, %v6570_v35  ;;  %v6698_v4 = vmax.f32 %v6634_v57, 0.0  ;;  %v6699_v26 = vmax.f32 %v6635_v37, 0.0  ;;  %v6700_v25 = vmax.f32 %v6636_v6, 0.0 }
 0x3b0   : > { %v6641_v51 = vadd.f32 %v12598_v59, %v6571_v0  ;;  %v6701_v61 = vmax.f32 %v6637_v18, 0.0  ;;  %v6702_v43 = vmax.f32 %v6638_v52, 0.0  ;;  %v6703_v39 = vmax.f32 %v6639_v53, 0.0  ;;  %v6518_v52 = vld [vmem:[%s13161_s7 + $0x1c0] sm:$0xff] }
 0x3b1   : > { %v6704_v62 = vmax.f32 %v6640_v17, 0.0  ;;  %6762 = vst.msk [vmem:[%s13161_s7 + $0x100] sm:$0xff] %vm434_vm4, %v6698_v4  ;;  %6763 = vst.msk [vmem:[%s13161_s7 + $0x108] sm:$0xff] %vm434_vm4, %v6699_v26  ;;  %v6572_v38 = vmul.f32 %v12583_v8, %v6502_v14  ;;  %v6573_v28 = vmul.f32 %v12583_v8, %v6503_v33  ;;  %v6574_v21 = vmul.f32 %v12583_v8, %v6504_v3  ;;  %v6520_v4 = vld [vmem:[%s13161_s7 + $0x1d0] sm:$0xff]  ;;  %v6521_v26 = vld [vmem:[%s13161_s7 + $0x1d8] sm:$0xff] }
 0x3b2   : > { %6764 = vst.msk [vmem:[%s13161_s7 + $0x110] sm:$0xff] %vm434_vm4, %v6700_v25  ;;  %v6705_v29 = vmax.f32 %v6641_v51, 0.0  ;;  %6765 = vst.msk [vmem:[%s13161_s7 + $0x118] sm:$0xff] %vm434_vm4, %v6701_v61  ;;  %v6575_v5 = vmul.f32 %v12583_v8, %v6505_v23  ;;  %v6576_v2 = vmul.f32 %v12583_v8, %v6506_v15  ;;  %v6577_v63 = vmul.f32 %v12583_v8, %v6507_v7  ;;  %v6519_v23 = vld [vmem:[%s13161_s7 + $0x1c8] sm:$0xff] }
 0x3b3   : > { %6766 = vst.msk [vmem:[%s13161_s7 + $0x120] sm:$0xff] %vm434_vm4, %v6702_v43  ;;  %6767 = vst.msk [vmem:[%s13161_s7 + $0x128] sm:$0xff] %vm434_vm4, %v6703_v39  ;;  %v6578_v45 = vmul.f32 %v12583_v8, %v6508_v40  ;;  %v6642_v48 = vadd.f32 %v12598_v59, %v6572_v38  ;;  %v6643_v41 = vadd.f32 %v12598_v59, %v6573_v28  ;;  %v6522_v40 = vld [vmem:[%s13161_s7 + $0x1e0] sm:$0xff]  ;;  %v6523_v61 = vld [vmem:[%s13161_s7 + $0x1e8] sm:$0xff] }
 0x3b4   : > { %6768 = vst.msk [vmem:[%s13161_s7 + $0x130] sm:$0xff] %vm434_vm4, %v6704_v62  ;;  %6769 = vst.msk [vmem:[%s13161_s7 + $0x138] sm:$0xff] %vm434_vm4, %v6705_v29  ;;  %v6644_v20 = vadd.f32 %v12598_v59, %v6574_v21  ;;  %v6579_v42 = vmul.f32 %v12583_v8, %v6509_v47  ;;  %v6645_v13 = vadd.f32 %v12598_v59, %v6575_v5  ;;  %v6524_v43 = vld [vmem:[%s13161_s7 + $0x1f0] sm:$0xff]  ;;  %v6525_v38 = vld [vmem:[%s13161_s7 + $0x1f8] sm:$0xff] }
 0x3b5   : > { %v6646_v34 = vadd.f32 %v12598_v59, %v6576_v2  ;;  %v6647_v49 = vadd.f32 %v12598_v59, %v6577_v63  ;;  %v6648_v30 = vadd.f32 %v12598_v59, %v6578_v45  ;;  %v6706_v22 = vmax.f32 %v6642_v48, 0.0 }
 0x3b6   : > { %v6707_v36 = vmax.f32 %v6643_v41, 0.0  ;;  %v6708_v54 = vmax.f32 %v6644_v20, 0.0  ;;  %v6649_v31 = vadd.f32 %v12598_v59, %v6579_v42  ;;  %v6709_v19 = vmax.f32 %v6645_v13, 0.0 }
 0x3b7   : > { %v6710_v60 = vmax.f32 %v6646_v34, 0.0  ;;  %v6711_v27 = vmax.f32 %v6647_v49, 0.0  ;;  %v6712_v10 = vmax.f32 %v6648_v30, 0.0  ;;  %6770 = vst.msk [vmem:[%s13161_s7 + $0x140] sm:$0xff] %vm434_vm4, %v6706_v22  ;;  %v6580_v9 = vmul.f32 %v12583_v8, %v6510_v50 }
 0x3b8   : > { %6771 = vst.msk [vmem:[%s13161_s7 + $0x148] sm:$0xff] %vm434_vm4, %v6707_v36  ;;  %6772 = vst.msk [vmem:[%s13161_s7 + $0x150] sm:$0xff] %vm434_vm4, %v6708_v54  ;;  %v6713_v56 = vmax.f32 %v6649_v31, 0.0  ;;  %v6581_v16 = vmul.f32 %v12583_v8, %v6511_v58  ;;  %v6582_v46 = vmul.f32 %v12583_v8, %v6512_v24  ;;  %v6583_v55 = vmul.f32 %v12583_v8, %v6513_v44 }
 0x3b9   : > { %6773 = vst.msk [vmem:[%s13161_s7 + $0x158] sm:$0xff] %vm434_vm4, %v6709_v19  ;;  %6774 = vst.msk [vmem:[%s13161_s7 + $0x160] sm:$0xff] %vm434_vm4, %v6710_v60  ;;  %v6584_v35 = vmul.f32 %v12583_v8, %v6514_v11  ;;  %v6585_v57 = vmul.f32 %v12583_v8, %v6515_v32  ;;  %v6586_v37 = vmul.f32 %v12583_v8, %v6516_v1 }
 0x3ba   : > { %6775 = vst.msk [vmem:[%s13161_s7 + $0x168] sm:$0xff] %vm434_vm4, %v6711_v27  ;;  %6776 = vst.msk [vmem:[%s13161_s7 + $0x170] sm:$0xff] %vm434_vm4, %v6712_v10  ;;  %v6650_v6 = vadd.f32 %v12598_v59, %v6580_v9  ;;  %v6651_v0 = vadd.f32 %v12598_v59, %v6581_v16  ;;  %v6652_v14 = vadd.f32 %v12598_v59, %v6582_v46 }
 0x3bb   : > { %6777 = vst.msk [vmem:[%s13161_s7 + $0x178] sm:$0xff] %vm434_vm4, %v6713_v56  ;;  %v6587_v18 = vmul.f32 %v12583_v8, %v6517_v12  ;;  %v6653_v53 = vadd.f32 %v12598_v59, %v6583_v55  ;;  %v6654_v17 = vadd.f32 %v12598_v59, %v6584_v35  ;;  %v6655_v33 = vadd.f32 %v12598_v59, %v6585_v57 }
 0x3bc   : > { %v6656_v3 = vadd.f32 %v12598_v59, %v6586_v37  ;;  %v6714_v25 = vmax.f32 %v6650_v6, 0.0  ;;  %v6715_v51 = vmax.f32 %v6651_v0, 0.0  ;;  %v6716_v15 = vmax.f32 %v6652_v14, 0.0 }
 0x3bd   : > { %v6657_v7 = vadd.f32 %v12598_v59, %v6587_v18  ;;  %v6717_v39 = vmax.f32 %v6653_v53, 0.0  ;;  %v6718_v62 = vmax.f32 %v6654_v17, 0.0  ;;  %v6719_v47 = vmax.f32 %v6655_v33, 0.0 }
 0x3be   : > { %v6720_v29 = vmax.f32 %v6656_v3, 0.0  ;;  %6778 = vst.msk [vmem:[%s13161_s7 + $0x180] sm:$0xff] %vm434_vm4, %v6714_v25  ;;  %6779 = vst.msk [vmem:[%s13161_s7 + $0x188] sm:$0xff] %vm434_vm4, %v6715_v51  ;;  %v6588_v21 = vmul.f32 %v12583_v8, %v6518_v52  ;;  %v6589_v5 = vmul.f32 %v12583_v8, %v6519_v23  ;;  %v6590_v2 = vmul.f32 %v12583_v8, %v6520_v4 }
 0x3bf   : > { %6780 = vst.msk [vmem:[%s13161_s7 + $0x190] sm:$0xff] %vm434_vm4, %v6716_v15  ;;  %v6721_v28 = vmax.f32 %v6657_v7, 0.0  ;;  %6781 = vst.msk [vmem:[%s13161_s7 + $0x198] sm:$0xff] %vm434_vm4, %v6717_v39  ;;  %v6591_v63 = vmul.f32 %v12583_v8, %v6521_v26  ;;  %v6592_v45 = vmul.f32 %v12583_v8, %v6522_v40  ;;  %v6593_v48 = vmul.f32 %v12583_v8, %v6523_v61 }
 0x3c0   : > { %6782 = vst.msk [vmem:[%s13161_s7 + $0x1a0] sm:$0xff] %vm434_vm4, %v6718_v62  ;;  %6783 = vst.msk [vmem:[%s13161_s7 + $0x1a8] sm:$0xff] %vm434_vm4, %v6719_v47  ;;  %v6594_v41 = vmul.f32 %v12583_v8, %v6524_v43  ;;  %v6658_v20 = vadd.f32 %v12598_v59, %v6588_v21  ;;  %v6659_v42 = vadd.f32 %v12598_v59, %v6589_v5 }
 0x3c1   : > { %6784 = vst.msk [vmem:[%s13161_s7 + $0x1b0] sm:$0xff] %vm434_vm4, %v6720_v29  ;;  %6785 = vst.msk [vmem:[%s13161_s7 + $0x1b8] sm:$0xff] %vm434_vm4, %v6721_v28  ;;  %v6660_v50 = vadd.f32 %v12598_v59, %v6590_v2  ;;  %v6595_v13 = vmul.f32 %v12583_v8, %v6525_v38  ;;  %v6661_v34 = vadd.f32 %v12598_v59, %v6591_v63 }
 0x3c2   : > { %v6662_v49 = vadd.f32 %v12598_v59, %v6592_v45  ;;  %v6663_v30 = vadd.f32 %v12598_v59, %v6593_v48  ;;  %v6664_v58 = vadd.f32 %v12598_v59, %v6594_v41  ;;  %v6722_v24 = vmax.f32 %v6658_v20, 0.0 }
 0x3c3   : > { %v6723_v44 = vmax.f32 %v6659_v42, 0.0  ;;  %v6724_v22 = vmax.f32 %v6660_v50, 0.0  ;;  %v6665_v36 = vadd.f32 %v12598_v59, %v6595_v13  ;;  %v6725_v54 = vmax.f32 %v6661_v34, 0.0 }
 0x3c4   : > { %v6726_v31 = vmax.f32 %v6662_v49, 0.0  ;;  %v6727_v11 = vmax.f32 %v6663_v30, 0.0  ;;  %v6728_v32 = vmax.f32 %v6664_v58, 0.0  ;;  %6786 = vst.msk [vmem:[%s13161_s7 + $0x1c0] sm:$0xff] %vm434_vm4, %v6722_v24 }
 0x3c5   : > { %6787 = vst.msk [vmem:[%s13161_s7 + $0x1c8] sm:$0xff] %vm434_vm4, %v6723_v44  ;;  %6788 = vst.msk [vmem:[%s13161_s7 + $0x1d0] sm:$0xff] %vm434_vm4, %v6724_v22  ;;  %v6729_v8 = vmax.f32 %v6665_v36, 0.0 }
 0x3c6   : > { %6789 = vst.msk [vmem:[%s13161_s7 + $0x1d8] sm:$0xff] %vm434_vm4, %v6725_v54  ;;  %6790 = vst.msk [vmem:[%s13161_s7 + $0x1e0] sm:$0xff] %vm434_vm4, %v6726_v31 }
 0x3c7   : > { %6791 = vst.msk [vmem:[%s13161_s7 + $0x1e8] sm:$0xff] %vm434_vm4, %v6727_v11  ;;  %6792 = vst.msk [vmem:[%s13161_s7 + $0x1f0] sm:$0xff] %vm434_vm4, %v6728_v32 }
 0x3c8   : > { %6793 = vst.msk [vmem:[%s13161_s7 + $0x1f8] sm:$0xff] %vm434_vm4, %v6729_v8 }
 0x3c9 PF: > { %s17_s24 = sadd.s32 1, %s9093_s24  }
 0x3ca   : > { %p14_p6 = scmp.ge.s32.totalorder %s17_s24, 4  }
 0x3cc   :  { %16 = sbr.rel (!%p14_p6) target bundleno = 1 (0x1), region = 104 }

</bundles_post_ra>
